<compile_context>
chip_gen: v5e
topology: v5e:2x2
jax: 0.10.0
libtpu: 0.0.40
codegen_flags: <defaults>
</compile_context>

<pallas_src>
import functools

import jax
import jax.numpy as jnp
from jax.experimental import pallas as pl
from jax.experimental.pallas import tpu as pltpu


# ----------------------------------------------------------------------------
# small helpers
# ----------------------------------------------------------------------------
def _round_up(x, m):
    return (x + m - 1) // m * m


def _pick_tile(dim, pref, align):
    """Pick (tile, padded_extent) for one matmul dimension."""
    if dim < pref:
        t = _round_up(dim, align)
        return t, t
    for t in (pref, pref // 2):
        if t >= align and dim % t == 0:
            return t, dim
    return pref, _round_up(dim, pref)


def _row_tiling(hw):
    """Tile the per-sample row dimension of an (N, HW, C) slab."""
    hwp = _round_up(hw, 8)
    if hwp <= 1024:
        return hwp, hwp
    for t in (1024, 896, 768, 640, 512, 448, 384, 320, 256, 192, 128, 64, 32, 16, 8):
        if hwp % t == 0:
            return hwp, t
    return hwp, 8


def _pad_rows(x3, hwp):
    hw = x3.shape[1]
    if hwp == hw:
        return x3
    return jnp.pad(x3, ((0, 0), (0, hwp - hw), (0, 0)))


# ----------------------------------------------------------------------------
# Pallas kernels
# ----------------------------------------------------------------------------
def _matmul_bias_kernel(a_ref, b_ref, bias_ref, o_ref, *, relu):
    """o = A @ B accumulated over the (last) K grid axis; bias (+ReLU) epilogue."""
    k = pl.program_id(2)

    @pl.when(k == 0)
    def _():
        o_ref[...] = jnp.zeros_like(o_ref)

    o_ref[...] += jnp.dot(a_ref[...], b_ref[...],
                          preferred_element_type=jnp.float32)

    @pl.when(k == pl.num_programs(2) - 1)
    def _():
        y = o_ref[...] + bias_ref[...]
        if relu:
            y = jnp.maximum(y, 0.0)
        o_ref[...] = y


def _ca_reduce_kernel(x_ref, ca_ref, o_ref):
    """Channel mean / max of the CA-gated map: stats of (x * ca_gate)."""
    g = x_ref[...] * ca_ref[...]                       # (1, tr, C) * (1, 1, C)
    avg = jnp.mean(g, axis=-1, keepdims=True)
    mx = jnp.max(g, axis=-1, keepdims=True)
    o_ref[...] = jnp.concatenate([avg, mx], axis=-1)   # (1, tr, 2)


def _gate_residual_kernel(x_ref, ca_ref, pa_ref, id_ref, o_ref):
    """y = relu(x * ca_gate * pa_gate + identity), gates broadcast in-kernel."""
    o_ref[...] = jnp.maximum(
        x_ref[...] * ca_ref[...] * pa_ref[...] + id_ref[...], 0.0)


# ----------------------------------------------------------------------------
# Pallas wrappers
# ----------------------------------------------------------------------------
def matmul_bias_pallas(a, b, bias, relu=False):
    """(M,K) @ (K,N) + bias[N]  (optional ReLU).  bf16 MXU inputs, f32 accumulation."""
    M, K = a.shape
    K2, N = b.shape
    assert K == K2
    tm, Mp = _pick_tile(M, 256, 16)    # bf16-safe sublane alignment
    tn, Np = _pick_tile(N, 256, 128)
    tk, Kp = _pick_tile(K, 256, 128)

    a = a.astype(jnp.bfloat16)
    b = b.astype(jnp.bfloat16)
    if (Mp, Kp) != (M, K):
        a = jnp.pad(a, ((0, Mp - M), (0, Kp - K)))
    if (Kp, Np) != (K, N):
        b = jnp.pad(b, ((0, Kp - K), (0, Np - N)))
    bias2 = bias.astype(jnp.float32).reshape(1, N)
    if Np != N:
        bias2 = jnp.pad(bias2, ((0, 0), (0, Np - N)))

    kern = functools.partial(_matmul_bias_kernel, relu=relu)
    out = pl.pallas_call(
        kern,
        out_shape=jax.ShapeDtypeStruct((Mp, Np), jnp.float32),
        grid_spec=pltpu.PrefetchScalarGridSpec(
            num_scalar_prefetch=0,
            grid=(Mp // tm, Np // tn, Kp // tk),       # reduction (K) last
            in_specs=[
                pl.BlockSpec((tm, tk), lambda i, j, k: (i, k)),
                pl.BlockSpec((tk, tn), lambda i, j, k: (k, j)),
                pl.BlockSpec((1, tn), lambda i, j, k: (0, j)),
            ],
            out_specs=pl.BlockSpec((tm, tn), lambda i, j, k: (i, j)),
        ),
        compiler_params=pltpu.CompilerParams(
            dimension_semantics=("parallel", "parallel", "arbitrary")),
    )(a, b, bias2)
    if (Mp, Np) != (M, N):
        out = out[:M, :N]
    return out


def ca_reduce_pallas(x3, ca_gate, tr):
    """x3: (N, HWp, C), ca_gate: (N, 1, C) -> (N, HWp, 2) channel mean/max of x*ca."""
    N, HWp, C = x3.shape
    return pl.pallas_call(
        _ca_reduce_kernel,
        out_shape=jax.ShapeDtypeStruct((N, HWp, 2), jnp.float32),
        grid=(N, HWp // tr),
        in_specs=[
            pl.BlockSpec((1, tr, C), lambda n, r: (n, r, 0)),
            pl.BlockSpec((1, 1, C), lambda n, r: (n, 0, 0)),
        ],
        out_specs=pl.BlockSpec((1, tr, 2), lambda n, r: (n, r, 0)),
        compiler_params=pltpu.CompilerParams(
            dimension_semantics=("parallel", "parallel")),
    )(x3.astype(jnp.float32), ca_gate.astype(jnp.float32))


def gate_residual_pallas(x3, ca_gate, pa_gate, identity3, tr):
    """relu(x * ca_gate * pa_gate + identity) with in-kernel gate broadcasts."""
    N, HWp, C = x3.shape
    return pl.pallas_call(
        _gate_residual_kernel,
        out_shape=jax.ShapeDtypeStruct((N, HWp, C), jnp.float32),
        grid=(N, HWp // tr),
        in_specs=[
            pl.BlockSpec((1, tr, C), lambda n, r: (n, r, 0)),
            pl.BlockSpec((1, 1, C), lambda n, r: (n, 0, 0)),
            pl.BlockSpec((1, tr, 1), lambda n, r: (n, r, 0)),
            pl.BlockSpec((1, tr, C), lambda n, r: (n, r, 0)),
        ],
        out_specs=pl.BlockSpec((1, tr, C), lambda n, r: (n, r, 0)),
        compiler_params=pltpu.CompilerParams(
            dimension_semantics=("parallel", "parallel")),
    )(x3.astype(jnp.float32), ca_gate.astype(jnp.float32),
      pa_gate.astype(jnp.float32), identity3.astype(jnp.float32))


# ----------------------------------------------------------------------------
# Conv / pooling glue (patch extraction in plain JAX, matmul on the MXU via Pallas)
# ----------------------------------------------------------------------------
def _im2col(x, kh, kw, stride, pad):
    """x: NHWC. Returns ((N*Ho*Wo, kh*kw*C), Ho, Wo) with (kh, kw, C) ordering."""
    N, H, W, C = x.shape
    xp = jnp.pad(x, ((0, 0), (pad, pad), (pad, pad), (0, 0))) if pad else x
    Ho = (H + 2 * pad - kh) // stride + 1
    Wo = (W + 2 * pad - kw) // stride + 1
    cols = []
    for dy in range(kh):
        for dx in range(kw):
            cols.append(xp[:, dy:dy + stride * Ho:stride,
                           dx:dx + stride * Wo:stride, :])
    patches = jnp.concatenate(cols, axis=-1)            # (N, Ho, Wo, kh*kw*C)
    return patches.reshape(N * Ho * Wo, kh * kw * C), Ho, Wo


def conv_bn_pallas(x, w, bn, stride, pad, relu):
    """Conv (torch-layout w: (O,I,kh,kw)) with inference BatchNorm folded into the
    weights and fused into the matmul epilogue. Returns ((N*Ho*Wo, O), Ho, Wo)."""
    O, I, kh, kw = w.shape
    scale = bn["gamma"] * jax.lax.rsqrt(bn["var"] + 1e-5)             # (O,)
    bias = bn["beta"] - bn["mean"] * scale                            # (O,)
    w2d = jnp.transpose(w, (2, 3, 1, 0)).reshape(kh * kw * I, O) * scale[None, :]
    # bf16 patches halve im2col HBM traffic; accumulation stays f32 on the MXU.
    cols, Ho, Wo = _im2col(x.astype(jnp.bfloat16), kh, kw, stride, pad)
    out = matmul_bias_pallas(cols, w2d, bias, relu=relu)
    return out, Ho, Wo


def maxpool3x3s2(x):
    """3x3 max pool, stride 2, padding 1 (torch semantics), NHWC."""
    N, H, W, C = x.shape
    xp = jnp.pad(x, ((0, 0), (1, 1), (1, 1), (0, 0)), constant_values=-jnp.inf)
    Ho = (H + 2 - 3) // 2 + 1
    Wo = (W + 2 - 3) // 2 + 1
    vals = []
    for dy in range(3):
        for dx in range(3):
            vals.append(xp[:, dy:dy + 2 * Ho:2, dx:dx + 2 * Wo:2, :])
    return jnp.max(jnp.stack(vals, axis=0), axis=0)


# ----------------------------------------------------------------------------
# Parameter construction (deterministic, matches module shapes)
# ----------------------------------------------------------------------------
# Static architecture config: (inplanes, planes, stride-of-first-block) per layer.
LAYER_CFG = ((64, 64, 1), (64, 128, 2), (128, 256, 2), (256, 512, 2))


def _make_bn(c):
    return dict(gamma=jnp.ones((c,), jnp.float32),
                beta=jnp.zeros((c,), jnp.float32),
                mean=jnp.zeros((c,), jnp.float32),
                var=jnp.ones((c,), jnp.float32))


def _conv_init(key, o, i, kh, kw):
    std = (2.0 / (i * kh * kw)) ** 0.5
    return jax.random.normal(key, (o, i, kh, kw), jnp.float32) * std


def _make_block(key, inplanes, planes, stride, reduction=16):
    ks = jax.random.split(key, 6)
    p = dict(
        conv1_w=_conv_init(ks[0], planes, inplanes, 3, 3),
        bn1=_make_bn(planes),
        conv2_w=_conv_init(ks[1], planes, planes, 3, 3),
        bn2=_make_bn(planes),
        ca_w1=_conv_init(ks[2], planes // reduction, planes, 1, 1),
        ca_w2=_conv_init(ks[3], planes, planes // reduction, 1, 1),
        pa_w=_conv_init(ks[4], 1, 2, 7, 7),
    )
    if stride != 1 or inplanes != planes:
        p["ds_w"] = _conv_init(ks[5], planes, inplanes, 1, 1)
        p["ds_bn"] = _make_bn(planes)
    return p


def make_params(key, num_classes=10, in_channels=1):
    keys = jax.random.split(key, 12)
    params = dict(
        conv1_w=_conv_init(keys[0], 64, in_channels, 7, 7),
        bn1=_make_bn(64),
        fc_w=jax.random.normal(keys[1], (num_classes, 512), jnp.float32) * 0.01,
        fc_b=jnp.zeros((num_classes,), jnp.float32),
    )
    layers = []
    k_idx = 2
    for inpl, planes, stride in LAYER_CFG:
        blocks = [_make_block(keys[k_idx], inpl, planes, stride),
                  _make_block(keys[k_idx + 1], planes, planes, 1)]
        layers.append(blocks)
        k_idx += 2
    params["layers"] = layers
    return params


# ----------------------------------------------------------------------------
# Model forward
# ----------------------------------------------------------------------------
def basic_block(x, p, stride):
    """x: NHWC float32. `stride` is a static Python int. Returns NHWC float32."""
    N = x.shape[0]
    planes = p["conv1_w"].shape[0]

    # conv1 + bn1 + relu (BN folded into conv, ReLU in the matmul epilogue)
    out2d, Ho, Wo = conv_bn_pallas(x, p["conv1_w"], p["bn1"], stride=stride,
                                   pad=1, relu=True)
    out = out2d.reshape(N, Ho, Wo, planes)

    # conv2 + bn2 (BN folded, no ReLU)
    out2d, _, _ = conv_bn_pallas(out, p["conv2_w"], p["bn2"], stride=1,
                                 pad=1, relu=False)

    HW = Ho * Wo
    hwp, tr = _row_tiling(HW)
    out3 = _pad_rows(out2d.reshape(N, HW, planes), hwp)          # (N, hwp, C)

    # ---- Channel attention gate: sigmoid(hardswish(W2 @ relu(W1 @ avgpool(out))))
    # tiny (N=2 rows) -> plain jnp, not worth a pallas_call launch.
    pooled = jnp.mean(out2d.reshape(N, HW, planes), axis=1)       # (N, planes)
    w1 = p["ca_w1"].reshape(p["ca_w1"].shape[0], planes)
    w2 = p["ca_w2"].reshape(planes, p["ca_w2"].shape[1])
    h = jnp.maximum(pooled @ w1.T, 0.0)                           # ReLU
    h = h @ w2.T
    h = h * jnp.clip(h + 3.0, 0.0, 6.0) / 6.0                     # Hardswish
    ca_gate = jax.nn.sigmoid(h)[:, None, :]                       # (N, 1, planes)

    # ---- Position attention: channel mean/max of the CA-gated map (fused Pallas
    # reduce, gate broadcast in-kernel; gated map never written to HBM)
    stats = ca_reduce_pallas(out3, ca_gate, tr)                   # (N, hwp, 2)
    spatial = stats[:, :HW, :].reshape(N, Ho, Wo, 2)
    # 7x7 conv 2->1 channels: tiny K=98, N=1 — VPU-sized, keep in plain jnp.
    cols, _, _ = _im2col(spatial, 7, 7, 1, 3)                     # (N*HW, 98)
    paw = jnp.transpose(p["pa_w"], (2, 3, 1, 0)).reshape(7 * 7 * 2, 1)
    pa_gate = jax.nn.sigmoid(cols @ paw).reshape(N, HW, 1)
    pa_gate = _pad_rows(pa_gate, hwp)                             # (N, hwp, 1)

    # ---- Identity / downsample branch
    if "ds_w" in p:
        id2d, _, _ = conv_bn_pallas(x, p["ds_w"], p["ds_bn"], stride=stride,
                                    pad=0, relu=False)
        idn = id2d.reshape(N, HW, planes)
    else:
        idn = x.reshape(N, HW, planes)
    idn = _pad_rows(idn, hwp)

    # ---- fused: relu(out * ca_gate * pa_gate + identity)
    y3 = gate_residual_pallas(out3, ca_gate, pa_gate, idn, tr)
    return y3[:, :HW, :].reshape(N, Ho, Wo, planes)


def resnet18_attention_forward(x_nchw, params):
    """x_nchw: (N, C_in, H, W) float32 -> logits (N, num_classes)."""
    x = jnp.transpose(x_nchw, (0, 2, 3, 1)).astype(jnp.float32)   # -> NHWC
    N = x.shape[0]

    # stem: conv 7x7 s2 (+folded bn + relu) -> maxpool 3x3 s2
    out2d, Ho, Wo = conv_bn_pallas(x, params["conv1_w"], params["bn1"],
                                   stride=2, pad=3, relu=True)
    x = out2d.reshape(N, Ho, Wo, 64)
    x = maxpool3x3s2(x)

    for (_, _, stride), layer_blocks in zip(LAYER_CFG, params["layers"]):
        for s, bp in zip((stride, 1), layer_blocks):
            x = basic_block(x, bp, s)

    feat = jnp.mean(x, axis=(1, 2))                               # global avg pool
    logits = feat @ params["fc_w"].T + params["fc_b"]             # tiny FC: plain jnp
    return logits


# ----------------------------------------------------------------------------
if __name__ == "__main__":
    key = jax.random.PRNGKey(0)
    k_param, k_in = jax.random.split(key)

    params = make_params(k_param, num_classes=10, in_channels=1)
    # small input consistent with the module (in_channels=1); 32x32 keeps every
    # stage's spatial extent >= 1 through the four stride-2 reductions.
    x = jax.random.normal(k_in, (2, 1, 32, 32), jnp.float32)

    fwd = jax.jit(resnet18_attention_forward)
    logits = fwd(x, params)
    jax.block_until_ready(logits)

    assert logits.shape == (2, 10), logits.shape
    assert bool(jnp.all(jnp.isfinite(logits)))
    print("KERNEL_OK")
</pallas_src>

<mosaic_0001>
module attributes {stable_mosaic.version = 11 : i64} {
  func.func @_matmul_bias_kernel(%arg0: i32, %arg1: i32, %arg2: i32, %arg3: memref<256x128xbf16, #tpu.memory_space<vmem>>, %arg4: memref<128x128xbf16, #tpu.memory_space<vmem>>, %arg5: memref<1x128xf32, #tpu.memory_space<vmem>>, %arg6: memref<256x128xf32, #tpu.memory_space<vmem>>) attributes {dimension_semantics = [#tpu.dimension_semantics<parallel>, #tpu.dimension_semantics<parallel>, #tpu.dimension_semantics<arbitrary>], iteration_bounds = array<i64: 2, 1, 1>, scalar_prefetch = 0 : i64, scratch_operands = 0 : i64, tpu.core_type = #tpu.core_type<tc>, window_params = [{transform_indices = @transform_0, window_bounds = array<i64: 256, 128>}, {transform_indices = @transform_1, window_bounds = array<i64: 128, 128>}, {transform_indices = @transform_2, window_bounds = array<i64: 1, 128>}, {transform_indices = @transform_3, window_bounds = array<i64: 256, 128>}]} {
    %c0_i32 = arith.constant 0 : i32
    %0 = arith.cmpi eq, %arg2, %c0_i32 : i32
    %1 = arith.extui %0 : i1 to i32
    %c0_i32_0 = arith.constant 0 : i32
    %2 = arith.cmpi ne, %1, %c0_i32_0 : i32
    scf.if %2 {
      %cst_10 = arith.constant 0.000000e+00 : f32
      %12 = vector.broadcast %cst_10 : f32 to vector<256x128xf32>
      %c0_11 = arith.constant 0 : index
      %c0_12 = arith.constant 0 : index
      %13 = vector.load %arg6[%c0_11, %c0_12] : memref<256x128xf32, #tpu.memory_space<vmem>>, vector<256x128xf32>
      tpu.vector_store %arg6[%c0_11, %c0_12], %12 {strides = array<i32>} : memref<256x128xf32, #tpu.memory_space<vmem>>, vector<256x128xf32>,
    } else {
    }
    %c0 = arith.constant 0 : index
    %c0_1 = arith.constant 0 : index
    %3 = vector.load %arg6[%c0, %c0_1] : memref<256x128xf32, #tpu.memory_space<vmem>>, vector<256x128xf32>
    %c0_2 = arith.constant 0 : index
    %c0_3 = arith.constant 0 : index
    %4 = vector.load %arg3[%c0_2, %c0_3] : memref<256x128xbf16, #tpu.memory_space<vmem>>, vector<256x128xbf16>
    %c0_4 = arith.constant 0 : index
    %c0_5 = arith.constant 0 : index
    %5 = vector.load %arg4[%c0_4, %c0_5] : memref<128x128xbf16, #tpu.memory_space<vmem>>, vector<128x128xbf16>
    %cst = arith.constant dense<0.000000e+00> : vector<256x128xf32>
    %6 = tpu.matmul %4, %5, %cst {dimension_numbers = #tpu.dot_dimension_numbers<[1], [0], [0], [1], [0, 0, 1, 1], [], []>} : vector<256x128xbf16>, vector<128x128xbf16>, vector<256x128xf32> -> vector<256x128xf32>
    %7 = arith.addf %3, %6 : vector<256x128xf32>
    %c0_6 = arith.constant 0 : index
    %c0_7 = arith.constant 0 : index
    %8 = vector.load %arg6[%c0_6, %c0_7] : memref<256x128xf32, #tpu.memory_space<vmem>>, vector<256x128xf32>
    tpu.vector_store %arg6[%c0_6, %c0_7], %7 {strides = array<i32>} : memref<256x128xf32, #tpu.memory_space<vmem>>, vector<256x128xf32>,
    %c0_i32_8 = arith.constant 0 : i32
    %9 = arith.cmpi eq, %arg2, %c0_i32_8 : i32
    %10 = arith.extui %9 : i1 to i32
    %c0_i32_9 = arith.constant 0 : i32
    %11 = arith.cmpi ne, %10, %c0_i32_9 : i32
    scf.if %11 {
      %c0_10 = arith.constant 0 : index
      %c0_11 = arith.constant 0 : index
      %12 = vector.load %arg6[%c0_10, %c0_11] : memref<256x128xf32, #tpu.memory_space<vmem>>, vector<256x128xf32>
      %c0_12 = arith.constant 0 : index
      %c0_13 = arith.constant 0 : index
      %13 = vector.load %arg5[%c0_12, %c0_13] : memref<1x128xf32, #tpu.memory_space<vmem>>, vector<1x128xf32>
      %14 = vector.broadcast %13 : vector<1x128xf32> to vector<256x128xf32>
      %15 = arith.addf %12, %14 : vector<256x128xf32>
      %cst_14 = arith.constant 0.000000e+00 : f32
      %16 = vector.broadcast %cst_14 : f32 to vector<256x128xf32>
      %17 = arith.maximumf %15, %16 : vector<256x128xf32>
      %c0_15 = arith.constant 0 : index
      %c0_16 = arith.constant 0 : index
      %18 = vector.load %arg6[%c0_15, %c0_16] : memref<256x128xf32, #tpu.memory_space<vmem>>, vector<256x128xf32>
      tpu.vector_store %arg6[%c0_15, %c0_16], %17 {strides = array<i32>} : memref<256x128xf32, #tpu.memory_space<vmem>>, vector<256x128xf32>,
    } else {
    }
    return
  }
  func.func @transform_0(%arg0: i32, %arg1: i32, %arg2: i32) -> (i32, i32) {
    %c0_i32 = arith.constant 0 : i32
    return %arg0, %arg2 : i32, i32
  }
  func.func @transform_1(%arg0: i32, %arg1: i32, %arg2: i32) -> (i32, i32) {
    %c0_i32 = arith.constant 0 : i32
    return %arg2, %arg1 : i32, i32
  }
  func.func @transform_2(%arg0: i32, %arg1: i32, %arg2: i32) -> (i32, i32) {
    %c0_i32 = arith.constant 0 : i32
    %c0_i32_0 = arith.constant 0 : i32
    return %c0_i32, %arg1 : i32, i32
  }
  func.func @transform_3(%arg0: i32, %arg1: i32, %arg2: i32) -> (i32, i32) {
    %c0_i32 = arith.constant 0 : i32
    return %arg0, %arg1 : i32, i32
  }
}

module attributes {stable_mosaic.version = 11 : i64} {
  func.func @_matmul_bias_kernel(%arg0: i32, %arg1: i32, %arg2: i32, %arg3: memref<128x256xbf16, #tpu.memory_space<vmem>>, %arg4: memref<256x128xbf16, #tpu.memory_space<vmem>>, %arg5: memref<1x128xf32, #tpu.memory_space<vmem>>, %arg6: memref<128x128xf32, #tpu.memory_space<vmem>>) attributes {dimension_semantics = [#tpu.dimension_semantics<parallel>, #tpu.dimension_semantics<parallel>, #tpu.dimension_semantics<arbitrary>], iteration_bounds = array<i64: 1, 1, 3>, scalar_prefetch = 0 : i64, scratch_operands = 0 : i64, tpu.core_type = #tpu.core_type<tc>, window_params = [{transform_indices = @transform_0, window_bounds = array<i64: 128, 256>}, {transform_indices = @transform_1, window_bounds = array<i64: 256, 128>}, {transform_indices = @transform_2, window_bounds = array<i64: 1, 128>}, {transform_indices = @transform_3, window_bounds = array<i64: 128, 128>}]} {
    %c0_i32 = arith.constant 0 : i32
    %0 = arith.cmpi eq, %arg2, %c0_i32 : i32
    %1 = arith.extui %0 : i1 to i32
    %c0_i32_0 = arith.constant 0 : i32
    %2 = arith.cmpi ne, %1, %c0_i32_0 : i32
    scf.if %2 {
      %cst_9 = arith.constant 0.000000e+00 : f32
      %12 = vector.broadcast %cst_9 : f32 to vector<128x128xf32>
      %c0_10 = arith.constant 0 : index
      %c0_11 = arith.constant 0 : index
      %13 = vector.load %arg6[%c0_10, %c0_11] : memref<128x128xf32, #tpu.memory_space<vmem>>, vector<128x128xf32>
      tpu.vector_store %arg6[%c0_10, %c0_11], %12 {strides = array<i32>} : memref<128x128xf32, #tpu.memory_space<vmem>>, vector<128x128xf32>,
    } else {
    }
    %c0 = arith.constant 0 : index
    %c0_1 = arith.constant 0 : index
    %3 = vector.load %arg6[%c0, %c0_1] : memref<128x128xf32, #tpu.memory_space<vmem>>, vector<128x128xf32>
    %c0_2 = arith.constant 0 : index
    %c0_3 = arith.constant 0 : index
    %4 = vector.load %arg3[%c0_2, %c0_3] : memref<128x256xbf16, #tpu.memory_space<vmem>>, vector<128x256xbf16>
    %c0_4 = arith.constant 0 : index
    %c0_5 = arith.constant 0 : index
    %5 = vector.load %arg4[%c0_4, %c0_5] : memref<256x128xbf16, #tpu.memory_space<vmem>>, vector<256x128xbf16>
    %cst = arith.constant dense<0.000000e+00> : vector<128x128xf32>
    %6 = tpu.matmul %4, %5, %cst {dimension_numbers = #tpu.dot_dimension_numbers<[1], [0], [0], [1], [0, 0, 1, 1], [], []>} : vector<128x256xbf16>, vector<256x128xbf16>, vector<128x128xf32> -> vector<128x128xf32>
    %7 = arith.addf %3, %6 : vector<128x128xf32>
    %c0_6 = arith.constant 0 : index
    %c0_7 = arith.constant 0 : index
    %8 = vector.load %arg6[%c0_6, %c0_7] : memref<128x128xf32, #tpu.memory_space<vmem>>, vector<128x128xf32>
    tpu.vector_store %arg6[%c0_6, %c0_7], %7 {strides = array<i32>} : memref<128x128xf32, #tpu.memory_space<vmem>>, vector<128x128xf32>,
    %c2_i32 = arith.constant 2 : i32
    %9 = arith.cmpi eq, %arg2, %c2_i32 : i32
    %10 = arith.extui %9 : i1 to i32
    %c0_i32_8 = arith.constant 0 : i32
    %11 = arith.cmpi ne, %10, %c0_i32_8 : i32
    scf.if %11 {
      %c0_9 = arith.constant 0 : index
      %c0_10 = arith.constant 0 : index
      %12 = vector.load %arg6[%c0_9, %c0_10] : memref<128x128xf32, #tpu.memory_space<vmem>>, vector<128x128xf32>
      %c0_11 = arith.constant 0 : index
      %c0_12 = arith.constant 0 : index
      %13 = vector.load %arg5[%c0_11, %c0_12] : memref<1x128xf32, #tpu.memory_space<vmem>>, vector<1x128xf32>
      %14 = vector.broadcast %13 : vector<1x128xf32> to vector<128x128xf32>
      %15 = arith.addf %12, %14 : vector<128x128xf32>
      %c0_13 = arith.constant 0 : index
      %c0_14 = arith.constant 0 : index
      %16 = vector.load %arg6[%c0_13, %c0_14] : memref<128x128xf32, #tpu.memory_space<vmem>>, vector<128x128xf32>
      tpu.vector_store %arg6[%c0_13, %c0_14], %15 {strides = array<i32>} : memref<128x128xf32, #tpu.memory_space<vmem>>, vector<128x128xf32>,
    } else {
    }
    return
  }
  func.func @transform_0(%arg0: i32, %arg1: i32, %arg2: i32) -> (i32, i32) {
    %c0_i32 = arith.constant 0 : i32
    return %arg0, %arg2 : i32, i32
  }
  func.func @transform_1(%arg0: i32, %arg1: i32, %arg2: i32) -> (i32, i32) {
    %c0_i32 = arith.constant 0 : i32
    return %arg2, %arg1 : i32, i32
  }
  func.func @transform_2(%arg0: i32, %arg1: i32, %arg2: i32) -> (i32, i32) {
    %c0_i32 = arith.constant 0 : i32
    %c0_i32_0 = arith.constant 0 : i32
    return %c0_i32, %arg1 : i32, i32
  }
  func.func @transform_3(%arg0: i32, %arg1: i32, %arg2: i32) -> (i32, i32) {
    %c0_i32 = arith.constant 0 : i32
    return %arg0, %arg1 : i32, i32
  }
}

module attributes {stable_mosaic.version = 11 : i64} {
  func.func @_matmul_bias_kernel(%arg0: i32, %arg1: i32, %arg2: i32, %arg3: memref<128x256xbf16, #tpu.memory_space<vmem>>, %arg4: memref<256x128xbf16, #tpu.memory_space<vmem>>, %arg5: memref<1x128xf32, #tpu.memory_space<vmem>>, %arg6: memref<128x128xf32, #tpu.memory_space<vmem>>) attributes {dimension_semantics = [#tpu.dimension_semantics<parallel>, #tpu.dimension_semantics<parallel>, #tpu.dimension_semantics<arbitrary>], iteration_bounds = array<i64: 1, 1, 3>, scalar_prefetch = 0 : i64, scratch_operands = 0 : i64, tpu.core_type = #tpu.core_type<tc>, window_params = [{transform_indices = @transform_0, window_bounds = array<i64: 128, 256>}, {transform_indices = @transform_1, window_bounds = array<i64: 256, 128>}, {transform_indices = @transform_2, window_bounds = array<i64: 1, 128>}, {transform_indices = @transform_3, window_bounds = array<i64: 128, 128>}]} {
    %c0_i32 = arith.constant 0 : i32
    %0 = arith.cmpi eq, %arg2, %c0_i32 : i32
    %1 = arith.extui %0 : i1 to i32
    %c0_i32_0 = arith.constant 0 : i32
    %2 = arith.cmpi ne, %1, %c0_i32_0 : i32
    scf.if %2 {
      %cst_9 = arith.constant 0.000000e+00 : f32
      %12 = vector.broadcast %cst_9 : f32 to vector<128x128xf32>
      %c0_10 = arith.constant 0 : index
      %c0_11 = arith.constant 0 : index
      %13 = vector.load %arg6[%c0_10, %c0_11] : memref<128x128xf32, #tpu.memory_space<vmem>>, vector<128x128xf32>
      tpu.vector_store %arg6[%c0_10, %c0_11], %12 {strides = array<i32>} : memref<128x128xf32, #tpu.memory_space<vmem>>, vector<128x128xf32>,
    } else {
    }
    %c0 = arith.constant 0 : index
    %c0_1 = arith.constant 0 : index
    %3 = vector.load %arg6[%c0, %c0_1] : memref<128x128xf32, #tpu.memory_space<vmem>>, vector<128x128xf32>
    %c0_2 = arith.constant 0 : index
    %c0_3 = arith.constant 0 : index
    %4 = vector.load %arg3[%c0_2, %c0_3] : memref<128x256xbf16, #tpu.memory_space<vmem>>, vector<128x256xbf16>
    %c0_4 = arith.constant 0 : index
    %c0_5 = arith.constant 0 : index
    %5 = vector.load %arg4[%c0_4, %c0_5] : memref<256x128xbf16, #tpu.memory_space<vmem>>, vector<256x128xbf16>
    %cst = arith.constant dense<0.000000e+00> : vector<128x128xf32>
    %6 = tpu.matmul %4, %5, %cst {dimension_numbers = #tpu.dot_dimension_numbers<[1], [0], [0], [1], [0, 0, 1, 1], [], []>} : vector<128x256xbf16>, vector<256x128xbf16>, vector<128x128xf32> -> vector<128x128xf32>
    %7 = arith.addf %3, %6 : vector<128x128xf32>
    %c0_6 = arith.constant 0 : index
    %c0_7 = arith.constant 0 : index
    %8 = vector.load %arg6[%c0_6, %c0_7] : memref<128x128xf32, #tpu.memory_space<vmem>>, vector<128x128xf32>
    tpu.vector_store %arg6[%c0_6, %c0_7], %7 {strides = array<i32>} : memref<128x128xf32, #tpu.memory_space<vmem>>, vector<128x128xf32>,
    %c2_i32 = arith.constant 2 : i32
    %9 = arith.cmpi eq, %arg2, %c2_i32 : i32
    %10 = arith.extui %9 : i1 to i32
    %c0_i32_8 = arith.constant 0 : i32
    %11 = arith.cmpi ne, %10, %c0_i32_8 : i32
    scf.if %11 {
      %c0_9 = arith.constant 0 : index
      %c0_10 = arith.constant 0 : index
      %12 = vector.load %arg6[%c0_9, %c0_10] : memref<128x128xf32, #tpu.memory_space<vmem>>, vector<128x128xf32>
      %c0_11 = arith.constant 0 : index
      %c0_12 = arith.constant 0 : index
      %13 = vector.load %arg5[%c0_11, %c0_12] : memref<1x128xf32, #tpu.memory_space<vmem>>, vector<1x128xf32>
      %14 = vector.broadcast %13 : vector<1x128xf32> to vector<128x128xf32>
      %15 = arith.addf %12, %14 : vector<128x128xf32>
      %cst_13 = arith.constant 0.000000e+00 : f32
      %16 = vector.broadcast %cst_13 : f32 to vector<128x128xf32>
      %17 = arith.maximumf %15, %16 : vector<128x128xf32>
      %c0_14 = arith.constant 0 : index
      %c0_15 = arith.constant 0 : index
      %18 = vector.load %arg6[%c0_14, %c0_15] : memref<128x128xf32, #tpu.memory_space<vmem>>, vector<128x128xf32>
      tpu.vector_store %arg6[%c0_14, %c0_15], %17 {strides = array<i32>} : memref<128x128xf32, #tpu.memory_space<vmem>>, vector<128x128xf32>,
    } else {
    }
    return
  }
  func.func @transform_0(%arg0: i32, %arg1: i32, %arg2: i32) -> (i32, i32) {
    %c0_i32 = arith.constant 0 : i32
    return %arg0, %arg2 : i32, i32
  }
  func.func @transform_1(%arg0: i32, %arg1: i32, %arg2: i32) -> (i32, i32) {
    %c0_i32 = arith.constant 0 : i32
    return %arg2, %arg1 : i32, i32
  }
  func.func @transform_2(%arg0: i32, %arg1: i32, %arg2: i32) -> (i32, i32) {
    %c0_i32 = arith.constant 0 : i32
    %c0_i32_0 = arith.constant 0 : i32
    return %c0_i32, %arg1 : i32, i32
  }
  func.func @transform_3(%arg0: i32, %arg1: i32, %arg2: i32) -> (i32, i32) {
    %c0_i32 = arith.constant 0 : i32
    return %arg0, %arg1 : i32, i32
  }
}

module attributes {stable_mosaic.version = 11 : i64} {
  func.func @_ca_reduce_kernel(%arg0: i32, %arg1: i32, %arg2: memref<1x64x64xf32, #tpu.memory_space<vmem>>, %arg3: memref<1x1x64xf32, #tpu.memory_space<vmem>>, %arg4: memref<1x64x2xf32, #tpu.memory_space<vmem>>) attributes {dimension_semantics = [#tpu.dimension_semantics<parallel>, #tpu.dimension_semantics<parallel>], iteration_bounds = array<i64: 2, 1>, scalar_prefetch = 0 : i64, scratch_operands = 0 : i64, tpu.core_type = #tpu.core_type<tc>, window_params = [{transform_indices = @transform_0, window_bounds = array<i64: 1, 64, 64>}, {transform_indices = @transform_1, window_bounds = array<i64: 1, 1, 64>}, {transform_indices = @transform_2, window_bounds = array<i64: 1, 64, 2>}]} {
    %c0 = arith.constant 0 : index
    %c0_0 = arith.constant 0 : index
    %c0_1 = arith.constant 0 : index
    %0 = vector.load %arg2[%c0, %c0_0, %c0_1] : memref<1x64x64xf32, #tpu.memory_space<vmem>>, vector<1x64x64xf32>
    %c0_2 = arith.constant 0 : index
    %c0_3 = arith.constant 0 : index
    %c0_4 = arith.constant 0 : index
    %1 = vector.load %arg3[%c0_2, %c0_3, %c0_4] : memref<1x1x64xf32, #tpu.memory_space<vmem>>, vector<1x1x64xf32>
    %2 = vector.broadcast %1 : vector<1x1x64xf32> to vector<1x64x64xf32>
    %3 = arith.mulf %0, %2 : vector<1x64x64xf32>
    %cst = arith.constant dense<0.000000e+00> : vector<1x64xf32>
    %4 = vector.multi_reduction <add>, %3, %cst [2] : vector<1x64x64xf32> to vector<1x64xf32>
    %5 = vector.shape_cast %4 : vector<1x64xf32> to vector<1x64x1xf32>
    %cst_5 = arith.constant 6.400000e+01 : f32
    %6 = vector.broadcast %cst_5 : f32 to vector<1x64x1xf32>
    %7 = arith.divf %5, %6 : vector<1x64x1xf32>
    %cst_6 = arith.constant dense<0xFF800000> : vector<1x64xf32>
    %8 = vector.multi_reduction <maximumf>, %3, %cst_6 [2] : vector<1x64x64xf32> to vector<1x64xf32>
    %9 = vector.shape_cast %8 : vector<1x64xf32> to vector<1x64x1xf32>
    %10 = tpu.concatenate %7, %9 in 2 : vector<1x64x1xf32>, vector<1x64x1xf32> -> vector<1x64x2xf32>
    %c0_7 = arith.constant 0 : index
    %c0_8 = arith.constant 0 : index
    %c0_9 = arith.constant 0 : index
    %11 = vector.load %arg4[%c0_7, %c0_8, %c0_9] : memref<1x64x2xf32, #tpu.memory_space<vmem>>, vector<1x64x2xf32>
    tpu.vector_store %arg4[%c0_7, %c0_8, %c0_9], %10 {strides = array<i32>} : memref<1x64x2xf32, #tpu.memory_space<vmem>>, vector<1x64x2xf32>,
    return
  }
  func.func @transform_0(%arg0: i32, %arg1: i32) -> (i32, i32, i32) {
    %c0_i32 = arith.constant 0 : i32
    %c0_i32_0 = arith.constant 0 : i32
    return %arg0, %arg1, %c0_i32 : i32, i32, i32
  }
  func.func @transform_1(%arg0: i32, %arg1: i32) -> (i32, i32, i32) {
    %c0_i32 = arith.constant 0 : i32
    %c0_i32_0 = arith.constant 0 : i32
    %c0_i32_1 = arith.constant 0 : i32
    return %arg0, %c0_i32, %c0_i32_0 : i32, i32, i32
  }
  func.func @transform_2(%arg0: i32, %arg1: i32) -> (i32, i32, i32) {
    %c0_i32 = arith.constant 0 : i32
    %c0_i32_0 = arith.constant 0 : i32
    return %arg0, %arg1, %c0_i32 : i32, i32, i32
  }
}

module attributes {stable_mosaic.version = 11 : i64} {
  func.func @_gate_residual_kernel(%arg0: i32, %arg1: i32, %arg2: memref<1x64x64xf32, #tpu.memory_space<vmem>>, %arg3: memref<1x1x64xf32, #tpu.memory_space<vmem>>, %arg4: memref<1x64x1xf32, #tpu.memory_space<vmem>>, %arg5: memref<1x64x64xf32, #tpu.memory_space<vmem>>, %arg6: memref<1x64x64xf32, #tpu.memory_space<vmem>>) attributes {dimension_semantics = [#tpu.dimension_semantics<parallel>, #tpu.dimension_semantics<parallel>], iteration_bounds = array<i64: 2, 1>, scalar_prefetch = 0 : i64, scratch_operands = 0 : i64, tpu.core_type = #tpu.core_type<tc>, window_params = [{transform_indices = @transform_0, window_bounds = array<i64: 1, 64, 64>}, {transform_indices = @transform_1, window_bounds = array<i64: 1, 1, 64>}, {transform_indices = @transform_2, window_bounds = array<i64: 1, 64, 1>}, {transform_indices = @transform_3, window_bounds = array<i64: 1, 64, 64>}, {transform_indices = @transform_4, window_bounds = array<i64: 1, 64, 64>}]} {
    %c0 = arith.constant 0 : index
    %c0_0 = arith.constant 0 : index
    %c0_1 = arith.constant 0 : index
    %0 = vector.load %arg2[%c0, %c0_0, %c0_1] : memref<1x64x64xf32, #tpu.memory_space<vmem>>, vector<1x64x64xf32>
    %c0_2 = arith.constant 0 : index
    %c0_3 = arith.constant 0 : index
    %c0_4 = arith.constant 0 : index
    %1 = vector.load %arg3[%c0_2, %c0_3, %c0_4] : memref<1x1x64xf32, #tpu.memory_space<vmem>>, vector<1x1x64xf32>
    %2 = vector.broadcast %1 : vector<1x1x64xf32> to vector<1x64x64xf32>
    %3 = arith.mulf %0, %2 : vector<1x64x64xf32>
    %c0_5 = arith.constant 0 : index
    %c0_6 = arith.constant 0 : index
    %c0_7 = arith.constant 0 : index
    %4 = vector.load %arg4[%c0_5, %c0_6, %c0_7] : memref<1x64x1xf32, #tpu.memory_space<vmem>>, vector<1x64x1xf32>
    %5 = vector.broadcast %4 : vector<1x64x1xf32> to vector<1x64x64xf32>
    %6 = arith.mulf %3, %5 : vector<1x64x64xf32>
    %c0_8 = arith.constant 0 : index
    %c0_9 = arith.constant 0 : index
    %c0_10 = arith.constant 0 : index
    %7 = vector.load %arg5[%c0_8, %c0_9, %c0_10] : memref<1x64x64xf32, #tpu.memory_space<vmem>>, vector<1x64x64xf32>
    %8 = arith.addf %6, %7 : vector<1x64x64xf32>
    %cst = arith.constant 0.000000e+00 : f32
    %9 = vector.broadcast %cst : f32 to vector<1x64x64xf32>
    %10 = arith.maximumf %8, %9 : vector<1x64x64xf32>
    %c0_11 = arith.constant 0 : index
    %c0_12 = arith.constant 0 : index
    %c0_13 = arith.constant 0 : index
    %11 = vector.load %arg6[%c0_11, %c0_12, %c0_13] : memref<1x64x64xf32, #tpu.memory_space<vmem>>, vector<1x64x64xf32>
    tpu.vector_store %arg6[%c0_11, %c0_12, %c0_13], %10 {strides = array<i32>} : memref<1x64x64xf32, #tpu.memory_space<vmem>>, vector<1x64x64xf32>,
    return
  }
  func.func @transform_0(%arg0: i32, %arg1: i32) -> (i32, i32, i32) {
    %c0_i32 = arith.constant 0 : i32
    %c0_i32_0 = arith.constant 0 : i32
    return %arg0, %arg1, %c0_i32 : i32, i32, i32
  }
  func.func @transform_1(%arg0: i32, %arg1: i32) -> (i32, i32, i32) {
    %c0_i32 = arith.constant 0 : i32
    %c0_i32_0 = arith.constant 0 : i32
    %c0_i32_1 = arith.constant 0 : i32
    return %arg0, %c0_i32, %c0_i32_0 : i32, i32, i32
  }
  func.func @transform_2(%arg0: i32, %arg1: i32) -> (i32, i32, i32) {
    %c0_i32 = arith.constant 0 : i32
    %c0_i32_0 = arith.constant 0 : i32
    return %arg0, %arg1, %c0_i32 : i32, i32, i32
  }
  func.func @transform_3(%arg0: i32, %arg1: i32) -> (i32, i32, i32) {
    %c0_i32 = arith.constant 0 : i32
    %c0_i32_0 = arith.constant 0 : i32
    return %arg0, %arg1, %c0_i32 : i32, i32, i32
  }
  func.func @transform_4(%arg0: i32, %arg1: i32) -> (i32, i32, i32) {
    %c0_i32 = arith.constant 0 : i32
    %c0_i32_0 = arith.constant 0 : i32
    return %arg0, %arg1, %c0_i32 : i32, i32, i32
  }
}

module attributes {stable_mosaic.version = 11 : i64} {
  func.func @_matmul_bias_kernel(%arg0: i32, %arg1: i32, %arg2: i32, %arg3: memref<32x256xbf16, #tpu.memory_space<vmem>>, %arg4: memref<256x128xbf16, #tpu.memory_space<vmem>>, %arg5: memref<1x128xf32, #tpu.memory_space<vmem>>, %arg6: memref<32x128xf32, #tpu.memory_space<vmem>>) attributes {dimension_semantics = [#tpu.dimension_semantics<parallel>, #tpu.dimension_semantics<parallel>, #tpu.dimension_semantics<arbitrary>], iteration_bounds = array<i64: 1, 1, 3>, scalar_prefetch = 0 : i64, scratch_operands = 0 : i64, tpu.core_type = #tpu.core_type<tc>, window_params = [{transform_indices = @transform_0, window_bounds = array<i64: 32, 256>}, {transform_indices = @transform_1, window_bounds = array<i64: 256, 128>}, {transform_indices = @transform_2, window_bounds = array<i64: 1, 128>}, {transform_indices = @transform_3, window_bounds = array<i64: 32, 128>}]} {
    %c0_i32 = arith.constant 0 : i32
    %0 = arith.cmpi eq, %arg2, %c0_i32 : i32
    %1 = arith.extui %0 : i1 to i32
    %c0_i32_0 = arith.constant 0 : i32
    %2 = arith.cmpi ne, %1, %c0_i32_0 : i32
    scf.if %2 {
      %cst_9 = arith.constant 0.000000e+00 : f32
      %12 = vector.broadcast %cst_9 : f32 to vector<32x128xf32>
      %c0_10 = arith.constant 0 : index
      %c0_11 = arith.constant 0 : index
      %13 = vector.load %arg6[%c0_10, %c0_11] : memref<32x128xf32, #tpu.memory_space<vmem>>, vector<32x128xf32>
      tpu.vector_store %arg6[%c0_10, %c0_11], %12 {strides = array<i32>} : memref<32x128xf32, #tpu.memory_space<vmem>>, vector<32x128xf32>,
    } else {
    }
    %c0 = arith.constant 0 : index
    %c0_1 = arith.constant 0 : index
    %3 = vector.load %arg6[%c0, %c0_1] : memref<32x128xf32, #tpu.memory_space<vmem>>, vector<32x128xf32>
    %c0_2 = arith.constant 0 : index
    %c0_3 = arith.constant 0 : index
    %4 = vector.load %arg3[%c0_2, %c0_3] : memref<32x256xbf16, #tpu.memory_space<vmem>>, vector<32x256xbf16>
    %c0_4 = arith.constant 0 : index
    %c0_5 = arith.constant 0 : index
    %5 = vector.load %arg4[%c0_4, %c0_5] : memref<256x128xbf16, #tpu.memory_space<vmem>>, vector<256x128xbf16>
    %cst = arith.constant dense<0.000000e+00> : vector<32x128xf32>
    %6 = tpu.matmul %4, %5, %cst {dimension_numbers = #tpu.dot_dimension_numbers<[1], [0], [0], [1], [0, 0, 1, 1], [], []>} : vector<32x256xbf16>, vector<256x128xbf16>, vector<32x128xf32> -> vector<32x128xf32>
    %7 = arith.addf %3, %6 : vector<32x128xf32>
    %c0_6 = arith.constant 0 : index
    %c0_7 = arith.constant 0 : index
    %8 = vector.load %arg6[%c0_6, %c0_7] : memref<32x128xf32, #tpu.memory_space<vmem>>, vector<32x128xf32>
    tpu.vector_store %arg6[%c0_6, %c0_7], %7 {strides = array<i32>} : memref<32x128xf32, #tpu.memory_space<vmem>>, vector<32x128xf32>,
    %c2_i32 = arith.constant 2 : i32
    %9 = arith.cmpi eq, %arg2, %c2_i32 : i32
    %10 = arith.extui %9 : i1 to i32
    %c0_i32_8 = arith.constant 0 : i32
    %11 = arith.cmpi ne, %10, %c0_i32_8 : i32
    scf.if %11 {
      %c0_9 = arith.constant 0 : index
      %c0_10 = arith.constant 0 : index
      %12 = vector.load %arg6[%c0_9, %c0_10] : memref<32x128xf32, #tpu.memory_space<vmem>>, vector<32x128xf32>
      %c0_11 = arith.constant 0 : index
      %c0_12 = arith.constant 0 : index
      %13 = vector.load %arg5[%c0_11, %c0_12] : memref<1x128xf32, #tpu.memory_space<vmem>>, vector<1x128xf32>
      %14 = vector.broadcast %13 : vector<1x128xf32> to vector<32x128xf32>
      %15 = arith.addf %12, %14 : vector<32x128xf32>
      %cst_13 = arith.constant 0.000000e+00 : f32
      %16 = vector.broadcast %cst_13 : f32 to vector<32x128xf32>
      %17 = arith.maximumf %15, %16 : vector<32x128xf32>
      %c0_14 = arith.constant 0 : index
      %c0_15 = arith.constant 0 : index
      %18 = vector.load %arg6[%c0_14, %c0_15] : memref<32x128xf32, #tpu.memory_space<vmem>>, vector<32x128xf32>
      tpu.vector_store %arg6[%c0_14, %c0_15], %17 {strides = array<i32>} : memref<32x128xf32, #tpu.memory_space<vmem>>, vector<32x128xf32>,
    } else {
    }
    return
  }
  func.func @transform_0(%arg0: i32, %arg1: i32, %arg2: i32) -> (i32, i32) {
    %c0_i32 = arith.constant 0 : i32
    return %arg0, %arg2 : i32, i32
  }
  func.func @transform_1(%arg0: i32, %arg1: i32, %arg2: i32) -> (i32, i32) {
    %c0_i32 = arith.constant 0 : i32
    return %arg2, %arg1 : i32, i32
  }
  func.func @transform_2(%arg0: i32, %arg1: i32, %arg2: i32) -> (i32, i32) {
    %c0_i32 = arith.constant 0 : i32
    %c0_i32_0 = arith.constant 0 : i32
    return %c0_i32, %arg1 : i32, i32
  }
  func.func @transform_3(%arg0: i32, %arg1: i32, %arg2: i32) -> (i32, i32) {
    %c0_i32 = arith.constant 0 : i32
    return %arg0, %arg1 : i32, i32
  }
}

module attributes {stable_mosaic.version = 11 : i64} {
  func.func @_matmul_bias_kernel(%arg0: i32, %arg1: i32, %arg2: i32, %arg3: memref<32x128xbf16, #tpu.memory_space<vmem>>, %arg4: memref<128x128xbf16, #tpu.memory_space<vmem>>, %arg5: memref<1x128xf32, #tpu.memory_space<vmem>>, %arg6: memref<32x128xf32, #tpu.memory_space<vmem>>) attributes {dimension_semantics = [#tpu.dimension_semantics<parallel>, #tpu.dimension_semantics<parallel>, #tpu.dimension_semantics<arbitrary>], iteration_bounds = array<i64: 1, 1, 9>, scalar_prefetch = 0 : i64, scratch_operands = 0 : i64, tpu.core_type = #tpu.core_type<tc>, window_params = [{transform_indices = @transform_0, window_bounds = array<i64: 32, 128>}, {transform_indices = @transform_1, window_bounds = array<i64: 128, 128>}, {transform_indices = @transform_2, window_bounds = array<i64: 1, 128>}, {transform_indices = @transform_3, window_bounds = array<i64: 32, 128>}]} {
    %c0_i32 = arith.constant 0 : i32
    %0 = arith.cmpi eq, %arg2, %c0_i32 : i32
    %1 = arith.extui %0 : i1 to i32
    %c0_i32_0 = arith.constant 0 : i32
    %2 = arith.cmpi ne, %1, %c0_i32_0 : i32
    scf.if %2 {
      %cst_9 = arith.constant 0.000000e+00 : f32
      %12 = vector.broadcast %cst_9 : f32 to vector<32x128xf32>
      %c0_10 = arith.constant 0 : index
      %c0_11 = arith.constant 0 : index
      %13 = vector.load %arg6[%c0_10, %c0_11] : memref<32x128xf32, #tpu.memory_space<vmem>>, vector<32x128xf32>
      tpu.vector_store %arg6[%c0_10, %c0_11], %12 {strides = array<i32>} : memref<32x128xf32, #tpu.memory_space<vmem>>, vector<32x128xf32>,
    } else {
    }
    %c0 = arith.constant 0 : index
    %c0_1 = arith.constant 0 : index
    %3 = vector.load %arg6[%c0, %c0_1] : memref<32x128xf32, #tpu.memory_space<vmem>>, vector<32x128xf32>
    %c0_2 = arith.constant 0 : index
    %c0_3 = arith.constant 0 : index
    %4 = vector.load %arg3[%c0_2, %c0_3] : memref<32x128xbf16, #tpu.memory_space<vmem>>, vector<32x128xbf16>
    %c0_4 = arith.constant 0 : index
    %c0_5 = arith.constant 0 : index
    %5 = vector.load %arg4[%c0_4, %c0_5] : memref<128x128xbf16, #tpu.memory_space<vmem>>, vector<128x128xbf16>
    %cst = arith.constant dense<0.000000e+00> : vector<32x128xf32>
    %6 = tpu.matmul %4, %5, %cst {dimension_numbers = #tpu.dot_dimension_numbers<[1], [0], [0], [1], [0, 0, 1, 1], [], []>} : vector<32x128xbf16>, vector<128x128xbf16>, vector<32x128xf32> -> vector<32x128xf32>
    %7 = arith.addf %3, %6 : vector<32x128xf32>
    %c0_6 = arith.constant 0 : index
    %c0_7 = arith.constant 0 : index
    %8 = vector.load %arg6[%c0_6, %c0_7] : memref<32x128xf32, #tpu.memory_space<vmem>>, vector<32x128xf32>
    tpu.vector_store %arg6[%c0_6, %c0_7], %7 {strides = array<i32>} : memref<32x128xf32, #tpu.memory_space<vmem>>, vector<32x128xf32>,
    %c8_i32 = arith.constant 8 : i32
    %9 = arith.cmpi eq, %arg2, %c8_i32 : i32
    %10 = arith.extui %9 : i1 to i32
    %c0_i32_8 = arith.constant 0 : i32
    %11 = arith.cmpi ne, %10, %c0_i32_8 : i32
    scf.if %11 {
      %c0_9 = arith.constant 0 : index
      %c0_10 = arith.constant 0 : index
      %12 = vector.load %arg6[%c0_9, %c0_10] : memref<32x128xf32, #tpu.memory_space<vmem>>, vector<32x128xf32>
      %c0_11 = arith.constant 0 : index
      %c0_12 = arith.constant 0 : index
      %13 = vector.load %arg5[%c0_11, %c0_12] : memref<1x128xf32, #tpu.memory_space<vmem>>, vector<1x128xf32>
      %14 = vector.broadcast %13 : vector<1x128xf32> to vector<32x128xf32>
      %15 = arith.addf %12, %14 : vector<32x128xf32>
      %c0_13 = arith.constant 0 : index
      %c0_14 = arith.constant 0 : index
      %16 = vector.load %arg6[%c0_13, %c0_14] : memref<32x128xf32, #tpu.memory_space<vmem>>, vector<32x128xf32>
      tpu.vector_store %arg6[%c0_13, %c0_14], %15 {strides = array<i32>} : memref<32x128xf32, #tpu.memory_space<vmem>>, vector<32x128xf32>,
    } else {
    }
    return
  }
  func.func @transform_0(%arg0: i32, %arg1: i32, %arg2: i32) -> (i32, i32) {
    %c0_i32 = arith.constant 0 : i32
    return %arg0, %arg2 : i32, i32
  }
  func.func @transform_1(%arg0: i32, %arg1: i32, %arg2: i32) -> (i32, i32) {
    %c0_i32 = arith.constant 0 : i32
    return %arg2, %arg1 : i32, i32
  }
  func.func @transform_2(%arg0: i32, %arg1: i32, %arg2: i32) -> (i32, i32) {
    %c0_i32 = arith.constant 0 : i32
    %c0_i32_0 = arith.constant 0 : i32
    return %c0_i32, %arg1 : i32, i32
  }
  func.func @transform_3(%arg0: i32, %arg1: i32, %arg2: i32) -> (i32, i32) {
    %c0_i32 = arith.constant 0 : i32
    return %arg0, %arg1 : i32, i32
  }
}

module attributes {stable_mosaic.version = 11 : i64} {
  func.func @_ca_reduce_kernel(%arg0: i32, %arg1: i32, %arg2: memref<1x16x128xf32, #tpu.memory_space<vmem>>, %arg3: memref<1x1x128xf32, #tpu.memory_space<vmem>>, %arg4: memref<1x16x2xf32, #tpu.memory_space<vmem>>) attributes {dimension_semantics = [#tpu.dimension_semantics<parallel>, #tpu.dimension_semantics<parallel>], iteration_bounds = array<i64: 2, 1>, scalar_prefetch = 0 : i64, scratch_operands = 0 : i64, tpu.core_type = #tpu.core_type<tc>, window_params = [{transform_indices = @transform_0, window_bounds = array<i64: 1, 16, 128>}, {transform_indices = @transform_1, window_bounds = array<i64: 1, 1, 128>}, {transform_indices = @transform_2, window_bounds = array<i64: 1, 16, 2>}]} {
    %c0 = arith.constant 0 : index
    %c0_0 = arith.constant 0 : index
    %c0_1 = arith.constant 0 : index
    %0 = vector.load %arg2[%c0, %c0_0, %c0_1] : memref<1x16x128xf32, #tpu.memory_space<vmem>>, vector<1x16x128xf32>
    %c0_2 = arith.constant 0 : index
    %c0_3 = arith.constant 0 : index
    %c0_4 = arith.constant 0 : index
    %1 = vector.load %arg3[%c0_2, %c0_3, %c0_4] : memref<1x1x128xf32, #tpu.memory_space<vmem>>, vector<1x1x128xf32>
    %2 = vector.broadcast %1 : vector<1x1x128xf32> to vector<1x16x128xf32>
    %3 = arith.mulf %0, %2 : vector<1x16x128xf32>
    %cst = arith.constant dense<0.000000e+00> : vector<1x16xf32>
    %4 = vector.multi_reduction <add>, %3, %cst [2] : vector<1x16x128xf32> to vector<1x16xf32>
    %5 = vector.shape_cast %4 : vector<1x16xf32> to vector<1x16x1xf32>
    %cst_5 = arith.constant 1.280000e+02 : f32
    %6 = vector.broadcast %cst_5 : f32 to vector<1x16x1xf32>
    %7 = arith.divf %5, %6 : vector<1x16x1xf32>
    %cst_6 = arith.constant dense<0xFF800000> : vector<1x16xf32>
    %8 = vector.multi_reduction <maximumf>, %3, %cst_6 [2] : vector<1x16x128xf32> to vector<1x16xf32>
    %9 = vector.shape_cast %8 : vector<1x16xf32> to vector<1x16x1xf32>
    %10 = tpu.concatenate %7, %9 in 2 : vector<1x16x1xf32>, vector<1x16x1xf32> -> vector<1x16x2xf32>
    %c0_7 = arith.constant 0 : index
    %c0_8 = arith.constant 0 : index
    %c0_9 = arith.constant 0 : index
    %11 = vector.load %arg4[%c0_7, %c0_8, %c0_9] : memref<1x16x2xf32, #tpu.memory_space<vmem>>, vector<1x16x2xf32>
    tpu.vector_store %arg4[%c0_7, %c0_8, %c0_9], %10 {strides = array<i32>} : memref<1x16x2xf32, #tpu.memory_space<vmem>>, vector<1x16x2xf32>,
    return
  }
  func.func @transform_0(%arg0: i32, %arg1: i32) -> (i32, i32, i32) {
    %c0_i32 = arith.constant 0 : i32
    %c0_i32_0 = arith.constant 0 : i32
    return %arg0, %arg1, %c0_i32 : i32, i32, i32
  }
  func.func @transform_1(%arg0: i32, %arg1: i32) -> (i32, i32, i32) {
    %c0_i32 = arith.constant 0 : i32
    %c0_i32_0 = arith.constant 0 : i32
    %c0_i32_1 = arith.constant 0 : i32
    return %arg0, %c0_i32, %c0_i32_0 : i32, i32, i32
  }
  func.func @transform_2(%arg0: i32, %arg1: i32) -> (i32, i32, i32) {
    %c0_i32 = arith.constant 0 : i32
    %c0_i32_0 = arith.constant 0 : i32
    return %arg0, %arg1, %c0_i32 : i32, i32, i32
  }
}

module attributes {stable_mosaic.version = 11 : i64} {
  func.func @_matmul_bias_kernel(%arg0: i32, %arg1: i32, %arg2: i32, %arg3: memref<32x128xbf16, #tpu.memory_space<vmem>>, %arg4: memref<128x128xbf16, #tpu.memory_space<vmem>>, %arg5: memref<1x128xf32, #tpu.memory_space<vmem>>, %arg6: memref<32x128xf32, #tpu.memory_space<vmem>>) attributes {dimension_semantics = [#tpu.dimension_semantics<parallel>, #tpu.dimension_semantics<parallel>, #tpu.dimension_semantics<arbitrary>], iteration_bounds = array<i64: 1, 1, 9>, scalar_prefetch = 0 : i64, scratch_operands = 0 : i64, tpu.core_type = #tpu.core_type<tc>, window_params = [{transform_indices = @transform_0, window_bounds = array<i64: 32, 128>}, {transform_indices = @transform_1, window_bounds = array<i64: 128, 128>}, {transform_indices = @transform_2, window_bounds = array<i64: 1, 128>}, {transform_indices = @transform_3, window_bounds = array<i64: 32, 128>}]} {
    %c0_i32 = arith.constant 0 : i32
    %0 = arith.cmpi eq, %arg2, %c0_i32 : i32
    %1 = arith.extui %0 : i1 to i32
    %c0_i32_0 = arith.constant 0 : i32
    %2 = arith.cmpi ne, %1, %c0_i32_0 : i32
    scf.if %2 {
      %cst_9 = arith.constant 0.000000e+00 : f32
      %12 = vector.broadcast %cst_9 : f32 to vector<32x128xf32>
      %c0_10 = arith.constant 0 : index
      %c0_11 = arith.constant 0 : index
      %13 = vector.load %arg6[%c0_10, %c0_11] : memref<32x128xf32, #tpu.memory_space<vmem>>, vector<32x128xf32>
      tpu.vector_store %arg6[%c0_10, %c0_11], %12 {strides = array<i32>} : memref<32x128xf32, #tpu.memory_space<vmem>>, vector<32x128xf32>,
    } else {
    }
    %c0 = arith.constant 0 : index
    %c0_1 = arith.constant 0 : index
    %3 = vector.load %arg6[%c0, %c0_1] : memref<32x128xf32, #tpu.memory_space<vmem>>, vector<32x128xf32>
    %c0_2 = arith.constant 0 : index
    %c0_3 = arith.constant 0 : index
    %4 = vector.load %arg3[%c0_2, %c0_3] : memref<32x128xbf16, #tpu.memory_space<vmem>>, vector<32x128xbf16>
    %c0_4 = arith.constant 0 : index
    %c0_5 = arith.constant 0 : index
    %5 = vector.load %arg4[%c0_4, %c0_5] : memref<128x128xbf16, #tpu.memory_space<vmem>>, vector<128x128xbf16>
    %cst = arith.constant dense<0.000000e+00> : vector<32x128xf32>
    %6 = tpu.matmul %4, %5, %cst {dimension_numbers = #tpu.dot_dimension_numbers<[1], [0], [0], [1], [0, 0, 1, 1], [], []>} : vector<32x128xbf16>, vector<128x128xbf16>, vector<32x128xf32> -> vector<32x128xf32>
    %7 = arith.addf %3, %6 : vector<32x128xf32>
    %c0_6 = arith.constant 0 : index
    %c0_7 = arith.constant 0 : index
    %8 = vector.load %arg6[%c0_6, %c0_7] : memref<32x128xf32, #tpu.memory_space<vmem>>, vector<32x128xf32>
    tpu.vector_store %arg6[%c0_6, %c0_7], %7 {strides = array<i32>} : memref<32x128xf32, #tpu.memory_space<vmem>>, vector<32x128xf32>,
    %c8_i32 = arith.constant 8 : i32
    %9 = arith.cmpi eq, %arg2, %c8_i32 : i32
    %10 = arith.extui %9 : i1 to i32
    %c0_i32_8 = arith.constant 0 : i32
    %11 = arith.cmpi ne, %10, %c0_i32_8 : i32
    scf.if %11 {
      %c0_9 = arith.constant 0 : index
      %c0_10 = arith.constant 0 : index
      %12 = vector.load %arg6[%c0_9, %c0_10] : memref<32x128xf32, #tpu.memory_space<vmem>>, vector<32x128xf32>
      %c0_11 = arith.constant 0 : index
      %c0_12 = arith.constant 0 : index
      %13 = vector.load %arg5[%c0_11, %c0_12] : memref<1x128xf32, #tpu.memory_space<vmem>>, vector<1x128xf32>
      %14 = vector.broadcast %13 : vector<1x128xf32> to vector<32x128xf32>
      %15 = arith.addf %12, %14 : vector<32x128xf32>
      %cst_13 = arith.constant 0.000000e+00 : f32
      %16 = vector.broadcast %cst_13 : f32 to vector<32x128xf32>
      %17 = arith.maximumf %15, %16 : vector<32x128xf32>
      %c0_14 = arith.constant 0 : index
      %c0_15 = arith.constant 0 : index
      %18 = vector.load %arg6[%c0_14, %c0_15] : memref<32x128xf32, #tpu.memory_space<vmem>>, vector<32x128xf32>
      tpu.vector_store %arg6[%c0_14, %c0_15], %17 {strides = array<i32>} : memref<32x128xf32, #tpu.memory_space<vmem>>, vector<32x128xf32>,
    } else {
    }
    return
  }
  func.func @transform_0(%arg0: i32, %arg1: i32, %arg2: i32) -> (i32, i32) {
    %c0_i32 = arith.constant 0 : i32
    return %arg0, %arg2 : i32, i32
  }
  func.func @transform_1(%arg0: i32, %arg1: i32, %arg2: i32) -> (i32, i32) {
    %c0_i32 = arith.constant 0 : i32
    return %arg2, %arg1 : i32, i32
  }
  func.func @transform_2(%arg0: i32, %arg1: i32, %arg2: i32) -> (i32, i32) {
    %c0_i32 = arith.constant 0 : i32
    %c0_i32_0 = arith.constant 0 : i32
    return %c0_i32, %arg1 : i32, i32
  }
  func.func @transform_3(%arg0: i32, %arg1: i32, %arg2: i32) -> (i32, i32) {
    %c0_i32 = arith.constant 0 : i32
    return %arg0, %arg1 : i32, i32
  }
}

module attributes {stable_mosaic.version = 11 : i64} {
  func.func @_gate_residual_kernel(%arg0: i32, %arg1: i32, %arg2: memref<1x16x128xf32, #tpu.memory_space<vmem>>, %arg3: memref<1x1x128xf32, #tpu.memory_space<vmem>>, %arg4: memref<1x16x1xf32, #tpu.memory_space<vmem>>, %arg5: memref<1x16x128xf32, #tpu.memory_space<vmem>>, %arg6: memref<1x16x128xf32, #tpu.memory_space<vmem>>) attributes {dimension_semantics = [#tpu.dimension_semantics<parallel>, #tpu.dimension_semantics<parallel>], iteration_bounds = array<i64: 2, 1>, scalar_prefetch = 0 : i64, scratch_operands = 0 : i64, tpu.core_type = #tpu.core_type<tc>, window_params = [{transform_indices = @transform_0, window_bounds = array<i64: 1, 16, 128>}, {transform_indices = @transform_1, window_bounds = array<i64: 1, 1, 128>}, {transform_indices = @transform_2, window_bounds = array<i64: 1, 16, 1>}, {transform_indices = @transform_3, window_bounds = array<i64: 1, 16, 128>}, {transform_indices = @transform_4, window_bounds = array<i64: 1, 16, 128>}]} {
    %c0 = arith.constant 0 : index
    %c0_0 = arith.constant 0 : index
    %c0_1 = arith.constant 0 : index
    %0 = vector.load %arg2[%c0, %c0_0, %c0_1] : memref<1x16x128xf32, #tpu.memory_space<vmem>>, vector<1x16x128xf32>
    %c0_2 = arith.constant 0 : index
    %c0_3 = arith.constant 0 : index
    %c0_4 = arith.constant 0 : index
    %1 = vector.load %arg3[%c0_2, %c0_3, %c0_4] : memref<1x1x128xf32, #tpu.memory_space<vmem>>, vector<1x1x128xf32>
    %2 = vector.broadcast %1 : vector<1x1x128xf32> to vector<1x16x128xf32>
    %3 = arith.mulf %0, %2 : vector<1x16x128xf32>
    %c0_5 = arith.constant 0 : index
    %c0_6 = arith.constant 0 : index
    %c0_7 = arith.constant 0 : index
    %4 = vector.load %arg4[%c0_5, %c0_6, %c0_7] : memref<1x16x1xf32, #tpu.memory_space<vmem>>, vector<1x16x1xf32>
    %5 = vector.broadcast %4 : vector<1x16x1xf32> to vector<1x16x128xf32>
    %6 = arith.mulf %3, %5 : vector<1x16x128xf32>
    %c0_8 = arith.constant 0 : index
    %c0_9 = arith.constant 0 : index
    %c0_10 = arith.constant 0 : index
    %7 = vector.load %arg5[%c0_8, %c0_9, %c0_10] : memref<1x16x128xf32, #tpu.memory_space<vmem>>, vector<1x16x128xf32>
    %8 = arith.addf %6, %7 : vector<1x16x128xf32>
    %cst = arith.constant 0.000000e+00 : f32
    %9 = vector.broadcast %cst : f32 to vector<1x16x128xf32>
    %10 = arith.maximumf %8, %9 : vector<1x16x128xf32>
    %c0_11 = arith.constant 0 : index
    %c0_12 = arith.constant 0 : index
    %c0_13 = arith.constant 0 : index
    %11 = vector.load %arg6[%c0_11, %c0_12, %c0_13] : memref<1x16x128xf32, #tpu.memory_space<vmem>>, vector<1x16x128xf32>
    tpu.vector_store %arg6[%c0_11, %c0_12, %c0_13], %10 {strides = array<i32>} : memref<1x16x128xf32, #tpu.memory_space<vmem>>, vector<1x16x128xf32>,
    return
  }
  func.func @transform_0(%arg0: i32, %arg1: i32) -> (i32, i32, i32) {
    %c0_i32 = arith.constant 0 : i32
    %c0_i32_0 = arith.constant 0 : i32
    return %arg0, %arg1, %c0_i32 : i32, i32, i32
  }
  func.func @transform_1(%arg0: i32, %arg1: i32) -> (i32, i32, i32) {
    %c0_i32 = arith.constant 0 : i32
    %c0_i32_0 = arith.constant 0 : i32
    %c0_i32_1 = arith.constant 0 : i32
    return %arg0, %c0_i32, %c0_i32_0 : i32, i32, i32
  }
  func.func @transform_2(%arg0: i32, %arg1: i32) -> (i32, i32, i32) {
    %c0_i32 = arith.constant 0 : i32
    %c0_i32_0 = arith.constant 0 : i32
    return %arg0, %arg1, %c0_i32 : i32, i32, i32
  }
  func.func @transform_3(%arg0: i32, %arg1: i32) -> (i32, i32, i32) {
    %c0_i32 = arith.constant 0 : i32
    %c0_i32_0 = arith.constant 0 : i32
    return %arg0, %arg1, %c0_i32 : i32, i32, i32
  }
  func.func @transform_4(%arg0: i32, %arg1: i32) -> (i32, i32, i32) {
    %c0_i32 = arith.constant 0 : i32
    %c0_i32_0 = arith.constant 0 : i32
    return %arg0, %arg1, %c0_i32 : i32, i32, i32
  }
}

module attributes {stable_mosaic.version = 11 : i64} {
  func.func @_matmul_bias_kernel(%arg0: i32, %arg1: i32, %arg2: i32, %arg3: memref<32x128xbf16, #tpu.memory_space<vmem>>, %arg4: memref<128x128xbf16, #tpu.memory_space<vmem>>, %arg5: memref<1x128xf32, #tpu.memory_space<vmem>>, %arg6: memref<32x128xf32, #tpu.memory_space<vmem>>) attributes {dimension_semantics = [#tpu.dimension_semantics<parallel>, #tpu.dimension_semantics<parallel>, #tpu.dimension_semantics<arbitrary>], iteration_bounds = array<i64: 1, 1, 1>, scalar_prefetch = 0 : i64, scratch_operands = 0 : i64, tpu.core_type = #tpu.core_type<tc>, window_params = [{transform_indices = @transform_0, window_bounds = array<i64: 32, 128>}, {transform_indices = @transform_1, window_bounds = array<i64: 128, 128>}, {transform_indices = @transform_2, window_bounds = array<i64: 1, 128>}, {transform_indices = @transform_3, window_bounds = array<i64: 32, 128>}]} {
    %c0_i32 = arith.constant 0 : i32
    %0 = arith.cmpi eq, %arg2, %c0_i32 : i32
    %1 = arith.extui %0 : i1 to i32
    %c0_i32_0 = arith.constant 0 : i32
    %2 = arith.cmpi ne, %1, %c0_i32_0 : i32
    scf.if %2 {
      %cst_10 = arith.constant 0.000000e+00 : f32
      %12 = vector.broadcast %cst_10 : f32 to vector<32x128xf32>
      %c0_11 = arith.constant 0 : index
      %c0_12 = arith.constant 0 : index
      %13 = vector.load %arg6[%c0_11, %c0_12] : memref<32x128xf32, #tpu.memory_space<vmem>>, vector<32x128xf32>
      tpu.vector_store %arg6[%c0_11, %c0_12], %12 {strides = array<i32>} : memref<32x128xf32, #tpu.memory_space<vmem>>, vector<32x128xf32>,
    } else {
    }
    %c0 = arith.constant 0 : index
    %c0_1 = arith.constant 0 : index
    %3 = vector.load %arg6[%c0, %c0_1] : memref<32x128xf32, #tpu.memory_space<vmem>>, vector<32x128xf32>
    %c0_2 = arith.constant 0 : index
    %c0_3 = arith.constant 0 : index
    %4 = vector.load %arg3[%c0_2, %c0_3] : memref<32x128xbf16, #tpu.memory_space<vmem>>, vector<32x128xbf16>
    %c0_4 = arith.constant 0 : index
    %c0_5 = arith.constant 0 : index
    %5 = vector.load %arg4[%c0_4, %c0_5] : memref<128x128xbf16, #tpu.memory_space<vmem>>, vector<128x128xbf16>
    %cst = arith.constant dense<0.000000e+00> : vector<32x128xf32>
    %6 = tpu.matmul %4, %5, %cst {dimension_numbers = #tpu.dot_dimension_numbers<[1], [0], [0], [1], [0, 0, 1, 1], [], []>} : vector<32x128xbf16>, vector<128x128xbf16>, vector<32x128xf32> -> vector<32x128xf32>
    %7 = arith.addf %3, %6 : vector<32x128xf32>
    %c0_6 = arith.constant 0 : index
    %c0_7 = arith.constant 0 : index
    %8 = vector.load %arg6[%c0_6, %c0_7] : memref<32x128xf32, #tpu.memory_space<vmem>>, vector<32x128xf32>
    tpu.vector_store %arg6[%c0_6, %c0_7], %7 {strides = array<i32>} : memref<32x128xf32, #tpu.memory_space<vmem>>, vector<32x128xf32>,
    %c0_i32_8 = arith.constant 0 : i32
    %9 = arith.cmpi eq, %arg2, %c0_i32_8 : i32
    %10 = arith.extui %9 : i1 to i32
    %c0_i32_9 = arith.constant 0 : i32
    %11 = arith.cmpi ne, %10, %c0_i32_9 : i32
    scf.if %11 {
      %c0_10 = arith.constant 0 : index
      %c0_11 = arith.constant 0 : index
      %12 = vector.load %arg6[%c0_10, %c0_11] : memref<32x128xf32, #tpu.memory_space<vmem>>, vector<32x128xf32>
      %c0_12 = arith.constant 0 : index
      %c0_13 = arith.constant 0 : index
      %13 = vector.load %arg5[%c0_12, %c0_13] : memref<1x128xf32, #tpu.memory_space<vmem>>, vector<1x128xf32>
      %14 = vector.broadcast %13 : vector<1x128xf32> to vector<32x128xf32>
      %15 = arith.addf %12, %14 : vector<32x128xf32>
      %c0_14 = arith.constant 0 : index
      %c0_15 = arith.constant 0 : index
      %16 = vector.load %arg6[%c0_14, %c0_15] : memref<32x128xf32, #tpu.memory_space<vmem>>, vector<32x128xf32>
      tpu.vector_store %arg6[%c0_14, %c0_15], %15 {strides = array<i32>} : memref<32x128xf32, #tpu.memory_space<vmem>>, vector<32x128xf32>,
    } else {
    }
    return
  }
  func.func @transform_0(%arg0: i32, %arg1: i32, %arg2: i32) -> (i32, i32) {
    %c0_i32 = arith.constant 0 : i32
    return %arg0, %arg2 : i32, i32
  }
  func.func @transform_1(%arg0: i32, %arg1: i32, %arg2: i32) -> (i32, i32) {
    %c0_i32 = arith.constant 0 : i32
    return %arg2, %arg1 : i32, i32
  }
  func.func @transform_2(%arg0: i32, %arg1: i32, %arg2: i32) -> (i32, i32) {
    %c0_i32 = arith.constant 0 : i32
    %c0_i32_0 = arith.constant 0 : i32
    return %c0_i32, %arg1 : i32, i32
  }
  func.func @transform_3(%arg0: i32, %arg1: i32, %arg2: i32) -> (i32, i32) {
    %c0_i32 = arith.constant 0 : i32
    return %arg0, %arg1 : i32, i32
  }
}

module attributes {stable_mosaic.version = 11 : i64} {
  func.func @_matmul_bias_kernel(%arg0: i32, %arg1: i32, %arg2: i32, %arg3: memref<16x128xbf16, #tpu.memory_space<vmem>>, %arg4: memref<128x256xbf16, #tpu.memory_space<vmem>>, %arg5: memref<1x256xf32, #tpu.memory_space<vmem>>, %arg6: memref<16x256xf32, #tpu.memory_space<vmem>>) attributes {dimension_semantics = [#tpu.dimension_semantics<parallel>, #tpu.dimension_semantics<parallel>, #tpu.dimension_semantics<arbitrary>], iteration_bounds = array<i64: 1, 1, 9>, scalar_prefetch = 0 : i64, scratch_operands = 0 : i64, tpu.core_type = #tpu.core_type<tc>, window_params = [{transform_indices = @transform_0, window_bounds = array<i64: 16, 128>}, {transform_indices = @transform_1, window_bounds = array<i64: 128, 256>}, {transform_indices = @transform_2, window_bounds = array<i64: 1, 256>}, {transform_indices = @transform_3, window_bounds = array<i64: 16, 256>}]} {
    %c0_i32 = arith.constant 0 : i32
    %0 = arith.cmpi eq, %arg2, %c0_i32 : i32
    %1 = arith.extui %0 : i1 to i32
    %c0_i32_0 = arith.constant 0 : i32
    %2 = arith.cmpi ne, %1, %c0_i32_0 : i32
    scf.if %2 {
      %cst_9 = arith.constant 0.000000e+00 : f32
      %12 = vector.broadcast %cst_9 : f32 to vector<16x256xf32>
      %c0_10 = arith.constant 0 : index
      %c0_11 = arith.constant 0 : index
      %13 = vector.load %arg6[%c0_10, %c0_11] : memref<16x256xf32, #tpu.memory_space<vmem>>, vector<16x256xf32>
      tpu.vector_store %arg6[%c0_10, %c0_11], %12 {strides = array<i32>} : memref<16x256xf32, #tpu.memory_space<vmem>>, vector<16x256xf32>,
    } else {
    }
    %c0 = arith.constant 0 : index
    %c0_1 = arith.constant 0 : index
    %3 = vector.load %arg6[%c0, %c0_1] : memref<16x256xf32, #tpu.memory_space<vmem>>, vector<16x256xf32>
    %c0_2 = arith.constant 0 : index
    %c0_3 = arith.constant 0 : index
    %4 = vector.load %arg3[%c0_2, %c0_3] : memref<16x128xbf16, #tpu.memory_space<vmem>>, vector<16x128xbf16>
    %c0_4 = arith.constant 0 : index
    %c0_5 = arith.constant 0 : index
    %5 = vector.load %arg4[%c0_4, %c0_5] : memref<128x256xbf16, #tpu.memory_space<vmem>>, vector<128x256xbf16>
    %cst = arith.constant dense<0.000000e+00> : vector<16x256xf32>
    %6 = tpu.matmul %4, %5, %cst {dimension_numbers = #tpu.dot_dimension_numbers<[1], [0], [0], [1], [0, 0, 1, 1], [], []>} : vector<16x128xbf16>, vector<128x256xbf16>, vector<16x256xf32> -> vector<16x256xf32>
    %7 = arith.addf %3, %6 : vector<16x256xf32>
    %c0_6 = arith.constant 0 : index
    %c0_7 = arith.constant 0 : index
    %8 = vector.load %arg6[%c0_6, %c0_7] : memref<16x256xf32, #tpu.memory_space<vmem>>, vector<16x256xf32>
    tpu.vector_store %arg6[%c0_6, %c0_7], %7 {strides = array<i32>} : memref<16x256xf32, #tpu.memory_space<vmem>>, vector<16x256xf32>,
    %c8_i32 = arith.constant 8 : i32
    %9 = arith.cmpi eq, %arg2, %c8_i32 : i32
    %10 = arith.extui %9 : i1 to i32
    %c0_i32_8 = arith.constant 0 : i32
    %11 = arith.cmpi ne, %10, %c0_i32_8 : i32
    scf.if %11 {
      %c0_9 = arith.constant 0 : index
      %c0_10 = arith.constant 0 : index
      %12 = vector.load %arg6[%c0_9, %c0_10] : memref<16x256xf32, #tpu.memory_space<vmem>>, vector<16x256xf32>
      %c0_11 = arith.constant 0 : index
      %c0_12 = arith.constant 0 : index
      %13 = vector.load %arg5[%c0_11, %c0_12] : memref<1x256xf32, #tpu.memory_space<vmem>>, vector<1x256xf32>
      %14 = vector.broadcast %13 : vector<1x256xf32> to vector<16x256xf32>
      %15 = arith.addf %12, %14 : vector<16x256xf32>
      %cst_13 = arith.constant 0.000000e+00 : f32
      %16 = vector.broadcast %cst_13 : f32 to vector<16x256xf32>
      %17 = arith.maximumf %15, %16 : vector<16x256xf32>
      %c0_14 = arith.constant 0 : index
      %c0_15 = arith.constant 0 : index
      %18 = vector.load %arg6[%c0_14, %c0_15] : memref<16x256xf32, #tpu.memory_space<vmem>>, vector<16x256xf32>
      tpu.vector_store %arg6[%c0_14, %c0_15], %17 {strides = array<i32>} : memref<16x256xf32, #tpu.memory_space<vmem>>, vector<16x256xf32>,
    } else {
    }
    return
  }
  func.func @transform_0(%arg0: i32, %arg1: i32, %arg2: i32) -> (i32, i32) {
    %c0_i32 = arith.constant 0 : i32
    return %arg0, %arg2 : i32, i32
  }
  func.func @transform_1(%arg0: i32, %arg1: i32, %arg2: i32) -> (i32, i32) {
    %c0_i32 = arith.constant 0 : i32
    return %arg2, %arg1 : i32, i32
  }
  func.func @transform_2(%arg0: i32, %arg1: i32, %arg2: i32) -> (i32, i32) {
    %c0_i32 = arith.constant 0 : i32
    %c0_i32_0 = arith.constant 0 : i32
    return %c0_i32, %arg1 : i32, i32
  }
  func.func @transform_3(%arg0: i32, %arg1: i32, %arg2: i32) -> (i32, i32) {
    %c0_i32 = arith.constant 0 : i32
    return %arg0, %arg1 : i32, i32
  }
}

module attributes {stable_mosaic.version = 11 : i64} {
  func.func @_matmul_bias_kernel(%arg0: i32, %arg1: i32, %arg2: i32, %arg3: memref<16x256xbf16, #tpu.memory_space<vmem>>, %arg4: memref<256x256xbf16, #tpu.memory_space<vmem>>, %arg5: memref<1x256xf32, #tpu.memory_space<vmem>>, %arg6: memref<16x256xf32, #tpu.memory_space<vmem>>) attributes {dimension_semantics = [#tpu.dimension_semantics<parallel>, #tpu.dimension_semantics<parallel>, #tpu.dimension_semantics<arbitrary>], iteration_bounds = array<i64: 1, 1, 9>, scalar_prefetch = 0 : i64, scratch_operands = 0 : i64, tpu.core_type = #tpu.core_type<tc>, window_params = [{transform_indices = @transform_0, window_bounds = array<i64: 16, 256>}, {transform_indices = @transform_1, window_bounds = array<i64: 256, 256>}, {transform_indices = @transform_2, window_bounds = array<i64: 1, 256>}, {transform_indices = @transform_3, window_bounds = array<i64: 16, 256>}]} {
    %c0_i32 = arith.constant 0 : i32
    %0 = arith.cmpi eq, %arg2, %c0_i32 : i32
    %1 = arith.extui %0 : i1 to i32
    %c0_i32_0 = arith.constant 0 : i32
    %2 = arith.cmpi ne, %1, %c0_i32_0 : i32
    scf.if %2 {
      %cst_9 = arith.constant 0.000000e+00 : f32
      %12 = vector.broadcast %cst_9 : f32 to vector<16x256xf32>
      %c0_10 = arith.constant 0 : index
      %c0_11 = arith.constant 0 : index
      %13 = vector.load %arg6[%c0_10, %c0_11] : memref<16x256xf32, #tpu.memory_space<vmem>>, vector<16x256xf32>
      tpu.vector_store %arg6[%c0_10, %c0_11], %12 {strides = array<i32>} : memref<16x256xf32, #tpu.memory_space<vmem>>, vector<16x256xf32>,
    } else {
    }
    %c0 = arith.constant 0 : index
    %c0_1 = arith.constant 0 : index
    %3 = vector.load %arg6[%c0, %c0_1] : memref<16x256xf32, #tpu.memory_space<vmem>>, vector<16x256xf32>
    %c0_2 = arith.constant 0 : index
    %c0_3 = arith.constant 0 : index
    %4 = vector.load %arg3[%c0_2, %c0_3] : memref<16x256xbf16, #tpu.memory_space<vmem>>, vector<16x256xbf16>
    %c0_4 = arith.constant 0 : index
    %c0_5 = arith.constant 0 : index
    %5 = vector.load %arg4[%c0_4, %c0_5] : memref<256x256xbf16, #tpu.memory_space<vmem>>, vector<256x256xbf16>
    %cst = arith.constant dense<0.000000e+00> : vector<16x256xf32>
    %6 = tpu.matmul %4, %5, %cst {dimension_numbers = #tpu.dot_dimension_numbers<[1], [0], [0], [1], [0, 0, 1, 1], [], []>} : vector<16x256xbf16>, vector<256x256xbf16>, vector<16x256xf32> -> vector<16x256xf32>
    %7 = arith.addf %3, %6 : vector<16x256xf32>
    %c0_6 = arith.constant 0 : index
    %c0_7 = arith.constant 0 : index
    %8 = vector.load %arg6[%c0_6, %c0_7] : memref<16x256xf32, #tpu.memory_space<vmem>>, vector<16x256xf32>
    tpu.vector_store %arg6[%c0_6, %c0_7], %7 {strides = array<i32>} : memref<16x256xf32, #tpu.memory_space<vmem>>, vector<16x256xf32>,
    %c8_i32 = arith.constant 8 : i32
    %9 = arith.cmpi eq, %arg2, %c8_i32 : i32
    %10 = arith.extui %9 : i1 to i32
    %c0_i32_8 = arith.constant 0 : i32
    %11 = arith.cmpi ne, %10, %c0_i32_8 : i32
    scf.if %11 {
      %c0_9 = arith.constant 0 : index
      %c0_10 = arith.constant 0 : index
      %12 = vector.load %arg6[%c0_9, %c0_10] : memref<16x256xf32, #tpu.memory_space<vmem>>, vector<16x256xf32>
      %c0_11 = arith.constant 0 : index
      %c0_12 = arith.constant 0 : index
      %13 = vector.load %arg5[%c0_11, %c0_12] : memref<1x256xf32, #tpu.memory_space<vmem>>, vector<1x256xf32>
      %14 = vector.broadcast %13 : vector<1x256xf32> to vector<16x256xf32>
      %15 = arith.addf %12, %14 : vector<16x256xf32>
      %c0_13 = arith.constant 0 : index
      %c0_14 = arith.constant 0 : index
      %16 = vector.load %arg6[%c0_13, %c0_14] : memref<16x256xf32, #tpu.memory_space<vmem>>, vector<16x256xf32>
      tpu.vector_store %arg6[%c0_13, %c0_14], %15 {strides = array<i32>} : memref<16x256xf32, #tpu.memory_space<vmem>>, vector<16x256xf32>,
    } else {
    }
    return
  }
  func.func @transform_0(%arg0: i32, %arg1: i32, %arg2: i32) -> (i32, i32) {
    %c0_i32 = arith.constant 0 : i32
    return %arg0, %arg2 : i32, i32
  }
  func.func @transform_1(%arg0: i32, %arg1: i32, %arg2: i32) -> (i32, i32) {
    %c0_i32 = arith.constant 0 : i32
    return %arg2, %arg1 : i32, i32
  }
  func.func @transform_2(%arg0: i32, %arg1: i32, %arg2: i32) -> (i32, i32) {
    %c0_i32 = arith.constant 0 : i32
    %c0_i32_0 = arith.constant 0 : i32
    return %c0_i32, %arg1 : i32, i32
  }
  func.func @transform_3(%arg0: i32, %arg1: i32, %arg2: i32) -> (i32, i32) {
    %c0_i32 = arith.constant 0 : i32
    return %arg0, %arg1 : i32, i32
  }
}

module attributes {stable_mosaic.version = 11 : i64} {
  func.func @_ca_reduce_kernel(%arg0: i32, %arg1: i32, %arg2: memref<1x8x256xf32, #tpu.memory_space<vmem>>, %arg3: memref<1x1x256xf32, #tpu.memory_space<vmem>>, %arg4: memref<1x8x2xf32, #tpu.memory_space<vmem>>) attributes {dimension_semantics = [#tpu.dimension_semantics<parallel>, #tpu.dimension_semantics<parallel>], iteration_bounds = array<i64: 2, 1>, scalar_prefetch = 0 : i64, scratch_operands = 0 : i64, tpu.core_type = #tpu.core_type<tc>, window_params = [{transform_indices = @transform_0, window_bounds = array<i64: 1, 8, 256>}, {transform_indices = @transform_1, window_bounds = array<i64: 1, 1, 256>}, {transform_indices = @transform_2, window_bounds = array<i64: 1, 8, 2>}]} {
    %c0 = arith.constant 0 : index
    %c0_0 = arith.constant 0 : index
    %c0_1 = arith.constant 0 : index
    %0 = vector.load %arg2[%c0, %c0_0, %c0_1] : memref<1x8x256xf32, #tpu.memory_space<vmem>>, vector<1x8x256xf32>
    %c0_2 = arith.constant 0 : index
    %c0_3 = arith.constant 0 : index
    %c0_4 = arith.constant 0 : index
    %1 = vector.load %arg3[%c0_2, %c0_3, %c0_4] : memref<1x1x256xf32, #tpu.memory_space<vmem>>, vector<1x1x256xf32>
    %2 = vector.broadcast %1 : vector<1x1x256xf32> to vector<1x8x256xf32>
    %3 = arith.mulf %0, %2 : vector<1x8x256xf32>
    %cst = arith.constant dense<0.000000e+00> : vector<1x8xf32>
    %4 = vector.multi_reduction <add>, %3, %cst [2] : vector<1x8x256xf32> to vector<1x8xf32>
    %5 = vector.shape_cast %4 : vector<1x8xf32> to vector<1x8x1xf32>
    %cst_5 = arith.constant 2.560000e+02 : f32
    %6 = vector.broadcast %cst_5 : f32 to vector<1x8x1xf32>
    %7 = arith.divf %5, %6 : vector<1x8x1xf32>
    %cst_6 = arith.constant dense<0xFF800000> : vector<1x8xf32>
    %8 = vector.multi_reduction <maximumf>, %3, %cst_6 [2] : vector<1x8x256xf32> to vector<1x8xf32>
    %9 = vector.shape_cast %8 : vector<1x8xf32> to vector<1x8x1xf32>
    %10 = tpu.concatenate %7, %9 in 2 : vector<1x8x1xf32>, vector<1x8x1xf32> -> vector<1x8x2xf32>
    %c0_7 = arith.constant 0 : index
    %c0_8 = arith.constant 0 : index
    %c0_9 = arith.constant 0 : index
    %11 = vector.load %arg4[%c0_7, %c0_8, %c0_9] : memref<1x8x2xf32, #tpu.memory_space<vmem>>, vector<1x8x2xf32>
    tpu.vector_store %arg4[%c0_7, %c0_8, %c0_9], %10 {strides = array<i32>} : memref<1x8x2xf32, #tpu.memory_space<vmem>>, vector<1x8x2xf32>,
    return
  }
  func.func @transform_0(%arg0: i32, %arg1: i32) -> (i32, i32, i32) {
    %c0_i32 = arith.constant 0 : i32
    %c0_i32_0 = arith.constant 0 : i32
    return %arg0, %arg1, %c0_i32 : i32, i32, i32
  }
  func.func @transform_1(%arg0: i32, %arg1: i32) -> (i32, i32, i32) {
    %c0_i32 = arith.constant 0 : i32
    %c0_i32_0 = arith.constant 0 : i32
    %c0_i32_1 = arith.constant 0 : i32
    return %arg0, %c0_i32, %c0_i32_0 : i32, i32, i32
  }
  func.func @transform_2(%arg0: i32, %arg1: i32) -> (i32, i32, i32) {
    %c0_i32 = arith.constant 0 : i32
    %c0_i32_0 = arith.constant 0 : i32
    return %arg0, %arg1, %c0_i32 : i32, i32, i32
  }
}

module attributes {stable_mosaic.version = 11 : i64} {
  func.func @_matmul_bias_kernel(%arg0: i32, %arg1: i32, %arg2: i32, %arg3: memref<16x128xbf16, #tpu.memory_space<vmem>>, %arg4: memref<128x256xbf16, #tpu.memory_space<vmem>>, %arg5: memref<1x256xf32, #tpu.memory_space<vmem>>, %arg6: memref<16x256xf32, #tpu.memory_space<vmem>>) attributes {dimension_semantics = [#tpu.dimension_semantics<parallel>, #tpu.dimension_semantics<parallel>, #tpu.dimension_semantics<arbitrary>], iteration_bounds = array<i64: 1, 1, 1>, scalar_prefetch = 0 : i64, scratch_operands = 0 : i64, tpu.core_type = #tpu.core_type<tc>, window_params = [{transform_indices = @transform_0, window_bounds = array<i64: 16, 128>}, {transform_indices = @transform_1, window_bounds = array<i64: 128, 256>}, {transform_indices = @transform_2, window_bounds = array<i64: 1, 256>}, {transform_indices = @transform_3, window_bounds = array<i64: 16, 256>}]} {
    %c0_i32 = arith.constant 0 : i32
    %0 = arith.cmpi eq, %arg2, %c0_i32 : i32
    %1 = arith.extui %0 : i1 to i32
    %c0_i32_0 = arith.constant 0 : i32
    %2 = arith.cmpi ne, %1, %c0_i32_0 : i32
    scf.if %2 {
      %cst_10 = arith.constant 0.000000e+00 : f32
      %12 = vector.broadcast %cst_10 : f32 to vector<16x256xf32>
      %c0_11 = arith.constant 0 : index
      %c0_12 = arith.constant 0 : index
      %13 = vector.load %arg6[%c0_11, %c0_12] : memref<16x256xf32, #tpu.memory_space<vmem>>, vector<16x256xf32>
      tpu.vector_store %arg6[%c0_11, %c0_12], %12 {strides = array<i32>} : memref<16x256xf32, #tpu.memory_space<vmem>>, vector<16x256xf32>,
    } else {
    }
    %c0 = arith.constant 0 : index
    %c0_1 = arith.constant 0 : index
    %3 = vector.load %arg6[%c0, %c0_1] : memref<16x256xf32, #tpu.memory_space<vmem>>, vector<16x256xf32>
    %c0_2 = arith.constant 0 : index
    %c0_3 = arith.constant 0 : index
    %4 = vector.load %arg3[%c0_2, %c0_3] : memref<16x128xbf16, #tpu.memory_space<vmem>>, vector<16x128xbf16>
    %c0_4 = arith.constant 0 : index
    %c0_5 = arith.constant 0 : index
    %5 = vector.load %arg4[%c0_4, %c0_5] : memref<128x256xbf16, #tpu.memory_space<vmem>>, vector<128x256xbf16>
    %cst = arith.constant dense<0.000000e+00> : vector<16x256xf32>
    %6 = tpu.matmul %4, %5, %cst {dimension_numbers = #tpu.dot_dimension_numbers<[1], [0], [0], [1], [0, 0, 1, 1], [], []>} : vector<16x128xbf16>, vector<128x256xbf16>, vector<16x256xf32> -> vector<16x256xf32>
    %7 = arith.addf %3, %6 : vector<16x256xf32>
    %c0_6 = arith.constant 0 : index
    %c0_7 = arith.constant 0 : index
    %8 = vector.load %arg6[%c0_6, %c0_7] : memref<16x256xf32, #tpu.memory_space<vmem>>, vector<16x256xf32>
    tpu.vector_store %arg6[%c0_6, %c0_7], %7 {strides = array<i32>} : memref<16x256xf32, #tpu.memory_space<vmem>>, vector<16x256xf32>,
    %c0_i32_8 = arith.constant 0 : i32
    %9 = arith.cmpi eq, %arg2, %c0_i32_8 : i32
    %10 = arith.extui %9 : i1 to i32
    %c0_i32_9 = arith.constant 0 : i32
    %11 = arith.cmpi ne, %10, %c0_i32_9 : i32
    scf.if %11 {
      %c0_10 = arith.constant 0 : index
      %c0_11 = arith.constant 0 : index
      %12 = vector.load %arg6[%c0_10, %c0_11] : memref<16x256xf32, #tpu.memory_space<vmem>>, vector<16x256xf32>
      %c0_12 = arith.constant 0 : index
      %c0_13 = arith.constant 0 : index
      %13 = vector.load %arg5[%c0_12, %c0_13] : memref<1x256xf32, #tpu.memory_space<vmem>>, vector<1x256xf32>
      %14 = vector.broadcast %13 : vector<1x256xf32> to vector<16x256xf32>
      %15 = arith.addf %12, %14 : vector<16x256xf32>
      %c0_14 = arith.constant 0 : index
      %c0_15 = arith.constant 0 : index
      %16 = vector.load %arg6[%c0_14, %c0_15] : memref<16x256xf32, #tpu.memory_space<vmem>>, vector<16x256xf32>
      tpu.vector_store %arg6[%c0_14, %c0_15], %15 {strides = array<i32>} : memref<16x256xf32, #tpu.memory_space<vmem>>, vector<16x256xf32>,
    } else {
    }
    return
  }
  func.func @transform_0(%arg0: i32, %arg1: i32, %arg2: i32) -> (i32, i32) {
    %c0_i32 = arith.constant 0 : i32
    return %arg0, %arg2 : i32, i32
  }
  func.func @transform_1(%arg0: i32, %arg1: i32, %arg2: i32) -> (i32, i32) {
    %c0_i32 = arith.constant 0 : i32
    return %arg2, %arg1 : i32, i32
  }
  func.func @transform_2(%arg0: i32, %arg1: i32, %arg2: i32) -> (i32, i32) {
    %c0_i32 = arith.constant 0 : i32
    %c0_i32_0 = arith.constant 0 : i32
    return %c0_i32, %arg1 : i32, i32
  }
  func.func @transform_3(%arg0: i32, %arg1: i32, %arg2: i32) -> (i32, i32) {
    %c0_i32 = arith.constant 0 : i32
    return %arg0, %arg1 : i32, i32
  }
}

module attributes {stable_mosaic.version = 11 : i64} {
  func.func @_gate_residual_kernel(%arg0: i32, %arg1: i32, %arg2: memref<1x8x256xf32, #tpu.memory_space<vmem>>, %arg3: memref<1x1x256xf32, #tpu.memory_space<vmem>>, %arg4: memref<1x8x1xf32, #tpu.memory_space<vmem>>, %arg5: memref<1x8x256xf32, #tpu.memory_space<vmem>>, %arg6: memref<1x8x256xf32, #tpu.memory_space<vmem>>) attributes {dimension_semantics = [#tpu.dimension_semantics<parallel>, #tpu.dimension_semantics<parallel>], iteration_bounds = array<i64: 2, 1>, scalar_prefetch = 0 : i64, scratch_operands = 0 : i64, tpu.core_type = #tpu.core_type<tc>, window_params = [{transform_indices = @transform_0, window_bounds = array<i64: 1, 8, 256>}, {transform_indices = @transform_1, window_bounds = array<i64: 1, 1, 256>}, {transform_indices = @transform_2, window_bounds = array<i64: 1, 8, 1>}, {transform_indices = @transform_3, window_bounds = array<i64: 1, 8, 256>}, {transform_indices = @transform_4, window_bounds = array<i64: 1, 8, 256>}]} {
    %c0 = arith.constant 0 : index
    %c0_0 = arith.constant 0 : index
    %c0_1 = arith.constant 0 : index
    %0 = vector.load %arg2[%c0, %c0_0, %c0_1] : memref<1x8x256xf32, #tpu.memory_space<vmem>>, vector<1x8x256xf32>
    %c0_2 = arith.constant 0 : index
    %c0_3 = arith.constant 0 : index
    %c0_4 = arith.constant 0 : index
    %1 = vector.load %arg3[%c0_2, %c0_3, %c0_4] : memref<1x1x256xf32, #tpu.memory_space<vmem>>, vector<1x1x256xf32>
    %2 = vector.broadcast %1 : vector<1x1x256xf32> to vector<1x8x256xf32>
    %3 = arith.mulf %0, %2 : vector<1x8x256xf32>
    %c0_5 = arith.constant 0 : index
    %c0_6 = arith.constant 0 : index
    %c0_7 = arith.constant 0 : index
    %4 = vector.load %arg4[%c0_5, %c0_6, %c0_7] : memref<1x8x1xf32, #tpu.memory_space<vmem>>, vector<1x8x1xf32>
    %5 = vector.broadcast %4 : vector<1x8x1xf32> to vector<1x8x256xf32>
    %6 = arith.mulf %3, %5 : vector<1x8x256xf32>
    %c0_8 = arith.constant 0 : index
    %c0_9 = arith.constant 0 : index
    %c0_10 = arith.constant 0 : index
    %7 = vector.load %arg5[%c0_8, %c0_9, %c0_10] : memref<1x8x256xf32, #tpu.memory_space<vmem>>, vector<1x8x256xf32>
    %8 = arith.addf %6, %7 : vector<1x8x256xf32>
    %cst = arith.constant 0.000000e+00 : f32
    %9 = vector.broadcast %cst : f32 to vector<1x8x256xf32>
    %10 = arith.maximumf %8, %9 : vector<1x8x256xf32>
    %c0_11 = arith.constant 0 : index
    %c0_12 = arith.constant 0 : index
    %c0_13 = arith.constant 0 : index
    %11 = vector.load %arg6[%c0_11, %c0_12, %c0_13] : memref<1x8x256xf32, #tpu.memory_space<vmem>>, vector<1x8x256xf32>
    tpu.vector_store %arg6[%c0_11, %c0_12, %c0_13], %10 {strides = array<i32>} : memref<1x8x256xf32, #tpu.memory_space<vmem>>, vector<1x8x256xf32>,
    return
  }
  func.func @transform_0(%arg0: i32, %arg1: i32) -> (i32, i32, i32) {
    %c0_i32 = arith.constant 0 : i32
    %c0_i32_0 = arith.constant 0 : i32
    return %arg0, %arg1, %c0_i32 : i32, i32, i32
  }
  func.func @transform_1(%arg0: i32, %arg1: i32) -> (i32, i32, i32) {
    %c0_i32 = arith.constant 0 : i32
    %c0_i32_0 = arith.constant 0 : i32
    %c0_i32_1 = arith.constant 0 : i32
    return %arg0, %c0_i32, %c0_i32_0 : i32, i32, i32
  }
  func.func @transform_2(%arg0: i32, %arg1: i32) -> (i32, i32, i32) {
    %c0_i32 = arith.constant 0 : i32
    %c0_i32_0 = arith.constant 0 : i32
    return %arg0, %arg1, %c0_i32 : i32, i32, i32
  }
  func.func @transform_3(%arg0: i32, %arg1: i32) -> (i32, i32, i32) {
    %c0_i32 = arith.constant 0 : i32
    %c0_i32_0 = arith.constant 0 : i32
    return %arg0, %arg1, %c0_i32 : i32, i32, i32
  }
  func.func @transform_4(%arg0: i32, %arg1: i32) -> (i32, i32, i32) {
    %c0_i32 = arith.constant 0 : i32
    %c0_i32_0 = arith.constant 0 : i32
    return %arg0, %arg1, %c0_i32 : i32, i32, i32
  }
}

module attributes {stable_mosaic.version = 11 : i64} {
  func.func @_matmul_bias_kernel(%arg0: i32, %arg1: i32, %arg2: i32, %arg3: memref<16x256xbf16, #tpu.memory_space<vmem>>, %arg4: memref<256x256xbf16, #tpu.memory_space<vmem>>, %arg5: memref<1x256xf32, #tpu.memory_space<vmem>>, %arg6: memref<16x256xf32, #tpu.memory_space<vmem>>) attributes {dimension_semantics = [#tpu.dimension_semantics<parallel>, #tpu.dimension_semantics<parallel>, #tpu.dimension_semantics<arbitrary>], iteration_bounds = array<i64: 1, 1, 9>, scalar_prefetch = 0 : i64, scratch_operands = 0 : i64, tpu.core_type = #tpu.core_type<tc>, window_params = [{transform_indices = @transform_0, window_bounds = array<i64: 16, 256>}, {transform_indices = @transform_1, window_bounds = array<i64: 256, 256>}, {transform_indices = @transform_2, window_bounds = array<i64: 1, 256>}, {transform_indices = @transform_3, window_bounds = array<i64: 16, 256>}]} {
    %c0_i32 = arith.constant 0 : i32
    %0 = arith.cmpi eq, %arg2, %c0_i32 : i32
    %1 = arith.extui %0 : i1 to i32
    %c0_i32_0 = arith.constant 0 : i32
    %2 = arith.cmpi ne, %1, %c0_i32_0 : i32
    scf.if %2 {
      %cst_9 = arith.constant 0.000000e+00 : f32
      %12 = vector.broadcast %cst_9 : f32 to vector<16x256xf32>
      %c0_10 = arith.constant 0 : index
      %c0_11 = arith.constant 0 : index
      %13 = vector.load %arg6[%c0_10, %c0_11] : memref<16x256xf32, #tpu.memory_space<vmem>>, vector<16x256xf32>
      tpu.vector_store %arg6[%c0_10, %c0_11], %12 {strides = array<i32>} : memref<16x256xf32, #tpu.memory_space<vmem>>, vector<16x256xf32>,
    } else {
    }
    %c0 = arith.constant 0 : index
    %c0_1 = arith.constant 0 : index
    %3 = vector.load %arg6[%c0, %c0_1] : memref<16x256xf32, #tpu.memory_space<vmem>>, vector<16x256xf32>
    %c0_2 = arith.constant 0 : index
    %c0_3 = arith.constant 0 : index
    %4 = vector.load %arg3[%c0_2, %c0_3] : memref<16x256xbf16, #tpu.memory_space<vmem>>, vector<16x256xbf16>
    %c0_4 = arith.constant 0 : index
    %c0_5 = arith.constant 0 : index
    %5 = vector.load %arg4[%c0_4, %c0_5] : memref<256x256xbf16, #tpu.memory_space<vmem>>, vector<256x256xbf16>
    %cst = arith.constant dense<0.000000e+00> : vector<16x256xf32>
    %6 = tpu.matmul %4, %5, %cst {dimension_numbers = #tpu.dot_dimension_numbers<[1], [0], [0], [1], [0, 0, 1, 1], [], []>} : vector<16x256xbf16>, vector<256x256xbf16>, vector<16x256xf32> -> vector<16x256xf32>
    %7 = arith.addf %3, %6 : vector<16x256xf32>
    %c0_6 = arith.constant 0 : index
    %c0_7 = arith.constant 0 : index
    %8 = vector.load %arg6[%c0_6, %c0_7] : memref<16x256xf32, #tpu.memory_space<vmem>>, vector<16x256xf32>
    tpu.vector_store %arg6[%c0_6, %c0_7], %7 {strides = array<i32>} : memref<16x256xf32, #tpu.memory_space<vmem>>, vector<16x256xf32>,
    %c8_i32 = arith.constant 8 : i32
    %9 = arith.cmpi eq, %arg2, %c8_i32 : i32
    %10 = arith.extui %9 : i1 to i32
    %c0_i32_8 = arith.constant 0 : i32
    %11 = arith.cmpi ne, %10, %c0_i32_8 : i32
    scf.if %11 {
      %c0_9 = arith.constant 0 : index
      %c0_10 = arith.constant 0 : index
      %12 = vector.load %arg6[%c0_9, %c0_10] : memref<16x256xf32, #tpu.memory_space<vmem>>, vector<16x256xf32>
      %c0_11 = arith.constant 0 : index
      %c0_12 = arith.constant 0 : index
      %13 = vector.load %arg5[%c0_11, %c0_12] : memref<1x256xf32, #tpu.memory_space<vmem>>, vector<1x256xf32>
      %14 = vector.broadcast %13 : vector<1x256xf32> to vector<16x256xf32>
      %15 = arith.addf %12, %14 : vector<16x256xf32>
      %cst_13 = arith.constant 0.000000e+00 : f32
      %16 = vector.broadcast %cst_13 : f32 to vector<16x256xf32>
      %17 = arith.maximumf %15, %16 : vector<16x256xf32>
      %c0_14 = arith.constant 0 : index
      %c0_15 = arith.constant 0 : index
      %18 = vector.load %arg6[%c0_14, %c0_15] : memref<16x256xf32, #tpu.memory_space<vmem>>, vector<16x256xf32>
      tpu.vector_store %arg6[%c0_14, %c0_15], %17 {strides = array<i32>} : memref<16x256xf32, #tpu.memory_space<vmem>>, vector<16x256xf32>,
    } else {
    }
    return
  }
  func.func @transform_0(%arg0: i32, %arg1: i32, %arg2: i32) -> (i32, i32) {
    %c0_i32 = arith.constant 0 : i32
    return %arg0, %arg2 : i32, i32
  }
  func.func @transform_1(%arg0: i32, %arg1: i32, %arg2: i32) -> (i32, i32) {
    %c0_i32 = arith.constant 0 : i32
    return %arg2, %arg1 : i32, i32
  }
  func.func @transform_2(%arg0: i32, %arg1: i32, %arg2: i32) -> (i32, i32) {
    %c0_i32 = arith.constant 0 : i32
    %c0_i32_0 = arith.constant 0 : i32
    return %c0_i32, %arg1 : i32, i32
  }
  func.func @transform_3(%arg0: i32, %arg1: i32, %arg2: i32) -> (i32, i32) {
    %c0_i32 = arith.constant 0 : i32
    return %arg0, %arg1 : i32, i32
  }
}

module attributes {stable_mosaic.version = 11 : i64} {
  func.func @_matmul_bias_kernel(%arg0: i32, %arg1: i32, %arg2: i32, %arg3: memref<16x256xbf16, #tpu.memory_space<vmem>>, %arg4: memref<256x256xbf16, #tpu.memory_space<vmem>>, %arg5: memref<1x256xf32, #tpu.memory_space<vmem>>, %arg6: memref<16x256xf32, #tpu.memory_space<vmem>>) attributes {dimension_semantics = [#tpu.dimension_semantics<parallel>, #tpu.dimension_semantics<parallel>, #tpu.dimension_semantics<arbitrary>], iteration_bounds = array<i64: 1, 2, 9>, scalar_prefetch = 0 : i64, scratch_operands = 0 : i64, tpu.core_type = #tpu.core_type<tc>, window_params = [{transform_indices = @transform_0, window_bounds = array<i64: 16, 256>}, {transform_indices = @transform_1, window_bounds = array<i64: 256, 256>}, {transform_indices = @transform_2, window_bounds = array<i64: 1, 256>}, {transform_indices = @transform_3, window_bounds = array<i64: 16, 256>}]} {
    %c0_i32 = arith.constant 0 : i32
    %0 = arith.cmpi eq, %arg2, %c0_i32 : i32
    %1 = arith.extui %0 : i1 to i32
    %c0_i32_0 = arith.constant 0 : i32
    %2 = arith.cmpi ne, %1, %c0_i32_0 : i32
    scf.if %2 {
      %cst_9 = arith.constant 0.000000e+00 : f32
      %12 = vector.broadcast %cst_9 : f32 to vector<16x256xf32>
      %c0_10 = arith.constant 0 : index
      %c0_11 = arith.constant 0 : index
      %13 = vector.load %arg6[%c0_10, %c0_11] : memref<16x256xf32, #tpu.memory_space<vmem>>, vector<16x256xf32>
      tpu.vector_store %arg6[%c0_10, %c0_11], %12 {strides = array<i32>} : memref<16x256xf32, #tpu.memory_space<vmem>>, vector<16x256xf32>,
    } else {
    }
    %c0 = arith.constant 0 : index
    %c0_1 = arith.constant 0 : index
    %3 = vector.load %arg6[%c0, %c0_1] : memref<16x256xf32, #tpu.memory_space<vmem>>, vector<16x256xf32>
    %c0_2 = arith.constant 0 : index
    %c0_3 = arith.constant 0 : index
    %4 = vector.load %arg3[%c0_2, %c0_3] : memref<16x256xbf16, #tpu.memory_space<vmem>>, vector<16x256xbf16>
    %c0_4 = arith.constant 0 : index
    %c0_5 = arith.constant 0 : index
    %5 = vector.load %arg4[%c0_4, %c0_5] : memref<256x256xbf16, #tpu.memory_space<vmem>>, vector<256x256xbf16>
    %cst = arith.constant dense<0.000000e+00> : vector<16x256xf32>
    %6 = tpu.matmul %4, %5, %cst {dimension_numbers = #tpu.dot_dimension_numbers<[1], [0], [0], [1], [0, 0, 1, 1], [], []>} : vector<16x256xbf16>, vector<256x256xbf16>, vector<16x256xf32> -> vector<16x256xf32>
    %7 = arith.addf %3, %6 : vector<16x256xf32>
    %c0_6 = arith.constant 0 : index
    %c0_7 = arith.constant 0 : index
    %8 = vector.load %arg6[%c0_6, %c0_7] : memref<16x256xf32, #tpu.memory_space<vmem>>, vector<16x256xf32>
    tpu.vector_store %arg6[%c0_6, %c0_7], %7 {strides = array<i32>} : memref<16x256xf32, #tpu.memory_space<vmem>>, vector<16x256xf32>,
    %c8_i32 = arith.constant 8 : i32
    %9 = arith.cmpi eq, %arg2, %c8_i32 : i32
    %10 = arith.extui %9 : i1 to i32
    %c0_i32_8 = arith.constant 0 : i32
    %11 = arith.cmpi ne, %10, %c0_i32_8 : i32
    scf.if %11 {
      %c0_9 = arith.constant 0 : index
      %c0_10 = arith.constant 0 : index
      %12 = vector.load %arg6[%c0_9, %c0_10] : memref<16x256xf32, #tpu.memory_space<vmem>>, vector<16x256xf32>
      %c0_11 = arith.constant 0 : index
      %c0_12 = arith.constant 0 : index
      %13 = vector.load %arg5[%c0_11, %c0_12] : memref<1x256xf32, #tpu.memory_space<vmem>>, vector<1x256xf32>
      %14 = vector.broadcast %13 : vector<1x256xf32> to vector<16x256xf32>
      %15 = arith.addf %12, %14 : vector<16x256xf32>
      %cst_13 = arith.constant 0.000000e+00 : f32
      %16 = vector.broadcast %cst_13 : f32 to vector<16x256xf32>
      %17 = arith.maximumf %15, %16 : vector<16x256xf32>
      %c0_14 = arith.constant 0 : index
      %c0_15 = arith.constant 0 : index
      %18 = vector.load %arg6[%c0_14, %c0_15] : memref<16x256xf32, #tpu.memory_space<vmem>>, vector<16x256xf32>
      tpu.vector_store %arg6[%c0_14, %c0_15], %17 {strides = array<i32>} : memref<16x256xf32, #tpu.memory_space<vmem>>, vector<16x256xf32>,
    } else {
    }
    return
  }
  func.func @transform_0(%arg0: i32, %arg1: i32, %arg2: i32) -> (i32, i32) {
    %c0_i32 = arith.constant 0 : i32
    return %arg0, %arg2 : i32, i32
  }
  func.func @transform_1(%arg0: i32, %arg1: i32, %arg2: i32) -> (i32, i32) {
    %c0_i32 = arith.constant 0 : i32
    return %arg2, %arg1 : i32, i32
  }
  func.func @transform_2(%arg0: i32, %arg1: i32, %arg2: i32) -> (i32, i32) {
    %c0_i32 = arith.constant 0 : i32
    %c0_i32_0 = arith.constant 0 : i32
    return %c0_i32, %arg1 : i32, i32
  }
  func.func @transform_3(%arg0: i32, %arg1: i32, %arg2: i32) -> (i32, i32) {
    %c0_i32 = arith.constant 0 : i32
    return %arg0, %arg1 : i32, i32
  }
}

module attributes {stable_mosaic.version = 11 : i64} {
  func.func @_matmul_bias_kernel(%arg0: i32, %arg1: i32, %arg2: i32, %arg3: memref<16x256xbf16, #tpu.memory_space<vmem>>, %arg4: memref<256x256xbf16, #tpu.memory_space<vmem>>, %arg5: memref<1x256xf32, #tpu.memory_space<vmem>>, %arg6: memref<16x256xf32, #tpu.memory_space<vmem>>) attributes {dimension_semantics = [#tpu.dimension_semantics<parallel>, #tpu.dimension_semantics<parallel>, #tpu.dimension_semantics<arbitrary>], iteration_bounds = array<i64: 1, 2, 18>, scalar_prefetch = 0 : i64, scratch_operands = 0 : i64, tpu.core_type = #tpu.core_type<tc>, window_params = [{transform_indices = @transform_0, window_bounds = array<i64: 16, 256>}, {transform_indices = @transform_1, window_bounds = array<i64: 256, 256>}, {transform_indices = @transform_2, window_bounds = array<i64: 1, 256>}, {transform_indices = @transform_3, window_bounds = array<i64: 16, 256>}]} {
    %c0_i32 = arith.constant 0 : i32
    %0 = arith.cmpi eq, %arg2, %c0_i32 : i32
    %1 = arith.extui %0 : i1 to i32
    %c0_i32_0 = arith.constant 0 : i32
    %2 = arith.cmpi ne, %1, %c0_i32_0 : i32
    scf.if %2 {
      %cst_9 = arith.constant 0.000000e+00 : f32
      %12 = vector.broadcast %cst_9 : f32 to vector<16x256xf32>
      %c0_10 = arith.constant 0 : index
      %c0_11 = arith.constant 0 : index
      %13 = vector.load %arg6[%c0_10, %c0_11] : memref<16x256xf32, #tpu.memory_space<vmem>>, vector<16x256xf32>
      tpu.vector_store %arg6[%c0_10, %c0_11], %12 {strides = array<i32>} : memref<16x256xf32, #tpu.memory_space<vmem>>, vector<16x256xf32>,
    } else {
    }
    %c0 = arith.constant 0 : index
    %c0_1 = arith.constant 0 : index
    %3 = vector.load %arg6[%c0, %c0_1] : memref<16x256xf32, #tpu.memory_space<vmem>>, vector<16x256xf32>
    %c0_2 = arith.constant 0 : index
    %c0_3 = arith.constant 0 : index
    %4 = vector.load %arg3[%c0_2, %c0_3] : memref<16x256xbf16, #tpu.memory_space<vmem>>, vector<16x256xbf16>
    %c0_4 = arith.constant 0 : index
    %c0_5 = arith.constant 0 : index
    %5 = vector.load %arg4[%c0_4, %c0_5] : memref<256x256xbf16, #tpu.memory_space<vmem>>, vector<256x256xbf16>
    %cst = arith.constant dense<0.000000e+00> : vector<16x256xf32>
    %6 = tpu.matmul %4, %5, %cst {dimension_numbers = #tpu.dot_dimension_numbers<[1], [0], [0], [1], [0, 0, 1, 1], [], []>} : vector<16x256xbf16>, vector<256x256xbf16>, vector<16x256xf32> -> vector<16x256xf32>
    %7 = arith.addf %3, %6 : vector<16x256xf32>
    %c0_6 = arith.constant 0 : index
    %c0_7 = arith.constant 0 : index
    %8 = vector.load %arg6[%c0_6, %c0_7] : memref<16x256xf32, #tpu.memory_space<vmem>>, vector<16x256xf32>
    tpu.vector_store %arg6[%c0_6, %c0_7], %7 {strides = array<i32>} : memref<16x256xf32, #tpu.memory_space<vmem>>, vector<16x256xf32>,
    %c17_i32 = arith.constant 17 : i32
    %9 = arith.cmpi eq, %arg2, %c17_i32 : i32
    %10 = arith.extui %9 : i1 to i32
    %c0_i32_8 = arith.constant 0 : i32
    %11 = arith.cmpi ne, %10, %c0_i32_8 : i32
    scf.if %11 {
      %c0_9 = arith.constant 0 : index
      %c0_10 = arith.constant 0 : index
      %12 = vector.load %arg6[%c0_9, %c0_10] : memref<16x256xf32, #tpu.memory_space<vmem>>, vector<16x256xf32>
      %c0_11 = arith.constant 0 : index
      %c0_12 = arith.constant 0 : index
      %13 = vector.load %arg5[%c0_11, %c0_12] : memref<1x256xf32, #tpu.memory_space<vmem>>, vector<1x256xf32>
      %14 = vector.broadcast %13 : vector<1x256xf32> to vector<16x256xf32>
      %15 = arith.addf %12, %14 : vector<16x256xf32>
      %c0_13 = arith.constant 0 : index
      %c0_14 = arith.constant 0 : index
      %16 = vector.load %arg6[%c0_13, %c0_14] : memref<16x256xf32, #tpu.memory_space<vmem>>, vector<16x256xf32>
      tpu.vector_store %arg6[%c0_13, %c0_14], %15 {strides = array<i32>} : memref<16x256xf32, #tpu.memory_space<vmem>>, vector<16x256xf32>,
    } else {
    }
    return
  }
  func.func @transform_0(%arg0: i32, %arg1: i32, %arg2: i32) -> (i32, i32) {
    %c0_i32 = arith.constant 0 : i32
    return %arg0, %arg2 : i32, i32
  }
  func.func @transform_1(%arg0: i32, %arg1: i32, %arg2: i32) -> (i32, i32) {
    %c0_i32 = arith.constant 0 : i32
    return %arg2, %arg1 : i32, i32
  }
  func.func @transform_2(%arg0: i32, %arg1: i32, %arg2: i32) -> (i32, i32) {
    %c0_i32 = arith.constant 0 : i32
    %c0_i32_0 = arith.constant 0 : i32
    return %c0_i32, %arg1 : i32, i32
  }
  func.func @transform_3(%arg0: i32, %arg1: i32, %arg2: i32) -> (i32, i32) {
    %c0_i32 = arith.constant 0 : i32
    return %arg0, %arg1 : i32, i32
  }
}

module attributes {stable_mosaic.version = 11 : i64} {
  func.func @_ca_reduce_kernel(%arg0: i32, %arg1: i32, %arg2: memref<1x8x512xf32, #tpu.memory_space<vmem>>, %arg3: memref<1x1x512xf32, #tpu.memory_space<vmem>>, %arg4: memref<1x8x2xf32, #tpu.memory_space<vmem>>) attributes {dimension_semantics = [#tpu.dimension_semantics<parallel>, #tpu.dimension_semantics<parallel>], iteration_bounds = array<i64: 2, 1>, scalar_prefetch = 0 : i64, scratch_operands = 0 : i64, tpu.core_type = #tpu.core_type<tc>, window_params = [{transform_indices = @transform_0, window_bounds = array<i64: 1, 8, 512>}, {transform_indices = @transform_1, window_bounds = array<i64: 1, 1, 512>}, {transform_indices = @transform_2, window_bounds = array<i64: 1, 8, 2>}]} {
    %c0 = arith.constant 0 : index
    %c0_0 = arith.constant 0 : index
    %c0_1 = arith.constant 0 : index
    %0 = vector.load %arg2[%c0, %c0_0, %c0_1] : memref<1x8x512xf32, #tpu.memory_space<vmem>>, vector<1x8x512xf32>
    %c0_2 = arith.constant 0 : index
    %c0_3 = arith.constant 0 : index
    %c0_4 = arith.constant 0 : index
    %1 = vector.load %arg3[%c0_2, %c0_3, %c0_4] : memref<1x1x512xf32, #tpu.memory_space<vmem>>, vector<1x1x512xf32>
    %2 = vector.broadcast %1 : vector<1x1x512xf32> to vector<1x8x512xf32>
    %3 = arith.mulf %0, %2 : vector<1x8x512xf32>
    %cst = arith.constant dense<0.000000e+00> : vector<1x8xf32>
    %4 = vector.multi_reduction <add>, %3, %cst [2] : vector<1x8x512xf32> to vector<1x8xf32>
    %5 = vector.shape_cast %4 : vector<1x8xf32> to vector<1x8x1xf32>
    %cst_5 = arith.constant 5.120000e+02 : f32
    %6 = vector.broadcast %cst_5 : f32 to vector<1x8x1xf32>
    %7 = arith.divf %5, %6 : vector<1x8x1xf32>
    %cst_6 = arith.constant dense<0xFF800000> : vector<1x8xf32>
    %8 = vector.multi_reduction <maximumf>, %3, %cst_6 [2] : vector<1x8x512xf32> to vector<1x8xf32>
    %9 = vector.shape_cast %8 : vector<1x8xf32> to vector<1x8x1xf32>
    %10 = tpu.concatenate %7, %9 in 2 : vector<1x8x1xf32>, vector<1x8x1xf32> -> vector<1x8x2xf32>
    %c0_7 = arith.constant 0 : index
    %c0_8 = arith.constant 0 : index
    %c0_9 = arith.constant 0 : index
    %11 = vector.load %arg4[%c0_7, %c0_8, %c0_9] : memref<1x8x2xf32, #tpu.memory_space<vmem>>, vector<1x8x2xf32>
    tpu.vector_store %arg4[%c0_7, %c0_8, %c0_9], %10 {strides = array<i32>} : memref<1x8x2xf32, #tpu.memory_space<vmem>>, vector<1x8x2xf32>,
    return
  }
  func.func @transform_0(%arg0: i32, %arg1: i32) -> (i32, i32, i32) {
    %c0_i32 = arith.constant 0 : i32
    %c0_i32_0 = arith.constant 0 : i32
    return %arg0, %arg1, %c0_i32 : i32, i32, i32
  }
  func.func @transform_1(%arg0: i32, %arg1: i32) -> (i32, i32, i32) {
    %c0_i32 = arith.constant 0 : i32
    %c0_i32_0 = arith.constant 0 : i32
    %c0_i32_1 = arith.constant 0 : i32
    return %arg0, %c0_i32, %c0_i32_0 : i32, i32, i32
  }
  func.func @transform_2(%arg0: i32, %arg1: i32) -> (i32, i32, i32) {
    %c0_i32 = arith.constant 0 : i32
    %c0_i32_0 = arith.constant 0 : i32
    return %arg0, %arg1, %c0_i32 : i32, i32, i32
  }
}

module attributes {stable_mosaic.version = 11 : i64} {
  func.func @_matmul_bias_kernel(%arg0: i32, %arg1: i32, %arg2: i32, %arg3: memref<16x256xbf16, #tpu.memory_space<vmem>>, %arg4: memref<256x256xbf16, #tpu.memory_space<vmem>>, %arg5: memref<1x256xf32, #tpu.memory_space<vmem>>, %arg6: memref<16x256xf32, #tpu.memory_space<vmem>>) attributes {dimension_semantics = [#tpu.dimension_semantics<parallel>, #tpu.dimension_semantics<parallel>, #tpu.dimension_semantics<arbitrary>], iteration_bounds = array<i64: 1, 2, 1>, scalar_prefetch = 0 : i64, scratch_operands = 0 : i64, tpu.core_type = #tpu.core_type<tc>, window_params = [{transform_indices = @transform_0, window_bounds = array<i64: 16, 256>}, {transform_indices = @transform_1, window_bounds = array<i64: 256, 256>}, {transform_indices = @transform_2, window_bounds = array<i64: 1, 256>}, {transform_indices = @transform_3, window_bounds = array<i64: 16, 256>}]} {
    %c0_i32 = arith.constant 0 : i32
    %0 = arith.cmpi eq, %arg2, %c0_i32 : i32
    %1 = arith.extui %0 : i1 to i32
    %c0_i32_0 = arith.constant 0 : i32
    %2 = arith.cmpi ne, %1, %c0_i32_0 : i32
    scf.if %2 {
      %cst_10 = arith.constant 0.000000e+00 : f32
      %12 = vector.broadcast %cst_10 : f32 to vector<16x256xf32>
      %c0_11 = arith.constant 0 : index
      %c0_12 = arith.constant 0 : index
      %13 = vector.load %arg6[%c0_11, %c0_12] : memref<16x256xf32, #tpu.memory_space<vmem>>, vector<16x256xf32>
      tpu.vector_store %arg6[%c0_11, %c0_12], %12 {strides = array<i32>} : memref<16x256xf32, #tpu.memory_space<vmem>>, vector<16x256xf32>,
    } else {
    }
    %c0 = arith.constant 0 : index
    %c0_1 = arith.constant 0 : index
    %3 = vector.load %arg6[%c0, %c0_1] : memref<16x256xf32, #tpu.memory_space<vmem>>, vector<16x256xf32>
    %c0_2 = arith.constant 0 : index
    %c0_3 = arith.constant 0 : index
    %4 = vector.load %arg3[%c0_2, %c0_3] : memref<16x256xbf16, #tpu.memory_space<vmem>>, vector<16x256xbf16>
    %c0_4 = arith.constant 0 : index
    %c0_5 = arith.constant 0 : index
    %5 = vector.load %arg4[%c0_4, %c0_5] : memref<256x256xbf16, #tpu.memory_space<vmem>>, vector<256x256xbf16>
    %cst = arith.constant dense<0.000000e+00> : vector<16x256xf32>
    %6 = tpu.matmul %4, %5, %cst {dimension_numbers = #tpu.dot_dimension_numbers<[1], [0], [0], [1], [0, 0, 1, 1], [], []>} : vector<16x256xbf16>, vector<256x256xbf16>, vector<16x256xf32> -> vector<16x256xf32>
    %7 = arith.addf %3, %6 : vector<16x256xf32>
    %c0_6 = arith.constant 0 : index
    %c0_7 = arith.constant 0 : index
    %8 = vector.load %arg6[%c0_6, %c0_7] : memref<16x256xf32, #tpu.memory_space<vmem>>, vector<16x256xf32>
    tpu.vector_store %arg6[%c0_6, %c0_7], %7 {strides = array<i32>} : memref<16x256xf32, #tpu.memory_space<vmem>>, vector<16x256xf32>,
    %c0_i32_8 = arith.constant 0 : i32
    %9 = arith.cmpi eq, %arg2, %c0_i32_8 : i32
    %10 = arith.extui %9 : i1 to i32
    %c0_i32_9 = arith.constant 0 : i32
    %11 = arith.cmpi ne, %10, %c0_i32_9 : i32
    scf.if %11 {
      %c0_10 = arith.constant 0 : index
      %c0_11 = arith.constant 0 : index
      %12 = vector.load %arg6[%c0_10, %c0_11] : memref<16x256xf32, #tpu.memory_space<vmem>>, vector<16x256xf32>
      %c0_12 = arith.constant 0 : index
      %c0_13 = arith.constant 0 : index
      %13 = vector.load %arg5[%c0_12, %c0_13] : memref<1x256xf32, #tpu.memory_space<vmem>>, vector<1x256xf32>
      %14 = vector.broadcast %13 : vector<1x256xf32> to vector<16x256xf32>
      %15 = arith.addf %12, %14 : vector<16x256xf32>
      %c0_14 = arith.constant 0 : index
      %c0_15 = arith.constant 0 : index
      %16 = vector.load %arg6[%c0_14, %c0_15] : memref<16x256xf32, #tpu.memory_space<vmem>>, vector<16x256xf32>
      tpu.vector_store %arg6[%c0_14, %c0_15], %15 {strides = array<i32>} : memref<16x256xf32, #tpu.memory_space<vmem>>, vector<16x256xf32>,
    } else {
    }
    return
  }
  func.func @transform_0(%arg0: i32, %arg1: i32, %arg2: i32) -> (i32, i32) {
    %c0_i32 = arith.constant 0 : i32
    return %arg0, %arg2 : i32, i32
  }
  func.func @transform_1(%arg0: i32, %arg1: i32, %arg2: i32) -> (i32, i32) {
    %c0_i32 = arith.constant 0 : i32
    return %arg2, %arg1 : i32, i32
  }
  func.func @transform_2(%arg0: i32, %arg1: i32, %arg2: i32) -> (i32, i32) {
    %c0_i32 = arith.constant 0 : i32
    %c0_i32_0 = arith.constant 0 : i32
    return %c0_i32, %arg1 : i32, i32
  }
  func.func @transform_3(%arg0: i32, %arg1: i32, %arg2: i32) -> (i32, i32) {
    %c0_i32 = arith.constant 0 : i32
    return %arg0, %arg1 : i32, i32
  }
}

module attributes {stable_mosaic.version = 11 : i64} {
  func.func @_gate_residual_kernel(%arg0: i32, %arg1: i32, %arg2: memref<1x8x512xf32, #tpu.memory_space<vmem>>, %arg3: memref<1x1x512xf32, #tpu.memory_space<vmem>>, %arg4: memref<1x8x1xf32, #tpu.memory_space<vmem>>, %arg5: memref<1x8x512xf32, #tpu.memory_space<vmem>>, %arg6: memref<1x8x512xf32, #tpu.memory_space<vmem>>) attributes {dimension_semantics = [#tpu.dimension_semantics<parallel>, #tpu.dimension_semantics<parallel>], iteration_bounds = array<i64: 2, 1>, scalar_prefetch = 0 : i64, scratch_operands = 0 : i64, tpu.core_type = #tpu.core_type<tc>, window_params = [{transform_indices = @transform_0, window_bounds = array<i64: 1, 8, 512>}, {transform_indices = @transform_1, window_bounds = array<i64: 1, 1, 512>}, {transform_indices = @transform_2, window_bounds = array<i64: 1, 8, 1>}, {transform_indices = @transform_3, window_bounds = array<i64: 1, 8, 512>}, {transform_indices = @transform_4, window_bounds = array<i64: 1, 8, 512>}]} {
    %c0 = arith.constant 0 : index
    %c0_0 = arith.constant 0 : index
    %c0_1 = arith.constant 0 : index
    %0 = vector.load %arg2[%c0, %c0_0, %c0_1] : memref<1x8x512xf32, #tpu.memory_space<vmem>>, vector<1x8x512xf32>
    %c0_2 = arith.constant 0 : index
    %c0_3 = arith.constant 0 : index
    %c0_4 = arith.constant 0 : index
    %1 = vector.load %arg3[%c0_2, %c0_3, %c0_4] : memref<1x1x512xf32, #tpu.memory_space<vmem>>, vector<1x1x512xf32>
    %2 = vector.broadcast %1 : vector<1x1x512xf32> to vector<1x8x512xf32>
    %3 = arith.mulf %0, %2 : vector<1x8x512xf32>
    %c0_5 = arith.constant 0 : index
    %c0_6 = arith.constant 0 : index
    %c0_7 = arith.constant 0 : index
    %4 = vector.load %arg4[%c0_5, %c0_6, %c0_7] : memref<1x8x1xf32, #tpu.memory_space<vmem>>, vector<1x8x1xf32>
    %5 = vector.broadcast %4 : vector<1x8x1xf32> to vector<1x8x512xf32>
    %6 = arith.mulf %3, %5 : vector<1x8x512xf32>
    %c0_8 = arith.constant 0 : index
    %c0_9 = arith.constant 0 : index
    %c0_10 = arith.constant 0 : index
    %7 = vector.load %arg5[%c0_8, %c0_9, %c0_10] : memref<1x8x512xf32, #tpu.memory_space<vmem>>, vector<1x8x512xf32>
    %8 = arith.addf %6, %7 : vector<1x8x512xf32>
    %cst = arith.constant 0.000000e+00 : f32
    %9 = vector.broadcast %cst : f32 to vector<1x8x512xf32>
    %10 = arith.maximumf %8, %9 : vector<1x8x512xf32>
    %c0_11 = arith.constant 0 : index
    %c0_12 = arith.constant 0 : index
    %c0_13 = arith.constant 0 : index
    %11 = vector.load %arg6[%c0_11, %c0_12, %c0_13] : memref<1x8x512xf32, #tpu.memory_space<vmem>>, vector<1x8x512xf32>
    tpu.vector_store %arg6[%c0_11, %c0_12, %c0_13], %10 {strides = array<i32>} : memref<1x8x512xf32, #tpu.memory_space<vmem>>, vector<1x8x512xf32>,
    return
  }
  func.func @transform_0(%arg0: i32, %arg1: i32) -> (i32, i32, i32) {
    %c0_i32 = arith.constant 0 : i32
    %c0_i32_0 = arith.constant 0 : i32
    return %arg0, %arg1, %c0_i32 : i32, i32, i32
  }
  func.func @transform_1(%arg0: i32, %arg1: i32) -> (i32, i32, i32) {
    %c0_i32 = arith.constant 0 : i32
    %c0_i32_0 = arith.constant 0 : i32
    %c0_i32_1 = arith.constant 0 : i32
    return %arg0, %c0_i32, %c0_i32_0 : i32, i32, i32
  }
  func.func @transform_2(%arg0: i32, %arg1: i32) -> (i32, i32, i32) {
    %c0_i32 = arith.constant 0 : i32
    %c0_i32_0 = arith.constant 0 : i32
    return %arg0, %arg1, %c0_i32 : i32, i32, i32
  }
  func.func @transform_3(%arg0: i32, %arg1: i32) -> (i32, i32, i32) {
    %c0_i32 = arith.constant 0 : i32
    %c0_i32_0 = arith.constant 0 : i32
    return %arg0, %arg1, %c0_i32 : i32, i32, i32
  }
  func.func @transform_4(%arg0: i32, %arg1: i32) -> (i32, i32, i32) {
    %c0_i32 = arith.constant 0 : i32
    %c0_i32_0 = arith.constant 0 : i32
    return %arg0, %arg1, %c0_i32 : i32, i32, i32
  }
}

module attributes {stable_mosaic.version = 11 : i64} {
  func.func @_matmul_bias_kernel(%arg0: i32, %arg1: i32, %arg2: i32, %arg3: memref<16x256xbf16, #tpu.memory_space<vmem>>, %arg4: memref<256x256xbf16, #tpu.memory_space<vmem>>, %arg5: memref<1x256xf32, #tpu.memory_space<vmem>>, %arg6: memref<16x256xf32, #tpu.memory_space<vmem>>) attributes {dimension_semantics = [#tpu.dimension_semantics<parallel>, #tpu.dimension_semantics<parallel>, #tpu.dimension_semantics<arbitrary>], iteration_bounds = array<i64: 1, 2, 18>, scalar_prefetch = 0 : i64, scratch_operands = 0 : i64, tpu.core_type = #tpu.core_type<tc>, window_params = [{transform_indices = @transform_0, window_bounds = array<i64: 16, 256>}, {transform_indices = @transform_1, window_bounds = array<i64: 256, 256>}, {transform_indices = @transform_2, window_bounds = array<i64: 1, 256>}, {transform_indices = @transform_3, window_bounds = array<i64: 16, 256>}]} {
    %c0_i32 = arith.constant 0 : i32
    %0 = arith.cmpi eq, %arg2, %c0_i32 : i32
    %1 = arith.extui %0 : i1 to i32
    %c0_i32_0 = arith.constant 0 : i32
    %2 = arith.cmpi ne, %1, %c0_i32_0 : i32
    scf.if %2 {
      %cst_9 = arith.constant 0.000000e+00 : f32
      %12 = vector.broadcast %cst_9 : f32 to vector<16x256xf32>
      %c0_10 = arith.constant 0 : index
      %c0_11 = arith.constant 0 : index
      %13 = vector.load %arg6[%c0_10, %c0_11] : memref<16x256xf32, #tpu.memory_space<vmem>>, vector<16x256xf32>
      tpu.vector_store %arg6[%c0_10, %c0_11], %12 {strides = array<i32>} : memref<16x256xf32, #tpu.memory_space<vmem>>, vector<16x256xf32>,
    } else {
    }
    %c0 = arith.constant 0 : index
    %c0_1 = arith.constant 0 : index
    %3 = vector.load %arg6[%c0, %c0_1] : memref<16x256xf32, #tpu.memory_space<vmem>>, vector<16x256xf32>
    %c0_2 = arith.constant 0 : index
    %c0_3 = arith.constant 0 : index
    %4 = vector.load %arg3[%c0_2, %c0_3] : memref<16x256xbf16, #tpu.memory_space<vmem>>, vector<16x256xbf16>
    %c0_4 = arith.constant 0 : index
    %c0_5 = arith.constant 0 : index
    %5 = vector.load %arg4[%c0_4, %c0_5] : memref<256x256xbf16, #tpu.memory_space<vmem>>, vector<256x256xbf16>
    %cst = arith.constant dense<0.000000e+00> : vector<16x256xf32>
    %6 = tpu.matmul %4, %5, %cst {dimension_numbers = #tpu.dot_dimension_numbers<[1], [0], [0], [1], [0, 0, 1, 1], [], []>} : vector<16x256xbf16>, vector<256x256xbf16>, vector<16x256xf32> -> vector<16x256xf32>
    %7 = arith.addf %3, %6 : vector<16x256xf32>
    %c0_6 = arith.constant 0 : index
    %c0_7 = arith.constant 0 : index
    %8 = vector.load %arg6[%c0_6, %c0_7] : memref<16x256xf32, #tpu.memory_space<vmem>>, vector<16x256xf32>
    tpu.vector_store %arg6[%c0_6, %c0_7], %7 {strides = array<i32>} : memref<16x256xf32, #tpu.memory_space<vmem>>, vector<16x256xf32>,
    %c17_i32 = arith.constant 17 : i32
    %9 = arith.cmpi eq, %arg2, %c17_i32 : i32
    %10 = arith.extui %9 : i1 to i32
    %c0_i32_8 = arith.constant 0 : i32
    %11 = arith.cmpi ne, %10, %c0_i32_8 : i32
    scf.if %11 {
      %c0_9 = arith.constant 0 : index
      %c0_10 = arith.constant 0 : index
      %12 = vector.load %arg6[%c0_9, %c0_10] : memref<16x256xf32, #tpu.memory_space<vmem>>, vector<16x256xf32>
      %c0_11 = arith.constant 0 : index
      %c0_12 = arith.constant 0 : index
      %13 = vector.load %arg5[%c0_11, %c0_12] : memref<1x256xf32, #tpu.memory_space<vmem>>, vector<1x256xf32>
      %14 = vector.broadcast %13 : vector<1x256xf32> to vector<16x256xf32>
      %15 = arith.addf %12, %14 : vector<16x256xf32>
      %cst_13 = arith.constant 0.000000e+00 : f32
      %16 = vector.broadcast %cst_13 : f32 to vector<16x256xf32>
      %17 = arith.maximumf %15, %16 : vector<16x256xf32>
      %c0_14 = arith.constant 0 : index
      %c0_15 = arith.constant 0 : index
      %18 = vector.load %arg6[%c0_14, %c0_15] : memref<16x256xf32, #tpu.memory_space<vmem>>, vector<16x256xf32>
      tpu.vector_store %arg6[%c0_14, %c0_15], %17 {strides = array<i32>} : memref<16x256xf32, #tpu.memory_space<vmem>>, vector<16x256xf32>,
    } else {
    }
    return
  }
  func.func @transform_0(%arg0: i32, %arg1: i32, %arg2: i32) -> (i32, i32) {
    %c0_i32 = arith.constant 0 : i32
    return %arg0, %arg2 : i32, i32
  }
  func.func @transform_1(%arg0: i32, %arg1: i32, %arg2: i32) -> (i32, i32) {
    %c0_i32 = arith.constant 0 : i32
    return %arg2, %arg1 : i32, i32
  }
  func.func @transform_2(%arg0: i32, %arg1: i32, %arg2: i32) -> (i32, i32) {
    %c0_i32 = arith.constant 0 : i32
    %c0_i32_0 = arith.constant 0 : i32
    return %c0_i32, %arg1 : i32, i32
  }
  func.func @transform_3(%arg0: i32, %arg1: i32, %arg2: i32) -> (i32, i32) {
    %c0_i32 = arith.constant 0 : i32
    return %arg0, %arg1 : i32, i32
  }
}

</mosaic_0001>

<bundles_post_ra>
// kernel: resnet18_attention_forward.36
= control target key start
LH: loop header
LB: loop body
LE: loop exit
PB: predicated region body
PF: predicated region fallthrough
CT: control target
= control target key end

     0   :  { %s1145_s12 = smov 0   ;;  %s1147_s13 = smov 0   ;;  %s1298_s0 = inlined_call_operand.vmem [shape: bf16[512,128], index: 0, kind: input, shape index: {}]   ;;  %s1299_s1 = inlined_call_operand.vmem [shape: bf16[128,128], index: 1, kind: input, shape index: {}]   ;;  %s1300_s2 = inlined_call_operand.vmem [shape: f32[1,128], index: 2, kind: input, shape index: {}]   ;;  %s1301_s3 = inlined_call_operand.vmem [shape: f32[512,128], index: 3, kind: output, shape index: {}]  }
   0x1   :  { %s1149_s14 = smov 0  }
   0x2 LB: > { %s32_s15 = sadd.s32 1, %s1119_s13  ;;  %p924_p0 = scmp.ge.s32.totalorder %s1123_s14, 1  ;;  %s1123_s14 = sphi %s1149_s14, %s13_s14   ;;  %s1119_s13 = sphi %s1147_s13, %s1303_s13   ;;  %s1115_s12 = sphi %s1145_s12, %s1302_s12  }
   0x3   : > { %p34_p1 = scmp.ge.s32.totalorder %s32_s15, 2  ;;  %p188_p2 = scmp.lt.s32.totalorder %s1123_s14, 3 }
   0x5   : > { %s1305_s15 = smov (%p34_p1, %s32_s15), 0  ;;  %p189_p3 = pnand %p924_p0, %p188_p2 }
   0x6   : > { %s925_s24 = sshll.u32 (!%p189_p3), %s1115_s12, 5 }
   0x7   : > { %192 = sbr.rel (%p189_p3) target bundleno = 239 (0xef), region = 32  ;;  %p230_p4 = scmp.lt.s32.totalorder (!%p189_p3), %s925_s24, 63 }
   0xc   : > { %v1050_v0 = vld [vmem:[%s1299_s1 + $0x38] sm:$0xff]  ;;  %v1049_v1 = vld [vmem:[%s1299_s1 + $0x30] sm:$0xff]  ;;  %v1048_v2 = vld [vmem:[%s1299_s1 + $0x28] sm:$0xff]  ;;  %s1307_s24 = smov (!%p230_p4, %s925_s24), 63 }
   0xd   : > { %519 = vmatpush.bf16.msra.mxu0 %v1050_v0  ;;  %1051 = vmatpush.bf16.msra.mxu1 %v1050_v0  ;;  %v1047_v3 = vld [vmem:[%s1299_s1 + $0x20] sm:$0xff]  ;;  %v1046_v4 = vld [vmem:[%s1299_s1 + $0x18] sm:$0xff]  ;;  %v1045_v5 = vld [vmem:[%s1299_s1 + $0x10] sm:$0xff]  ;;  %s926_s4 = sshll.u32 %s1307_s24, 2  ;;  %s928_s12 = sshll.u32 %s1307_s24, 3 }
   0xe   : > { %1052 = vmatpush.bf16.msra.mxu2 %v1050_v0  ;;  %1053 = vmatpush.bf16.msra.mxu3 %v1050_v0  ;;  %v1044_v6 = vld [vmem:[%s1299_s1 + $0x8] sm:$0xff]  ;;  %v1043_v7 = vld [vmem:[%s1299_s1] sm:$0xff]  ;;  %s1196_s9 = scalar_lea.vmem %s1298_s0, %s926_s4  ;;  %s1225_s18 = scalar_lea.vmem %s1301_s3, %s928_s12 }
   0xf   : > { %v1027_v8 = vld [vmem:[%s1196_s9] sm:$0xff]  ;;  %v1028_v12 = vld [vmem:[%s1196_s9 + $0x8] sm:$0xff]  ;;  %v1029_v16 = vld [vmem:[%s1196_s9 + $0x10] sm:$0xff] }
  0x10   : > { %v1031_v9 = vld [vmem:[%s1196_s9 + $0x20] sm:$0xff]  ;;  %v1032_v13 = vld [vmem:[%s1196_s9 + $0x28] sm:$0xff]  ;;  %v1033_v17 = vld [vmem:[%s1196_s9 + $0x30] sm:$0xff] }
  0x11   : > { %520 = vmatpush.bf16.msra.mxu0 %v1049_v1  ;;  %1054 = vmatpush.bf16.msra.mxu1 %v1049_v1  ;;  %v1035_v10 = vld [vmem:[%s1196_s9 + $0x40] sm:$0xff]  ;;  %v1036_v14 = vld [vmem:[%s1196_s9 + $0x48] sm:$0xff]  ;;  %v1037_v18 = vld [vmem:[%s1196_s9 + $0x50] sm:$0xff] }
  0x12   : > { %1055 = vmatpush.bf16.msra.mxu2 %v1049_v1  ;;  %1056 = vmatpush.bf16.msra.mxu3 %v1049_v1  ;;  %v1039_v11 = vld [vmem:[%s1196_s9 + $0x60] sm:$0xff]  ;;  %v1040_v15 = vld [vmem:[%s1196_s9 + $0x68] sm:$0xff]  ;;  %v1041_v19 = vld [vmem:[%s1196_s9 + $0x70] sm:$0xff] }
  0x13   : > { %v1030_v20 = vld [vmem:[%s1196_s9 + $0x18] sm:$0xff]  ;;  %v1217_v24 = vld [vmem:[%s1300_s2] ss:$0 sm:$0xff] }
  0x14   : > { %v1034_v21 = vld [vmem:[%s1196_s9 + $0x38] sm:$0xff] }
  0x15   : > { %521 = vmatpush.bf16.msra.mxu0 %v1048_v2  ;;  %1057 = vmatpush.bf16.msra.mxu1 %v1048_v2  ;;  %v1038_v22 = vld [vmem:[%s1196_s9 + $0x58] sm:$0xff] }
  0x16   : > { %1058 = vmatpush.bf16.msra.mxu2 %v1048_v2  ;;  %1059 = vmatpush.bf16.msra.mxu3 %v1048_v2  ;;  %v1042_v23 = vld [vmem:[%s1196_s9 + $0x78] sm:$0xff] }
  0x19   : > { %522 = vmatpush.bf16.msra.mxu0 %v1047_v3  ;;  %1060 = vmatpush.bf16.msra.mxu1 %v1047_v3 }
  0x1a   : > { %1061 = vmatpush.bf16.msra.mxu2 %v1047_v3  ;;  %1062 = vmatpush.bf16.msra.mxu3 %v1047_v3 }
  0x1d   : > { %523 = vmatpush.bf16.msra.mxu0 %v1046_v4  ;;  %1063 = vmatpush.bf16.msra.mxu1 %v1046_v4 }
  0x1e   : > { %1064 = vmatpush.bf16.msra.mxu2 %v1046_v4  ;;  %1065 = vmatpush.bf16.msra.mxu3 %v1046_v4 }
  0x21   : > { %524 = vmatpush.bf16.msra.mxu0 %v1045_v5  ;;  %1066 = vmatpush.bf16.msra.mxu1 %v1045_v5 }
  0x22   : > { %1067 = vmatpush.bf16.msra.mxu2 %v1045_v5  ;;  %1068 = vmatpush.bf16.msra.mxu3 %v1045_v5 }
  0x25   : > { %525 = vmatpush.bf16.msra.mxu0 %v1044_v6  ;;  %1069 = vmatpush.bf16.msra.mxu1 %v1044_v6 }
  0x26   : > { %1070 = vmatpush.bf16.msra.mxu2 %v1044_v6  ;;  %1071 = vmatpush.bf16.msra.mxu3 %v1044_v6 }
  0x29   : > { %526 = vmatpush.bf16.msra.mxu0 %v1043_v7  ;;  %1072 = vmatpush.bf16.msra.mxu1 %v1043_v7 }
  0x2a   : > { %1073 = vmatpush.bf16.msra.mxu2 %v1043_v7  ;;  %1074 = vmatpush.bf16.msra.mxu3 %v1043_v7 }
  0x2c   : > { %527 = vmatmul.bf16.vlgmr.msra.gmra.mxu0 %v1027_v8  ;;  %547 = vmatmul.bf16.vlgmr.msra.gmra.mxu1 %v1031_v9 }
  0x2d   : > { %567 = vmatmul.bf16.vlgmr.msra.gmra.mxu2 %v1035_v10  ;;  %587 = vmatmul.bf16.vlgmr.msra.gmra.mxu3 %v1039_v11 }
  0x3c   : > { %532 = vmatmul.bf16.gmra.mxu0 %v1028_v12  ;;  %552 = vmatmul.bf16.gmra.mxu1 %v1032_v13 }
  0x3d   : > { %572 = vmatmul.bf16.gmra.mxu2 %v1036_v14  ;;  %592 = vmatmul.bf16.gmra.mxu3 %v1040_v15 }
  0x4c   : > { %537 = vmatmul.bf16.gmra.mxu0 %v1029_v16  ;;  %557 = vmatmul.bf16.gmra.mxu1 %v1033_v17 }
  0x4d   : > { %577 = vmatmul.bf16.gmra.mxu2 %v1037_v18  ;;  %597 = vmatmul.bf16.gmra.mxu3 %v1041_v19 }
  0x5c   : > { %542 = vmatmul.bf16.gmra.mxu0 %v1030_v20  ;;  %562 = vmatmul.bf16.gmra.mxu1 %v1034_v21 }
  0x5d   : > { %582 = vmatmul.bf16.gmra.mxu2 %v1038_v22  ;;  %602 = vmatmul.bf16.gmra.mxu3 %v1042_v23 }
  0xa9   : > { %v528_v25 = vpop.f32.mrf.mxu0  ;;  %v548_v26 = vpop.f32.mrf.mxu1 }
  0xaa   : > { %v711_v27 = vadd.f32 %v1217_v24, %v528_v25  ;;  %v719_v28 = vadd.f32 %v1217_v24, %v548_v26 }
  0xac   : > { %v743_v29 = vmax.f32 %v711_v27, 0.0  ;;  %v751_v30 = vmax.f32 %v719_v28, 0.0 }
  0xae   : > { %775 = vst [vmem:[%s1225_s18] sm:$0xff] %v743_v29 }
  0xaf   : > { %783 = vst [vmem:[%s1225_s18 + $0x40] sm:$0xff] %v751_v30 }
  0xb0   : > { %v568_v31 = vpop.f32.mrf.mxu2  ;;  %v588_v32 = vpop.f32.mrf.mxu3 }
  0xb1   : > { %v530_v33 = vpop.f32.mrf.mxu0  ;;  %v550_v34 = vpop.f32.mrf.mxu1  ;;  %v727_v35 = vadd.f32 %v1217_v24, %v568_v31  ;;  %v735_v36 = vadd.f32 %v1217_v24, %v588_v32 }
  0xb2   : > { %v712_v37 = vadd.f32 %v1217_v24, %v530_v33  ;;  %v720_v38 = vadd.f32 %v1217_v24, %v550_v34 }
  0xb3   : > { %v759_v39 = vmax.f32 %v727_v35, 0.0  ;;  %v767_v40 = vmax.f32 %v735_v36, 0.0 }
  0xb4   : > { %v744_v41 = vmax.f32 %v712_v37, 0.0  ;;  %v752_v42 = vmax.f32 %v720_v38, 0.0 }
  0xb5   : > { %791 = vst [vmem:[%s1225_s18 + $0x80] sm:$0xff] %v759_v39 }
  0xb6   : > { %799 = vst [vmem:[%s1225_s18 + $0xc0] sm:$0xff] %v767_v40 }
  0xb7   : > { %776 = vst [vmem:[%s1225_s18 + $0x8] sm:$0xff] %v744_v41 }
  0xb8   : > { %v570_v43 = vpop.f32.mrf.mxu2  ;;  %v590_v44 = vpop.f32.mrf.mxu3  ;;  %784 = vst [vmem:[%s1225_s18 + $0x48] sm:$0xff] %v752_v42 }
  0xb9   : > { %v533_v45 = vpop.f32.mrf.mxu0  ;;  %v553_v46 = vpop.f32.mrf.mxu1  ;;  %v728_v47 = vadd.f32 %v1217_v24, %v570_v43  ;;  %v736_v48 = vadd.f32 %v1217_v24, %v590_v44 }
  0xba   : > { %v713_v49 = vadd.f32 %v1217_v24, %v533_v45  ;;  %v721_v50 = vadd.f32 %v1217_v24, %v553_v46 }
  0xbb   : > { %v760_v51 = vmax.f32 %v728_v47, 0.0  ;;  %v768_v52 = vmax.f32 %v736_v48, 0.0 }
  0xbc   : > { %v745_v53 = vmax.f32 %v713_v49, 0.0  ;;  %v753_v54 = vmax.f32 %v721_v50, 0.0 }
  0xbd   : > { %792 = vst [vmem:[%s1225_s18 + $0x88] sm:$0xff] %v760_v51 }
  0xbe   : > { %800 = vst [vmem:[%s1225_s18 + $0xc8] sm:$0xff] %v768_v52 }
  0xbf   : > { %777 = vst [vmem:[%s1225_s18 + $0x10] sm:$0xff] %v745_v53 }
  0xc0   : > { %v573_v55 = vpop.f32.mrf.mxu2  ;;  %v593_v56 = vpop.f32.mrf.mxu3  ;;  %785 = vst [vmem:[%s1225_s18 + $0x50] sm:$0xff] %v753_v54 }
  0xc1   : > { %v535_v57 = vpop.f32.mrf.mxu0  ;;  %v555_v58 = vpop.f32.mrf.mxu1  ;;  %v729_v59 = vadd.f32 %v1217_v24, %v573_v55  ;;  %v737_v60 = vadd.f32 %v1217_v24, %v593_v56 }
  0xc2   : > { %v714_v61 = vadd.f32 %v1217_v24, %v535_v57  ;;  %v722_v62 = vadd.f32 %v1217_v24, %v555_v58 }
  0xc3   : > { %v761_v63 = vmax.f32 %v729_v59, 0.0  ;;  %v769_v0 = vmax.f32 %v737_v60, 0.0 }
  0xc4   : > { %v746_v1 = vmax.f32 %v714_v61, 0.0  ;;  %v754_v2 = vmax.f32 %v722_v62, 0.0 }
  0xc5   : > { %793 = vst [vmem:[%s1225_s18 + $0x90] sm:$0xff] %v761_v63 }
  0xc6   : > { %801 = vst [vmem:[%s1225_s18 + $0xd0] sm:$0xff] %v769_v0 }
  0xc7   : > { %778 = vst [vmem:[%s1225_s18 + $0x18] sm:$0xff] %v746_v1 }
  0xc8   : > { %v575_v3 = vpop.f32.mrf.mxu2  ;;  %v595_v4 = vpop.f32.mrf.mxu3  ;;  %786 = vst [vmem:[%s1225_s18 + $0x58] sm:$0xff] %v754_v2 }
  0xc9   : > { %v538_v5 = vpop.f32.mrf.mxu0  ;;  %v558_v6 = vpop.f32.mrf.mxu1  ;;  %v730_v7 = vadd.f32 %v1217_v24, %v575_v3  ;;  %v738_v8 = vadd.f32 %v1217_v24, %v595_v4 }
  0xca   : > { %v715_v9 = vadd.f32 %v1217_v24, %v538_v5  ;;  %v723_v10 = vadd.f32 %v1217_v24, %v558_v6 }
  0xcb   : > { %v762_v11 = vmax.f32 %v730_v7, 0.0  ;;  %v770_v12 = vmax.f32 %v738_v8, 0.0 }
  0xcc   : > { %v747_v13 = vmax.f32 %v715_v9, 0.0  ;;  %v755_v14 = vmax.f32 %v723_v10, 0.0 }
  0xcd   : > { %794 = vst [vmem:[%s1225_s18 + $0x98] sm:$0xff] %v762_v11 }
  0xce   : > { %802 = vst [vmem:[%s1225_s18 + $0xd8] sm:$0xff] %v770_v12 }
  0xcf   : > { %779 = vst [vmem:[%s1225_s18 + $0x20] sm:$0xff] %v747_v13 }
  0xd0   : > { %v578_v15 = vpop.f32.mrf.mxu2  ;;  %v598_v16 = vpop.f32.mrf.mxu3  ;;  %787 = vst [vmem:[%s1225_s18 + $0x60] sm:$0xff] %v755_v14 }
  0xd1   : > { %v540_v17 = vpop.f32.mrf.mxu0  ;;  %v560_v18 = vpop.f32.mrf.mxu1  ;;  %v731_v19 = vadd.f32 %v1217_v24, %v578_v15  ;;  %v739_v20 = vadd.f32 %v1217_v24, %v598_v16 }
  0xd2   : > { %v716_v21 = vadd.f32 %v1217_v24, %v540_v17  ;;  %v724_v22 = vadd.f32 %v1217_v24, %v560_v18 }
  0xd3   : > { %v763_v23 = vmax.f32 %v731_v19, 0.0  ;;  %v771_v25 = vmax.f32 %v739_v20, 0.0 }
  0xd4   : > { %v748_v26 = vmax.f32 %v716_v21, 0.0  ;;  %v756_v27 = vmax.f32 %v724_v22, 0.0 }
  0xd5   : > { %795 = vst [vmem:[%s1225_s18 + $0xa0] sm:$0xff] %v763_v23 }
  0xd6   : > { %803 = vst [vmem:[%s1225_s18 + $0xe0] sm:$0xff] %v771_v25 }
  0xd7   : > { %780 = vst [vmem:[%s1225_s18 + $0x28] sm:$0xff] %v748_v26 }
  0xd8   : > { %v580_v28 = vpop.f32.mrf.mxu2  ;;  %v600_v29 = vpop.f32.mrf.mxu3  ;;  %788 = vst [vmem:[%s1225_s18 + $0x68] sm:$0xff] %v756_v27 }
  0xd9   : > { %v543_v30 = vpop.f32.mrf.mxu0  ;;  %v563_v31 = vpop.f32.mrf.mxu1  ;;  %v732_v32 = vadd.f32 %v1217_v24, %v580_v28  ;;  %v740_v33 = vadd.f32 %v1217_v24, %v600_v29 }
  0xda   : > { %v717_v34 = vadd.f32 %v1217_v24, %v543_v30  ;;  %v725_v35 = vadd.f32 %v1217_v24, %v563_v31 }
  0xdb   : > { %v764_v36 = vmax.f32 %v732_v32, 0.0  ;;  %v772_v37 = vmax.f32 %v740_v33, 0.0 }
  0xdc   : > { %v749_v38 = vmax.f32 %v717_v34, 0.0  ;;  %v757_v39 = vmax.f32 %v725_v35, 0.0 }
  0xdd   : > { %796 = vst [vmem:[%s1225_s18 + $0xa8] sm:$0xff] %v764_v36 }
  0xde   : > { %804 = vst [vmem:[%s1225_s18 + $0xe8] sm:$0xff] %v772_v37 }
  0xdf   : > { %781 = vst [vmem:[%s1225_s18 + $0x30] sm:$0xff] %v749_v38 }
  0xe0   : > { %v583_v40 = vpop.f32.mrf.mxu2  ;;  %v603_v41 = vpop.f32.mrf.mxu3  ;;  %789 = vst [vmem:[%s1225_s18 + $0x70] sm:$0xff] %v757_v39 }
  0xe1   : > { %v545_v42 = vpop.f32.mrf.mxu0  ;;  %v565_v43 = vpop.f32.mrf.mxu1  ;;  %v733_v44 = vadd.f32 %v1217_v24, %v583_v40  ;;  %v741_v45 = vadd.f32 %v1217_v24, %v603_v41 }
  0xe2   : > { %v718_v46 = vadd.f32 %v1217_v24, %v545_v42  ;;  %v726_v47 = vadd.f32 %v1217_v24, %v565_v43 }
  0xe3   : > { %v765_v48 = vmax.f32 %v733_v44, 0.0  ;;  %v773_v49 = vmax.f32 %v741_v45, 0.0 }
  0xe4   : > { %v750_v50 = vmax.f32 %v718_v46, 0.0  ;;  %v758_v51 = vmax.f32 %v726_v47, 0.0 }
  0xe5   : > { %797 = vst [vmem:[%s1225_s18 + $0xb0] sm:$0xff] %v765_v48 }
  0xe6   : > { %805 = vst [vmem:[%s1225_s18 + $0xf0] sm:$0xff] %v773_v49 }
  0xe7   : > { %782 = vst [vmem:[%s1225_s18 + $0x38] sm:$0xff] %v750_v50 }
  0xe8   : > { %v585_v52 = vpop.f32.mrf.mxu2  ;;  %v605_v53 = vpop.f32.mrf.mxu3  ;;  %790 = vst [vmem:[%s1225_s18 + $0x78] sm:$0xff] %v758_v51 }
  0xe9   : > { %v734_v54 = vadd.f32 %v1217_v24, %v585_v52  ;;  %v742_v55 = vadd.f32 %v1217_v24, %v605_v53 }
  0xeb   : > { %v766_v56 = vmax.f32 %v734_v54, 0.0  ;;  %v774_v57 = vmax.f32 %v742_v55, 0.0 }
  0xed   : > { %798 = vst [vmem:[%s1225_s18 + $0xb8] sm:$0xff] %v766_v56 }
  0xee   : > { %806 = vst [vmem:[%s1225_s18 + $0xf8] sm:$0xff] %v774_v57 }
  0xef PF: > { %s13_s14 = sadd.s32 1, %s1123_s14   ;;  %s1302_s12 = smov %s1119_s13 }
  0xf0   : > { %p10_p5 = scmp.ge.s32.totalorder %s13_s14, 4   ;;  %s1303_s13 = smov %s1305_s15 }
  0xf2   :  { %12 = sbr.rel (!%p10_p5) target bundleno = 2 (0x2), region = 76 }

// kernel: resnet18_attention_forward.38
= control target key start
LH: loop header
LB: loop body
LE: loop exit
PB: predicated region body
PF: predicated region fallthrough
CT: control target
= control target key end

     0   :  { %s1203_s12 = smov 0   ;;  %s1205_s13 = smov 0   ;;  %s1583_s0 = inlined_call_operand.vmem [shape: bf16[128,768], index: 0, kind: input, shape index: {}]   ;;  %s1584_s1 = inlined_call_operand.vmem [shape: bf16[768,128], index: 1, kind: input, shape index: {}]   ;;  %s1585_s2 = inlined_call_operand.vmem [shape: f32[1,128], index: 2, kind: input, shape index: {}]   ;;  %s1586_s3 = inlined_call_operand.vmem [shape: f32[128,128], index: 3, kind: output, shape index: {}]  }
   0x1   :  { %s1207_s14 = smov 0   ;;  %s1209_s15 = smov 0  }
   0x2   :  { %s1211_s16 = smov 0  }
   0x3 LB: > { %s25_s17 = sadd.s32 1, %s1176_s15  ;;  %p48_p1 = scmp.ne.s32.totalorder %s1168_s13, %s1164_s12  ;;  %s1180_s16 = sphi %s1211_s16, %s13_s16   ;;  %s1176_s15 = sphi %s1209_s15, %s1590_s15   ;;  %s1172_s14 = sphi %s1207_s14, %s1589_s14   ;;  %s1168_s13 = sphi %s1205_s13, %s1588_s13   ;;  %s1164_s12 = sphi %s1203_s12, %s1587_s12  }
   0x4   : > { %p26_p0 = scmp.ge.s32.totalorder %s25_s17, 3  ;;  %p49_p2 = scmp.eq.s32.totalorder %s1180_s16, 0 }
   0x5   : > { %s41_s19 = sadd.s32 1, %s1168_s13  ;;  %p909_p5 = scmp.ge.s32.totalorder %s1180_s16, 3 }
   0x6   : > { %s1592_s17 = smov (%p26_p0, %s25_s17), 0  ;;  %p50_p3 = por %p49_p2, %p48_p1 }
   0x7   : > { %s37_s18 = ssub.s32 %s1176_s15, %s1592_s17  ;;  %162 = sbr.rel (%p909_p5) target bundleno = 32 (0x20), region = 20 }
   0x8   : > { %p39_p4 = scmp.eq.s32.totalorder %s37_s18, 0 }
   0xa   : > { %s1238_s20 = scalar_select %p39_p4, %s1168_s13, %s41_s19  }
   0xc   : > { %165 = sbr.rel (!%p50_p3) target bundleno = 32 (0x20), region = 24  ;;  %s167_s21 = sand.u32 (%p50_p3), 1, %s1168_s13  }
   0xd   : > { %s1051_s22 = sshll.u32 (%p50_p3), %s1176_s15, 3  ;;  %s910_s23 = sshll.u32 (%p50_p3), %s167_s21, 7 }
   0xe   : > { %s1246_s26 = scalar_lea.vmem (%p50_p3), %s1583_s0, %s1051_s22  ;;  %s169_s27 = scalar_lea.vmem (%p50_p3), [#allocation2], %s910_s23 }
   0xf   : > { %v234_v0 = vld [vmem:[%s1246_s26] sm:$0xff] (%p50_p3)  ;;  %v236_v1 = vld [vmem:[%s1246_s26 + $0x18] sm:$0xff] (%p50_p3)  ;;  %v238_v2 = vld [vmem:[%s1246_s26 + $0x30] sm:$0xff] (%p50_p3) }
  0x10   : > { %235 = vst [vmem:[%s169_s27] sm:$0xff] (%p50_p3), %v234_v0  ;;  %v240_v3 = vld [vmem:[%s1246_s26 + $0x48] sm:$0xff] (%p50_p3)  ;;  %v242_v4 = vld [vmem:[%s1246_s26 + $0x60] sm:$0xff] (%p50_p3)  ;;  %v244_v5 = vld [vmem:[%s1246_s26 + $0x78] sm:$0xff] (%p50_p3) }
  0x11   : > { %237 = vst [vmem:[%s169_s27 + $0x8] sm:$0xff] %v236_v1  ;;  %v246_v6 = vld [vmem:[%s1246_s26 + $0x90] sm:$0xff]  ;;  %v248_v7 = vld [vmem:[%s1246_s26 + $0xa8] sm:$0xff]  ;;  %v250_v8 = vld [vmem:[%s1246_s26 + $0xc0] sm:$0xff] }
  0x12   : > { %239 = vst [vmem:[%s169_s27 + $0x10] sm:$0xff] %v238_v2  ;;  %v252_v9 = vld [vmem:[%s1246_s26 + $0xd8] sm:$0xff]  ;;  %v254_v10 = vld [vmem:[%s1246_s26 + $0xf0] sm:$0xff]  ;;  %v256_v11 = vld [vmem:[%s1246_s26 + $0x108] sm:$0xff] }
  0x13   : > { %241 = vst [vmem:[%s169_s27 + $0x18] sm:$0xff] %v240_v3  ;;  %v258_v12 = vld [vmem:[%s1246_s26 + $0x120] sm:$0xff]  ;;  %v260_v13 = vld [vmem:[%s1246_s26 + $0x138] sm:$0xff]  ;;  %v262_v14 = vld [vmem:[%s1246_s26 + $0x150] sm:$0xff] }
  0x14   : > { %243 = vst [vmem:[%s169_s27 + $0x20] sm:$0xff] %v242_v4  ;;  %v264_v15 = vld [vmem:[%s1246_s26 + $0x168] sm:$0xff] }
  0x15   : > { %245 = vst [vmem:[%s169_s27 + $0x28] sm:$0xff] %v244_v5 }
  0x16   : > { %247 = vst [vmem:[%s169_s27 + $0x30] sm:$0xff] %v246_v6 }
  0x17   : > { %249 = vst [vmem:[%s169_s27 + $0x38] sm:$0xff] %v248_v7 }
  0x18   : > { %251 = vst [vmem:[%s169_s27 + $0x40] sm:$0xff] %v250_v8 }
  0x19   : > { %253 = vst [vmem:[%s169_s27 + $0x48] sm:$0xff] %v252_v9 }
  0x1a   : > { %255 = vst [vmem:[%s169_s27 + $0x50] sm:$0xff] %v254_v10 }
  0x1b   : > { %257 = vst [vmem:[%s169_s27 + $0x58] sm:$0xff] %v256_v11 }
  0x1c   : > { %259 = vst [vmem:[%s169_s27 + $0x60] sm:$0xff] %v258_v12 }
  0x1d   : > { %261 = vst [vmem:[%s169_s27 + $0x68] sm:$0xff] %v260_v13 }
  0x1e   : > { %263 = vst [vmem:[%s169_s27 + $0x70] sm:$0xff] %v262_v14 }
  0x1f   : > { %265 = vst [vmem:[%s169_s27 + $0x78] sm:$0xff] %v264_v15 }
  0x20 PF: > { %p913_p6 = scmp.ge.s32.totalorder %s1180_s16, 1  ;;  %p282_p7 = scmp.lt.s32.totalorder %s1180_s16, 4 }
  0x22   : > { %p283_p8 = pnand %p913_p6, %p282_p7 }
  0x23   : > { %s289_s28 = sand.u32 (!%p283_p8), 1, %s1164_s12   ;;  %s915_s29 = sshll.u32 (!%p283_p8), %s1172_s14, 5 }
  0x24   : > { %286 = sbr.rel (%p283_p8) target bundleno = 309 (0x135), region = 66  ;;  %s914_s30 = sshll.u32 (!%p283_p8), %s289_s28, 7 }
  0x25   : > { %p329_p9 = scmp.lt.s32.totalorder (!%p283_p8), %s915_s29, 95  ;;  %s1273_s8 = scalar_lea.vmem (!%p283_p8), [#allocation2], %s914_s30 }
  0x26   : > { %p917_p10 = scmp.ne.s32.totalorder (!%p283_p8), %s1172_s14, 0 }
  0x29   : > { %s1594_s29 = smov (!%p329_p9, %s915_s29), 95  ;;  %352 = sbr.rel (%p917_p10) target bundleno = 63 (0x3f), region = 74 }
  0x2a   : > { %s916_s4 = sshll.u32 %s1594_s29, 2 }
  0x2b   : > { %s1271_s7 = scalar_lea.vmem %s1584_s1, %s916_s4 }
  0x2e   : > { %v1182_v16 = vmov 0.0  }
  0x2f   : > { %353 = vst [vmem:[%s1586_s3] sm:$0xff] %v1182_v16 }
  0x30   : > { %354 = vst [vmem:[%s1586_s3 + $0x8] sm:$0xff] %v1182_v16 }
  0x31   : > { %355 = vst [vmem:[%s1586_s3 + $0x10] sm:$0xff] %v1182_v16 }
  0x32   : > { %356 = vst [vmem:[%s1586_s3 + $0x18] sm:$0xff] %v1182_v16 }
  0x33   : > { %357 = vst [vmem:[%s1586_s3 + $0x20] sm:$0xff] %v1182_v16 }
  0x34   : > { %358 = vst [vmem:[%s1586_s3 + $0x28] sm:$0xff] %v1182_v16 }
  0x35   : > { %359 = vst [vmem:[%s1586_s3 + $0x30] sm:$0xff] %v1182_v16 }
  0x36   : > { %360 = vst [vmem:[%s1586_s3 + $0x38] sm:$0xff] %v1182_v16 }
  0x37   : > { %361 = vst [vmem:[%s1586_s3 + $0x40] sm:$0xff] %v1182_v16 }
  0x38   : > { %362 = vst [vmem:[%s1586_s3 + $0x48] sm:$0xff] %v1182_v16 }
  0x39   : > { %363 = vst [vmem:[%s1586_s3 + $0x50] sm:$0xff] %v1182_v16 }
  0x3a   : > { %364 = vst [vmem:[%s1586_s3 + $0x58] sm:$0xff] %v1182_v16 }
  0x3b   : > { %365 = vst [vmem:[%s1586_s3 + $0x60] sm:$0xff] %v1182_v16 }
  0x3c   : > { %366 = vst [vmem:[%s1586_s3 + $0x68] sm:$0xff] %v1182_v16 }
  0x3d   : > { %367 = vst [vmem:[%s1586_s3 + $0x70] sm:$0xff] %v1182_v16 }
  0x3e   : > { %368 = vst [vmem:[%s1586_s3 + $0x78] sm:$0xff] %v1182_v16 }
  0x3f PF: > { %v1075_v17 = vld [vmem:[%s1271_s7 + $0x38] sm:$0xff]  ;;  %v1074_v19 = vld [vmem:[%s1271_s7 + $0x30] sm:$0xff]  ;;  %v1073_v21 = vld [vmem:[%s1271_s7 + $0x28] sm:$0xff]  ;;  %p1046_p11 = scmp.ne.s32.totalorder %s1172_s14, 2 }
  0x40   : > { %v1083_v18 = vld [vmem:[%s1271_s7 + $0x78] sm:$0xff]  ;;  %609 = vmatpush.bf16.msra.mxu0 %v1075_v17  ;;  %1084 = vmatpush.bf16.msra.mxu2 %v1075_v17  ;;  %v1082_v20 = vld [vmem:[%s1271_s7 + $0x70] sm:$0xff]  ;;  %v1081_v22 = vld [vmem:[%s1271_s7 + $0x68] sm:$0xff] }
  0x41   : > { %658 = vmatpush.bf16.msra.mxu1 %v1083_v18  ;;  %1092 = vmatpush.bf16.msra.mxu3 %v1083_v18  ;;  %v1072_v23 = vld [vmem:[%s1271_s7 + $0x20] sm:$0xff]  ;;  %v1071_v25 = vld [vmem:[%s1271_s7 + $0x18] sm:$0xff]  ;;  %v1070_v27 = vld [vmem:[%s1271_s7 + $0x10] sm:$0xff] }
  0x42   : > { %v1080_v24 = vld [vmem:[%s1271_s7 + $0x60] sm:$0xff]  ;;  %v1079_v26 = vld [vmem:[%s1271_s7 + $0x58] sm:$0xff]  ;;  %v1078_v28 = vld [vmem:[%s1271_s7 + $0x50] sm:$0xff] }
  0x43   : > { %v1069_v29 = vld [vmem:[%s1271_s7 + $0x8] sm:$0xff]  ;;  %v1068_v31 = vld [vmem:[%s1271_s7] sm:$0xff]  ;;  %v928_v45 = vld [vmem:[%s1273_s8 + $0x10] sm:$0xf] }
  0x44   : > { %610 = vmatpush.bf16.msra.mxu0 %v1074_v19  ;;  %1085 = vmatpush.bf16.msra.mxu2 %v1074_v19  ;;  %v1077_v30 = vld [vmem:[%s1271_s7 + $0x48] sm:$0xff]  ;;  %v1076_v32 = vld [vmem:[%s1271_s7 + $0x40] sm:$0xff]  ;;  %v1055_v46 = vld [vmem:[%s1273_s8 + $0x14] sm:$0xf0] }
  0x45   : > { %659 = vmatpush.bf16.msra.mxu1 %v1082_v20  ;;  %1093 = vmatpush.bf16.msra.mxu3 %v1082_v20  ;;  %v920_v33 = vld [vmem:[%s1273_s8] sm:$0xf]  ;;  %v1053_v34 = vld [vmem:[%s1273_s8 + $0x4] sm:$0xf0]  ;;  %v1052_v37 = vld [vmem:[%s1273_s8 + $0x4] sm:$0xf]  ;;  %v929_v53 = vor.u32 %v1055_v46, %v928_v45 }
  0x46   : > { %v952_v35 = vld [vmem:[%s1273_s8 + $0x40] sm:$0xf]  ;;  %v1061_v36 = vld [vmem:[%s1273_s8 + $0x44] sm:$0xf0]  ;;  %v922_v38 = vld [vmem:[%s1273_s8 + $0x8] sm:$0xf0]  ;;  %v921_v41 = vor.u32 %v1053_v34, %v920_v33 }
  0x47   : > { %v1060_v39 = vld [vmem:[%s1273_s8 + $0x44] sm:$0xf]  ;;  %v954_v40 = vld [vmem:[%s1273_s8 + $0x48] sm:$0xf0]  ;;  %v953_v42 = vor.u32 %v1061_v36, %v952_v35  ;;  %v925_v43 = vor.u32 %v1052_v37, %v922_v38  ;;  %v960_v47 = vld [vmem:[%s1273_s8 + $0x50] sm:$0xf] }
  0x48   : > { %611 = vmatpush.bf16.msra.mxu0 %v1073_v21  ;;  %1086 = vmatpush.bf16.msra.mxu2 %v1073_v21  ;;  %v957_v44 = vor.u32 %v1060_v39, %v954_v40  ;;  %v1063_v48 = vld [vmem:[%s1273_s8 + $0x54] sm:$0xf0]  ;;  %v1054_v49 = vld [vmem:[%s1273_s8 + $0x14] sm:$0xf]  ;;  %v930_v50 = vld [vmem:[%s1273_s8 + $0x18] sm:$0xf0] }
  0x49   : > { %660 = vmatpush.bf16.msra.mxu1 %v1081_v22  ;;  %1094 = vmatpush.bf16.msra.mxu3 %v1081_v22  ;;  %v1062_v51 = vld [vmem:[%s1273_s8 + $0x54] sm:$0xf]  ;;  %v962_v52 = vld [vmem:[%s1273_s8 + $0x58] sm:$0xf0]  ;;  %v961_v54 = vor.u32 %v1063_v48, %v960_v47  ;;  %v933_v55 = vor.u32 %v1054_v49, %v930_v50  ;;  %v936_v57 = vld [vmem:[%s1273_s8 + $0x20] sm:$0xf] }
  0x4a   : > { %v965_v56 = vor.u32 %v1062_v51, %v962_v52  ;;  %v1057_v58 = vld [vmem:[%s1273_s8 + $0x24] sm:$0xf0]  ;;  %v968_v59 = vld [vmem:[%s1273_s8 + $0x60] sm:$0xf]  ;;  %v1056_v61 = vld [vmem:[%s1273_s8 + $0x24] sm:$0xf] }
  0x4b   : > { %v1065_v60 = vld [vmem:[%s1273_s8 + $0x64] sm:$0xf0]  ;;  %v938_v62 = vld [vmem:[%s1273_s8 + $0x28] sm:$0xf0]  ;;  %v1064_v63 = vld [vmem:[%s1273_s8 + $0x64] sm:$0xf]  ;;  %v937_v1 = vor.u32 %v1057_v58, %v936_v57 }
  0x4c   : > { %612 = vmatpush.bf16.msra.mxu0 %v1072_v23  ;;  %1087 = vmatpush.bf16.msra.mxu2 %v1072_v23  ;;  %v970_v0 = vld [vmem:[%s1273_s8 + $0x68] sm:$0xf0]  ;;  %v969_v2 = vor.u32 %v1065_v60, %v968_v59  ;;  %v941_v3 = vor.u32 %v1056_v61, %v938_v62  ;;  %v944_v5 = vld [vmem:[%s1273_s8 + $0x30] sm:$0xf]  ;;  %v1059_v6 = vld [vmem:[%s1273_s8 + $0x34] sm:$0xf0] }
  0x4d   : > { %661 = vmatpush.bf16.msra.mxu1 %v1080_v24  ;;  %1095 = vmatpush.bf16.msra.mxu3 %v1080_v24  ;;  %v973_v4 = vor.u32 %v1064_v63, %v970_v0  ;;  %v976_v7 = vld [vmem:[%s1273_s8 + $0x70] sm:$0xf]  ;;  %v1067_v8 = vld [vmem:[%s1273_s8 + $0x74] sm:$0xf0]  ;;  %v1058_v9 = vld [vmem:[%s1273_s8 + $0x34] sm:$0xf]  ;;  %v945_v13 = vor.u32 %v1059_v6, %v944_v5 }
  0x4e   : > { %v946_v10 = vld [vmem:[%s1273_s8 + $0x38] sm:$0xf0]  ;;  %v1066_v11 = vld [vmem:[%s1273_s8 + $0x74] sm:$0xf]  ;;  %v977_v14 = vor.u32 %v1067_v8, %v976_v7  ;;  %v369_v18 = vld [vmem:[%s1586_s3] sm:$0xff] }
  0x4f   : > { %v978_v12 = vld [vmem:[%s1273_s8 + $0x78] sm:$0xf0]  ;;  %v949_v15 = vor.u32 %v1058_v9, %v946_v10  ;;  %v377_v23 = vld [vmem:[%s1586_s3 + $0x40] sm:$0xff]  ;;  %v378_v33 = vld [vmem:[%s1586_s3 + $0x48] sm:$0xff] }
  0x50   : > { %613 = vmatpush.bf16.msra.mxu0 %v1071_v25  ;;  %1088 = vmatpush.bf16.msra.mxu2 %v1071_v25  ;;  %v981_v16 = vor.u32 %v1066_v11, %v978_v12  ;;  %v371_v37 = vld [vmem:[%s1586_s3 + $0x10] sm:$0xff]  ;;  %v372_v47 = vld [vmem:[%s1586_s3 + $0x18] sm:$0xff]  ;;  %v373_v57 = vld [vmem:[%s1586_s3 + $0x20] sm:$0xff] }
  0x51   : > { %662 = vmatpush.bf16.msra.mxu1 %v1079_v26  ;;  %1096 = vmatpush.bf16.msra.mxu3 %v1079_v26  ;;  %v381_v63 = vld [vmem:[%s1586_s3 + $0x60] sm:$0xff]  ;;  %v382_v9 = vld [vmem:[%s1586_s3 + $0x68] sm:$0xff] }
  0x54   : > { %614 = vmatpush.bf16.msra.mxu0 %v1070_v27  ;;  %1089 = vmatpush.bf16.msra.mxu2 %v1070_v27  ;;  %v370_v27 = vld [vmem:[%s1586_s3 + $0x8] sm:$0xff] }
  0x55   : > { %663 = vmatpush.bf16.msra.mxu1 %v1078_v28  ;;  %1097 = vmatpush.bf16.msra.mxu3 %v1078_v28 }
  0x58   : > { %615 = vmatpush.bf16.msra.mxu0 %v1069_v29  ;;  %1090 = vmatpush.bf16.msra.mxu2 %v1069_v29 }
  0x59   : > { %664 = vmatpush.bf16.msra.mxu1 %v1077_v30  ;;  %1098 = vmatpush.bf16.msra.mxu3 %v1077_v30 }
  0x5c   : > { %616 = vmatpush.bf16.msra.mxu0 %v1068_v31  ;;  %1091 = vmatpush.bf16.msra.mxu2 %v1068_v31 }
  0x5d   : > { %665 = vmatpush.bf16.msra.mxu1 %v1076_v32  ;;  %1099 = vmatpush.bf16.msra.mxu3 %v1076_v32 }
  0x5f   : > { %617 = vmatmul.bf16.vlgmr.msra.gmra.mxu0 %v921_v41  ;;  %637 = vmatmul.bf16.vlgmr.msra.gmra.mxu2 %v953_v42 }
  0x60   : > { %666 = vmatmul.bf16.vlgmr.msra.gmra.mxu1 %v925_v43  ;;  %686 = vmatmul.bf16.vlgmr.msra.gmra.mxu3 %v957_v44  ;;  %v379_v43 = vld [vmem:[%s1586_s3 + $0x50] sm:$0xff] }
  0x6f   : > { %622 = vmatmul.bf16.gmra.mxu0 %v929_v53  ;;  %642 = vmatmul.bf16.gmra.mxu2 %v961_v54  ;;  %v380_v53 = vld [vmem:[%s1586_s3 + $0x58] sm:$0xff] }
  0x70   : > { %671 = vmatmul.bf16.gmra.mxu1 %v933_v55  ;;  %691 = vmatmul.bf16.gmra.mxu3 %v965_v56 }
  0x7f   : > { %627 = vmatmul.bf16.gmra.mxu0 %v937_v1  ;;  %647 = vmatmul.bf16.gmra.mxu2 %v969_v2 }
  0x80   : > { %676 = vmatmul.bf16.gmra.mxu1 %v941_v3  ;;  %696 = vmatmul.bf16.gmra.mxu3 %v973_v4  ;;  %v374_v3 = vld [vmem:[%s1586_s3 + $0x28] sm:$0xff] }
  0x8f   : > { %632 = vmatmul.bf16.gmra.mxu0 %v945_v13  ;;  %652 = vmatmul.bf16.gmra.mxu2 %v977_v14  ;;  %v375_v13 = vld [vmem:[%s1586_s3 + $0x30] sm:$0xff] }
  0x90   : > { %681 = vmatmul.bf16.gmra.mxu1 %v949_v15  ;;  %701 = vmatmul.bf16.gmra.mxu3 %v981_v16 }
  0xdc   : > { %v618_v17 = vpop.f32.mrf.mxu0 }
  0xdd   : > { %v667_v19 = vpop.f32.mrf.mxu1 }
  0xde   : > { %v668_v20 = vadd.f32 %v667_v19, %v618_v17  ;;  %v383_v19 = vld [vmem:[%s1586_s3 + $0x70] sm:$0xff] }
  0xe0   : > { %v707_v21 = vadd.f32 %v668_v20, %v369_v18 }
  0xe2   : > { %723 = vst [vmem:[%s1586_s3] sm:$0xff] %v707_v21  ;;  %v638_v22 = vpop.f32.mrf.mxu2 }
  0xe3   : > { %v687_v24 = vpop.f32.mrf.mxu3 }
  0xe4   : > { %v688_v25 = vadd.f32 %v687_v24, %v638_v22  ;;  %v620_v26 = vpop.f32.mrf.mxu0 }
  0xe5   : > { %v669_v28 = vpop.f32.mrf.mxu1 }
  0xe6   : > { %v715_v29 = vadd.f32 %v688_v25, %v377_v23  ;;  %v670_v30 = vadd.f32 %v669_v28, %v620_v26  ;;  %v376_v23 = vld [vmem:[%s1586_s3 + $0x38] sm:$0xff] }
  0xe8   : > { %731 = vst [vmem:[%s1586_s3 + $0x40] sm:$0xff] %v715_v29  ;;  %v708_v31 = vadd.f32 %v670_v30, %v370_v27  ;;  %v384_v29 = vld [vmem:[%s1586_s3 + $0x78] sm:$0xff] }
  0xea   : > { %724 = vst [vmem:[%s1586_s3 + $0x8] sm:$0xff] %v708_v31  ;;  %v640_v32 = vpop.f32.mrf.mxu2 }
  0xeb   : > { %v689_v34 = vpop.f32.mrf.mxu3 }
  0xec   : > { %v690_v35 = vadd.f32 %v689_v34, %v640_v32  ;;  %v623_v36 = vpop.f32.mrf.mxu0 }
  0xed   : > { %v672_v38 = vpop.f32.mrf.mxu1 }
  0xee   : > { %v716_v39 = vadd.f32 %v690_v35, %v378_v33  ;;  %v673_v40 = vadd.f32 %v672_v38, %v623_v36 }
  0xf0   : > { %732 = vst [vmem:[%s1586_s3 + $0x48] sm:$0xff] %v716_v39  ;;  %v709_v41 = vadd.f32 %v673_v40, %v371_v37 }
  0xf2   : > { %725 = vst [vmem:[%s1586_s3 + $0x10] sm:$0xff] %v709_v41  ;;  %v643_v42 = vpop.f32.mrf.mxu2 }
  0xf3   : > { %v692_v44 = vpop.f32.mrf.mxu3 }
  0xf4   : > { %v693_v45 = vadd.f32 %v692_v44, %v643_v42  ;;  %v625_v46 = vpop.f32.mrf.mxu0 }
  0xf5   : > { %v674_v48 = vpop.f32.mrf.mxu1 }
  0xf6   : > { %v717_v49 = vadd.f32 %v693_v45, %v379_v43  ;;  %v675_v50 = vadd.f32 %v674_v48, %v625_v46 }
  0xf8   : > { %733 = vst [vmem:[%s1586_s3 + $0x50] sm:$0xff] %v717_v49  ;;  %v710_v51 = vadd.f32 %v675_v50, %v372_v47 }
  0xfa   : > { %726 = vst [vmem:[%s1586_s3 + $0x18] sm:$0xff] %v710_v51  ;;  %v645_v52 = vpop.f32.mrf.mxu2 }
  0xfb   : > { %v694_v54 = vpop.f32.mrf.mxu3 }
  0xfc   : > { %v695_v55 = vadd.f32 %v694_v54, %v645_v52  ;;  %v628_v56 = vpop.f32.mrf.mxu0 }
  0xfd   : > { %v677_v58 = vpop.f32.mrf.mxu1 }
  0xfe   : > { %v718_v59 = vadd.f32 %v695_v55, %v380_v53  ;;  %v678_v60 = vadd.f32 %v677_v58, %v628_v56 }
 0x100   : > { %734 = vst [vmem:[%s1586_s3 + $0x58] sm:$0xff] %v718_v59  ;;  %v711_v61 = vadd.f32 %v678_v60, %v373_v57 }
 0x102   : > { %727 = vst [vmem:[%s1586_s3 + $0x20] sm:$0xff] %v711_v61  ;;  %v648_v62 = vpop.f32.mrf.mxu2 }
 0x103   : > { %v697_v0 = vpop.f32.mrf.mxu3 }
 0x104   : > { %v698_v1 = vadd.f32 %v697_v0, %v648_v62  ;;  %v630_v2 = vpop.f32.mrf.mxu0 }
 0x105   : > { %v679_v4 = vpop.f32.mrf.mxu1 }
 0x106   : > { %v719_v5 = vadd.f32 %v698_v1, %v381_v63  ;;  %v680_v6 = vadd.f32 %v679_v4, %v630_v2 }
 0x108   : > { %735 = vst [vmem:[%s1586_s3 + $0x60] sm:$0xff] %v719_v5  ;;  %v712_v7 = vadd.f32 %v680_v6, %v374_v3 }
 0x10a   : > { %728 = vst [vmem:[%s1586_s3 + $0x28] sm:$0xff] %v712_v7  ;;  %v650_v8 = vpop.f32.mrf.mxu2 }
 0x10b   : > { %v699_v10 = vpop.f32.mrf.mxu3 }
 0x10c   : > { %v700_v11 = vadd.f32 %v699_v10, %v650_v8  ;;  %v633_v12 = vpop.f32.mrf.mxu0 }
 0x10d   : > { %v682_v14 = vpop.f32.mrf.mxu1 }
 0x10e   : > { %v720_v15 = vadd.f32 %v700_v11, %v382_v9  ;;  %v683_v16 = vadd.f32 %v682_v14, %v633_v12 }
 0x110   : > { %736 = vst [vmem:[%s1586_s3 + $0x68] sm:$0xff] %v720_v15  ;;  %v713_v17 = vadd.f32 %v683_v16, %v375_v13 }
 0x112   : > { %729 = vst [vmem:[%s1586_s3 + $0x30] sm:$0xff] %v713_v17  ;;  %v653_v18 = vpop.f32.mrf.mxu2 }
 0x113   : > { %v702_v20 = vpop.f32.mrf.mxu3 }
 0x114   : > { %v703_v21 = vadd.f32 %v702_v20, %v653_v18  ;;  %v635_v22 = vpop.f32.mrf.mxu0 }
 0x115   : > { %v684_v24 = vpop.f32.mrf.mxu1 }
 0x116   : > { %v721_v25 = vadd.f32 %v703_v21, %v383_v19  ;;  %v685_v26 = vadd.f32 %v684_v24, %v635_v22 }
 0x118   : > { %737 = vst [vmem:[%s1586_s3 + $0x70] sm:$0xff] %v721_v25  ;;  %v714_v27 = vadd.f32 %v685_v26, %v376_v23 }
 0x11a   : > { %730 = vst [vmem:[%s1586_s3 + $0x38] sm:$0xff] %v714_v27  ;;  %v655_v28 = vpop.f32.mrf.mxu2 }
 0x11b   : > { %v704_v30 = vpop.f32.mrf.mxu3 }
 0x11c   : > { %v705_v31 = vadd.f32 %v704_v30, %v655_v28  ;;  %742 = sbr.rel (%p1046_p11) target bundleno = 309 (0x135), region = 78 }
 0x11e   : > { %v722_v32 = vadd.f32 %v705_v31, %v384_v29 }
 0x120   : > { %738 = vst [vmem:[%s1586_s3 + $0x78] sm:$0xff] %v722_v32 }
 0x121   : > { %v743_v33 = vld [vmem:[%s1586_s3] sm:$0xff]  ;;  %v744_v35 = vld [vmem:[%s1586_s3 + $0x8] sm:$0xff]  ;;  %v745_v36 = vld [vmem:[%s1586_s3 + $0x10] sm:$0xff] }
 0x122   : > { %v1141_v34 = vld [vmem:[%s1585_s2] ss:$0 sm:$0xff]  ;;  %v746_v37 = vld [vmem:[%s1586_s3 + $0x18] sm:$0xff]  ;;  %v748_v42 = vld [vmem:[%s1586_s3 + $0x28] sm:$0xff] }
 0x123   : > { %v763_v38 = vadd.f32 %v1141_v34, %v743_v33  ;;  %v764_v39 = vadd.f32 %v1141_v34, %v744_v35  ;;  %v765_v40 = vadd.f32 %v1141_v34, %v745_v36  ;;  %v747_v41 = vld [vmem:[%s1586_s3 + $0x20] sm:$0xff]  ;;  %v766_v43 = vadd.f32 %v1141_v34, %v746_v37  ;;  %v749_v44 = vld [vmem:[%s1586_s3 + $0x30] sm:$0xff]  ;;  %v750_v46 = vld [vmem:[%s1586_s3 + $0x38] sm:$0xff] }
 0x124   : > { %v767_v45 = vadd.f32 %v1141_v34, %v747_v41  ;;  %v768_v47 = vadd.f32 %v1141_v34, %v748_v42  ;;  %v751_v48 = vld [vmem:[%s1586_s3 + $0x40] sm:$0xff]  ;;  %v769_v49 = vadd.f32 %v1141_v34, %v749_v44  ;;  %v752_v50 = vld [vmem:[%s1586_s3 + $0x48] sm:$0xff]  ;;  %v770_v51 = vadd.f32 %v1141_v34, %v750_v46  ;;  %v753_v52 = vld [vmem:[%s1586_s3 + $0x50] sm:$0xff] }
 0x125   : > { %779 = vst [vmem:[%s1586_s3] sm:$0xff] %v763_v38  ;;  %v771_v53 = vadd.f32 %v1141_v34, %v751_v48  ;;  %v754_v54 = vld [vmem:[%s1586_s3 + $0x58] sm:$0xff]  ;;  %v772_v55 = vadd.f32 %v1141_v34, %v752_v50  ;;  %v755_v56 = vld [vmem:[%s1586_s3 + $0x60] sm:$0xff]  ;;  %v773_v57 = vadd.f32 %v1141_v34, %v753_v52  ;;  %v756_v58 = vld [vmem:[%s1586_s3 + $0x68] sm:$0xff] }
 0x126   : > { %780 = vst [vmem:[%s1586_s3 + $0x8] sm:$0xff] %v764_v39  ;;  %v774_v59 = vadd.f32 %v1141_v34, %v754_v54  ;;  %v757_v60 = vld [vmem:[%s1586_s3 + $0x70] sm:$0xff]  ;;  %v775_v61 = vadd.f32 %v1141_v34, %v755_v56  ;;  %v776_v63 = vadd.f32 %v1141_v34, %v756_v58 }
 0x127   : > { %781 = vst [vmem:[%s1586_s3 + $0x10] sm:$0xff] %v765_v40  ;;  %v758_v62 = vld [vmem:[%s1586_s3 + $0x78] sm:$0xff]  ;;  %v777_v0 = vadd.f32 %v1141_v34, %v757_v60 }
 0x128   : > { %782 = vst [vmem:[%s1586_s3 + $0x18] sm:$0xff] %v766_v43  ;;  %v778_v1 = vadd.f32 %v1141_v34, %v758_v62 }
 0x129   : > { %783 = vst [vmem:[%s1586_s3 + $0x20] sm:$0xff] %v767_v45 }
 0x12a   : > { %784 = vst [vmem:[%s1586_s3 + $0x28] sm:$0xff] %v768_v47 }
 0x12b   : > { %785 = vst [vmem:[%s1586_s3 + $0x30] sm:$0xff] %v769_v49 }
 0x12c   : > { %786 = vst [vmem:[%s1586_s3 + $0x38] sm:$0xff] %v770_v51 }
 0x12d   : > { %787 = vst [vmem:[%s1586_s3 + $0x40] sm:$0xff] %v771_v53 }
 0x12e   : > { %788 = vst [vmem:[%s1586_s3 + $0x48] sm:$0xff] %v772_v55 }
 0x12f   : > { %789 = vst [vmem:[%s1586_s3 + $0x50] sm:$0xff] %v773_v57 }
 0x130   : > { %790 = vst [vmem:[%s1586_s3 + $0x58] sm:$0xff] %v774_v59 }
 0x131   : > { %791 = vst [vmem:[%s1586_s3 + $0x60] sm:$0xff] %v775_v61 }
 0x132   : > { %792 = vst [vmem:[%s1586_s3 + $0x68] sm:$0xff] %v776_v63 }
 0x133   : > { %793 = vst [vmem:[%s1586_s3 + $0x70] sm:$0xff] %v777_v0 }
 0x134   : > { %794 = vst [vmem:[%s1586_s3 + $0x78] sm:$0xff] %v778_v1 }
 0x135 PF: > { %s13_s16 = sadd.s32 1, %s1180_s16   ;;  %s1587_s12 = smov %s1168_s13 }
 0x136   : > { %p10_p12 = scmp.ge.s32.totalorder %s13_s16, 5   ;;  %s1588_s13 = smov %s1238_s20 }
 0x137   : > { %s1589_s14 = smov %s1176_s15  ;;  %s1590_s15 = smov %s1592_s17 }
 0x138   :  { %12 = sbr.rel (!%p10_p12) target bundleno = 3 (0x3), region = 119 }

// kernel: resnet18_attention_forward.37
= control target key start
LH: loop header
LB: loop body
LE: loop exit
PB: predicated region body
PF: predicated region fallthrough
CT: control target
= control target key end

     0   :  { %s1219_s12 = smov 0   ;;  %s1221_s13 = smov 0   ;;  %s1599_s0 = inlined_call_operand.vmem [shape: bf16[128,768], index: 0, kind: input, shape index: {}]   ;;  %s1600_s1 = inlined_call_operand.vmem [shape: bf16[768,128], index: 1, kind: input, shape index: {}]   ;;  %s1601_s2 = inlined_call_operand.vmem [shape: f32[1,128], index: 2, kind: input, shape index: {}]   ;;  %s1602_s3 = inlined_call_operand.vmem [shape: f32[128,128], index: 3, kind: output, shape index: {}]  }
   0x1   :  { %s1223_s14 = smov 0   ;;  %s1225_s15 = smov 0  }
   0x2   :  { %s1227_s16 = smov 0  }
   0x3 LB: > { %s25_s17 = sadd.s32 1, %s1192_s15  ;;  %p48_p1 = scmp.ne.s32.totalorder %s1184_s13, %s1180_s12  ;;  %s1196_s16 = sphi %s1227_s16, %s13_s16   ;;  %s1192_s15 = sphi %s1225_s15, %s1606_s15   ;;  %s1188_s14 = sphi %s1223_s14, %s1605_s14   ;;  %s1184_s13 = sphi %s1221_s13, %s1604_s13   ;;  %s1180_s12 = sphi %s1219_s12, %s1603_s12  }
   0x4   : > { %p26_p0 = scmp.ge.s32.totalorder %s25_s17, 3  ;;  %p49_p2 = scmp.eq.s32.totalorder %s1196_s16, 0 }
   0x5   : > { %s41_s19 = sadd.s32 1, %s1184_s13  ;;  %p925_p5 = scmp.ge.s32.totalorder %s1196_s16, 3 }
   0x6   : > { %s1608_s17 = smov (%p26_p0, %s25_s17), 0  ;;  %p50_p3 = por %p49_p2, %p48_p1 }
   0x7   : > { %s37_s18 = ssub.s32 %s1192_s15, %s1608_s17  ;;  %162 = sbr.rel (%p925_p5) target bundleno = 32 (0x20), region = 20 }
   0x8   : > { %p39_p4 = scmp.eq.s32.totalorder %s37_s18, 0 }
   0xa   : > { %s1254_s20 = scalar_select %p39_p4, %s1184_s13, %s41_s19  }
   0xc   : > { %165 = sbr.rel (!%p50_p3) target bundleno = 32 (0x20), region = 24  ;;  %s167_s21 = sand.u32 (%p50_p3), 1, %s1184_s13  }
   0xd   : > { %s1067_s22 = sshll.u32 (%p50_p3), %s1192_s15, 3  ;;  %s926_s23 = sshll.u32 (%p50_p3), %s167_s21, 7 }
   0xe   : > { %s1262_s26 = scalar_lea.vmem (%p50_p3), %s1599_s0, %s1067_s22  ;;  %s169_s27 = scalar_lea.vmem (%p50_p3), [#allocation2], %s926_s23 }
   0xf   : > { %v234_v0 = vld [vmem:[%s1262_s26] sm:$0xff] (%p50_p3)  ;;  %v236_v1 = vld [vmem:[%s1262_s26 + $0x18] sm:$0xff] (%p50_p3)  ;;  %v238_v2 = vld [vmem:[%s1262_s26 + $0x30] sm:$0xff] (%p50_p3) }
  0x10   : > { %235 = vst [vmem:[%s169_s27] sm:$0xff] (%p50_p3), %v234_v0  ;;  %v240_v3 = vld [vmem:[%s1262_s26 + $0x48] sm:$0xff] (%p50_p3)  ;;  %v242_v4 = vld [vmem:[%s1262_s26 + $0x60] sm:$0xff] (%p50_p3)  ;;  %v244_v5 = vld [vmem:[%s1262_s26 + $0x78] sm:$0xff] (%p50_p3) }
  0x11   : > { %237 = vst [vmem:[%s169_s27 + $0x8] sm:$0xff] %v236_v1  ;;  %v246_v6 = vld [vmem:[%s1262_s26 + $0x90] sm:$0xff]  ;;  %v248_v7 = vld [vmem:[%s1262_s26 + $0xa8] sm:$0xff]  ;;  %v250_v8 = vld [vmem:[%s1262_s26 + $0xc0] sm:$0xff] }
  0x12   : > { %239 = vst [vmem:[%s169_s27 + $0x10] sm:$0xff] %v238_v2  ;;  %v252_v9 = vld [vmem:[%s1262_s26 + $0xd8] sm:$0xff]  ;;  %v254_v10 = vld [vmem:[%s1262_s26 + $0xf0] sm:$0xff]  ;;  %v256_v11 = vld [vmem:[%s1262_s26 + $0x108] sm:$0xff] }
  0x13   : > { %241 = vst [vmem:[%s169_s27 + $0x18] sm:$0xff] %v240_v3  ;;  %v258_v12 = vld [vmem:[%s1262_s26 + $0x120] sm:$0xff]  ;;  %v260_v13 = vld [vmem:[%s1262_s26 + $0x138] sm:$0xff]  ;;  %v262_v14 = vld [vmem:[%s1262_s26 + $0x150] sm:$0xff] }
  0x14   : > { %243 = vst [vmem:[%s169_s27 + $0x20] sm:$0xff] %v242_v4  ;;  %v264_v15 = vld [vmem:[%s1262_s26 + $0x168] sm:$0xff] }
  0x15   : > { %245 = vst [vmem:[%s169_s27 + $0x28] sm:$0xff] %v244_v5 }
  0x16   : > { %247 = vst [vmem:[%s169_s27 + $0x30] sm:$0xff] %v246_v6 }
  0x17   : > { %249 = vst [vmem:[%s169_s27 + $0x38] sm:$0xff] %v248_v7 }
  0x18   : > { %251 = vst [vmem:[%s169_s27 + $0x40] sm:$0xff] %v250_v8 }
  0x19   : > { %253 = vst [vmem:[%s169_s27 + $0x48] sm:$0xff] %v252_v9 }
  0x1a   : > { %255 = vst [vmem:[%s169_s27 + $0x50] sm:$0xff] %v254_v10 }
  0x1b   : > { %257 = vst [vmem:[%s169_s27 + $0x58] sm:$0xff] %v256_v11 }
  0x1c   : > { %259 = vst [vmem:[%s169_s27 + $0x60] sm:$0xff] %v258_v12 }
  0x1d   : > { %261 = vst [vmem:[%s169_s27 + $0x68] sm:$0xff] %v260_v13 }
  0x1e   : > { %263 = vst [vmem:[%s169_s27 + $0x70] sm:$0xff] %v262_v14 }
  0x1f   : > { %265 = vst [vmem:[%s169_s27 + $0x78] sm:$0xff] %v264_v15 }
  0x20 PF: > { %p929_p6 = scmp.ge.s32.totalorder %s1196_s16, 1  ;;  %p282_p7 = scmp.lt.s32.totalorder %s1196_s16, 4 }
  0x22   : > { %p283_p8 = pnand %p929_p6, %p282_p7 }
  0x23   : > { %s289_s28 = sand.u32 (!%p283_p8), 1, %s1180_s12   ;;  %s931_s29 = sshll.u32 (!%p283_p8), %s1188_s14, 5 }
  0x24   : > { %286 = sbr.rel (%p283_p8) target bundleno = 311 (0x137), region = 66  ;;  %s930_s30 = sshll.u32 (!%p283_p8), %s289_s28, 7 }
  0x25   : > { %p329_p9 = scmp.lt.s32.totalorder (!%p283_p8), %s931_s29, 95  ;;  %s1289_s8 = scalar_lea.vmem (!%p283_p8), [#allocation2], %s930_s30 }
  0x26   : > { %p933_p10 = scmp.ne.s32.totalorder (!%p283_p8), %s1188_s14, 0 }
  0x29   : > { %s1610_s29 = smov (!%p329_p9, %s931_s29), 95  ;;  %352 = sbr.rel (%p933_p10) target bundleno = 63 (0x3f), region = 74 }
  0x2a   : > { %s932_s4 = sshll.u32 %s1610_s29, 2 }
  0x2b   : > { %s1287_s7 = scalar_lea.vmem %s1600_s1, %s932_s4 }
  0x2e   : > { %v1198_v16 = vmov 0.0  }
  0x2f   : > { %353 = vst [vmem:[%s1602_s3] sm:$0xff] %v1198_v16 }
  0x30   : > { %354 = vst [vmem:[%s1602_s3 + $0x8] sm:$0xff] %v1198_v16 }
  0x31   : > { %355 = vst [vmem:[%s1602_s3 + $0x10] sm:$0xff] %v1198_v16 }
  0x32   : > { %356 = vst [vmem:[%s1602_s3 + $0x18] sm:$0xff] %v1198_v16 }
  0x33   : > { %357 = vst [vmem:[%s1602_s3 + $0x20] sm:$0xff] %v1198_v16 }
  0x34   : > { %358 = vst [vmem:[%s1602_s3 + $0x28] sm:$0xff] %v1198_v16 }
  0x35   : > { %359 = vst [vmem:[%s1602_s3 + $0x30] sm:$0xff] %v1198_v16 }
  0x36   : > { %360 = vst [vmem:[%s1602_s3 + $0x38] sm:$0xff] %v1198_v16 }
  0x37   : > { %361 = vst [vmem:[%s1602_s3 + $0x40] sm:$0xff] %v1198_v16 }
  0x38   : > { %362 = vst [vmem:[%s1602_s3 + $0x48] sm:$0xff] %v1198_v16 }
  0x39   : > { %363 = vst [vmem:[%s1602_s3 + $0x50] sm:$0xff] %v1198_v16 }
  0x3a   : > { %364 = vst [vmem:[%s1602_s3 + $0x58] sm:$0xff] %v1198_v16 }
  0x3b   : > { %365 = vst [vmem:[%s1602_s3 + $0x60] sm:$0xff] %v1198_v16 }
  0x3c   : > { %366 = vst [vmem:[%s1602_s3 + $0x68] sm:$0xff] %v1198_v16 }
  0x3d   : > { %367 = vst [vmem:[%s1602_s3 + $0x70] sm:$0xff] %v1198_v16 }
  0x3e   : > { %368 = vst [vmem:[%s1602_s3 + $0x78] sm:$0xff] %v1198_v16 }
  0x3f PF: > { %v1091_v17 = vld [vmem:[%s1287_s7 + $0x38] sm:$0xff]  ;;  %v1090_v19 = vld [vmem:[%s1287_s7 + $0x30] sm:$0xff]  ;;  %v1089_v21 = vld [vmem:[%s1287_s7 + $0x28] sm:$0xff]  ;;  %p1062_p11 = scmp.ne.s32.totalorder %s1188_s14, 2 }
  0x40   : > { %v1099_v18 = vld [vmem:[%s1287_s7 + $0x78] sm:$0xff]  ;;  %609 = vmatpush.bf16.msra.mxu0 %v1091_v17  ;;  %1100 = vmatpush.bf16.msra.mxu2 %v1091_v17  ;;  %v1098_v20 = vld [vmem:[%s1287_s7 + $0x70] sm:$0xff]  ;;  %v1097_v22 = vld [vmem:[%s1287_s7 + $0x68] sm:$0xff] }
  0x41   : > { %658 = vmatpush.bf16.msra.mxu1 %v1099_v18  ;;  %1108 = vmatpush.bf16.msra.mxu3 %v1099_v18  ;;  %v1088_v23 = vld [vmem:[%s1287_s7 + $0x20] sm:$0xff]  ;;  %v1087_v25 = vld [vmem:[%s1287_s7 + $0x18] sm:$0xff]  ;;  %v1086_v27 = vld [vmem:[%s1287_s7 + $0x10] sm:$0xff] }
  0x42   : > { %v1096_v24 = vld [vmem:[%s1287_s7 + $0x60] sm:$0xff]  ;;  %v1095_v26 = vld [vmem:[%s1287_s7 + $0x58] sm:$0xff]  ;;  %v1094_v28 = vld [vmem:[%s1287_s7 + $0x50] sm:$0xff] }
  0x43   : > { %v1085_v29 = vld [vmem:[%s1287_s7 + $0x8] sm:$0xff]  ;;  %v1084_v31 = vld [vmem:[%s1287_s7] sm:$0xff]  ;;  %v944_v45 = vld [vmem:[%s1289_s8 + $0x10] sm:$0xf] }
  0x44   : > { %610 = vmatpush.bf16.msra.mxu0 %v1090_v19  ;;  %1101 = vmatpush.bf16.msra.mxu2 %v1090_v19  ;;  %v1093_v30 = vld [vmem:[%s1287_s7 + $0x48] sm:$0xff]  ;;  %v1092_v32 = vld [vmem:[%s1287_s7 + $0x40] sm:$0xff]  ;;  %v1071_v46 = vld [vmem:[%s1289_s8 + $0x14] sm:$0xf0] }
  0x45   : > { %659 = vmatpush.bf16.msra.mxu1 %v1098_v20  ;;  %1109 = vmatpush.bf16.msra.mxu3 %v1098_v20  ;;  %v936_v33 = vld [vmem:[%s1289_s8] sm:$0xf]  ;;  %v1069_v34 = vld [vmem:[%s1289_s8 + $0x4] sm:$0xf0]  ;;  %v1068_v37 = vld [vmem:[%s1289_s8 + $0x4] sm:$0xf]  ;;  %v945_v53 = vor.u32 %v1071_v46, %v944_v45 }
  0x46   : > { %v968_v35 = vld [vmem:[%s1289_s8 + $0x40] sm:$0xf]  ;;  %v1077_v36 = vld [vmem:[%s1289_s8 + $0x44] sm:$0xf0]  ;;  %v938_v38 = vld [vmem:[%s1289_s8 + $0x8] sm:$0xf0]  ;;  %v937_v41 = vor.u32 %v1069_v34, %v936_v33 }
  0x47   : > { %v1076_v39 = vld [vmem:[%s1289_s8 + $0x44] sm:$0xf]  ;;  %v970_v40 = vld [vmem:[%s1289_s8 + $0x48] sm:$0xf0]  ;;  %v969_v42 = vor.u32 %v1077_v36, %v968_v35  ;;  %v941_v43 = vor.u32 %v1068_v37, %v938_v38  ;;  %v976_v47 = vld [vmem:[%s1289_s8 + $0x50] sm:$0xf] }
  0x48   : > { %611 = vmatpush.bf16.msra.mxu0 %v1089_v21  ;;  %1102 = vmatpush.bf16.msra.mxu2 %v1089_v21  ;;  %v973_v44 = vor.u32 %v1076_v39, %v970_v40  ;;  %v1079_v48 = vld [vmem:[%s1289_s8 + $0x54] sm:$0xf0]  ;;  %v1070_v49 = vld [vmem:[%s1289_s8 + $0x14] sm:$0xf]  ;;  %v946_v50 = vld [vmem:[%s1289_s8 + $0x18] sm:$0xf0] }
  0x49   : > { %660 = vmatpush.bf16.msra.mxu1 %v1097_v22  ;;  %1110 = vmatpush.bf16.msra.mxu3 %v1097_v22  ;;  %v1078_v51 = vld [vmem:[%s1289_s8 + $0x54] sm:$0xf]  ;;  %v978_v52 = vld [vmem:[%s1289_s8 + $0x58] sm:$0xf0]  ;;  %v977_v54 = vor.u32 %v1079_v48, %v976_v47  ;;  %v949_v55 = vor.u32 %v1070_v49, %v946_v50  ;;  %v952_v57 = vld [vmem:[%s1289_s8 + $0x20] sm:$0xf] }
  0x4a   : > { %v981_v56 = vor.u32 %v1078_v51, %v978_v52  ;;  %v1073_v58 = vld [vmem:[%s1289_s8 + $0x24] sm:$0xf0]  ;;  %v984_v59 = vld [vmem:[%s1289_s8 + $0x60] sm:$0xf]  ;;  %v1072_v61 = vld [vmem:[%s1289_s8 + $0x24] sm:$0xf] }
  0x4b   : > { %v1081_v60 = vld [vmem:[%s1289_s8 + $0x64] sm:$0xf0]  ;;  %v954_v62 = vld [vmem:[%s1289_s8 + $0x28] sm:$0xf0]  ;;  %v1080_v63 = vld [vmem:[%s1289_s8 + $0x64] sm:$0xf]  ;;  %v953_v1 = vor.u32 %v1073_v58, %v952_v57 }
  0x4c   : > { %612 = vmatpush.bf16.msra.mxu0 %v1088_v23  ;;  %1103 = vmatpush.bf16.msra.mxu2 %v1088_v23  ;;  %v986_v0 = vld [vmem:[%s1289_s8 + $0x68] sm:$0xf0]  ;;  %v985_v2 = vor.u32 %v1081_v60, %v984_v59  ;;  %v957_v3 = vor.u32 %v1072_v61, %v954_v62  ;;  %v960_v5 = vld [vmem:[%s1289_s8 + $0x30] sm:$0xf]  ;;  %v1075_v6 = vld [vmem:[%s1289_s8 + $0x34] sm:$0xf0] }
  0x4d   : > { %661 = vmatpush.bf16.msra.mxu1 %v1096_v24  ;;  %1111 = vmatpush.bf16.msra.mxu3 %v1096_v24  ;;  %v989_v4 = vor.u32 %v1080_v63, %v986_v0  ;;  %v992_v7 = vld [vmem:[%s1289_s8 + $0x70] sm:$0xf]  ;;  %v1083_v8 = vld [vmem:[%s1289_s8 + $0x74] sm:$0xf0]  ;;  %v1074_v9 = vld [vmem:[%s1289_s8 + $0x34] sm:$0xf]  ;;  %v961_v13 = vor.u32 %v1075_v6, %v960_v5 }
  0x4e   : > { %v962_v10 = vld [vmem:[%s1289_s8 + $0x38] sm:$0xf0]  ;;  %v1082_v11 = vld [vmem:[%s1289_s8 + $0x74] sm:$0xf]  ;;  %v993_v14 = vor.u32 %v1083_v8, %v992_v7  ;;  %v369_v18 = vld [vmem:[%s1602_s3] sm:$0xff] }
  0x4f   : > { %v994_v12 = vld [vmem:[%s1289_s8 + $0x78] sm:$0xf0]  ;;  %v965_v15 = vor.u32 %v1074_v9, %v962_v10  ;;  %v377_v23 = vld [vmem:[%s1602_s3 + $0x40] sm:$0xff]  ;;  %v378_v33 = vld [vmem:[%s1602_s3 + $0x48] sm:$0xff] }
  0x50   : > { %613 = vmatpush.bf16.msra.mxu0 %v1087_v25  ;;  %1104 = vmatpush.bf16.msra.mxu2 %v1087_v25  ;;  %v997_v16 = vor.u32 %v1082_v11, %v994_v12  ;;  %v371_v37 = vld [vmem:[%s1602_s3 + $0x10] sm:$0xff]  ;;  %v372_v47 = vld [vmem:[%s1602_s3 + $0x18] sm:$0xff]  ;;  %v373_v57 = vld [vmem:[%s1602_s3 + $0x20] sm:$0xff] }
  0x51   : > { %662 = vmatpush.bf16.msra.mxu1 %v1095_v26  ;;  %1112 = vmatpush.bf16.msra.mxu3 %v1095_v26  ;;  %v381_v63 = vld [vmem:[%s1602_s3 + $0x60] sm:$0xff]  ;;  %v382_v9 = vld [vmem:[%s1602_s3 + $0x68] sm:$0xff] }
  0x54   : > { %614 = vmatpush.bf16.msra.mxu0 %v1086_v27  ;;  %1105 = vmatpush.bf16.msra.mxu2 %v1086_v27  ;;  %v370_v27 = vld [vmem:[%s1602_s3 + $0x8] sm:$0xff] }
  0x55   : > { %663 = vmatpush.bf16.msra.mxu1 %v1094_v28  ;;  %1113 = vmatpush.bf16.msra.mxu3 %v1094_v28 }
  0x58   : > { %615 = vmatpush.bf16.msra.mxu0 %v1085_v29  ;;  %1106 = vmatpush.bf16.msra.mxu2 %v1085_v29 }
  0x59   : > { %664 = vmatpush.bf16.msra.mxu1 %v1093_v30  ;;  %1114 = vmatpush.bf16.msra.mxu3 %v1093_v30 }
  0x5c   : > { %616 = vmatpush.bf16.msra.mxu0 %v1084_v31  ;;  %1107 = vmatpush.bf16.msra.mxu2 %v1084_v31 }
  0x5d   : > { %665 = vmatpush.bf16.msra.mxu1 %v1092_v32  ;;  %1115 = vmatpush.bf16.msra.mxu3 %v1092_v32 }
  0x5f   : > { %617 = vmatmul.bf16.vlgmr.msra.gmra.mxu0 %v937_v41  ;;  %637 = vmatmul.bf16.vlgmr.msra.gmra.mxu2 %v969_v42 }
  0x60   : > { %666 = vmatmul.bf16.vlgmr.msra.gmra.mxu1 %v941_v43  ;;  %686 = vmatmul.bf16.vlgmr.msra.gmra.mxu3 %v973_v44  ;;  %v379_v43 = vld [vmem:[%s1602_s3 + $0x50] sm:$0xff] }
  0x6f   : > { %622 = vmatmul.bf16.gmra.mxu0 %v945_v53  ;;  %642 = vmatmul.bf16.gmra.mxu2 %v977_v54  ;;  %v380_v53 = vld [vmem:[%s1602_s3 + $0x58] sm:$0xff] }
  0x70   : > { %671 = vmatmul.bf16.gmra.mxu1 %v949_v55  ;;  %691 = vmatmul.bf16.gmra.mxu3 %v981_v56 }
  0x7f   : > { %627 = vmatmul.bf16.gmra.mxu0 %v953_v1  ;;  %647 = vmatmul.bf16.gmra.mxu2 %v985_v2 }
  0x80   : > { %676 = vmatmul.bf16.gmra.mxu1 %v957_v3  ;;  %696 = vmatmul.bf16.gmra.mxu3 %v989_v4  ;;  %v374_v3 = vld [vmem:[%s1602_s3 + $0x28] sm:$0xff] }
  0x8f   : > { %632 = vmatmul.bf16.gmra.mxu0 %v961_v13  ;;  %652 = vmatmul.bf16.gmra.mxu2 %v993_v14  ;;  %v375_v13 = vld [vmem:[%s1602_s3 + $0x30] sm:$0xff] }
  0x90   : > { %681 = vmatmul.bf16.gmra.mxu1 %v965_v15  ;;  %701 = vmatmul.bf16.gmra.mxu3 %v997_v16 }
  0xdc   : > { %v618_v17 = vpop.f32.mrf.mxu0 }
  0xdd   : > { %v667_v19 = vpop.f32.mrf.mxu1 }
  0xde   : > { %v668_v20 = vadd.f32 %v667_v19, %v618_v17  ;;  %v383_v19 = vld [vmem:[%s1602_s3 + $0x70] sm:$0xff] }
  0xe0   : > { %v707_v21 = vadd.f32 %v668_v20, %v369_v18 }
  0xe2   : > { %723 = vst [vmem:[%s1602_s3] sm:$0xff] %v707_v21  ;;  %v638_v22 = vpop.f32.mrf.mxu2 }
  0xe3   : > { %v687_v24 = vpop.f32.mrf.mxu3 }
  0xe4   : > { %v688_v25 = vadd.f32 %v687_v24, %v638_v22  ;;  %v620_v26 = vpop.f32.mrf.mxu0 }
  0xe5   : > { %v669_v28 = vpop.f32.mrf.mxu1 }
  0xe6   : > { %v715_v29 = vadd.f32 %v688_v25, %v377_v23  ;;  %v670_v30 = vadd.f32 %v669_v28, %v620_v26  ;;  %v376_v23 = vld [vmem:[%s1602_s3 + $0x38] sm:$0xff] }
  0xe8   : > { %731 = vst [vmem:[%s1602_s3 + $0x40] sm:$0xff] %v715_v29  ;;  %v708_v31 = vadd.f32 %v670_v30, %v370_v27  ;;  %v384_v29 = vld [vmem:[%s1602_s3 + $0x78] sm:$0xff] }
  0xea   : > { %724 = vst [vmem:[%s1602_s3 + $0x8] sm:$0xff] %v708_v31  ;;  %v640_v32 = vpop.f32.mrf.mxu2 }
  0xeb   : > { %v689_v34 = vpop.f32.mrf.mxu3 }
  0xec   : > { %v690_v35 = vadd.f32 %v689_v34, %v640_v32  ;;  %v623_v36 = vpop.f32.mrf.mxu0 }
  0xed   : > { %v672_v38 = vpop.f32.mrf.mxu1 }
  0xee   : > { %v716_v39 = vadd.f32 %v690_v35, %v378_v33  ;;  %v673_v40 = vadd.f32 %v672_v38, %v623_v36 }
  0xf0   : > { %732 = vst [vmem:[%s1602_s3 + $0x48] sm:$0xff] %v716_v39  ;;  %v709_v41 = vadd.f32 %v673_v40, %v371_v37 }
  0xf2   : > { %725 = vst [vmem:[%s1602_s3 + $0x10] sm:$0xff] %v709_v41  ;;  %v643_v42 = vpop.f32.mrf.mxu2 }
  0xf3   : > { %v692_v44 = vpop.f32.mrf.mxu3 }
  0xf4   : > { %v693_v45 = vadd.f32 %v692_v44, %v643_v42  ;;  %v625_v46 = vpop.f32.mrf.mxu0 }
  0xf5   : > { %v674_v48 = vpop.f32.mrf.mxu1 }
  0xf6   : > { %v717_v49 = vadd.f32 %v693_v45, %v379_v43  ;;  %v675_v50 = vadd.f32 %v674_v48, %v625_v46 }
  0xf8   : > { %733 = vst [vmem:[%s1602_s3 + $0x50] sm:$0xff] %v717_v49  ;;  %v710_v51 = vadd.f32 %v675_v50, %v372_v47 }
  0xfa   : > { %726 = vst [vmem:[%s1602_s3 + $0x18] sm:$0xff] %v710_v51  ;;  %v645_v52 = vpop.f32.mrf.mxu2 }
  0xfb   : > { %v694_v54 = vpop.f32.mrf.mxu3 }
  0xfc   : > { %v695_v55 = vadd.f32 %v694_v54, %v645_v52  ;;  %v628_v56 = vpop.f32.mrf.mxu0 }
  0xfd   : > { %v677_v58 = vpop.f32.mrf.mxu1 }
  0xfe   : > { %v718_v59 = vadd.f32 %v695_v55, %v380_v53  ;;  %v678_v60 = vadd.f32 %v677_v58, %v628_v56 }
 0x100   : > { %734 = vst [vmem:[%s1602_s3 + $0x58] sm:$0xff] %v718_v59  ;;  %v711_v61 = vadd.f32 %v678_v60, %v373_v57 }
 0x102   : > { %727 = vst [vmem:[%s1602_s3 + $0x20] sm:$0xff] %v711_v61  ;;  %v648_v62 = vpop.f32.mrf.mxu2 }
 0x103   : > { %v697_v0 = vpop.f32.mrf.mxu3 }
 0x104   : > { %v698_v1 = vadd.f32 %v697_v0, %v648_v62  ;;  %v630_v2 = vpop.f32.mrf.mxu0 }
 0x105   : > { %v679_v4 = vpop.f32.mrf.mxu1 }
 0x106   : > { %v719_v5 = vadd.f32 %v698_v1, %v381_v63  ;;  %v680_v6 = vadd.f32 %v679_v4, %v630_v2 }
 0x108   : > { %735 = vst [vmem:[%s1602_s3 + $0x60] sm:$0xff] %v719_v5  ;;  %v712_v7 = vadd.f32 %v680_v6, %v374_v3 }
 0x10a   : > { %728 = vst [vmem:[%s1602_s3 + $0x28] sm:$0xff] %v712_v7  ;;  %v650_v8 = vpop.f32.mrf.mxu2 }
 0x10b   : > { %v699_v10 = vpop.f32.mrf.mxu3 }
 0x10c   : > { %v700_v11 = vadd.f32 %v699_v10, %v650_v8  ;;  %v633_v12 = vpop.f32.mrf.mxu0 }
 0x10d   : > { %v682_v14 = vpop.f32.mrf.mxu1 }
 0x10e   : > { %v720_v15 = vadd.f32 %v700_v11, %v382_v9  ;;  %v683_v16 = vadd.f32 %v682_v14, %v633_v12 }
 0x110   : > { %736 = vst [vmem:[%s1602_s3 + $0x68] sm:$0xff] %v720_v15  ;;  %v713_v17 = vadd.f32 %v683_v16, %v375_v13 }
 0x112   : > { %729 = vst [vmem:[%s1602_s3 + $0x30] sm:$0xff] %v713_v17  ;;  %v653_v18 = vpop.f32.mrf.mxu2 }
 0x113   : > { %v702_v20 = vpop.f32.mrf.mxu3 }
 0x114   : > { %v703_v21 = vadd.f32 %v702_v20, %v653_v18  ;;  %v635_v22 = vpop.f32.mrf.mxu0 }
 0x115   : > { %v684_v24 = vpop.f32.mrf.mxu1 }
 0x116   : > { %v721_v25 = vadd.f32 %v703_v21, %v383_v19  ;;  %v685_v26 = vadd.f32 %v684_v24, %v635_v22 }
 0x118   : > { %737 = vst [vmem:[%s1602_s3 + $0x70] sm:$0xff] %v721_v25  ;;  %v714_v27 = vadd.f32 %v685_v26, %v376_v23 }
 0x11a   : > { %730 = vst [vmem:[%s1602_s3 + $0x38] sm:$0xff] %v714_v27  ;;  %v655_v28 = vpop.f32.mrf.mxu2 }
 0x11b   : > { %v704_v30 = vpop.f32.mrf.mxu3 }
 0x11c   : > { %v705_v31 = vadd.f32 %v704_v30, %v655_v28  ;;  %742 = sbr.rel (%p1062_p11) target bundleno = 311 (0x137), region = 78 }
 0x11e   : > { %v722_v32 = vadd.f32 %v705_v31, %v384_v29 }
 0x120   : > { %738 = vst [vmem:[%s1602_s3 + $0x78] sm:$0xff] %v722_v32 }
 0x121   : > { %v743_v33 = vld [vmem:[%s1602_s3] sm:$0xff]  ;;  %v744_v35 = vld [vmem:[%s1602_s3 + $0x8] sm:$0xff]  ;;  %v745_v36 = vld [vmem:[%s1602_s3 + $0x10] sm:$0xff] }
 0x122   : > { %v1157_v34 = vld [vmem:[%s1601_s2] ss:$0 sm:$0xff]  ;;  %v746_v37 = vld [vmem:[%s1602_s3 + $0x18] sm:$0xff]  ;;  %v748_v43 = vld [vmem:[%s1602_s3 + $0x28] sm:$0xff] }
 0x123   : > { %v763_v38 = vadd.f32 %v1157_v34, %v743_v33  ;;  %v764_v39 = vadd.f32 %v1157_v34, %v744_v35  ;;  %v765_v40 = vadd.f32 %v1157_v34, %v745_v36  ;;  %v766_v41 = vadd.f32 %v1157_v34, %v746_v37  ;;  %v747_v42 = vld [vmem:[%s1602_s3 + $0x20] sm:$0xff]  ;;  %v749_v44 = vld [vmem:[%s1602_s3 + $0x30] sm:$0xff]  ;;  %v750_v47 = vld [vmem:[%s1602_s3 + $0x38] sm:$0xff] }
 0x124   : > { %v767_v45 = vadd.f32 %v1157_v34, %v747_v42  ;;  %v768_v46 = vadd.f32 %v1157_v34, %v748_v43  ;;  %v751_v48 = vld [vmem:[%s1602_s3 + $0x40] sm:$0xff]  ;;  %v769_v52 = vadd.f32 %v1157_v34, %v749_v44  ;;  %v752_v53 = vld [vmem:[%s1602_s3 + $0x48] sm:$0xff]  ;;  %v770_v55 = vadd.f32 %v1157_v34, %v750_v47  ;;  %v753_v56 = vld [vmem:[%s1602_s3 + $0x50] sm:$0xff] }
 0x125   : > { %v779_v49 = vmax.f32 %v763_v38, 0.0  ;;  %v780_v50 = vmax.f32 %v764_v39, 0.0  ;;  %v781_v51 = vmax.f32 %v765_v40, 0.0  ;;  %v782_v54 = vmax.f32 %v766_v41, 0.0  ;;  %v754_v59 = vld [vmem:[%s1602_s3 + $0x58] sm:$0xff]  ;;  %v755_v62 = vld [vmem:[%s1602_s3 + $0x60] sm:$0xff] }
 0x126   : > { %v783_v57 = vmax.f32 %v767_v45, 0.0  ;;  %v771_v58 = vadd.f32 %v1157_v34, %v751_v48  ;;  %v784_v60 = vmax.f32 %v768_v46, 0.0  ;;  %v772_v61 = vadd.f32 %v1157_v34, %v752_v53  ;;  %v756_v1 = vld [vmem:[%s1602_s3 + $0x68] sm:$0xff]  ;;  %v757_v4 = vld [vmem:[%s1602_s3 + $0x70] sm:$0xff] }
 0x127   : > { %795 = vst [vmem:[%s1602_s3] sm:$0xff] %v779_v49  ;;  %v785_v63 = vmax.f32 %v769_v52, 0.0  ;;  %v773_v0 = vadd.f32 %v1157_v34, %v753_v56  ;;  %v786_v2 = vmax.f32 %v770_v55, 0.0  ;;  %v774_v3 = vadd.f32 %v1157_v34, %v754_v59  ;;  %v758_v7 = vld [vmem:[%s1602_s3 + $0x78] sm:$0xff] }
 0x128   : > { %796 = vst [vmem:[%s1602_s3 + $0x8] sm:$0xff] %v780_v50  ;;  %v787_v5 = vmax.f32 %v771_v58, 0.0  ;;  %v775_v6 = vadd.f32 %v1157_v34, %v755_v62  ;;  %v788_v8 = vmax.f32 %v772_v61, 0.0  ;;  %v776_v9 = vadd.f32 %v1157_v34, %v756_v1 }
 0x129   : > { %797 = vst [vmem:[%s1602_s3 + $0x10] sm:$0xff] %v781_v51  ;;  %v789_v10 = vmax.f32 %v773_v0, 0.0  ;;  %v777_v11 = vadd.f32 %v1157_v34, %v757_v4  ;;  %v790_v12 = vmax.f32 %v774_v3, 0.0  ;;  %v778_v13 = vadd.f32 %v1157_v34, %v758_v7 }
 0x12a   : > { %798 = vst [vmem:[%s1602_s3 + $0x18] sm:$0xff] %v782_v54  ;;  %v791_v14 = vmax.f32 %v775_v6, 0.0  ;;  %v792_v15 = vmax.f32 %v776_v9, 0.0 }
 0x12b   : > { %799 = vst [vmem:[%s1602_s3 + $0x20] sm:$0xff] %v783_v57  ;;  %v793_v16 = vmax.f32 %v777_v11, 0.0  ;;  %v794_v17 = vmax.f32 %v778_v13, 0.0 }
 0x12c   : > { %800 = vst [vmem:[%s1602_s3 + $0x28] sm:$0xff] %v784_v60 }
 0x12d   : > { %801 = vst [vmem:[%s1602_s3 + $0x30] sm:$0xff] %v785_v63 }
 0x12e   : > { %802 = vst [vmem:[%s1602_s3 + $0x38] sm:$0xff] %v786_v2 }
 0x12f   : > { %803 = vst [vmem:[%s1602_s3 + $0x40] sm:$0xff] %v787_v5 }
 0x130   : > { %804 = vst [vmem:[%s1602_s3 + $0x48] sm:$0xff] %v788_v8 }
 0x131   : > { %805 = vst [vmem:[%s1602_s3 + $0x50] sm:$0xff] %v789_v10 }
 0x132   : > { %806 = vst [vmem:[%s1602_s3 + $0x58] sm:$0xff] %v790_v12 }
 0x133   : > { %807 = vst [vmem:[%s1602_s3 + $0x60] sm:$0xff] %v791_v14 }
 0x134   : > { %808 = vst [vmem:[%s1602_s3 + $0x68] sm:$0xff] %v792_v15 }
 0x135   : > { %809 = vst [vmem:[%s1602_s3 + $0x70] sm:$0xff] %v793_v16 }
 0x136   : > { %810 = vst [vmem:[%s1602_s3 + $0x78] sm:$0xff] %v794_v17 }
 0x137 PF: > { %s13_s16 = sadd.s32 1, %s1196_s16   ;;  %s1603_s12 = smov %s1184_s13 }
 0x138   : > { %p10_p12 = scmp.ge.s32.totalorder %s13_s16, 5   ;;  %s1604_s13 = smov %s1254_s20 }
 0x139   : > { %s1605_s14 = smov %s1192_s15  ;;  %s1606_s15 = smov %s1608_s17 }
 0x13a   :  { %12 = sbr.rel (!%p10_p12) target bundleno = 3 (0x3), region = 119 }

// kernel: resnet18_attention_forward.39
= control target key start
LH: loop header
LB: loop body
LE: loop exit
PB: predicated region body
PF: predicated region fallthrough
CT: control target
= control target key end

     0   :  { %s476_s9 = smov 0   ;;  %s478_s10 = smov 0   ;;  %s562_s0 = inlined_call_operand.vmem [shape: f32[2,64,64], index: 0, kind: input, shape index: {}]   ;;  %s563_s1 = inlined_call_operand.vmem [shape: f32[2,1,64], index: 1, kind: input, shape index: {}]   ;;  %s564_s2 = inlined_call_operand.vmem [shape: f32[2,64,2], index: 2, kind: output, shape index: {}]  }
   0x1   :  { %s480_s11 = smov 0  }
   0x2 LB: > { %s24_s12 = sadd.s32 1, %s454_s10  ;;  %p399_p0 = scmp.ge.s32.totalorder %s458_s11, 1  ;;  %s458_s11 = sphi %s480_s11, %s12_s11   ;;  %s454_s10 = sphi %s478_s10, %s566_s10   ;;  %s450_s9 = sphi %s476_s9, %s565_s9  }
   0x3   : > { %p26_p1 = scmp.ge.s32.totalorder %s24_s12, 2  ;;  %p141_p2 = scmp.lt.s32.totalorder %s458_s11, 3 }
   0x5   : > { %s568_s12 = smov (%p26_p1, %s24_s12), 0  ;;  %p142_p3 = pnand %p399_p0, %p141_p2 }
   0x6   : > { %p175_p4 = scmp.lt.s32.totalorder (!%p142_p3), %s450_s9, 1 }
   0x7   : > { %145 = sbr.rel (%p142_p3) target bundleno = 178 (0xb2), region = 28 }
   0xc   : > { %s570_s9 = smov (!%p175_p4, %s450_s9), 1  ;;  %vm217_vm0 = vcmask 523264   ;;  %v460_v33 = vmov 64.0   ;;  %vm281_vm2 = vcmask 7168   ;;  %vm290_vm3 = vcmask 15360  }
   0xd   : > { %s406_s13 = sshll.u32 %s570_s9, 6  ;;  %s186_s16 = scalar_lea.vmem %s563_s1, %s570_s9  ;;  %434 = vrcp.f32 %v460_v33 }
   0xe   : > { %s182_s19 = scalar_lea.vmem %s562_s0, %s406_s13  ;;  %v433_v0 = vld [vmem:[%s186_s16] ss:$0 sm:$0xff]  ;;  %s527_s22 = scalar_lea.vmem %s564_s2, %s406_s13 }
   0xf   : > { %v201_v1 = vld [vmem:[%s182_s19 + $0x20] sm:$0xff]  ;;  %v199_v2 = vld [vmem:[%s182_s19 + $0x10] sm:$0xff]  ;;  %v202_v7 = vld [vmem:[%s182_s19 + $0x28] sm:$0xff] }
  0x10   : > { %v197_v3 = vld [vmem:[%s182_s19] sm:$0xff]  ;;  %v213_v4 = vmul.f32 %v433_v0, %v201_v1  ;;  %v211_v5 = vmul.f32 %v433_v0, %v199_v2  ;;  %v200_v8 = vld [vmem:[%s182_s19 + $0x18] sm:$0xff]  ;;  %v198_v12 = vld [vmem:[%s182_s19 + $0x8] sm:$0xff]  ;;  %v214_v13 = vmul.f32 %v433_v0, %v202_v7 }
  0x11   : > { %v209_v6 = vmul.f32 %v433_v0, %v197_v3  ;;  %v212_v14 = vmul.f32 %v433_v0, %v200_v8  ;;  %v210_v15 = vmul.f32 %v433_v0, %v198_v12  ;;  %v204_v19 = vld [vmem:[%s182_s19 + $0x38] sm:$0xff]  ;;  %v203_v20 = vld [vmem:[%s182_s19 + $0x30] sm:$0xff] }
  0x12   : > { %v230_v9 = vsel %vm217_vm0, %v213_v4, 0.0  ;;  %v224_v10 = vsel %vm217_vm0, %v211_v5, 0.0  ;;  %v233_v16 = vsel %vm217_vm0, %v214_v13, 0.0  ;;  %v216_v21 = vmul.f32 %v433_v0, %v204_v19 }
  0x13   : > { %v218_v11 = vsel %vm217_vm0, %v209_v6, 0.0  ;;  %231 = vadd.xlane.f32.xlu2 %v230_v9  ;;  %225 = vadd.xlane.f32.xlu1 %v224_v10  ;;  %v227_v17 = vsel %vm217_vm0, %v212_v14, 0.0  ;;  %v221_v18 = vsel %vm217_vm0, %v210_v15, 0.0  ;;  %v215_v22 = vmul.f32 %v433_v0, %v203_v20  ;;  %v435_v34 = vpop.eup %434 }
  0x14   : > { %219 = vadd.xlane.f32.xlu0 %v218_v11  ;;  %v239_v23 = vsel %vm217_vm0, %v216_v21, 0.0  ;;  %v257_v24 = vsel %vm217_vm0, %v209_v6, -inf  ;;  %v263_v26 = vsel %vm217_vm0, %v211_v5, -inf  ;;  %v266_v27 = vsel %vm217_vm0, %v212_v14, -inf }
  0x15   : > { %v236_v25 = vsel %vm217_vm0, %v215_v22, 0.0  ;;  %v260_v28 = vsel %vm217_vm0, %v210_v15, -inf  ;;  %v272_v29 = vsel %vm217_vm0, %v214_v13, -inf  ;;  %v275_v30 = vsel %vm217_vm0, %v215_v22, -inf }
  0x16   : > { %v269_v31 = vsel %vm217_vm0, %v213_v4, -inf  ;;  %v278_v32 = vsel %vm217_vm0, %v216_v21, -inf  ;;  %v243_v35 = vmul.f32 64.0, %v435_v34  ;;  %vm247_vm1 = vweird.f32 %v435_v34 }
  0x18   : > { %v244_v36 = vsub.f32 1.0, %v243_v35 }
  0x1a   : > { %v245_v40 = vmul.f32 %v435_v34, %v244_v36 }
  0x1b   : > { %234 = vadd.xlane.f32.xlu2 %v233_v16  ;;  %228 = vadd.xlane.f32.xlu1 %v227_v17 }
  0x1c   : > { %222 = vadd.xlane.f32.xlu0 %v221_v18  ;;  %v246_v41 = vadd.f32 %v435_v34, %v245_v40 }
  0x1e   : > { %v248_v45 = vsel %vm247_vm1, %v435_v34, %v246_v41 }
  0x23   : > { %240 = vadd.xlane.f32.xlu1 %v239_v23  ;;  %258 = vmax.xlane.f32.xlu2 %v257_v24 }
  0x24   : > { %237 = vadd.xlane.f32.xlu0 %v236_v25 }
  0x2b   : > { %264 = vmax.xlane.f32.xlu1 %v263_v26  ;;  %267 = vmax.xlane.f32.xlu2 %v266_v27 }
  0x2c   : > { %261 = vmax.xlane.f32.xlu0 %v260_v28 }
  0x33   : > { %273 = vmax.xlane.f32.xlu1 %v272_v29  ;;  %276 = vmax.xlane.f32.xlu2 %v275_v30 }
  0x34   : > { %270 = vmax.xlane.f32.xlu0 %v269_v31 }
  0x3c   : > { %279 = vmax.xlane.f32.xlu0 %v278_v32 }
  0x86   : > { %v232_v37 = vpop.xlane.xlu2 %231  ;;  %v226_v38 = vpop.xlane.xlu1 %225 }
  0x87   : > { %v220_v39 = vpop.xlane.xlu0 %219  ;;  %v251_v51 = vmul.f32 %v248_v45, %v226_v38  ;;  %v253_v62 = vmul.f32 %v248_v45, %v232_v37 }
  0x88   : > { %v249_v46 = vmul.f32 %v248_v45, %v220_v39 }
  0x8e   : > { %v235_v42 = vpop.xlane.xlu2 %234  ;;  %v229_v43 = vpop.xlane.xlu1 %228 }
  0x8f   : > { %v223_v44 = vpop.xlane.xlu0 %222  ;;  %v252_v52 = vmul.f32 %v248_v45, %v229_v43  ;;  %v254_v60 = vmul.f32 %v248_v45, %v235_v42 }
  0x90   : > { %v250_v53 = vmul.f32 %v248_v45, %v223_v44 }
  0x96   : > { %v241_v47 = vpop.xlane.xlu1 %240  ;;  %v259_v48 = vpop.xlane.xlu2 %258 }
  0x97   : > { %v282_v49 = vsel %vm281_vm2, %v249_v46, %v259_v48  ;;  %v238_v50 = vpop.xlane.xlu0 %237  ;;  %v256_v5 = vmul.f32 %v248_v45, %v241_v47 }
  0x98   : > { %291 = vst.msk [vmem:[%s527_s22] sm:$0xff] %vm290_vm3, %v282_v49  ;;  %v255_v61 = vmul.f32 %v248_v45, %v238_v50 }
  0x9e   : > { %v265_v54 = vpop.xlane.xlu1 %264  ;;  %v268_v55 = vpop.xlane.xlu2 %267 }
  0x9f   : > { %v284_v56 = vsel %vm281_vm2, %v251_v51, %v265_v54  ;;  %v285_v57 = vsel %vm281_vm2, %v252_v52, %v268_v55  ;;  %v262_v58 = vpop.xlane.xlu0 %261 }
  0xa0   : > { %293 = vst.msk [vmem:[%s527_s22 + $0x10] sm:$0xff] %vm290_vm3, %v284_v56  ;;  %v283_v59 = vsel %vm281_vm2, %v250_v53, %v262_v58 }
  0xa1   : > { %294 = vst.msk [vmem:[%s527_s22 + $0x18] sm:$0xff] %vm290_vm3, %v285_v57 }
  0xa2   : > { %292 = vst.msk [vmem:[%s527_s22 + $0x8] sm:$0xff] %vm290_vm3, %v283_v59 }
  0xa6   : > { %v274_v63 = vpop.xlane.xlu1 %273  ;;  %v277_v0 = vpop.xlane.xlu2 %276 }
  0xa7   : > { %v287_v1 = vsel %vm281_vm2, %v254_v60, %v274_v63  ;;  %v288_v2 = vsel %vm281_vm2, %v255_v61, %v277_v0  ;;  %v271_v3 = vpop.xlane.xlu0 %270 }
  0xa8   : > { %296 = vst.msk [vmem:[%s527_s22 + $0x28] sm:$0xff] %vm290_vm3, %v287_v1  ;;  %v286_v4 = vsel %vm281_vm2, %v253_v62, %v271_v3 }
  0xa9   : > { %297 = vst.msk [vmem:[%s527_s22 + $0x30] sm:$0xff] %vm290_vm3, %v288_v2 }
  0xaa   : > { %295 = vst.msk [vmem:[%s527_s22 + $0x20] sm:$0xff] %vm290_vm3, %v286_v4 }
  0xaf   : > { %v280_v6 = vpop.xlane.xlu0 %279 }
  0xb0   : > { %v289_v7 = vsel %vm281_vm2, %v256_v5, %v280_v6 }
  0xb1   : > { %298 = vst.msk [vmem:[%s527_s22 + $0x38] sm:$0xff] %vm290_vm3, %v289_v7 }
  0xb2 PF: > { %s12_s11 = sadd.s32 1, %s458_s11   ;;  %s565_s9 = smov %s454_s10 }
  0xb3   : > { %p9_p5 = scmp.ge.s32.totalorder %s12_s11, 4   ;;  %s566_s10 = smov %s568_s12 }
  0xb5   :  { %11 = sbr.rel (!%p9_p5) target bundleno = 2 (0x2), region = 61 }

// kernel: resnet18_attention_forward.40
= control target key start
LH: loop header
LB: loop body
LE: loop exit
PB: predicated region body
PF: predicated region fallthrough
CT: control target
= control target key end

     0   :  { %s662_s15 = smov 0   ;;  %s664_s16 = smov 0   ;;  %s738_s0 = inlined_call_operand.vmem [shape: f32[2,64,64], index: 0, kind: input, shape index: {}]   ;;  %s739_s1 = inlined_call_operand.vmem [shape: f32[2,1,64], index: 1, kind: input, shape index: {}]   ;;  %s740_s2 = inlined_call_operand.vmem [shape: f32[2,64,1], index: 2, kind: input, shape index: {}]   ;;  %s741_s3 = inlined_call_operand.vmem [shape: f32[2,64,64], index: 3, kind: input, shape index: {}]   ;;  %s742_s4 = inlined_call_operand.vmem [shape: f32[2,64,64], index: 4, kind: output, shape index: {}]  }
   0x1   :  { %s666_s17 = smov 0  }
   0x2 LB: > { %s26_s18 = sadd.s32 1, %s630_s16  ;;  %p568_p0 = scmp.ge.s32.totalorder %s634_s17, 1  ;;  %s634_s17 = sphi %s666_s17, %s14_s17   ;;  %s630_s16 = sphi %s664_s16, %s744_s16   ;;  %s626_s15 = sphi %s662_s15, %s743_s15  }
   0x3   : > { %p28_p1 = scmp.ge.s32.totalorder %s26_s18, 2  ;;  %p225_p2 = scmp.lt.s32.totalorder %s634_s17, 3 }
   0x5   : > { %s746_s18 = smov (%p28_p1, %s26_s18), 0  ;;  %p226_p3 = pnand %p568_p0, %p225_p2 }
   0x6   : > { %p281_p4 = scmp.lt.s32.totalorder (!%p226_p3), %s626_s15, 1 }
   0x7   : > { %229 = sbr.rel (%p226_p3) target bundleno = 155 (0x9b), region = 36 }
   0xc   : > { %v636_v0 = vmov 0   ;;  %s748_s15 = smov (!%p281_p4, %s626_s15), 1  ;;  %vm423_vm0 = vcmask 523264  }
   0xd   : > { %609 = vset.pattern.permute.xlu1 %v636_v0  ;;  %608 = vset.pattern.permute.xlu0 %v636_v0  ;;  %s680_s19 = sshll.u32 %s748_s15, 6  ;;  %s292_s22 = scalar_lea.vmem %s739_s1, %s748_s15 }
   0xe   : > { %610 = vset.pattern.permute.xlu2 %v636_v0  ;;  %s301_s25 = scalar_lea.vmem %s740_s2, %s680_s19  ;;  %v611_v9 = vld [vmem:[%s292_s22] ss:$0 sm:$0xff]  ;;  %s288_s28 = scalar_lea.vmem %s738_s0, %s680_s19 }
   0xf   : > { %v345_v1 = vld [vmem:[%s301_s25 + $0x10] sm:$0xff]  ;;  %v343_v2 = vld [vmem:[%s301_s25] sm:$0xff]  ;;  %v346_v4 = vld [vmem:[%s301_s25 + $0x18] sm:$0xff]  ;;  %s697_s5 = scalar_lea.vmem %s741_s3, %s680_s19  ;;  %s704_s8 = scalar_lea.vmem %s742_s4, %s680_s19 }
  0x10   : > { %363 = vperm.xlu1 %609, %v345_v1   ;;  %353 = vperm.xlu0 %608, %v343_v2   ;;  %v347_v3 = vld [vmem:[%s301_s25 + $0x20] sm:$0xff]  ;;  %v344_v5 = vld [vmem:[%s301_s25 + $0x8] sm:$0xff]  ;;  %v350_v7 = vld [vmem:[%s301_s25 + $0x38] sm:$0xff] }
  0x11   : > { %373 = vperm.xlu2 %610, %v347_v3   ;;  %v348_v6 = vld [vmem:[%s301_s25 + $0x28] sm:$0xff]  ;;  %v349_v8 = vld [vmem:[%s301_s25 + $0x30] sm:$0xff]  ;;  %v327_v10 = vld [vmem:[%s288_s28 + $0x20] sm:$0xff] }
  0x12   : > { %v339_v11 = vmul.f32 %v611_v9, %v327_v10  ;;  %v325_v12 = vld [vmem:[%s288_s28 + $0x10] sm:$0xff]  ;;  %v323_v13 = vld [vmem:[%s288_s28] sm:$0xff]  ;;  %v328_v16 = vld [vmem:[%s288_s28 + $0x28] sm:$0xff] }
  0x13   : > { %v337_v14 = vmul.f32 %v611_v9, %v325_v12  ;;  %v335_v15 = vmul.f32 %v611_v9, %v323_v13  ;;  %v326_v17 = vld [vmem:[%s288_s28 + $0x18] sm:$0xff]  ;;  %v324_v18 = vld [vmem:[%s288_s28 + $0x8] sm:$0xff]  ;;  %v340_v19 = vmul.f32 %v611_v9, %v328_v16  ;;  %v403_v22 = vld [vmem:[%s697_s5 + $0x20] sm:$0xff] }
  0x14   : > { %v338_v20 = vmul.f32 %v611_v9, %v326_v17  ;;  %v336_v21 = vmul.f32 %v611_v9, %v324_v18  ;;  %v330_v27 = vld [vmem:[%s288_s28 + $0x38] sm:$0xff]  ;;  %v329_v28 = vld [vmem:[%s288_s28 + $0x30] sm:$0xff]  ;;  %v404_v31 = vld [vmem:[%s697_s5 + $0x28] sm:$0xff] }
  0x15   : > { %v342_v29 = vmul.f32 %v611_v9, %v330_v27  ;;  %v341_v30 = vmul.f32 %v611_v9, %v329_v28  ;;  %v401_v36 = vld [vmem:[%s697_s5 + $0x10] sm:$0xff]  ;;  %v399_v38 = vld [vmem:[%s697_s5] sm:$0xff]  ;;  %v402_v46 = vld [vmem:[%s697_s5 + $0x18] sm:$0xff] }
  0x16   : > { %v400_v48 = vld [vmem:[%s697_s5 + $0x8] sm:$0xff]  ;;  %v406_v56 = vld [vmem:[%s697_s5 + $0x38] sm:$0xff]  ;;  %v405_v58 = vld [vmem:[%s697_s5 + $0x30] sm:$0xff] }
  0x18   : > { %368 = vperm.xlu1 %609, %v346_v4   ;;  %358 = vperm.xlu0 %608, %v344_v5  }
  0x19   : > { %378 = vperm.xlu2 %610, %v348_v6  }
  0x20   : > { %388 = vperm.xlu1 %609, %v350_v7   ;;  %383 = vperm.xlu0 %608, %v349_v8  }
  0x6b   : > { %v374_v23 = vpop.permute.xlu2 %373 }
  0x6c   : > { %v395_v24 = vmul.f32 %v374_v23, %v339_v11 }
  0x6e   : > { %v411_v25 = vadd.f32 %v403_v22, %v395_v24 }
  0x70   : > { %v419_v26 = vmax.f32 %v411_v25, 0.0 }
  0x72   : > { %428 = vst.msk [vmem:[%s704_s8 + $0x20] sm:$0xff] %vm423_vm0, %v419_v26 }
  0x73   : > { %v379_v32 = vpop.permute.xlu2 %378 }
  0x74   : > { %v396_v33 = vmul.f32 %v379_v32, %v340_v19 }
  0x76   : > { %v412_v34 = vadd.f32 %v404_v31, %v396_v33 }
  0x78   : > { %v420_v35 = vmax.f32 %v412_v34, 0.0 }
  0x7a   : > { %429 = vst.msk [vmem:[%s704_s8 + $0x28] sm:$0xff] %vm423_vm0, %v420_v35 }
  0x82   : > { %v364_v37 = vpop.permute.xlu1 %363  ;;  %v354_v39 = vpop.permute.xlu0 %353 }
  0x83   : > { %v393_v40 = vmul.f32 %v364_v37, %v337_v14  ;;  %v391_v41 = vmul.f32 %v354_v39, %v335_v15 }
  0x85   : > { %v409_v42 = vadd.f32 %v401_v36, %v393_v40  ;;  %v407_v43 = vadd.f32 %v399_v38, %v391_v41 }
  0x87   : > { %v417_v44 = vmax.f32 %v409_v42, 0.0  ;;  %v415_v45 = vmax.f32 %v407_v43, 0.0 }
  0x89   : > { %426 = vst.msk [vmem:[%s704_s8 + $0x10] sm:$0xff] %vm423_vm0, %v417_v44 }
  0x8a   : > { %424 = vst.msk [vmem:[%s704_s8] sm:$0xff] %vm423_vm0, %v415_v45  ;;  %v369_v47 = vpop.permute.xlu1 %368  ;;  %v359_v49 = vpop.permute.xlu0 %358 }
  0x8b   : > { %v394_v50 = vmul.f32 %v369_v47, %v338_v20  ;;  %v392_v51 = vmul.f32 %v359_v49, %v336_v21 }
  0x8d   : > { %v410_v52 = vadd.f32 %v402_v46, %v394_v50  ;;  %v408_v53 = vadd.f32 %v400_v48, %v392_v51 }
  0x8f   : > { %v418_v54 = vmax.f32 %v410_v52, 0.0  ;;  %v416_v55 = vmax.f32 %v408_v53, 0.0 }
  0x91   : > { %427 = vst.msk [vmem:[%s704_s8 + $0x18] sm:$0xff] %vm423_vm0, %v418_v54 }
  0x92   : > { %425 = vst.msk [vmem:[%s704_s8 + $0x8] sm:$0xff] %vm423_vm0, %v416_v55  ;;  %v389_v57 = vpop.permute.xlu1 %388  ;;  %v384_v59 = vpop.permute.xlu0 %383 }
  0x93   : > { %v398_v60 = vmul.f32 %v389_v57, %v342_v29  ;;  %v397_v61 = vmul.f32 %v384_v59, %v341_v30 }
  0x95   : > { %v414_v62 = vadd.f32 %v406_v56, %v398_v60  ;;  %v413_v63 = vadd.f32 %v405_v58, %v397_v61 }
  0x97   : > { %v422_v0 = vmax.f32 %v414_v62, 0.0  ;;  %v421_v1 = vmax.f32 %v413_v63, 0.0 }
  0x99   : > { %431 = vst.msk [vmem:[%s704_s8 + $0x38] sm:$0xff] %vm423_vm0, %v422_v0 }
  0x9a   : > { %430 = vst.msk [vmem:[%s704_s8 + $0x30] sm:$0xff] %vm423_vm0, %v421_v1 }
  0x9b PF: > { %s14_s17 = sadd.s32 1, %s634_s17   ;;  %s743_s15 = smov %s630_s16 }
  0x9c   : > { %p11_p5 = scmp.ge.s32.totalorder %s14_s17, 4   ;;  %s744_s16 = smov %s746_s18 }
  0x9e   :  { %13 = sbr.rel (!%p11_p5) target bundleno = 2 (0x2), region = 75 }

// kernel: resnet18_attention_forward.45
= control target key start
LH: loop header
LB: loop body
LE: loop exit
PB: predicated region body
PF: predicated region fallthrough
CT: control target
= control target key end

     0   :  { %s883_s12 = smov 0   ;;  %s885_s13 = smov 0   ;;  %s1041_s0 = inlined_call_operand.vmem [shape: bf16[32,768], index: 0, kind: input, shape index: {}]   ;;  %s1042_s1 = inlined_call_operand.vmem [shape: bf16[768,128], index: 1, kind: input, shape index: {}]   ;;  %s1043_s2 = inlined_call_operand.vmem [shape: f32[1,128], index: 2, kind: input, shape index: {}]   ;;  %s1044_s3 = inlined_call_operand.vmem [shape: f32[32,128], index: 3, kind: output, shape index: {}]  }
   0x1   :  { %s887_s14 = smov 0   ;;  %s889_s15 = smov 0  }
   0x2   :  { %s891_s16 = smov 0  }
   0x3 LB: > { %s25_s17 = sadd.s32 1, %s856_s15  ;;  %p48_p1 = scmp.ne.s32.totalorder %s848_s13, %s844_s12  ;;  %s860_s16 = sphi %s891_s16, %s13_s16   ;;  %s856_s15 = sphi %s889_s15, %s1048_s15   ;;  %s852_s14 = sphi %s887_s14, %s1047_s14   ;;  %s848_s13 = sphi %s885_s13, %s1046_s13   ;;  %s844_s12 = sphi %s883_s12, %s1045_s12  }
   0x4   : > { %p26_p0 = scmp.ge.s32.totalorder %s25_s17, 3  ;;  %p49_p2 = scmp.eq.s32.totalorder %s860_s16, 0 }
   0x5   : > { %s41_s19 = sadd.s32 1, %s848_s13  ;;  %p649_p5 = scmp.ge.s32.totalorder %s860_s16, 3 }
   0x6   : > { %s1050_s17 = smov (%p26_p0, %s25_s17), 0  ;;  %p50_p3 = por %p49_p2, %p48_p1 }
   0x7   : > { %s37_s18 = ssub.s32 %s856_s15, %s1050_s17  ;;  %162 = sbr.rel (%p649_p5) target bundleno = 20 (0x14), region = 20 }
   0x8   : > { %p39_p4 = scmp.eq.s32.totalorder %s37_s18, 0 }
   0xa   : > { %s918_s20 = scalar_select %p39_p4, %s848_s13, %s41_s19  }
   0xc   : > { %165 = sbr.rel (!%p50_p3) target bundleno = 20 (0x14), region = 24  ;;  %s167_s21 = sand.u32 (%p50_p3), 1, %s848_s13  }
   0xd   : > { %s743_s22 = sshll.u32 (%p50_p3), %s856_s15, 3  ;;  %s650_s23 = sshll.u32 (%p50_p3), %s167_s21, 5 }
   0xe   : > { %s175_s26 = scalar_lea.vmem (%p50_p3), %s1041_s0, %s743_s22  ;;  %s169_s27 = scalar_lea.vmem (%p50_p3), [#allocation2], %s650_s23 }
   0xf   : > { %v210_v0 = vld [vmem:[%s175_s26] sm:$0xff] (%p50_p3)  ;;  %v212_v1 = vld [vmem:[%s175_s26 + $0x18] sm:$0xff] (%p50_p3)  ;;  %v214_v2 = vld [vmem:[%s175_s26 + $0x30] sm:$0xff] (%p50_p3) }
  0x10   : > { %211 = vst [vmem:[%s169_s27] sm:$0xff] (%p50_p3), %v210_v0  ;;  %v216_v3 = vld [vmem:[%s175_s26 + $0x48] sm:$0xff] (%p50_p3) }
  0x11   : > { %213 = vst [vmem:[%s169_s27 + $0x8] sm:$0xff] %v212_v1 }
  0x12   : > { %215 = vst [vmem:[%s169_s27 + $0x10] sm:$0xff] %v214_v2 }
  0x13   : > { %217 = vst [vmem:[%s169_s27 + $0x18] sm:$0xff] %v216_v3 }
  0x14 PF: > { %p653_p6 = scmp.ge.s32.totalorder %s860_s16, 1  ;;  %p234_p7 = scmp.lt.s32.totalorder %s860_s16, 4 }
  0x16   : > { %p235_p8 = pnand %p653_p6, %p234_p7 }
  0x17   : > { %s241_s28 = sand.u32 (!%p235_p8), 1, %s844_s12   ;;  %s655_s29 = sshll.u32 (!%p235_p8), %s852_s14, 5 }
  0x18   : > { %238 = sbr.rel (%p235_p8) target bundleno = 229 (0xe5), region = 66  ;;  %s654_s30 = sshll.u32 (!%p235_p8), %s241_s28, 5 }
  0x19   : > { %p281_p9 = scmp.lt.s32.totalorder (!%p235_p8), %s655_s29, 95  ;;  %s935_s8 = scalar_lea.vmem (!%p235_p8), [#allocation2], %s654_s30 }
  0x1a   : > { %p657_p10 = scmp.ne.s32.totalorder (!%p235_p8), %s852_s14, 0 }
  0x1d   : > { %s1052_s29 = smov (!%p281_p9, %s655_s29), 95  ;;  %304 = sbr.rel (%p657_p10) target bundleno = 39 (0x27), region = 74 }
  0x1e   : > { %s656_s4 = sshll.u32 %s1052_s29, 2 }
  0x1f   : > { %s933_s7 = scalar_lea.vmem %s1042_s1, %s656_s4 }
  0x22   : > { %v862_v4 = vmov 0.0  }
  0x23   : > { %305 = vst [vmem:[%s1044_s3] sm:$0xff] %v862_v4 }
  0x24   : > { %306 = vst [vmem:[%s1044_s3 + $0x8] sm:$0xff] %v862_v4 }
  0x25   : > { %307 = vst [vmem:[%s1044_s3 + $0x10] sm:$0xff] %v862_v4 }
  0x26   : > { %308 = vst [vmem:[%s1044_s3 + $0x18] sm:$0xff] %v862_v4 }
  0x27 PF: > { %v755_v5 = vld [vmem:[%s933_s7 + $0x38] sm:$0xff]  ;;  %v754_v7 = vld [vmem:[%s933_s7 + $0x30] sm:$0xff]  ;;  %v753_v9 = vld [vmem:[%s933_s7 + $0x28] sm:$0xff]  ;;  %p738_p11 = scmp.ne.s32.totalorder %s852_s14, 2 }
  0x28   : > { %v763_v6 = vld [vmem:[%s933_s7 + $0x78] sm:$0xff]  ;;  %465 = vmatpush.bf16.msra.mxu0 %v755_v5  ;;  %764 = vmatpush.bf16.msra.mxu2 %v755_v5  ;;  %v762_v8 = vld [vmem:[%s933_s7 + $0x70] sm:$0xff]  ;;  %v761_v10 = vld [vmem:[%s933_s7 + $0x68] sm:$0xff] }
  0x29   : > { %484 = vmatpush.bf16.msra.mxu1 %v763_v6  ;;  %772 = vmatpush.bf16.msra.mxu3 %v763_v6  ;;  %v752_v11 = vld [vmem:[%s933_s7 + $0x20] sm:$0xff]  ;;  %v751_v13 = vld [vmem:[%s933_s7 + $0x18] sm:$0xff]  ;;  %v750_v15 = vld [vmem:[%s933_s7 + $0x10] sm:$0xff] }
  0x2a   : > { %v760_v12 = vld [vmem:[%s933_s7 + $0x60] sm:$0xff]  ;;  %v759_v14 = vld [vmem:[%s933_s7 + $0x58] sm:$0xff]  ;;  %v758_v16 = vld [vmem:[%s933_s7 + $0x50] sm:$0xff] }
  0x2b   : > { %v749_v17 = vld [vmem:[%s933_s7 + $0x8] sm:$0xff]  ;;  %v748_v19 = vld [vmem:[%s933_s7] sm:$0xff]  ;;  %v668_v23 = vld [vmem:[%s935_s8 + $0x10] sm:$0xf] }
  0x2c   : > { %466 = vmatpush.bf16.msra.mxu0 %v754_v7  ;;  %765 = vmatpush.bf16.msra.mxu2 %v754_v7  ;;  %v757_v18 = vld [vmem:[%s933_s7 + $0x48] sm:$0xff]  ;;  %v756_v20 = vld [vmem:[%s933_s7 + $0x40] sm:$0xff]  ;;  %v747_v24 = vld [vmem:[%s935_s8 + $0x14] sm:$0xf0] }
  0x2d   : > { %485 = vmatpush.bf16.msra.mxu1 %v762_v8  ;;  %773 = vmatpush.bf16.msra.mxu3 %v762_v8  ;;  %v660_v21 = vld [vmem:[%s935_s8] sm:$0xf]  ;;  %v745_v22 = vld [vmem:[%s935_s8 + $0x4] sm:$0xf0]  ;;  %v744_v25 = vld [vmem:[%s935_s8 + $0x4] sm:$0xf]  ;;  %v669_v30 = vor.u32 %v747_v24, %v668_v23 }
  0x2e   : > { %v662_v26 = vld [vmem:[%s935_s8 + $0x8] sm:$0xf0]  ;;  %v746_v27 = vld [vmem:[%s935_s8 + $0x14] sm:$0xf]  ;;  %v670_v28 = vld [vmem:[%s935_s8 + $0x18] sm:$0xf0]  ;;  %v661_v29 = vor.u32 %v745_v22, %v660_v21 }
  0x2f   : > { %v665_v31 = vor.u32 %v744_v25, %v662_v26  ;;  %v673_v32 = vor.u32 %v746_v27, %v670_v28  ;;  %v309_v34 = vld [vmem:[%s1044_s3] sm:$0xff]  ;;  %v311_v39 = vld [vmem:[%s1044_s3 + $0x10] sm:$0xff]  ;;  %v310_v43 = vld [vmem:[%s1044_s3 + $0x8] sm:$0xff] }
  0x30   : > { %467 = vmatpush.bf16.msra.mxu0 %v753_v9  ;;  %766 = vmatpush.bf16.msra.mxu2 %v753_v9  ;;  %v312_v49 = vld [vmem:[%s1044_s3 + $0x18] sm:$0xff] }
  0x31   : > { %486 = vmatpush.bf16.msra.mxu1 %v761_v10  ;;  %774 = vmatpush.bf16.msra.mxu3 %v761_v10 }
  0x34   : > { %468 = vmatpush.bf16.msra.mxu0 %v752_v11  ;;  %767 = vmatpush.bf16.msra.mxu2 %v752_v11 }
  0x35   : > { %487 = vmatpush.bf16.msra.mxu1 %v760_v12  ;;  %775 = vmatpush.bf16.msra.mxu3 %v760_v12 }
  0x38   : > { %469 = vmatpush.bf16.msra.mxu0 %v751_v13  ;;  %768 = vmatpush.bf16.msra.mxu2 %v751_v13 }
  0x39   : > { %488 = vmatpush.bf16.msra.mxu1 %v759_v14  ;;  %776 = vmatpush.bf16.msra.mxu3 %v759_v14 }
  0x3c   : > { %470 = vmatpush.bf16.msra.mxu0 %v750_v15  ;;  %769 = vmatpush.bf16.msra.mxu2 %v750_v15 }
  0x3d   : > { %489 = vmatpush.bf16.msra.mxu1 %v758_v16  ;;  %777 = vmatpush.bf16.msra.mxu3 %v758_v16 }
  0x40   : > { %471 = vmatpush.bf16.msra.mxu0 %v749_v17  ;;  %770 = vmatpush.bf16.msra.mxu2 %v749_v17 }
  0x41   : > { %490 = vmatpush.bf16.msra.mxu1 %v757_v18  ;;  %778 = vmatpush.bf16.msra.mxu3 %v757_v18 }
  0x44   : > { %472 = vmatpush.bf16.msra.mxu0 %v748_v19  ;;  %771 = vmatpush.bf16.msra.mxu2 %v748_v19 }
  0x45   : > { %491 = vmatpush.bf16.msra.mxu1 %v756_v20  ;;  %779 = vmatpush.bf16.msra.mxu3 %v756_v20 }
  0x47   : > { %473 = vmatmul.bf16.vlgmr.msra.gmra.mxu0 %v661_v29  ;;  %478 = vmatmul.bf16.vlgmr.msra.gmra.mxu2 %v669_v30 }
  0x48   : > { %492 = vmatmul.bf16.vlgmr.msra.gmra.mxu1 %v665_v31  ;;  %497 = vmatmul.bf16.vlgmr.msra.gmra.mxu3 %v673_v32 }
  0xc4   : > { %v474_v33 = vpop.f32.mrf.mxu0 }
  0xc5   : > { %v493_v35 = vpop.f32.mrf.mxu1 }
  0xc6   : > { %v494_v36 = vadd.f32 %v493_v35, %v474_v33 }
  0xc8   : > { %v503_v37 = vadd.f32 %v494_v36, %v309_v34 }
  0xca   : > { %507 = vst [vmem:[%s1044_s3] sm:$0xff] %v503_v37  ;;  %v479_v38 = vpop.f32.mrf.mxu2 }
  0xcb   : > { %v498_v40 = vpop.f32.mrf.mxu3 }
  0xcc   : > { %v499_v41 = vadd.f32 %v498_v40, %v479_v38  ;;  %v476_v42 = vpop.f32.mrf.mxu0 }
  0xcd   : > { %v495_v44 = vpop.f32.mrf.mxu1 }
  0xce   : > { %v505_v45 = vadd.f32 %v499_v41, %v311_v39  ;;  %v496_v46 = vadd.f32 %v495_v44, %v476_v42 }
  0xd0   : > { %509 = vst [vmem:[%s1044_s3 + $0x10] sm:$0xff] %v505_v45  ;;  %v504_v47 = vadd.f32 %v496_v46, %v310_v43 }
  0xd2   : > { %508 = vst [vmem:[%s1044_s3 + $0x8] sm:$0xff] %v504_v47  ;;  %v481_v48 = vpop.f32.mrf.mxu2 }
  0xd3   : > { %v500_v50 = vpop.f32.mrf.mxu3 }
  0xd4   : > { %v501_v51 = vadd.f32 %v500_v50, %v481_v48  ;;  %514 = sbr.rel (%p738_p11) target bundleno = 229 (0xe5), region = 78 }
  0xd6   : > { %v506_v52 = vadd.f32 %v501_v51, %v312_v49 }
  0xd8   : > { %510 = vst [vmem:[%s1044_s3 + $0x18] sm:$0xff] %v506_v52 }
  0xd9   : > { %v515_v53 = vld [vmem:[%s1044_s3] sm:$0xff]  ;;  %v516_v55 = vld [vmem:[%s1044_s3 + $0x8] sm:$0xff]  ;;  %v517_v56 = vld [vmem:[%s1044_s3 + $0x10] sm:$0xff] }
  0xda   : > { %v821_v54 = vld [vmem:[%s1043_s2] ss:$0 sm:$0xff] }
  0xdb   : > { %v523_v58 = vadd.f32 %v821_v54, %v515_v53  ;;  %v524_v59 = vadd.f32 %v821_v54, %v516_v55  ;;  %v525_v60 = vadd.f32 %v821_v54, %v517_v56 }
  0xdd   : > { %v527_v62 = vmax.f32 %v523_v58, 0.0  ;;  %v528_v63 = vmax.f32 %v524_v59, 0.0  ;;  %v529_v0 = vmax.f32 %v525_v60, 0.0 }
  0xdf   : > { %v518_v57 = vld [vmem:[%s1044_s3 + $0x18] sm:$0xff]  ;;  %531 = vst [vmem:[%s1044_s3] sm:$0xff] %v527_v62 }
  0xe0   : > { %v526_v61 = vadd.f32 %v821_v54, %v518_v57  ;;  %532 = vst [vmem:[%s1044_s3 + $0x8] sm:$0xff] %v528_v63 }
  0xe1   : > { %533 = vst [vmem:[%s1044_s3 + $0x10] sm:$0xff] %v529_v0 }
  0xe2   : > { %v530_v1 = vmax.f32 %v526_v61, 0.0 }
  0xe4   : > { %534 = vst [vmem:[%s1044_s3 + $0x18] sm:$0xff] %v530_v1 }
  0xe5 PF: > { %s13_s16 = sadd.s32 1, %s860_s16   ;;  %s1045_s12 = smov %s848_s13 }
  0xe6   : > { %p10_p12 = scmp.ge.s32.totalorder %s13_s16, 5   ;;  %s1046_s13 = smov %s918_s20 }
  0xe7   : > { %s1047_s14 = smov %s856_s15  ;;  %s1048_s15 = smov %s1050_s17 }
  0xe8   :  { %12 = sbr.rel (!%p10_p12) target bundleno = 3 (0x3), region = 119 }

// kernel: resnet18_attention_forward.46
= control target key start
LH: loop header
LB: loop body
LE: loop exit
PB: predicated region body
PF: predicated region fallthrough
CT: control target
= control target key end

     0   :  { %s733_s12 = smov 0   ;;  %s735_s13 = smov 0   ;;  %s880_s0 = inlined_call_operand.vmem [shape: bf16[32,1152], index: 0, kind: input, shape index: {}]   ;;  %s881_s1 = inlined_call_operand.vmem [shape: bf16[1152,128], index: 1, kind: input, shape index: {}]   ;;  %s882_s2 = inlined_call_operand.vmem [shape: f32[1,128], index: 2, kind: input, shape index: {}]   ;;  %s883_s3 = inlined_call_operand.vmem [shape: f32[32,128], index: 3, kind: output, shape index: {}]  }
   0x1   :  { %s737_s14 = smov 0   ;;  %s739_s15 = smov 0  }
   0x2   :  { %s741_s16 = smov 0  }
   0x3 LB: > { %s25_s17 = sadd.s32 1, %s706_s15  ;;  %p48_p1 = scmp.ne.s32.totalorder %s698_s13, %s694_s12  ;;  %s710_s16 = sphi %s741_s16, %s13_s16   ;;  %s706_s15 = sphi %s739_s15, %s887_s15   ;;  %s702_s14 = sphi %s737_s14, %s886_s14   ;;  %s698_s13 = sphi %s735_s13, %s885_s13   ;;  %s694_s12 = sphi %s733_s12, %s884_s12  }
   0x4   : > { %p26_p0 = scmp.ge.s32.totalorder %s25_s17, 9  ;;  %p49_p2 = scmp.eq.s32.totalorder %s710_s16, 0 }
   0x5   : > { %s41_s19 = sadd.s32 1, %s698_s13  ;;  %p559_p5 = scmp.ge.s32.totalorder %s710_s16, 9 }
   0x6   : > { %s889_s17 = smov (%p26_p0, %s25_s17), 0  ;;  %p50_p3 = por %p49_p2, %p48_p1 }
   0x7   : > { %s37_s18 = ssub.s32 %s706_s15, %s889_s17  ;;  %162 = sbr.rel (%p559_p5) target bundleno = 20 (0x14), region = 20 }
   0x8   : > { %p39_p4 = scmp.eq.s32.totalorder %s37_s18, 0 }
   0xa   : > { %s768_s20 = scalar_select %p39_p4, %s698_s13, %s41_s19  }
   0xc   : > { %165 = sbr.rel (!%p50_p3) target bundleno = 20 (0x14), region = 24  ;;  %s167_s21 = sand.u32 (%p50_p3), 1, %s698_s13  }
   0xd   : > { %s561_s22 = sshll.u32 (%p50_p3), %s706_s15, 2  ;;  %s560_s23 = sshll.u32 (%p50_p3), %s167_s21, 4 }
   0xe   : > { %s174_s26 = scalar_lea.vmem (%p50_p3), %s880_s0, %s561_s22  ;;  %s169_s27 = scalar_lea.vmem (%p50_p3), [#allocation2], %s560_s23 }
   0xf   : > { %v191_v0 = vld [vmem:[%s174_s26] sm:$0xf] (%p50_p3)  ;;  %v193_v1 = vld [vmem:[%s174_s26 + $0x24] sm:$0xf] (%p50_p3)  ;;  %v195_v2 = vld [vmem:[%s174_s26 + $0x48] sm:$0xf] (%p50_p3) }
  0x10   : > { %192 = vst [vmem:[%s169_s27] sm:$0xf] (%p50_p3), %v191_v0  ;;  %v197_v3 = vld [vmem:[%s174_s26 + $0x6c] sm:$0xf] (%p50_p3) }
  0x11   : > { %194 = vst [vmem:[%s169_s27 + $0x4] sm:$0xf] %v193_v1 }
  0x12   : > { %196 = vst [vmem:[%s169_s27 + $0x8] sm:$0xf] %v195_v2 }
  0x13   : > { %198 = vst [vmem:[%s169_s27 + $0xc] sm:$0xf] %v197_v3 }
  0x14 PF: > { %p562_p6 = scmp.ge.s32.totalorder %s710_s16, 1  ;;  %p241_p7 = scmp.lt.s32.totalorder %s710_s16, 10 }
  0x16   : > { %p242_p8 = pnand %p562_p6, %p241_p7 }
  0x17   : > { %s248_s28 = sand.u32 (!%p242_p8), 1, %s694_s12   ;;  %s564_s29 = sshll.u32 (!%p242_p8), %s702_s14, 4 }
  0x18   : > { %245 = sbr.rel (%p242_p8) target bundleno = 219 (0xdb), region = 69  ;;  %s780_s30 = sshll.u32 (!%p242_p8), %s248_s28, 4 }
  0x19   : > { %p287_p9 = scmp.lt.s32.totalorder (!%p242_p8), %s564_s29, 143  ;;  %s250_s8 = scalar_lea.vmem (!%p242_p8), [#allocation2], %s780_s30 }
  0x1a   : > { %p566_p10 = scmp.ne.s32.totalorder (!%p242_p8), %s702_s14, 0 }
  0x1d   : > { %s891_s29 = smov (!%p287_p9, %s564_s29), 143  ;;  %310 = sbr.rel (%p566_p10) target bundleno = 39 (0x27), region = 77 }
  0x1e   : > { %s565_s4 = sshll.u32 %s891_s29, 2 }
  0x1f   : > { %s785_s7 = scalar_lea.vmem %s881_s1, %s565_s4 }
  0x22   : > { %v712_v4 = vmov 0.0  }
  0x23   : > { %311 = vst [vmem:[%s883_s3] sm:$0xff] %v712_v4 }
  0x24   : > { %312 = vst [vmem:[%s883_s3 + $0x8] sm:$0xff] %v712_v4 }
  0x25   : > { %313 = vst [vmem:[%s883_s3 + $0x10] sm:$0xff] %v712_v4 }
  0x26   : > { %314 = vst [vmem:[%s883_s3 + $0x18] sm:$0xff] %v712_v4 }
  0x27 PF: > { %v621_v5 = vld [vmem:[%s785_s7 + $0x38] sm:$0xff]  ;;  %v620_v6 = vld [vmem:[%s785_s7 + $0x30] sm:$0xff]  ;;  %v619_v7 = vld [vmem:[%s785_s7 + $0x28] sm:$0xff]  ;;  %p607_p11 = scmp.ne.s32.totalorder %s702_s14, 8 }
  0x28   : > { %399 = vmatpush.bf16.msra.mxu0 %v621_v5  ;;  %622 = vmatpush.bf16.msra.mxu1 %v621_v5  ;;  %v618_v8 = vld [vmem:[%s785_s7 + $0x20] sm:$0xff]  ;;  %v617_v9 = vld [vmem:[%s785_s7 + $0x18] sm:$0xff]  ;;  %v616_v10 = vld [vmem:[%s785_s7 + $0x10] sm:$0xff] }
  0x29   : > { %v615_v11 = vld [vmem:[%s785_s7 + $0x8] sm:$0xff]  ;;  %v614_v12 = vld [vmem:[%s785_s7] sm:$0xff] }
  0x2a   : > { %v612_v13 = vld [vmem:[%s250_s8] sm:$0xff]  ;;  %v613_v14 = vld [vmem:[%s250_s8 + $0x8] sm:$0xff] }
  0x2b   : > { %v315_v15 = vld [vmem:[%s883_s3] sm:$0xff]  ;;  %v316_v21 = vld [vmem:[%s883_s3 + $0x8] sm:$0xff] }
  0x2c   : > { %400 = vmatpush.bf16.msra.mxu0 %v620_v6  ;;  %623 = vmatpush.bf16.msra.mxu1 %v620_v6  ;;  %v317_v16 = vld [vmem:[%s883_s3 + $0x10] sm:$0xff] }
  0x2d   : > { %v318_v22 = vld [vmem:[%s883_s3 + $0x18] sm:$0xff] }
  0x30   : > { %401 = vmatpush.bf16.msra.mxu0 %v619_v7  ;;  %624 = vmatpush.bf16.msra.mxu1 %v619_v7 }
  0x34   : > { %402 = vmatpush.bf16.msra.mxu0 %v618_v8  ;;  %625 = vmatpush.bf16.msra.mxu1 %v618_v8 }
  0x38   : > { %403 = vmatpush.bf16.msra.mxu0 %v617_v9  ;;  %626 = vmatpush.bf16.msra.mxu1 %v617_v9 }
  0x3c   : > { %404 = vmatpush.bf16.msra.mxu0 %v616_v10  ;;  %627 = vmatpush.bf16.msra.mxu1 %v616_v10 }
  0x40   : > { %405 = vmatpush.bf16.msra.mxu0 %v615_v11  ;;  %628 = vmatpush.bf16.msra.mxu1 %v615_v11 }
  0x44   : > { %406 = vmatpush.bf16.msra.mxu0 %v614_v12  ;;  %629 = vmatpush.bf16.msra.mxu1 %v614_v12 }
  0x47   : > { %407 = vmatmul.bf16.vlgmr.msra.gmra.mxu0 %v612_v13  ;;  %412 = vmatmul.bf16.vlgmr.msra.gmra.mxu1 %v613_v14 }
  0xc4   : > { %v408_v17 = vpop.f32.mrf.mxu0  ;;  %v413_v18 = vpop.f32.mrf.mxu1 }
  0xc5   : > { %v418_v19 = vadd.f32 %v408_v17, %v315_v15  ;;  %v420_v20 = vadd.f32 %v413_v18, %v317_v16 }
  0xc7   : > { %422 = vst [vmem:[%s883_s3] sm:$0xff] %v418_v19 }
  0xc8   : > { %424 = vst [vmem:[%s883_s3 + $0x10] sm:$0xff] %v420_v20 }
  0xcc   : > { %v410_v23 = vpop.f32.mrf.mxu0  ;;  %v415_v24 = vpop.f32.mrf.mxu1  ;;  %429 = sbr.rel (%p607_p11) target bundleno = 219 (0xdb), region = 81 }
  0xcd   : > { %v419_v25 = vadd.f32 %v410_v23, %v316_v21  ;;  %v421_v26 = vadd.f32 %v415_v24, %v318_v22 }
  0xcf   : > { %423 = vst [vmem:[%s883_s3 + $0x8] sm:$0xff] %v419_v25 }
  0xd0   : > { %425 = vst [vmem:[%s883_s3 + $0x18] sm:$0xff] %v421_v26 }
  0xd1   : > { %v430_v27 = vld [vmem:[%s883_s3] sm:$0xff]  ;;  %v432_v30 = vld [vmem:[%s883_s3 + $0x10] sm:$0xff] }
  0xd2   : > { %v671_v28 = vld [vmem:[%s882_s2] ss:$0 sm:$0xff] }
  0xd3   : > { %v438_v32 = vadd.f32 %v671_v28, %v430_v27  ;;  %v440_v34 = vadd.f32 %v671_v28, %v432_v30 }
  0xd5   : > { %442 = vst [vmem:[%s883_s3] sm:$0xff] %v438_v32 }
  0xd6   : > { %v431_v29 = vld [vmem:[%s883_s3 + $0x8] sm:$0xff]  ;;  %444 = vst [vmem:[%s883_s3 + $0x10] sm:$0xff] %v440_v34 }
  0xd7   : > { %v433_v31 = vld [vmem:[%s883_s3 + $0x18] sm:$0xff]  ;;  %v439_v33 = vadd.f32 %v671_v28, %v431_v29 }
  0xd8   : > { %v441_v35 = vadd.f32 %v671_v28, %v433_v31 }
  0xd9   : > { %443 = vst [vmem:[%s883_s3 + $0x8] sm:$0xff] %v439_v33 }
  0xda   : > { %445 = vst [vmem:[%s883_s3 + $0x18] sm:$0xff] %v441_v35 }
  0xdb PF: > { %s13_s16 = sadd.s32 1, %s710_s16   ;;  %s884_s12 = smov %s698_s13 }
  0xdc   : > { %p10_p12 = scmp.ge.s32.totalorder %s13_s16, 11   ;;  %s885_s13 = smov %s768_s20 }
  0xdd   : > { %s886_s14 = smov %s706_s15  ;;  %s887_s15 = smov %s889_s17 }
  0xde   :  { %12 = sbr.rel (!%p10_p12) target bundleno = 3 (0x3), region = 122 }

// kernel: resnet18_attention_forward.47
= control target key start
LH: loop header
LB: loop body
LE: loop exit
PB: predicated region body
PF: predicated region fallthrough
CT: control target
= control target key end

     0   :  { %s405_s9 = smov 0   ;;  %s407_s10 = smov 0   ;;  %s441_s0 = inlined_call_operand.vmem [shape: f32[2,16,128], index: 0, kind: input, shape index: {}]   ;;  %s442_s1 = inlined_call_operand.vmem [shape: f32[2,1,128], index: 1, kind: input, shape index: {}]   ;;  %s443_s2 = inlined_call_operand.vmem [shape: f32[2,16,2], index: 2, kind: output, shape index: {}]  }
   0x1   :  { %s409_s11 = smov 0  }
   0x2 LB: > { %s24_s12 = sadd.s32 1, %s383_s10  ;;  %p328_p0 = scmp.ge.s32.totalorder %s387_s11, 1  ;;  %s387_s11 = sphi %s409_s11, %s12_s11   ;;  %s383_s10 = sphi %s407_s10, %s445_s10   ;;  %s379_s9 = sphi %s405_s9, %s444_s9  }
   0x3   : > { %p26_p1 = scmp.ge.s32.totalorder %s24_s12, 2  ;;  %p141_p2 = scmp.lt.s32.totalorder %s387_s11, 3 }
   0x5   : > { %s447_s12 = smov (%p26_p1, %s24_s12), 0  ;;  %p142_p3 = pnand %p328_p0, %p141_p2 }
   0x6   : > { %p175_p4 = scmp.lt.s32.totalorder (!%p142_p3), %s379_s9, 1 }
   0x7   : > { %145 = sbr.rel (%p142_p3) target bundleno = 146 (0x92), region = 28 }
   0xc   : > { %s449_s9 = smov (!%p175_p4, %s379_s9), 1  ;;  %v389_v5 = vmov 128.0   ;;  %vm222_vm1 = vcmask 7168   ;;  %vm225_vm2 = vcmask 15360  }
   0xd   : > { %s335_s13 = sshll.u32 %s449_s9, 4  ;;  %s186_s16 = scalar_lea.vmem %s442_s1, %s449_s9  ;;  %363 = vrcp.f32 %v389_v5 }
   0xe   : > { %s182_s19 = scalar_lea.vmem %s441_s0, %s335_s13  ;;  %v362_v0 = vld [vmem:[%s186_s16] ss:$0 sm:$0xff]  ;;  %s195_s22 = scalar_lea.vmem %s443_s2, %s335_s13 }
   0xf   : > { %v197_v1 = vld [vmem:[%s182_s19] sm:$0xff]  ;;  %v198_v3 = vld [vmem:[%s182_s19 + $0x8] sm:$0xff] }
  0x10   : > { %v203_v2 = vmul.f32 %v362_v0, %v197_v1  ;;  %v204_v4 = vmul.f32 %v362_v0, %v198_v3 }
  0x12   : > { %205 = vadd.xlane.f32.xlu0 %v203_v2  ;;  %218 = vmax.xlane.f32.xlu1 %v203_v2 }
  0x13   : > { %v364_v6 = vpop.eup %363 }
  0x14   : > { %v210_v7 = vmul.f32 128.0, %v364_v6  ;;  %vm214_vm0 = vweird.f32 %v364_v6 }
  0x16   : > { %v211_v8 = vsub.f32 1.0, %v210_v7 }
  0x18   : > { %v212_v9 = vmul.f32 %v364_v6, %v211_v8 }
  0x1a   : > { %207 = vadd.xlane.f32.xlu0 %v204_v4  ;;  %220 = vmax.xlane.f32.xlu1 %v204_v4  ;;  %v213_v10 = vadd.f32 %v364_v6, %v212_v9 }
  0x1c   : > { %v215_v11 = vsel %vm214_vm0, %v364_v6, %v213_v10 }
  0x85   : > { %v206_v12 = vpop.xlane.xlu0 %205  ;;  %v219_v13 = vpop.xlane.xlu1 %218 }
  0x86   : > { %v216_v14 = vmul.f32 %v215_v11, %v206_v12 }
  0x88   : > { %v223_v15 = vsel %vm222_vm1, %v216_v14, %v219_v13 }
  0x89   : > { %226 = vst.msk [vmem:[%s195_s22] sm:$0xff] %vm225_vm2, %v223_v15 }
  0x8d   : > { %v208_v16 = vpop.xlane.xlu0 %207  ;;  %v221_v17 = vpop.xlane.xlu1 %220 }
  0x8e   : > { %v217_v18 = vmul.f32 %v215_v11, %v208_v16 }
  0x90   : > { %v224_v19 = vsel %vm222_vm1, %v217_v18, %v221_v17 }
  0x91   : > { %227 = vst.msk [vmem:[%s195_s22 + $0x8] sm:$0xff] %vm225_vm2, %v224_v19 }
  0x92 PF: > { %s12_s11 = sadd.s32 1, %s387_s11   ;;  %s444_s9 = smov %s383_s10 }
  0x93   : > { %p9_p5 = scmp.ge.s32.totalorder %s12_s11, 4   ;;  %s445_s10 = smov %s447_s12 }
  0x95   :  { %11 = sbr.rel (!%p9_p5) target bundleno = 2 (0x2), region = 61 }

// kernel: resnet18_attention_forward.49
= control target key start
LH: loop header
LB: loop body
LE: loop exit
PB: predicated region body
PF: predicated region fallthrough
CT: control target
= control target key end

     0   :  { %s581_s15 = smov 0   ;;  %s583_s16 = smov 0   ;;  %s623_s0 = inlined_call_operand.vmem [shape: f32[2,16,128], index: 0, kind: input, shape index: {}]   ;;  %s624_s1 = inlined_call_operand.vmem [shape: f32[2,1,128], index: 1, kind: input, shape index: {}]   ;;  %s625_s2 = inlined_call_operand.vmem [shape: f32[2,16,1], index: 2, kind: input, shape index: {}]   ;;  %s626_s3 = inlined_call_operand.vmem [shape: f32[2,16,128], index: 3, kind: input, shape index: {}]   ;;  %s627_s4 = inlined_call_operand.vmem [shape: f32[2,16,128], index: 4, kind: output, shape index: {}]  }
   0x1   :  { %s585_s17 = smov 0  }
   0x2 LB: > { %s26_s18 = sadd.s32 1, %s549_s16  ;;  %p489_p0 = scmp.ge.s32.totalorder %s553_s17, 1  ;;  %s553_s17 = sphi %s585_s17, %s14_s17   ;;  %s549_s16 = sphi %s583_s16, %s629_s16   ;;  %s545_s15 = sphi %s581_s15, %s628_s15  }
   0x3   : > { %p28_p1 = scmp.ge.s32.totalorder %s26_s18, 2  ;;  %p225_p2 = scmp.lt.s32.totalorder %s553_s17, 3 }
   0x5   : > { %s631_s18 = smov (%p28_p1, %s26_s18), 0  ;;  %p226_p3 = pnand %p489_p0, %p225_p2 }
   0x6   : > { %p281_p4 = scmp.lt.s32.totalorder (!%p226_p3), %s545_s15, 1 }
   0x7   : > { %229 = sbr.rel (%p226_p3) target bundleno = 146 (0x92), region = 36 }
   0xc   : > { %v555_v0 = vmov 0   ;;  %s633_s15 = smov (!%p281_p4, %s545_s15), 1 }
   0xd   : > { %529 = vset.pattern.permute.xlu0 %v555_v0  ;;  %s500_s19 = sshll.u32 %s633_s15, 4  ;;  %s292_s22 = scalar_lea.vmem %s624_s1, %s633_s15 }
   0xe   : > { %s301_s25 = scalar_lea.vmem %s625_s2, %s500_s19  ;;  %v530_v3 = vld [vmem:[%s292_s22] ss:$0 sm:$0xff]  ;;  %s288_s28 = scalar_lea.vmem %s623_s0, %s500_s19 }
   0xf   : > { %v331_v1 = vld [vmem:[%s301_s25] sm:$0xff]  ;;  %v332_v2 = vld [vmem:[%s301_s25 + $0x8] sm:$0xff]  ;;  %s311_s5 = scalar_lea.vmem %s626_s3, %s500_s19  ;;  %s321_s8 = scalar_lea.vmem %s627_s4, %s500_s19 }
  0x10   : > { %335 = vperm.xlu0 %529, %v331_v1   ;;  %v323_v4 = vld [vmem:[%s288_s28] sm:$0xff]  ;;  %v324_v6 = vld [vmem:[%s288_s28 + $0x8] sm:$0xff] }
  0x11   : > { %v329_v5 = vmul.f32 %v530_v3, %v323_v4  ;;  %v330_v7 = vmul.f32 %v530_v3, %v324_v6  ;;  %v345_v8 = vld [vmem:[%s311_s5] sm:$0xff]  ;;  %v346_v13 = vld [vmem:[%s311_s5 + $0x8] sm:$0xff] }
  0x18   : > { %340 = vperm.xlu0 %529, %v332_v2  }
  0x82   : > { %v336_v9 = vpop.permute.xlu0 %335 }
  0x83   : > { %v343_v10 = vmul.f32 %v336_v9, %v329_v5 }
  0x85   : > { %v347_v11 = vadd.f32 %v345_v8, %v343_v10 }
  0x87   : > { %v349_v12 = vmax.f32 %v347_v11, 0.0 }
  0x89   : > { %351 = vst [vmem:[%s321_s8] sm:$0xff] %v349_v12 }
  0x8a   : > { %v341_v14 = vpop.permute.xlu0 %340 }
  0x8b   : > { %v344_v15 = vmul.f32 %v341_v14, %v330_v7 }
  0x8d   : > { %v348_v16 = vadd.f32 %v346_v13, %v344_v15 }
  0x8f   : > { %v350_v17 = vmax.f32 %v348_v16, 0.0 }
  0x91   : > { %352 = vst [vmem:[%s321_s8 + $0x8] sm:$0xff] %v350_v17 }
  0x92 PF: > { %s14_s17 = sadd.s32 1, %s553_s17   ;;  %s628_s15 = smov %s549_s16 }
  0x93   : > { %p11_p5 = scmp.ge.s32.totalorder %s14_s17, 4   ;;  %s629_s16 = smov %s631_s18 }
  0x95   :  { %13 = sbr.rel (!%p11_p5) target bundleno = 2 (0x2), region = 75 }

// kernel: resnet18_attention_forward.50
= control target key start
LH: loop header
LB: loop body
LE: loop exit
PB: predicated region body
PF: predicated region fallthrough
CT: control target
= control target key end

     0   :  { %s737_s12 = smov 0   ;;  %s739_s13 = smov 0   ;;  %s884_s0 = inlined_call_operand.vmem [shape: bf16[32,1152], index: 0, kind: input, shape index: {}]   ;;  %s885_s1 = inlined_call_operand.vmem [shape: bf16[1152,128], index: 1, kind: input, shape index: {}]   ;;  %s886_s2 = inlined_call_operand.vmem [shape: f32[1,128], index: 2, kind: input, shape index: {}]   ;;  %s887_s3 = inlined_call_operand.vmem [shape: f32[32,128], index: 3, kind: output, shape index: {}]  }
   0x1   :  { %s741_s14 = smov 0   ;;  %s743_s15 = smov 0  }
   0x2   :  { %s745_s16 = smov 0  }
   0x3 LB: > { %s25_s17 = sadd.s32 1, %s710_s15  ;;  %p48_p1 = scmp.ne.s32.totalorder %s702_s13, %s698_s12  ;;  %s714_s16 = sphi %s745_s16, %s13_s16   ;;  %s710_s15 = sphi %s743_s15, %s891_s15   ;;  %s706_s14 = sphi %s741_s14, %s890_s14   ;;  %s702_s13 = sphi %s739_s13, %s889_s13   ;;  %s698_s12 = sphi %s737_s12, %s888_s12  }
   0x4   : > { %p26_p0 = scmp.ge.s32.totalorder %s25_s17, 9  ;;  %p49_p2 = scmp.eq.s32.totalorder %s714_s16, 0 }
   0x5   : > { %s41_s19 = sadd.s32 1, %s702_s13  ;;  %p563_p5 = scmp.ge.s32.totalorder %s714_s16, 9 }
   0x6   : > { %s893_s17 = smov (%p26_p0, %s25_s17), 0  ;;  %p50_p3 = por %p49_p2, %p48_p1 }
   0x7   : > { %s37_s18 = ssub.s32 %s710_s15, %s893_s17  ;;  %162 = sbr.rel (%p563_p5) target bundleno = 20 (0x14), region = 20 }
   0x8   : > { %p39_p4 = scmp.eq.s32.totalorder %s37_s18, 0 }
   0xa   : > { %s772_s20 = scalar_select %p39_p4, %s702_s13, %s41_s19  }
   0xc   : > { %165 = sbr.rel (!%p50_p3) target bundleno = 20 (0x14), region = 24  ;;  %s167_s21 = sand.u32 (%p50_p3), 1, %s702_s13  }
   0xd   : > { %s565_s22 = sshll.u32 (%p50_p3), %s710_s15, 2  ;;  %s564_s23 = sshll.u32 (%p50_p3), %s167_s21, 4 }
   0xe   : > { %s174_s26 = scalar_lea.vmem (%p50_p3), %s884_s0, %s565_s22  ;;  %s169_s27 = scalar_lea.vmem (%p50_p3), [#allocation2], %s564_s23 }
   0xf   : > { %v191_v0 = vld [vmem:[%s174_s26] sm:$0xf] (%p50_p3)  ;;  %v193_v1 = vld [vmem:[%s174_s26 + $0x24] sm:$0xf] (%p50_p3)  ;;  %v195_v2 = vld [vmem:[%s174_s26 + $0x48] sm:$0xf] (%p50_p3) }
  0x10   : > { %192 = vst [vmem:[%s169_s27] sm:$0xf] (%p50_p3), %v191_v0  ;;  %v197_v3 = vld [vmem:[%s174_s26 + $0x6c] sm:$0xf] (%p50_p3) }
  0x11   : > { %194 = vst [vmem:[%s169_s27 + $0x4] sm:$0xf] %v193_v1 }
  0x12   : > { %196 = vst [vmem:[%s169_s27 + $0x8] sm:$0xf] %v195_v2 }
  0x13   : > { %198 = vst [vmem:[%s169_s27 + $0xc] sm:$0xf] %v197_v3 }
  0x14 PF: > { %p566_p6 = scmp.ge.s32.totalorder %s714_s16, 1  ;;  %p241_p7 = scmp.lt.s32.totalorder %s714_s16, 10 }
  0x16   : > { %p242_p8 = pnand %p566_p6, %p241_p7 }
  0x17   : > { %s248_s28 = sand.u32 (!%p242_p8), 1, %s698_s12   ;;  %s568_s29 = sshll.u32 (!%p242_p8), %s706_s14, 4 }
  0x18   : > { %245 = sbr.rel (%p242_p8) target bundleno = 221 (0xdd), region = 69  ;;  %s784_s30 = sshll.u32 (!%p242_p8), %s248_s28, 4 }
  0x19   : > { %p287_p9 = scmp.lt.s32.totalorder (!%p242_p8), %s568_s29, 143  ;;  %s250_s8 = scalar_lea.vmem (!%p242_p8), [#allocation2], %s784_s30 }
  0x1a   : > { %p570_p10 = scmp.ne.s32.totalorder (!%p242_p8), %s706_s14, 0 }
  0x1d   : > { %s895_s29 = smov (!%p287_p9, %s568_s29), 143  ;;  %310 = sbr.rel (%p570_p10) target bundleno = 39 (0x27), region = 77 }
  0x1e   : > { %s569_s4 = sshll.u32 %s895_s29, 2 }
  0x1f   : > { %s789_s7 = scalar_lea.vmem %s885_s1, %s569_s4 }
  0x22   : > { %v716_v4 = vmov 0.0  }
  0x23   : > { %311 = vst [vmem:[%s887_s3] sm:$0xff] %v716_v4 }
  0x24   : > { %312 = vst [vmem:[%s887_s3 + $0x8] sm:$0xff] %v716_v4 }
  0x25   : > { %313 = vst [vmem:[%s887_s3 + $0x10] sm:$0xff] %v716_v4 }
  0x26   : > { %314 = vst [vmem:[%s887_s3 + $0x18] sm:$0xff] %v716_v4 }
  0x27 PF: > { %v625_v5 = vld [vmem:[%s789_s7 + $0x38] sm:$0xff]  ;;  %v624_v6 = vld [vmem:[%s789_s7 + $0x30] sm:$0xff]  ;;  %v623_v7 = vld [vmem:[%s789_s7 + $0x28] sm:$0xff]  ;;  %p611_p11 = scmp.ne.s32.totalorder %s706_s14, 8 }
  0x28   : > { %399 = vmatpush.bf16.msra.mxu0 %v625_v5  ;;  %626 = vmatpush.bf16.msra.mxu1 %v625_v5  ;;  %v622_v8 = vld [vmem:[%s789_s7 + $0x20] sm:$0xff]  ;;  %v621_v9 = vld [vmem:[%s789_s7 + $0x18] sm:$0xff]  ;;  %v620_v10 = vld [vmem:[%s789_s7 + $0x10] sm:$0xff] }
  0x29   : > { %v619_v11 = vld [vmem:[%s789_s7 + $0x8] sm:$0xff]  ;;  %v618_v12 = vld [vmem:[%s789_s7] sm:$0xff] }
  0x2a   : > { %v616_v13 = vld [vmem:[%s250_s8] sm:$0xff]  ;;  %v617_v14 = vld [vmem:[%s250_s8 + $0x8] sm:$0xff] }
  0x2b   : > { %v315_v15 = vld [vmem:[%s887_s3] sm:$0xff]  ;;  %v316_v21 = vld [vmem:[%s887_s3 + $0x8] sm:$0xff] }
  0x2c   : > { %400 = vmatpush.bf16.msra.mxu0 %v624_v6  ;;  %627 = vmatpush.bf16.msra.mxu1 %v624_v6  ;;  %v317_v16 = vld [vmem:[%s887_s3 + $0x10] sm:$0xff] }
  0x2d   : > { %v318_v22 = vld [vmem:[%s887_s3 + $0x18] sm:$0xff] }
  0x30   : > { %401 = vmatpush.bf16.msra.mxu0 %v623_v7  ;;  %628 = vmatpush.bf16.msra.mxu1 %v623_v7 }
  0x34   : > { %402 = vmatpush.bf16.msra.mxu0 %v622_v8  ;;  %629 = vmatpush.bf16.msra.mxu1 %v622_v8 }
  0x38   : > { %403 = vmatpush.bf16.msra.mxu0 %v621_v9  ;;  %630 = vmatpush.bf16.msra.mxu1 %v621_v9 }
  0x3c   : > { %404 = vmatpush.bf16.msra.mxu0 %v620_v10  ;;  %631 = vmatpush.bf16.msra.mxu1 %v620_v10 }
  0x40   : > { %405 = vmatpush.bf16.msra.mxu0 %v619_v11  ;;  %632 = vmatpush.bf16.msra.mxu1 %v619_v11 }
  0x44   : > { %406 = vmatpush.bf16.msra.mxu0 %v618_v12  ;;  %633 = vmatpush.bf16.msra.mxu1 %v618_v12 }
  0x47   : > { %407 = vmatmul.bf16.vlgmr.msra.gmra.mxu0 %v616_v13  ;;  %412 = vmatmul.bf16.vlgmr.msra.gmra.mxu1 %v617_v14 }
  0xc4   : > { %v408_v17 = vpop.f32.mrf.mxu0  ;;  %v413_v18 = vpop.f32.mrf.mxu1 }
  0xc5   : > { %v418_v19 = vadd.f32 %v408_v17, %v315_v15  ;;  %v420_v20 = vadd.f32 %v413_v18, %v317_v16 }
  0xc7   : > { %422 = vst [vmem:[%s887_s3] sm:$0xff] %v418_v19 }
  0xc8   : > { %424 = vst [vmem:[%s887_s3 + $0x10] sm:$0xff] %v420_v20 }
  0xcc   : > { %v410_v23 = vpop.f32.mrf.mxu0  ;;  %v415_v24 = vpop.f32.mrf.mxu1  ;;  %429 = sbr.rel (%p611_p11) target bundleno = 221 (0xdd), region = 81 }
  0xcd   : > { %v419_v25 = vadd.f32 %v410_v23, %v316_v21  ;;  %v421_v26 = vadd.f32 %v415_v24, %v318_v22 }
  0xcf   : > { %423 = vst [vmem:[%s887_s3 + $0x8] sm:$0xff] %v419_v25 }
  0xd0   : > { %425 = vst [vmem:[%s887_s3 + $0x18] sm:$0xff] %v421_v26 }
  0xd1   : > { %v430_v27 = vld [vmem:[%s887_s3] sm:$0xff]  ;;  %v432_v30 = vld [vmem:[%s887_s3 + $0x10] sm:$0xff] }
  0xd2   : > { %v675_v28 = vld [vmem:[%s886_s2] ss:$0 sm:$0xff] }
  0xd3   : > { %v438_v32 = vadd.f32 %v675_v28, %v430_v27  ;;  %v440_v34 = vadd.f32 %v675_v28, %v432_v30 }
  0xd5   : > { %v442_v36 = vmax.f32 %v438_v32, 0.0  ;;  %v444_v38 = vmax.f32 %v440_v34, 0.0 }
  0xd6   : > { %v431_v29 = vld [vmem:[%s887_s3 + $0x8] sm:$0xff] }
  0xd7   : > { %v433_v31 = vld [vmem:[%s887_s3 + $0x18] sm:$0xff]  ;;  %v439_v33 = vadd.f32 %v675_v28, %v431_v29  ;;  %446 = vst [vmem:[%s887_s3] sm:$0xff] %v442_v36 }
  0xd8   : > { %v441_v35 = vadd.f32 %v675_v28, %v433_v31  ;;  %448 = vst [vmem:[%s887_s3 + $0x10] sm:$0xff] %v444_v38 }
  0xd9   : > { %v443_v37 = vmax.f32 %v439_v33, 0.0 }
  0xda   : > { %v445_v39 = vmax.f32 %v441_v35, 0.0 }
  0xdb   : > { %447 = vst [vmem:[%s887_s3 + $0x8] sm:$0xff] %v443_v37 }
  0xdc   : > { %449 = vst [vmem:[%s887_s3 + $0x18] sm:$0xff] %v445_v39 }
  0xdd PF: > { %s13_s16 = sadd.s32 1, %s714_s16   ;;  %s888_s12 = smov %s702_s13 }
  0xde   : > { %p10_p12 = scmp.ge.s32.totalorder %s13_s16, 11   ;;  %s889_s13 = smov %s772_s20 }
  0xdf   : > { %s890_s14 = smov %s710_s15  ;;  %s891_s15 = smov %s893_s17 }
  0xe0   :  { %12 = sbr.rel (!%p10_p12) target bundleno = 3 (0x3), region = 122 }

// kernel: resnet18_attention_forward.48
= control target key start
LH: loop header
LB: loop body
LE: loop exit
PB: predicated region body
PF: predicated region fallthrough
CT: control target
= control target key end

     0   :  { %s281_s1 = inlined_call_operand.vmem [shape: bf16[128,128], index: 1, kind: input, shape index: {}]   ;;  %s282_s2 = inlined_call_operand.vmem [shape: f32[1,128], index: 2, kind: input, shape index: {}]   ;;  %s283_s0 = inlined_call_operand.vmem [shape: bf16[32,128], index: 0, kind: input, shape index: {}]   ;;  %s284_s3 = inlined_call_operand.vmem [shape: f32[32,128], index: 3, kind: output, shape index: {}]  }
   0x1   :  { %v205_v0 = vld [vmem:[%s281_s1 + $0x38] sm:$0xff]  ;;  %v204_v1 = vld [vmem:[%s281_s1 + $0x30] sm:$0xff]  ;;  %v203_v2 = vld [vmem:[%s281_s1 + $0x28] sm:$0xff] }
   0x2   :  { %106 = vmatpush.bf16.msra.mxu0 %v205_v0  ;;  %206 = vmatpush.bf16.msra.mxu1 %v205_v0  ;;  %v202_v3 = vld [vmem:[%s281_s1 + $0x20] sm:$0xff]  ;;  %v201_v4 = vld [vmem:[%s281_s1 + $0x18] sm:$0xff]  ;;  %v200_v5 = vld [vmem:[%s281_s1 + $0x10] sm:$0xff] }
   0x3   :  { %v199_v6 = vld [vmem:[%s281_s1 + $0x8] sm:$0xff]  ;;  %v198_v7 = vld [vmem:[%s281_s1] sm:$0xff] }
   0x4   :  { %v196_v8 = vld [vmem:[%s283_s0] sm:$0xff]  ;;  %v197_v9 = vld [vmem:[%s283_s0 + $0x8] sm:$0xff] }
   0x5   :  { %v215_v10 = vld [vmem:[%s282_s2] ss:$0 sm:$0xff] }
   0x6   :  { %107 = vmatpush.bf16.msra.mxu0 %v204_v1  ;;  %207 = vmatpush.bf16.msra.mxu1 %v204_v1 }
   0xa   :  { %108 = vmatpush.bf16.msra.mxu0 %v203_v2  ;;  %208 = vmatpush.bf16.msra.mxu1 %v203_v2 }
   0xe   :  { %109 = vmatpush.bf16.msra.mxu0 %v202_v3  ;;  %209 = vmatpush.bf16.msra.mxu1 %v202_v3 }
  0x12   :  { %110 = vmatpush.bf16.msra.mxu0 %v201_v4  ;;  %210 = vmatpush.bf16.msra.mxu1 %v201_v4 }
  0x16   :  { %111 = vmatpush.bf16.msra.mxu0 %v200_v5  ;;  %211 = vmatpush.bf16.msra.mxu1 %v200_v5 }
  0x1a   :  { %112 = vmatpush.bf16.msra.mxu0 %v199_v6  ;;  %212 = vmatpush.bf16.msra.mxu1 %v199_v6 }
  0x1e   :  { %113 = vmatpush.bf16.msra.mxu0 %v198_v7  ;;  %213 = vmatpush.bf16.msra.mxu1 %v198_v7 }
  0x21   :  { %114 = vmatmul.bf16.vlgmr.msra.gmra.mxu0 %v196_v8  ;;  %119 = vmatmul.bf16.vlgmr.msra.gmra.mxu1 %v197_v9 }
  0x9e   :  { %v115_v11 = vpop.f32.mrf.mxu0  ;;  %v120_v12 = vpop.f32.mrf.mxu1 }
  0x9f   :  { %v144_v13 = vadd.f32 %v215_v10, %v115_v11  ;;  %v146_v14 = vadd.f32 %v215_v10, %v120_v12 }
  0xa1   :  { %148 = vst [vmem:[%s284_s3] sm:$0xff] %v144_v13 }
  0xa2   :  { %150 = vst [vmem:[%s284_s3 + $0x10] sm:$0xff] %v146_v14 }
  0xa6   :  { %v117_v15 = vpop.f32.mrf.mxu0  ;;  %v122_v16 = vpop.f32.mrf.mxu1 }
  0xa7   :  { %v145_v17 = vadd.f32 %v215_v10, %v117_v15  ;;  %v147_v18 = vadd.f32 %v215_v10, %v122_v16 }
  0xa9   :  { %149 = vst [vmem:[%s284_s3 + $0x8] sm:$0xff] %v145_v17 }
  0xaa   :  { %151 = vst [vmem:[%s284_s3 + $0x18] sm:$0xff] %v147_v18 }

// kernel: resnet18_attention_forward.54
= control target key start
LH: loop header
LB: loop body
LE: loop exit
PB: predicated region body
PF: predicated region fallthrough
CT: control target
= control target key end

     0   :  { %s822_s12 = smov 0   ;;  %s824_s13 = smov 0   ;;  %s991_s0 = inlined_call_operand.vmem [shape: bf16[16,1152], index: 0, kind: input, shape index: {}]   ;;  %s992_s1 = inlined_call_operand.vmem [shape: bf16[1152,256], index: 1, kind: input, shape index: {}]   ;;  %s993_s2 = inlined_call_operand.vmem [shape: f32[1,256], index: 2, kind: input, shape index: {}]   ;;  %s994_s3 = inlined_call_operand.vmem [shape: f32[16,256], index: 3, kind: output, shape index: {}]  }
   0x1   :  { %s826_s14 = smov 0   ;;  %s828_s15 = smov 0  }
   0x2   :  { %s830_s16 = smov 0  }
   0x3 LB: > { %s25_s17 = sadd.s32 1, %s795_s15  ;;  %p48_p1 = scmp.ne.s32.totalorder %s787_s13, %s783_s12  ;;  %s799_s16 = sphi %s830_s16, %s13_s16   ;;  %s795_s15 = sphi %s828_s15, %s998_s15   ;;  %s791_s14 = sphi %s826_s14, %s997_s14   ;;  %s787_s13 = sphi %s824_s13, %s996_s13   ;;  %s783_s12 = sphi %s822_s12, %s995_s12  }
   0x4   : > { %p26_p0 = scmp.ge.s32.totalorder %s25_s17, 9  ;;  %p49_p2 = scmp.eq.s32.totalorder %s799_s16, 0 }
   0x5   : > { %s41_s19 = sadd.s32 1, %s787_s13  ;;  %p620_p5 = scmp.ge.s32.totalorder %s799_s16, 9 }
   0x6   : > { %s1000_s17 = smov (%p26_p0, %s25_s17), 0  ;;  %p50_p3 = por %p49_p2, %p48_p1 }
   0x7   : > { %s37_s18 = ssub.s32 %s795_s15, %s1000_s17  ;;  %164 = sbr.rel (%p620_p5) target bundleno = 18 (0x12), region = 20 }
   0x8   : > { %p39_p4 = scmp.eq.s32.totalorder %s37_s18, 0 }
   0xa   : > { %s857_s20 = scalar_select %p39_p4, %s787_s13, %s41_s19  }
   0xc   : > { %167 = sbr.rel (!%p50_p3) target bundleno = 18 (0x12), region = 24  ;;  %s169_s21 = sand.u32 (%p50_p3), 1, %s787_s13  }
   0xd   : > { %s622_s22 = sshll.u32 (%p50_p3), %s795_s15, 2  ;;  %s621_s23 = sshll.u32 (%p50_p3), %s169_s21, 3 }
   0xe   : > { %s176_s26 = scalar_lea.vmem (%p50_p3), %s991_s0, %s622_s22  ;;  %s171_s27 = scalar_lea.vmem (%p50_p3), [#allocation2], %s621_s23 }
   0xf   : > { %v193_v0 = vld [vmem:[%s176_s26] sm:$0xf] (%p50_p3)  ;;  %v195_v1 = vld [vmem:[%s176_s26 + $0x24] sm:$0xf] (%p50_p3) }
  0x10   : > { %194 = vst [vmem:[%s171_s27] sm:$0xf] (%p50_p3), %v193_v0 }
  0x11   : > { %196 = vst [vmem:[%s171_s27 + $0x4] sm:$0xf] %v195_v1 }
  0x12 PF: > { %p623_p6 = scmp.ge.s32.totalorder %s799_s16, 1  ;;  %p238_p7 = scmp.lt.s32.totalorder %s799_s16, 10 }
  0x14   : > { %p239_p8 = pnand %p623_p6, %p238_p7 }
  0x15   : > { %s245_s28 = sand.u32 (!%p239_p8), 1, %s783_s12   ;;  %s625_s29 = sshll.u32 (!%p239_p8), %s791_s14, 4 }
  0x16   : > { %242 = sbr.rel (%p239_p8) target bundleno = 221 (0xdd), region = 69  ;;  %s869_s30 = sshll.u32 (!%p239_p8), %s245_s28, 3 }
  0x17   : > { %p290_p9 = scmp.lt.s32.totalorder (!%p239_p8), %s625_s29, 143  ;;  %s247_s8 = scalar_lea.vmem (!%p239_p8), [#allocation2], %s869_s30 }
  0x18   : > { %p628_p10 = scmp.ne.s32.totalorder (!%p239_p8), %s791_s14, 0 }
  0x1b   : > { %s1002_s29 = smov (!%p290_p9, %s625_s29), 143  ;;  %320 = sbr.rel (%p628_p10) target bundleno = 37 (0x25), region = 77 }
  0x1c   : > { %s702_s4 = sshll.u32 %s1002_s29, 3 }
  0x1d   : > { %s874_s7 = scalar_lea.vmem %s992_s1, %s702_s4 }
  0x20   : > { %v801_v2 = vmov 0.0  }
  0x21   : > { %321 = vst [vmem:[%s994_s3] sm:$0xff] %v801_v2 }
  0x22   : > { %322 = vst [vmem:[%s994_s3 + $0x8] sm:$0xff] %v801_v2 }
  0x23   : > { %323 = vst [vmem:[%s994_s3 + $0x10] sm:$0xff] %v801_v2 }
  0x24   : > { %324 = vst [vmem:[%s994_s3 + $0x18] sm:$0xff] %v801_v2 }
  0x25 PF: > { %v691_v3 = vld [vmem:[%s874_s7 + $0x70] sm:$0xf]  ;;  %v719_v4 = vld [vmem:[%s874_s7 + $0x74] sm:$0xf0]  ;;  %v718_v5 = vld [vmem:[%s874_s7 + $0x74] sm:$0xf] }
  0x26   : > { %v692_v6 = vor.u32 %v719_v4, %v691_v3  ;;  %v693_v7 = vld [vmem:[%s874_s7 + $0x78] sm:$0xf0]  ;;  %v683_v8 = vld [vmem:[%s874_s7 + $0x60] sm:$0xf]  ;;  %v717_v9 = vld [vmem:[%s874_s7 + $0x64] sm:$0xf0] }
  0x27   : > { %v696_v10 = vor.u32 %v718_v5, %v693_v7  ;;  %v716_v11 = vld [vmem:[%s874_s7 + $0x64] sm:$0xf]  ;;  %v685_v12 = vld [vmem:[%s874_s7 + $0x68] sm:$0xf0]  ;;  %v684_v13 = vor.u32 %v717_v9, %v683_v8  ;;  %v675_v15 = vld [vmem:[%s874_s7 + $0x50] sm:$0xf] }
  0x28   : > { %433 = vmatpush.bf16.msra.mxu0 %v692_v6  ;;  %v688_v14 = vor.u32 %v716_v11, %v685_v12  ;;  %v715_v16 = vld [vmem:[%s874_s7 + $0x54] sm:$0xf0]  ;;  %v714_v17 = vld [vmem:[%s874_s7 + $0x54] sm:$0xf]  ;;  %v677_v18 = vld [vmem:[%s874_s7 + $0x58] sm:$0xf0] }
  0x29   : > { %447 = vmatpush.bf16.msra.mxu1 %v696_v10  ;;  %v676_v19 = vor.u32 %v715_v16, %v675_v15  ;;  %v680_v20 = vor.u32 %v714_v17, %v677_v18  ;;  %v667_v21 = vld [vmem:[%s874_s7 + $0x40] sm:$0xf]  ;;  %v713_v22 = vld [vmem:[%s874_s7 + $0x44] sm:$0xf0]  ;;  %v712_v23 = vld [vmem:[%s874_s7 + $0x44] sm:$0xf] }
  0x2a   : > { %v669_v24 = vld [vmem:[%s874_s7 + $0x48] sm:$0xf0]  ;;  %v668_v25 = vor.u32 %v713_v22, %v667_v21  ;;  %v659_v27 = vld [vmem:[%s874_s7 + $0x30] sm:$0xf]  ;;  %v711_v28 = vld [vmem:[%s874_s7 + $0x34] sm:$0xf0] }
  0x2b   : > { %v672_v26 = vor.u32 %v712_v23, %v669_v24  ;;  %v710_v29 = vld [vmem:[%s874_s7 + $0x34] sm:$0xf]  ;;  %v661_v30 = vld [vmem:[%s874_s7 + $0x38] sm:$0xf0]  ;;  %v660_v31 = vor.u32 %v711_v28, %v659_v27  ;;  %v651_v33 = vld [vmem:[%s874_s7 + $0x20] sm:$0xf] }
  0x2c   : > { %434 = vmatpush.bf16.msra.mxu0 %v684_v13  ;;  %v664_v32 = vor.u32 %v710_v29, %v661_v30  ;;  %v709_v34 = vld [vmem:[%s874_s7 + $0x24] sm:$0xf0]  ;;  %v708_v35 = vld [vmem:[%s874_s7 + $0x24] sm:$0xf]  ;;  %v653_v36 = vld [vmem:[%s874_s7 + $0x28] sm:$0xf0] }
  0x2d   : > { %448 = vmatpush.bf16.msra.mxu1 %v688_v14  ;;  %v652_v37 = vor.u32 %v709_v34, %v651_v33  ;;  %v656_v38 = vor.u32 %v708_v35, %v653_v36  ;;  %v643_v39 = vld [vmem:[%s874_s7 + $0x10] sm:$0xf]  ;;  %v707_v40 = vld [vmem:[%s874_s7 + $0x14] sm:$0xf0]  ;;  %v706_v41 = vld [vmem:[%s874_s7 + $0x14] sm:$0xf] }
  0x2e   : > { %v645_v42 = vld [vmem:[%s874_s7 + $0x18] sm:$0xf0]  ;;  %v644_v43 = vor.u32 %v707_v40, %v643_v39  ;;  %v635_v45 = vld [vmem:[%s874_s7] sm:$0xf]  ;;  %v705_v46 = vld [vmem:[%s874_s7 + $0x4] sm:$0xf0] }
  0x2f   : > { %v648_v44 = vor.u32 %v706_v41, %v645_v42  ;;  %v704_v47 = vld [vmem:[%s874_s7 + $0x4] sm:$0xf]  ;;  %v637_v48 = vld [vmem:[%s874_s7 + $0x8] sm:$0xf0]  ;;  %v636_v49 = vor.u32 %v705_v46, %v635_v45  ;;  %v327_v58 = vld [vmem:[%s994_s3 + $0x10] sm:$0xff]  ;;  %p697_p11 = scmp.ne.s32.totalorder %s791_s14, 8 }
  0x30   : > { %435 = vmatpush.bf16.msra.mxu0 %v676_v19  ;;  %v640_v50 = vor.u32 %v704_v47, %v637_v48  ;;  %v703_v51 = vld [vmem:[%s247_s8] sm:$0xff]  ;;  %v328_v59 = vld [vmem:[%s994_s3 + $0x18] sm:$0xff] }
  0x31   : > { %449 = vmatpush.bf16.msra.mxu1 %v680_v20  ;;  %v325_v52 = vld [vmem:[%s994_s3] sm:$0xff]  ;;  %v326_v53 = vld [vmem:[%s994_s3 + $0x8] sm:$0xff] }
  0x34   : > { %436 = vmatpush.bf16.msra.mxu0 %v668_v25 }
  0x35   : > { %450 = vmatpush.bf16.msra.mxu1 %v672_v26 }
  0x38   : > { %437 = vmatpush.bf16.msra.mxu0 %v660_v31 }
  0x39   : > { %451 = vmatpush.bf16.msra.mxu1 %v664_v32 }
  0x3c   : > { %438 = vmatpush.bf16.msra.mxu0 %v652_v37 }
  0x3d   : > { %452 = vmatpush.bf16.msra.mxu1 %v656_v38 }
  0x40   : > { %439 = vmatpush.bf16.msra.mxu0 %v644_v43 }
  0x41   : > { %453 = vmatpush.bf16.msra.mxu1 %v648_v44 }
  0x44   : > { %440 = vmatpush.bf16.msra.mxu0 %v636_v49 }
  0x45   : > { %454 = vmatpush.bf16.msra.mxu1 %v640_v50 }
  0x47   : > { %441 = vmatmul.bf16.vlgmr.msra.gmra.mxu0 %v703_v51 }
  0x48   : > { %455 = vmatmul.bf16.vlgmr.msra.gmra.mxu1 %v703_v51 }
  0xc4   : > { %v442_v54 = vpop.f32.mrf.mxu0 }
  0xc5   : > { %v461_v55 = vadd.f32 %v442_v54, %v325_v52  ;;  %v456_v56 = vpop.f32.mrf.mxu1 }
  0xc6   : > { %v462_v57 = vadd.f32 %v456_v56, %v326_v53 }
  0xc7   : > { %465 = vst [vmem:[%s994_s3] sm:$0xff] %v461_v55 }
  0xc8   : > { %466 = vst [vmem:[%s994_s3 + $0x8] sm:$0xff] %v462_v57 }
  0xcc   : > { %v444_v60 = vpop.f32.mrf.mxu0  ;;  %472 = sbr.rel (%p697_p11) target bundleno = 221 (0xdd), region = 81 }
  0xcd   : > { %v463_v61 = vadd.f32 %v444_v60, %v327_v58  ;;  %v458_v62 = vpop.f32.mrf.mxu1 }
  0xce   : > { %v464_v63 = vadd.f32 %v458_v62, %v328_v59 }
  0xcf   : > { %467 = vst [vmem:[%s994_s3 + $0x10] sm:$0xff] %v463_v61 }
  0xd0   : > { %468 = vst [vmem:[%s994_s3 + $0x18] sm:$0xff] %v464_v63 }
  0xd1   : > { %v473_v0 = vld [vmem:[%s994_s3] sm:$0xff]  ;;  %v474_v2 = vld [vmem:[%s994_s3 + $0x8] sm:$0xff] }
  0xd2   : > { %v477_v1 = vld [vmem:[%s993_s2] sm:$0x3] }
  0xd3   : > { %v479_v3 = vperm.slane %v477_v1, 0  ;;  %v480_v4 = vperm.slane %v477_v1, 1 }
  0xd5   : > { %v483_v7 = vadd.f32 %v479_v3, %v473_v0  ;;  %v484_v8 = vadd.f32 %v480_v4, %v474_v2 }
  0xd6   : > { %v475_v5 = vld [vmem:[%s994_s3 + $0x10] sm:$0xff] }
  0xd7   : > { %v476_v6 = vld [vmem:[%s994_s3 + $0x18] sm:$0xff]  ;;  %v485_v9 = vadd.f32 %v479_v3, %v475_v5  ;;  %v487_v11 = vmax.f32 %v483_v7, 0.0  ;;  %v488_v12 = vmax.f32 %v484_v8, 0.0 }
  0xd8   : > { %v486_v10 = vadd.f32 %v480_v4, %v476_v6 }
  0xd9   : > { %v489_v13 = vmax.f32 %v485_v9, 0.0  ;;  %491 = vst [vmem:[%s994_s3] sm:$0xff] %v487_v11 }
  0xda   : > { %v490_v14 = vmax.f32 %v486_v10, 0.0  ;;  %492 = vst [vmem:[%s994_s3 + $0x8] sm:$0xff] %v488_v12 }
  0xdb   : > { %493 = vst [vmem:[%s994_s3 + $0x10] sm:$0xff] %v489_v13 }
  0xdc   : > { %494 = vst [vmem:[%s994_s3 + $0x18] sm:$0xff] %v490_v14 }
  0xdd PF: > { %s13_s16 = sadd.s32 1, %s799_s16   ;;  %s995_s12 = smov %s787_s13 }
  0xde   : > { %p10_p12 = scmp.ge.s32.totalorder %s13_s16, 11   ;;  %s996_s13 = smov %s857_s20 }
  0xdf   : > { %s997_s14 = smov %s795_s15  ;;  %s998_s15 = smov %s1000_s17 }
  0xe0   :  { %12 = sbr.rel (!%p10_p12) target bundleno = 3 (0x3), region = 122 }

// kernel: resnet18_attention_forward.55
= control target key start
LH: loop header
LB: loop body
LE: loop exit
PB: predicated region body
PF: predicated region fallthrough
CT: control target
= control target key end

     0   :  { %s1028_s12 = smov 0   ;;  %s1030_s13 = smov 0   ;;  %s1230_s0 = inlined_call_operand.vmem [shape: bf16[16,2304], index: 0, kind: input, shape index: {}]   ;;  %s1231_s1 = inlined_call_operand.vmem [shape: bf16[2304,256], index: 1, kind: input, shape index: {}]   ;;  %s1232_s2 = inlined_call_operand.vmem [shape: f32[1,256], index: 2, kind: input, shape index: {}]   ;;  %s1233_s3 = inlined_call_operand.vmem [shape: f32[16,256], index: 3, kind: output, shape index: {}]  }
   0x1   :  { %s1032_s14 = smov 0   ;;  %s1034_s15 = smov 0  }
   0x2   :  { %s1036_s16 = smov 0  }
   0x3 LB: > { %s25_s17 = sadd.s32 1, %s1001_s15  ;;  %p48_p1 = scmp.ne.s32.totalorder %s993_s13, %s989_s12  ;;  %s1005_s16 = sphi %s1036_s16, %s13_s16   ;;  %s1001_s15 = sphi %s1034_s15, %s1237_s15   ;;  %s997_s14 = sphi %s1032_s14, %s1236_s14   ;;  %s993_s13 = sphi %s1030_s13, %s1235_s13   ;;  %s989_s12 = sphi %s1028_s12, %s1234_s12  }
   0x4   : > { %p26_p0 = scmp.ge.s32.totalorder %s25_s17, 9  ;;  %p49_p2 = scmp.eq.s32.totalorder %s1005_s16, 0 }
   0x5   : > { %s41_s19 = sadd.s32 1, %s993_s13  ;;  %p739_p5 = scmp.ge.s32.totalorder %s1005_s16, 9 }
   0x6   : > { %s1239_s17 = smov (%p26_p0, %s25_s17), 0  ;;  %p50_p3 = por %p49_p2, %p48_p1 }
   0x7   : > { %s37_s18 = ssub.s32 %s1001_s15, %s1239_s17  ;;  %164 = sbr.rel (%p739_p5) target bundleno = 18 (0x12), region = 20 }
   0x8   : > { %p39_p4 = scmp.eq.s32.totalorder %s37_s18, 0 }
   0xa   : > { %s1063_s20 = scalar_select %p39_p4, %s993_s13, %s41_s19  }
   0xc   : > { %167 = sbr.rel (!%p50_p3) target bundleno = 18 (0x12), region = 24  ;;  %s169_s21 = sand.u32 (%p50_p3), 1, %s993_s13  }
   0xd   : > { %s890_s22 = sshll.u32 (%p50_p3), %s1001_s15, 3  ;;  %s740_s23 = sshll.u32 (%p50_p3), %s169_s21, 4 }
   0xe   : > { %s177_s26 = scalar_lea.vmem (%p50_p3), %s1230_s0, %s890_s22  ;;  %s171_s27 = scalar_lea.vmem (%p50_p3), [#allocation2], %s740_s23 }
   0xf   : > { %v208_v0 = vld [vmem:[%s177_s26] sm:$0xff] (%p50_p3)  ;;  %v210_v1 = vld [vmem:[%s177_s26 + $0x48] sm:$0xff] (%p50_p3) }
  0x10   : > { %209 = vst [vmem:[%s171_s27] sm:$0xff] (%p50_p3), %v208_v0 }
  0x11   : > { %211 = vst [vmem:[%s171_s27 + $0x8] sm:$0xff] %v210_v1 }
  0x12 PF: > { %p743_p6 = scmp.ge.s32.totalorder %s1005_s16, 1  ;;  %p231_p7 = scmp.lt.s32.totalorder %s1005_s16, 10 }
  0x14   : > { %p232_p8 = pnand %p743_p6, %p231_p7 }
  0x15   : > { %s238_s28 = sand.u32 (!%p232_p8), 1, %s989_s12   ;;  %s745_s29 = sshll.u32 (!%p232_p8), %s997_s14, 5 }
  0x16   : > { %235 = sbr.rel (%p232_p8) target bundleno = 228 (0xe4), region = 66  ;;  %s744_s30 = sshll.u32 (!%p232_p8), %s238_s28, 4 }
  0x17   : > { %p284_p9 = scmp.lt.s32.totalorder (!%p232_p8), %s745_s29, 287  ;;  %s1080_s8 = scalar_lea.vmem (!%p232_p8), [#allocation2], %s744_s30 }
  0x18   : > { %p748_p10 = scmp.ne.s32.totalorder (!%p232_p8), %s997_s14, 0 }
  0x1b   : > { %s1241_s29 = smov (!%p284_p9, %s745_s29), 287  ;;  %314 = sbr.rel (%p748_p10) target bundleno = 37 (0x25), region = 74 }
  0x1c   : > { %s891_s4 = sshll.u32 %s1241_s29, 3 }
  0x1d   : > { %s1078_s7 = scalar_lea.vmem %s1231_s1, %s891_s4 }
  0x20   : > { %v1007_v2 = vmov 0.0  }
  0x21   : > { %315 = vst [vmem:[%s1233_s3] sm:$0xff] %v1007_v2 }
  0x22   : > { %316 = vst [vmem:[%s1233_s3 + $0x8] sm:$0xff] %v1007_v2 }
  0x23   : > { %317 = vst [vmem:[%s1233_s3 + $0x10] sm:$0xff] %v1007_v2 }
  0x24   : > { %318 = vst [vmem:[%s1233_s3 + $0x18] sm:$0xff] %v1007_v2 }
  0x25 PF: > { %v815_v3 = vld [vmem:[%s1078_s7 + $0x70] sm:$0xf]  ;;  %v909_v4 = vld [vmem:[%s1078_s7 + $0x74] sm:$0xf0]  ;;  %v908_v8 = vld [vmem:[%s1078_s7 + $0x74] sm:$0xf] }
  0x26   : > { %v879_v5 = vld [vmem:[%s1078_s7 + $0xf0] sm:$0xf]  ;;  %v816_v6 = vor.u32 %v909_v4, %v815_v3  ;;  %v925_v7 = vld [vmem:[%s1078_s7 + $0xf4] sm:$0xf0]  ;;  %v817_v9 = vld [vmem:[%s1078_s7 + $0x78] sm:$0xf0] }
  0x27   : > { %v880_v10 = vor.u32 %v925_v7, %v879_v5  ;;  %v820_v11 = vor.u32 %v908_v8, %v817_v9  ;;  %v924_v12 = vld [vmem:[%s1078_s7 + $0xf4] sm:$0xf]  ;;  %v881_v13 = vld [vmem:[%s1078_s7 + $0xf8] sm:$0xf0]  ;;  %v807_v14 = vld [vmem:[%s1078_s7 + $0x60] sm:$0xf] }
  0x28   : > { %527 = vmatpush.bf16.msra.mxu0 %v816_v6  ;;  %v884_v15 = vor.u32 %v924_v12, %v881_v13  ;;  %v907_v16 = vld [vmem:[%s1078_s7 + $0x64] sm:$0xf0]  ;;  %v871_v17 = vld [vmem:[%s1078_s7 + $0xe0] sm:$0xf]  ;;  %v906_v21 = vld [vmem:[%s1078_s7 + $0x64] sm:$0xf] }
  0x29   : > { %v923_v18 = vld [vmem:[%s1078_s7 + $0xe4] sm:$0xf0]  ;;  %541 = vmatpush.bf16.msra.mxu1 %v880_v10  ;;  %555 = vmatpush.bf16.msra.mxu2 %v820_v11  ;;  %v808_v19 = vor.u32 %v907_v16, %v807_v14  ;;  %v809_v22 = vld [vmem:[%s1078_s7 + $0x68] sm:$0xf0]  ;;  %v922_v23 = vld [vmem:[%s1078_s7 + $0xe4] sm:$0xf] }
  0x2a   : > { %v872_v20 = vor.u32 %v923_v18, %v871_v17  ;;  %569 = vmatpush.bf16.msra.mxu3 %v884_v15  ;;  %v812_v24 = vor.u32 %v906_v21, %v809_v22  ;;  %v873_v25 = vld [vmem:[%s1078_s7 + $0xe8] sm:$0xf0]  ;;  %v799_v26 = vld [vmem:[%s1078_s7 + $0x50] sm:$0xf]  ;;  %v905_v27 = vld [vmem:[%s1078_s7 + $0x54] sm:$0xf0] }
  0x2b   : > { %v876_v28 = vor.u32 %v922_v23, %v873_v25  ;;  %v863_v29 = vld [vmem:[%s1078_s7 + $0xd0] sm:$0xf]  ;;  %v921_v30 = vld [vmem:[%s1078_s7 + $0xd4] sm:$0xf0]  ;;  %v904_v31 = vld [vmem:[%s1078_s7 + $0x54] sm:$0xf]  ;;  %v800_v32 = vor.u32 %v905_v27, %v799_v26 }
  0x2c   : > { %528 = vmatpush.bf16.msra.mxu0 %v808_v19  ;;  %v801_v33 = vld [vmem:[%s1078_s7 + $0x58] sm:$0xf0]  ;;  %v920_v34 = vld [vmem:[%s1078_s7 + $0xd4] sm:$0xf]  ;;  %v864_v36 = vor.u32 %v921_v30, %v863_v29  ;;  %v791_v38 = vld [vmem:[%s1078_s7 + $0x40] sm:$0xf] }
  0x2d   : > { %v865_v35 = vld [vmem:[%s1078_s7 + $0xd8] sm:$0xf0]  ;;  %542 = vmatpush.bf16.msra.mxu1 %v872_v20  ;;  %556 = vmatpush.bf16.msra.mxu2 %v812_v24  ;;  %v804_v37 = vor.u32 %v904_v31, %v801_v33  ;;  %v903_v39 = vld [vmem:[%s1078_s7 + $0x44] sm:$0xf0]  ;;  %v855_v40 = vld [vmem:[%s1078_s7 + $0xc0] sm:$0xf] }
  0x2e   : > { %570 = vmatpush.bf16.msra.mxu3 %v876_v28  ;;  %v868_v41 = vor.u32 %v920_v34, %v865_v35  ;;  %v919_v42 = vld [vmem:[%s1078_s7 + $0xc4] sm:$0xf0]  ;;  %v902_v43 = vld [vmem:[%s1078_s7 + $0x44] sm:$0xf]  ;;  %v793_v44 = vld [vmem:[%s1078_s7 + $0x48] sm:$0xf0]  ;;  %v792_v47 = vor.u32 %v903_v39, %v791_v38 }
  0x2f   : > { %v918_v45 = vld [vmem:[%s1078_s7 + $0xc4] sm:$0xf]  ;;  %v857_v46 = vld [vmem:[%s1078_s7 + $0xc8] sm:$0xf0]  ;;  %v856_v48 = vor.u32 %v919_v42, %v855_v40  ;;  %v796_v49 = vor.u32 %v902_v43, %v793_v44  ;;  %v783_v50 = vld [vmem:[%s1078_s7 + $0x30] sm:$0xf] }
  0x30   : > { %529 = vmatpush.bf16.msra.mxu0 %v800_v32  ;;  %v901_v51 = vld [vmem:[%s1078_s7 + $0x34] sm:$0xf0]  ;;  %v847_v52 = vld [vmem:[%s1078_s7 + $0xb0] sm:$0xf]  ;;  %v860_v53 = vor.u32 %v918_v45, %v857_v46  ;;  %v900_v55 = vld [vmem:[%s1078_s7 + $0x34] sm:$0xf] }
  0x31   : > { %543 = vmatpush.bf16.msra.mxu1 %v864_v36  ;;  %557 = vmatpush.bf16.msra.mxu2 %v804_v37  ;;  %v917_v54 = vld [vmem:[%s1078_s7 + $0xb4] sm:$0xf0]  ;;  %v785_v56 = vld [vmem:[%s1078_s7 + $0x38] sm:$0xf0]  ;;  %v916_v57 = vld [vmem:[%s1078_s7 + $0xb4] sm:$0xf]  ;;  %v784_v59 = vor.u32 %v901_v51, %v783_v50 }
  0x32   : > { %571 = vmatpush.bf16.msra.mxu3 %v868_v41  ;;  %v849_v58 = vld [vmem:[%s1078_s7 + $0xb8] sm:$0xf0]  ;;  %v848_v60 = vor.u32 %v917_v54, %v847_v52  ;;  %v788_v61 = vor.u32 %v900_v55, %v785_v56  ;;  %v775_v62 = vld [vmem:[%s1078_s7 + $0x20] sm:$0xf]  ;;  %v899_v63 = vld [vmem:[%s1078_s7 + $0x24] sm:$0xf0] }
  0x33   : > { %v839_v0 = vld [vmem:[%s1078_s7 + $0xa0] sm:$0xf]  ;;  %v852_v1 = vor.u32 %v916_v57, %v849_v58  ;;  %v915_v2 = vld [vmem:[%s1078_s7 + $0xa4] sm:$0xf0]  ;;  %v898_v3 = vld [vmem:[%s1078_s7 + $0x24] sm:$0xf]  ;;  %v776_v7 = vor.u32 %v899_v63, %v775_v62 }
  0x34   : > { %530 = vmatpush.bf16.msra.mxu0 %v792_v47  ;;  %v777_v4 = vld [vmem:[%s1078_s7 + $0x28] sm:$0xf0]  ;;  %v914_v5 = vld [vmem:[%s1078_s7 + $0xa4] sm:$0xf]  ;;  %v840_v8 = vor.u32 %v915_v2, %v839_v0  ;;  %v767_v10 = vld [vmem:[%s1078_s7 + $0x10] sm:$0xf] }
  0x35   : > { %544 = vmatpush.bf16.msra.mxu1 %v856_v48  ;;  %558 = vmatpush.bf16.msra.mxu2 %v796_v49  ;;  %v841_v6 = vld [vmem:[%s1078_s7 + $0xa8] sm:$0xf0]  ;;  %v780_v9 = vor.u32 %v898_v3, %v777_v4  ;;  %v897_v11 = vld [vmem:[%s1078_s7 + $0x14] sm:$0xf0]  ;;  %v831_v12 = vld [vmem:[%s1078_s7 + $0x90] sm:$0xf] }
  0x36   : > { %572 = vmatpush.bf16.msra.mxu3 %v860_v53  ;;  %v844_v13 = vor.u32 %v914_v5, %v841_v6  ;;  %v913_v14 = vld [vmem:[%s1078_s7 + $0x94] sm:$0xf0]  ;;  %v896_v15 = vld [vmem:[%s1078_s7 + $0x14] sm:$0xf]  ;;  %v769_v16 = vld [vmem:[%s1078_s7 + $0x18] sm:$0xf0]  ;;  %v768_v19 = vor.u32 %v897_v11, %v767_v10 }
  0x37   : > { %v912_v17 = vld [vmem:[%s1078_s7 + $0x94] sm:$0xf]  ;;  %v833_v18 = vld [vmem:[%s1078_s7 + $0x98] sm:$0xf0]  ;;  %v832_v20 = vor.u32 %v913_v14, %v831_v12  ;;  %v772_v21 = vor.u32 %v896_v15, %v769_v16  ;;  %v759_v22 = vld [vmem:[%s1078_s7] sm:$0xf] }
  0x38   : > { %531 = vmatpush.bf16.msra.mxu0 %v784_v59  ;;  %v895_v23 = vld [vmem:[%s1078_s7 + $0x4] sm:$0xf0]  ;;  %v823_v24 = vld [vmem:[%s1078_s7 + $0x80] sm:$0xf]  ;;  %v836_v25 = vor.u32 %v912_v17, %v833_v18  ;;  %v894_v27 = vld [vmem:[%s1078_s7 + $0x4] sm:$0xf] }
  0x39   : > { %545 = vmatpush.bf16.msra.mxu1 %v848_v60  ;;  %559 = vmatpush.bf16.msra.mxu2 %v788_v61  ;;  %v911_v26 = vld [vmem:[%s1078_s7 + $0x84] sm:$0xf0]  ;;  %v761_v28 = vld [vmem:[%s1078_s7 + $0x8] sm:$0xf0]  ;;  %v910_v29 = vld [vmem:[%s1078_s7 + $0x84] sm:$0xf]  ;;  %v760_v31 = vor.u32 %v895_v23, %v759_v22 }
  0x3a   : > { %573 = vmatpush.bf16.msra.mxu3 %v852_v1  ;;  %v825_v30 = vld [vmem:[%s1078_s7 + $0x88] sm:$0xf0]  ;;  %v751_v32 = vld [vmem:[%s1080_s8] sm:$0xf]  ;;  %v893_v33 = vld [vmem:[%s1080_s8 + $0x4] sm:$0xf0]  ;;  %v824_v34 = vor.u32 %v911_v26, %v823_v24  ;;  %v764_v35 = vor.u32 %v894_v27, %v761_v28 }
  0x3b   : > { %v892_v36 = vld [vmem:[%s1080_s8 + $0x4] sm:$0xf]  ;;  %v753_v37 = vld [vmem:[%s1080_s8 + $0x8] sm:$0xf0]  ;;  %v828_v38 = vor.u32 %v910_v29, %v825_v30  ;;  %v752_v39 = vor.u32 %v893_v33, %v751_v32  ;;  %p885_p11 = scmp.ne.s32.totalorder %s997_s14, 8 }
  0x3c   : > { %532 = vmatpush.bf16.msra.mxu0 %v776_v7  ;;  %v756_v40 = vor.u32 %v892_v36, %v753_v37  ;;  %v319_v42 = vld [vmem:[%s1233_s3] sm:$0xff]  ;;  %v320_v47 = vld [vmem:[%s1233_s3 + $0x8] sm:$0xff]  ;;  %v321_v51 = vld [vmem:[%s1233_s3 + $0x10] sm:$0xff] }
  0x3d   : > { %546 = vmatpush.bf16.msra.mxu1 %v840_v8  ;;  %560 = vmatpush.bf16.msra.mxu2 %v780_v9  ;;  %v322_v57 = vld [vmem:[%s1233_s3 + $0x18] sm:$0xff] }
  0x3e   : > { %574 = vmatpush.bf16.msra.mxu3 %v844_v13 }
  0x40   : > { %533 = vmatpush.bf16.msra.mxu0 %v768_v19 }
  0x41   : > { %547 = vmatpush.bf16.msra.mxu1 %v832_v20  ;;  %561 = vmatpush.bf16.msra.mxu2 %v772_v21 }
  0x42   : > { %575 = vmatpush.bf16.msra.mxu3 %v836_v25 }
  0x44   : > { %534 = vmatpush.bf16.msra.mxu0 %v760_v31 }
  0x45   : > { %548 = vmatpush.bf16.msra.mxu1 %v824_v34  ;;  %562 = vmatpush.bf16.msra.mxu2 %v764_v35 }
  0x46   : > { %576 = vmatpush.bf16.msra.mxu3 %v828_v38 }
  0x47   : > { %535 = vmatmul.bf16.vlgmr.msra.gmra.mxu0 %v752_v39 }
  0x48   : > { %549 = vmatmul.bf16.vlgmr.msra.gmra.mxu1 %v756_v40  ;;  %563 = vmatmul.bf16.vlgmr.msra.gmra.mxu2 %v752_v39 }
  0x49   : > { %577 = vmatmul.bf16.vlgmr.msra.gmra.mxu3 %v756_v40 }
  0xc4   : > { %v536_v41 = vpop.f32.mrf.mxu0 }
  0xc5   : > { %v550_v43 = vpop.f32.mrf.mxu1 }
  0xc6   : > { %v551_v44 = vadd.f32 %v550_v43, %v536_v41 }
  0xc8   : > { %v583_v45 = vadd.f32 %v551_v44, %v319_v42 }
  0xca   : > { %587 = vst [vmem:[%s1233_s3] sm:$0xff] %v583_v45 }
  0xcb   : > { %v564_v46 = vpop.f32.mrf.mxu2 }
  0xcc   : > { %v578_v48 = vpop.f32.mrf.mxu3  ;;  %v538_v49 = vpop.f32.mrf.mxu0 }
  0xcd   : > { %v579_v50 = vadd.f32 %v578_v48, %v564_v46  ;;  %v552_v52 = vpop.f32.mrf.mxu1 }
  0xce   : > { %v553_v53 = vadd.f32 %v552_v52, %v538_v49 }
  0xcf   : > { %v584_v54 = vadd.f32 %v579_v50, %v320_v47 }
  0xd0   : > { %v585_v55 = vadd.f32 %v553_v53, %v321_v51 }
  0xd1   : > { %588 = vst [vmem:[%s1233_s3 + $0x8] sm:$0xff] %v584_v54 }
  0xd2   : > { %589 = vst [vmem:[%s1233_s3 + $0x10] sm:$0xff] %v585_v55 }
  0xd3   : > { %v566_v56 = vpop.f32.mrf.mxu2 }
  0xd4   : > { %v580_v58 = vpop.f32.mrf.mxu3 }
  0xd5   : > { %v581_v59 = vadd.f32 %v580_v58, %v566_v56  ;;  %594 = sbr.rel (%p885_p11) target bundleno = 228 (0xe4), region = 78 }
  0xd7   : > { %v586_v60 = vadd.f32 %v581_v59, %v322_v57 }
  0xd9   : > { %590 = vst [vmem:[%s1233_s3 + $0x18] sm:$0xff] %v586_v60 }
  0xda   : > { %v595_v61 = vld [vmem:[%s1233_s3] sm:$0xff]  ;;  %v596_v63 = vld [vmem:[%s1233_s3 + $0x8] sm:$0xff]  ;;  %v597_v2 = vld [vmem:[%s1233_s3 + $0x10] sm:$0xff] }
  0xdb   : > { %v599_v62 = vld [vmem:[%s1232_s2] sm:$0x3] }
  0xdc   : > { %v601_v0 = vperm.slane %v599_v62, 0  ;;  %v602_v1 = vperm.slane %v599_v62, 1 }
  0xde   : > { %v605_v4 = vadd.f32 %v601_v0, %v595_v61  ;;  %v606_v5 = vadd.f32 %v602_v1, %v596_v63  ;;  %v607_v6 = vadd.f32 %v601_v0, %v597_v2 }
  0xe0   : > { %v598_v3 = vld [vmem:[%s1233_s3 + $0x18] sm:$0xff]  ;;  %609 = vst [vmem:[%s1233_s3] sm:$0xff] %v605_v4 }
  0xe1   : > { %v608_v7 = vadd.f32 %v602_v1, %v598_v3  ;;  %610 = vst [vmem:[%s1233_s3 + $0x8] sm:$0xff] %v606_v5 }
  0xe2   : > { %611 = vst [vmem:[%s1233_s3 + $0x10] sm:$0xff] %v607_v6 }
  0xe3   : > { %612 = vst [vmem:[%s1233_s3 + $0x18] sm:$0xff] %v608_v7 }
  0xe4 PF: > { %s13_s16 = sadd.s32 1, %s1005_s16   ;;  %s1234_s12 = smov %s993_s13 }
  0xe5   : > { %p10_p12 = scmp.ge.s32.totalorder %s13_s16, 11   ;;  %s1235_s13 = smov %s1063_s20 }
  0xe6   : > { %s1236_s14 = smov %s1001_s15  ;;  %s1237_s15 = smov %s1239_s17 }
  0xe7   :  { %12 = sbr.rel (!%p10_p12) target bundleno = 3 (0x3), region = 119 }

// kernel: resnet18_attention_forward.56
= control target key start
LH: loop header
LB: loop body
LE: loop exit
PB: predicated region body
PF: predicated region fallthrough
CT: control target
= control target key end

     0   :  { %s392_s9 = smov 0   ;;  %s394_s10 = smov 0   ;;  %s433_s0 = inlined_call_operand.vmem [shape: f32[2,8,256], index: 0, kind: input, shape index: {}]   ;;  %s434_s1 = inlined_call_operand.vmem [shape: f32[2,1,256], index: 1, kind: input, shape index: {}]   ;;  %s435_s2 = inlined_call_operand.vmem [shape: f32[2,8,2], index: 2, kind: output, shape index: {}]  }
   0x1   :  { %s396_s11 = smov 0  }
   0x2 LB: > { %s24_s12 = sadd.s32 1, %s370_s10  ;;  %p317_p0 = scmp.ge.s32.totalorder %s374_s11, 1  ;;  %s374_s11 = sphi %s396_s11, %s12_s11   ;;  %s370_s10 = sphi %s394_s10, %s437_s10   ;;  %s366_s9 = sphi %s392_s9, %s436_s9  }
   0x3   : > { %p26_p1 = scmp.ge.s32.totalorder %s24_s12, 2  ;;  %p141_p2 = scmp.lt.s32.totalorder %s374_s11, 3 }
   0x5   : > { %s439_s12 = smov (%p26_p1, %s24_s12), 0  ;;  %p142_p3 = pnand %p317_p0, %p141_p2 }
   0x6   : > { %p173_p4 = scmp.lt.s32.totalorder (!%p142_p3), %s366_s9, 1 }
   0x7   : > { %145 = sbr.rel (%p142_p3) target bundleno = 149 (0x95), region = 28 }
   0xc   : > { %s441_s9 = smov (!%p173_p4, %s366_s9), 1  ;;  %v376_v9 = vmov 256.0   ;;  %vm217_vm1 = vcmask 7168   ;;  %vm219_vm2 = vcmask 15360  }
   0xd   : > { %s324_s13 = sshll.u32 %s441_s9, 4  ;;  %s320_s14 = sshll.u32 %s441_s9, 1  ;;  %350 = vrcp.f32 %v376_v9 }
   0xe   : > { %s181_s17 = scalar_lea.vmem %s433_s0, %s324_s13  ;;  %s185_s20 = scalar_lea.vmem %s434_s1, %s320_s14 }
   0xf   : > { %v193_v0 = vld [vmem:[%s181_s17] sm:$0xff]  ;;  %v194_v1 = vld [vmem:[%s181_s17 + $0x8] sm:$0xff]  ;;  %s321_s21 = sshll.u32 %s441_s9, 3 }
  0x10   : > { %v195_v2 = vld [vmem:[%s185_s20] sm:$0x3]  ;;  %s192_s24 = scalar_lea.vmem %s435_s2, %s321_s21 }
  0x11   : > { %v197_v3 = vperm.slane %v195_v2, 0  ;;  %v198_v4 = vperm.slane %v195_v2, 1 }
  0x13   : > { %v201_v5 = vmul.f32 %v197_v3, %v193_v0  ;;  %v202_v6 = vmul.f32 %v198_v4, %v194_v1  ;;  %v351_v10 = vpop.eup %350 }
  0x14   : > { %v207_v11 = vmul.f32 256.0, %v351_v10  ;;  %vm211_vm0 = vweird.f32 %v351_v10 }
  0x15   : > { %v203_v7 = vadd.f32 %v202_v6, %v201_v5  ;;  %v214_v8 = vmax.f32 %v201_v5, %v202_v6 }
  0x16   : > { %v208_v12 = vsub.f32 1.0, %v207_v11 }
  0x17   : > { %204 = vadd.xlane.f32.xlu0 %v203_v7 }
  0x18   : > { %v209_v13 = vmul.f32 %v351_v10, %v208_v12 }
  0x1a   : > { %v210_v14 = vadd.f32 %v351_v10, %v209_v13 }
  0x1c   : > { %v212_v16 = vsel %vm211_vm0, %v351_v10, %v210_v14 }
  0x1f   : > { %215 = vmax.xlane.f32.xlu0 %v214_v8 }
  0x8a   : > { %v205_v15 = vpop.xlane.xlu0 %204 }
  0x8b   : > { %v213_v17 = vmul.f32 %v212_v16, %v205_v15 }
  0x92   : > { %v216_v18 = vpop.xlane.xlu0 %215 }
  0x93   : > { %v218_v19 = vsel %vm217_vm1, %v213_v17, %v216_v18 }
  0x94   : > { %220 = vst.msk [vmem:[%s192_s24] sm:$0xff] %vm219_vm2, %v218_v19 }
  0x95 PF: > { %s12_s11 = sadd.s32 1, %s374_s11   ;;  %s436_s9 = smov %s370_s10 }
  0x96   : > { %p9_p5 = scmp.ge.s32.totalorder %s12_s11, 4   ;;  %s437_s10 = smov %s439_s12 }
  0x98   :  { %11 = sbr.rel (!%p9_p5) target bundleno = 2 (0x2), region = 61 }

// kernel: resnet18_attention_forward.58
= control target key start
LH: loop header
LB: loop body
LE: loop exit
PB: predicated region body
PF: predicated region fallthrough
CT: control target
= control target key end

     0   :  { %s573_s15 = smov 0   ;;  %s575_s16 = smov 0   ;;  %s615_s0 = inlined_call_operand.vmem [shape: f32[2,8,256], index: 0, kind: input, shape index: {}]   ;;  %s616_s1 = inlined_call_operand.vmem [shape: f32[2,1,256], index: 1, kind: input, shape index: {}]   ;;  %s617_s2 = inlined_call_operand.vmem [shape: f32[2,8,1], index: 2, kind: input, shape index: {}]   ;;  %s618_s3 = inlined_call_operand.vmem [shape: f32[2,8,256], index: 3, kind: input, shape index: {}]   ;;  %s619_s4 = inlined_call_operand.vmem [shape: f32[2,8,256], index: 4, kind: output, shape index: {}]  }
   0x1   :  { %s577_s17 = smov 0  }
   0x2 LB: > { %s26_s18 = sadd.s32 1, %s541_s16  ;;  %p483_p0 = scmp.ge.s32.totalorder %s545_s17, 1  ;;  %s545_s17 = sphi %s577_s17, %s14_s17   ;;  %s541_s16 = sphi %s575_s16, %s621_s16   ;;  %s537_s15 = sphi %s573_s15, %s620_s15  }
   0x3   : > { %p28_p1 = scmp.ge.s32.totalorder %s26_s18, 2  ;;  %p221_p2 = scmp.lt.s32.totalorder %s545_s17, 3 }
   0x5   : > { %s623_s18 = smov (%p28_p1, %s26_s18), 0  ;;  %p222_p3 = pnand %p483_p0, %p221_p2 }
   0x6   : > { %p275_p4 = scmp.lt.s32.totalorder (!%p222_p3), %s537_s15, 1 }
   0x7   : > { %225 = sbr.rel (%p222_p3) target bundleno = 139 (0x8b), region = 36 }
   0xc   : > { %v547_v0 = vmov 0   ;;  %s625_s15 = smov (!%p275_p4, %s537_s15), 1 }
   0xd   : > { %522 = vset.pattern.permute.xlu0 %v547_v0  ;;  %s487_s19 = sshll.u32 %s625_s15, 3  ;;  %s486_s23 = sshll.u32 %s625_s15, 1 }
   0xe   : > { %s294_s22 = scalar_lea.vmem %s617_s2, %s487_s19  ;;  %s287_s26 = scalar_lea.vmem %s616_s1, %s486_s23 }
   0xf   : > { %v323_v1 = vld [vmem:[%s294_s22] sm:$0xff]  ;;  %s494_s27 = sshll.u32 %s625_s15, 4 }
  0x10   : > { %326 = vperm.xlu0 %522, %v323_v1   ;;  %v315_v2 = vld [vmem:[%s287_s26] sm:$0x3]  ;;  %s283_s30 = scalar_lea.vmem %s615_s0, %s494_s27  ;;  %s303_s7 = scalar_lea.vmem %s618_s3, %s494_s27 }
  0x11   : > { %v317_v3 = vperm.slane %v315_v2, 0  ;;  %v318_v4 = vperm.slane %v315_v2, 1  ;;  %v313_v5 = vld [vmem:[%s283_s30] sm:$0xff]  ;;  %v314_v6 = vld [vmem:[%s283_s30 + $0x8] sm:$0xff]  ;;  %s312_s10 = scalar_lea.vmem %s619_s4, %s494_s27 }
  0x12   : > { %v331_v10 = vld [vmem:[%s303_s7] sm:$0xff]  ;;  %v332_v11 = vld [vmem:[%s303_s7 + $0x8] sm:$0xff] }
  0x13   : > { %v321_v7 = vmul.f32 %v317_v3, %v313_v5  ;;  %v322_v8 = vmul.f32 %v318_v4, %v314_v6 }
  0x82   : > { %v327_v9 = vpop.permute.xlu0 %326 }
  0x83   : > { %v329_v12 = vmul.f32 %v327_v9, %v321_v7  ;;  %v330_v13 = vmul.f32 %v327_v9, %v322_v8 }
  0x85   : > { %v333_v14 = vadd.f32 %v331_v10, %v329_v12  ;;  %v334_v15 = vadd.f32 %v332_v11, %v330_v13 }
  0x87   : > { %v335_v16 = vmax.f32 %v333_v14, 0.0  ;;  %v336_v17 = vmax.f32 %v334_v15, 0.0 }
  0x89   : > { %337 = vst [vmem:[%s312_s10] sm:$0xff] %v335_v16 }
  0x8a   : > { %338 = vst [vmem:[%s312_s10 + $0x8] sm:$0xff] %v336_v17 }
  0x8b PF: > { %s14_s17 = sadd.s32 1, %s545_s17   ;;  %s620_s15 = smov %s541_s16 }
  0x8c   : > { %p11_p5 = scmp.ge.s32.totalorder %s14_s17, 4   ;;  %s621_s16 = smov %s623_s18 }
  0x8e   :  { %13 = sbr.rel (!%p11_p5) target bundleno = 2 (0x2), region = 75 }

// kernel: resnet18_attention_forward.57
= control target key start
LH: loop header
LB: loop body
LE: loop exit
PB: predicated region body
PF: predicated region fallthrough
CT: control target
= control target key end

     0   :  { %s411_s1 = inlined_call_operand.vmem [shape: bf16[128,256], index: 1, kind: input, shape index: {}]   ;;  %s412_s0 = inlined_call_operand.vmem [shape: bf16[16,128], index: 0, kind: input, shape index: {}]   ;;  %s413_s2 = inlined_call_operand.vmem [shape: f32[1,256], index: 2, kind: input, shape index: {}]   ;;  %s414_s3 = inlined_call_operand.vmem [shape: f32[16,256], index: 3, kind: output, shape index: {}]  }
   0x1   :  { %v253_v0 = vld [vmem:[%s411_s1 + $0x70] sm:$0xf]  ;;  %v275_v1 = vld [vmem:[%s411_s1 + $0x74] sm:$0xf0]  ;;  %v274_v2 = vld [vmem:[%s411_s1 + $0x74] sm:$0xf] }
   0x2   :  { %v254_v3 = vor.u32 %v275_v1, %v253_v0  ;;  %v255_v4 = vld [vmem:[%s411_s1 + $0x78] sm:$0xf0]  ;;  %v245_v5 = vld [vmem:[%s411_s1 + $0x60] sm:$0xf]  ;;  %v273_v6 = vld [vmem:[%s411_s1 + $0x64] sm:$0xf0] }
   0x3   :  { %v258_v7 = vor.u32 %v274_v2, %v255_v4  ;;  %v272_v8 = vld [vmem:[%s411_s1 + $0x64] sm:$0xf]  ;;  %v247_v9 = vld [vmem:[%s411_s1 + $0x68] sm:$0xf0]  ;;  %v246_v10 = vor.u32 %v273_v6, %v245_v5  ;;  %v237_v12 = vld [vmem:[%s411_s1 + $0x50] sm:$0xf] }
   0x4   :  { %130 = vmatpush.bf16.msra.mxu0 %v254_v3  ;;  %v250_v11 = vor.u32 %v272_v8, %v247_v9  ;;  %v271_v13 = vld [vmem:[%s411_s1 + $0x54] sm:$0xf0]  ;;  %v270_v14 = vld [vmem:[%s411_s1 + $0x54] sm:$0xf]  ;;  %v239_v15 = vld [vmem:[%s411_s1 + $0x58] sm:$0xf0] }
   0x5   :  { %144 = vmatpush.bf16.msra.mxu1 %v258_v7  ;;  %v238_v16 = vor.u32 %v271_v13, %v237_v12  ;;  %v242_v17 = vor.u32 %v270_v14, %v239_v15  ;;  %v229_v18 = vld [vmem:[%s411_s1 + $0x40] sm:$0xf]  ;;  %v269_v19 = vld [vmem:[%s411_s1 + $0x44] sm:$0xf0]  ;;  %v268_v20 = vld [vmem:[%s411_s1 + $0x44] sm:$0xf] }
   0x6   :  { %v231_v21 = vld [vmem:[%s411_s1 + $0x48] sm:$0xf0]  ;;  %v230_v22 = vor.u32 %v269_v19, %v229_v18  ;;  %v221_v24 = vld [vmem:[%s411_s1 + $0x30] sm:$0xf]  ;;  %v267_v25 = vld [vmem:[%s411_s1 + $0x34] sm:$0xf0] }
   0x7   :  { %v234_v23 = vor.u32 %v268_v20, %v231_v21  ;;  %v266_v26 = vld [vmem:[%s411_s1 + $0x34] sm:$0xf]  ;;  %v223_v27 = vld [vmem:[%s411_s1 + $0x38] sm:$0xf0]  ;;  %v222_v28 = vor.u32 %v267_v25, %v221_v24  ;;  %v213_v30 = vld [vmem:[%s411_s1 + $0x20] sm:$0xf] }
   0x8   :  { %131 = vmatpush.bf16.msra.mxu0 %v246_v10  ;;  %v226_v29 = vor.u32 %v266_v26, %v223_v27  ;;  %v265_v31 = vld [vmem:[%s411_s1 + $0x24] sm:$0xf0]  ;;  %v264_v32 = vld [vmem:[%s411_s1 + $0x24] sm:$0xf]  ;;  %v215_v33 = vld [vmem:[%s411_s1 + $0x28] sm:$0xf0] }
   0x9   :  { %145 = vmatpush.bf16.msra.mxu1 %v250_v11  ;;  %v214_v34 = vor.u32 %v265_v31, %v213_v30  ;;  %v218_v35 = vor.u32 %v264_v32, %v215_v33  ;;  %v205_v36 = vld [vmem:[%s411_s1 + $0x10] sm:$0xf]  ;;  %v263_v37 = vld [vmem:[%s411_s1 + $0x14] sm:$0xf0]  ;;  %v262_v38 = vld [vmem:[%s411_s1 + $0x14] sm:$0xf] }
   0xa   :  { %v207_v39 = vld [vmem:[%s411_s1 + $0x18] sm:$0xf0]  ;;  %v206_v40 = vor.u32 %v263_v37, %v205_v36  ;;  %v197_v42 = vld [vmem:[%s411_s1] sm:$0xf]  ;;  %v261_v43 = vld [vmem:[%s411_s1 + $0x4] sm:$0xf0] }
   0xb   :  { %v210_v41 = vor.u32 %v262_v38, %v207_v39  ;;  %v260_v44 = vld [vmem:[%s411_s1 + $0x4] sm:$0xf]  ;;  %v199_v45 = vld [vmem:[%s411_s1 + $0x8] sm:$0xf0]  ;;  %v198_v46 = vor.u32 %v261_v43, %v197_v42  ;;  %v173_v49 = vld [vmem:[%s413_s2] sm:$0x3] }
   0xc   :  { %132 = vmatpush.bf16.msra.mxu0 %v238_v16  ;;  %v202_v47 = vor.u32 %v260_v44, %v199_v45  ;;  %v259_v48 = vld [vmem:[%s412_s0] sm:$0xff]  ;;  %v175_v50 = vperm.slane %v173_v49, 0  ;;  %v176_v52 = vperm.slane %v173_v49, 1 }
   0xd   :  { %146 = vmatpush.bf16.msra.mxu1 %v242_v17 }
  0x10   :  { %133 = vmatpush.bf16.msra.mxu0 %v230_v22 }
  0x11   :  { %147 = vmatpush.bf16.msra.mxu1 %v234_v23 }
  0x14   :  { %134 = vmatpush.bf16.msra.mxu0 %v222_v28 }
  0x15   :  { %148 = vmatpush.bf16.msra.mxu1 %v226_v29 }
  0x18   :  { %135 = vmatpush.bf16.msra.mxu0 %v214_v34 }
  0x19   :  { %149 = vmatpush.bf16.msra.mxu1 %v218_v35 }
  0x1c   :  { %136 = vmatpush.bf16.msra.mxu0 %v206_v40 }
  0x1d   :  { %150 = vmatpush.bf16.msra.mxu1 %v210_v41 }
  0x20   :  { %137 = vmatpush.bf16.msra.mxu0 %v198_v46 }
  0x21   :  { %151 = vmatpush.bf16.msra.mxu1 %v202_v47 }
  0x23   :  { %138 = vmatmul.bf16.vlgmr.msra.gmra.mxu0 %v259_v48 }
  0x24   :  { %152 = vmatmul.bf16.vlgmr.msra.gmra.mxu1 %v259_v48 }
  0xa0   :  { %v139_v51 = vpop.f32.mrf.mxu0 }
  0xa1   :  { %v153_v53 = vpop.f32.mrf.mxu1  ;;  %v179_v54 = vadd.f32 %v175_v50, %v139_v51 }
  0xa2   :  { %v180_v55 = vadd.f32 %v176_v52, %v153_v53 }
  0xa3   :  { %183 = vst [vmem:[%s414_s3] sm:$0xff] %v179_v54 }
  0xa4   :  { %184 = vst [vmem:[%s414_s3 + $0x8] sm:$0xff] %v180_v55 }
  0xa8   :  { %v141_v56 = vpop.f32.mrf.mxu0 }
  0xa9   :  { %v155_v57 = vpop.f32.mrf.mxu1  ;;  %v181_v58 = vadd.f32 %v175_v50, %v141_v56 }
  0xaa   :  { %v182_v59 = vadd.f32 %v176_v52, %v155_v57 }
  0xab   :  { %185 = vst [vmem:[%s414_s3 + $0x10] sm:$0xff] %v181_v58 }
  0xac   :  { %186 = vst [vmem:[%s414_s3 + $0x18] sm:$0xff] %v182_v59 }

// kernel: resnet18_attention_forward.59
= control target key start
LH: loop header
LB: loop body
LE: loop exit
PB: predicated region body
PF: predicated region fallthrough
CT: control target
= control target key end

     0   :  { %s1032_s12 = smov 0   ;;  %s1034_s13 = smov 0   ;;  %s1234_s0 = inlined_call_operand.vmem [shape: bf16[16,2304], index: 0, kind: input, shape index: {}]   ;;  %s1235_s1 = inlined_call_operand.vmem [shape: bf16[2304,256], index: 1, kind: input, shape index: {}]   ;;  %s1236_s2 = inlined_call_operand.vmem [shape: f32[1,256], index: 2, kind: input, shape index: {}]   ;;  %s1237_s3 = inlined_call_operand.vmem [shape: f32[16,256], index: 3, kind: output, shape index: {}]  }
   0x1   :  { %s1036_s14 = smov 0   ;;  %s1038_s15 = smov 0  }
   0x2   :  { %s1040_s16 = smov 0  }
   0x3 LB: > { %s25_s17 = sadd.s32 1, %s1005_s15  ;;  %p48_p1 = scmp.ne.s32.totalorder %s997_s13, %s993_s12  ;;  %s1009_s16 = sphi %s1040_s16, %s13_s16   ;;  %s1005_s15 = sphi %s1038_s15, %s1241_s15   ;;  %s1001_s14 = sphi %s1036_s14, %s1240_s14   ;;  %s997_s13 = sphi %s1034_s13, %s1239_s13   ;;  %s993_s12 = sphi %s1032_s12, %s1238_s12  }
   0x4   : > { %p26_p0 = scmp.ge.s32.totalorder %s25_s17, 9  ;;  %p49_p2 = scmp.eq.s32.totalorder %s1009_s16, 0 }
   0x5   : > { %s41_s19 = sadd.s32 1, %s997_s13  ;;  %p743_p5 = scmp.ge.s32.totalorder %s1009_s16, 9 }
   0x6   : > { %s1243_s17 = smov (%p26_p0, %s25_s17), 0  ;;  %p50_p3 = por %p49_p2, %p48_p1 }
   0x7   : > { %s37_s18 = ssub.s32 %s1005_s15, %s1243_s17  ;;  %164 = sbr.rel (%p743_p5) target bundleno = 18 (0x12), region = 20 }
   0x8   : > { %p39_p4 = scmp.eq.s32.totalorder %s37_s18, 0 }
   0xa   : > { %s1067_s20 = scalar_select %p39_p4, %s997_s13, %s41_s19  }
   0xc   : > { %167 = sbr.rel (!%p50_p3) target bundleno = 18 (0x12), region = 24  ;;  %s169_s21 = sand.u32 (%p50_p3), 1, %s997_s13  }
   0xd   : > { %s894_s22 = sshll.u32 (%p50_p3), %s1005_s15, 3  ;;  %s744_s23 = sshll.u32 (%p50_p3), %s169_s21, 4 }
   0xe   : > { %s177_s26 = scalar_lea.vmem (%p50_p3), %s1234_s0, %s894_s22  ;;  %s171_s27 = scalar_lea.vmem (%p50_p3), [#allocation2], %s744_s23 }
   0xf   : > { %v208_v0 = vld [vmem:[%s177_s26] sm:$0xff] (%p50_p3)  ;;  %v210_v1 = vld [vmem:[%s177_s26 + $0x48] sm:$0xff] (%p50_p3) }
  0x10   : > { %209 = vst [vmem:[%s171_s27] sm:$0xff] (%p50_p3), %v208_v0 }
  0x11   : > { %211 = vst [vmem:[%s171_s27 + $0x8] sm:$0xff] %v210_v1 }
  0x12 PF: > { %p747_p6 = scmp.ge.s32.totalorder %s1009_s16, 1  ;;  %p231_p7 = scmp.lt.s32.totalorder %s1009_s16, 10 }
  0x14   : > { %p232_p8 = pnand %p747_p6, %p231_p7 }
  0x15   : > { %s238_s28 = sand.u32 (!%p232_p8), 1, %s993_s12   ;;  %s749_s29 = sshll.u32 (!%p232_p8), %s1001_s14, 5 }
  0x16   : > { %235 = sbr.rel (%p232_p8) target bundleno = 230 (0xe6), region = 66  ;;  %s748_s30 = sshll.u32 (!%p232_p8), %s238_s28, 4 }
  0x17   : > { %p284_p9 = scmp.lt.s32.totalorder (!%p232_p8), %s749_s29, 287  ;;  %s1084_s8 = scalar_lea.vmem (!%p232_p8), [#allocation2], %s748_s30 }
  0x18   : > { %p752_p10 = scmp.ne.s32.totalorder (!%p232_p8), %s1001_s14, 0 }
  0x1b   : > { %s1245_s29 = smov (!%p284_p9, %s749_s29), 287  ;;  %314 = sbr.rel (%p752_p10) target bundleno = 37 (0x25), region = 74 }
  0x1c   : > { %s895_s4 = sshll.u32 %s1245_s29, 3 }
  0x1d   : > { %s1082_s7 = scalar_lea.vmem %s1235_s1, %s895_s4 }
  0x20   : > { %v1011_v2 = vmov 0.0  }
  0x21   : > { %315 = vst [vmem:[%s1237_s3] sm:$0xff] %v1011_v2 }
  0x22   : > { %316 = vst [vmem:[%s1237_s3 + $0x8] sm:$0xff] %v1011_v2 }
  0x23   : > { %317 = vst [vmem:[%s1237_s3 + $0x10] sm:$0xff] %v1011_v2 }
  0x24   : > { %318 = vst [vmem:[%s1237_s3 + $0x18] sm:$0xff] %v1011_v2 }
  0x25 PF: > { %v819_v3 = vld [vmem:[%s1082_s7 + $0x70] sm:$0xf]  ;;  %v913_v4 = vld [vmem:[%s1082_s7 + $0x74] sm:$0xf0]  ;;  %v912_v8 = vld [vmem:[%s1082_s7 + $0x74] sm:$0xf] }
  0x26   : > { %v883_v5 = vld [vmem:[%s1082_s7 + $0xf0] sm:$0xf]  ;;  %v820_v6 = vor.u32 %v913_v4, %v819_v3  ;;  %v929_v7 = vld [vmem:[%s1082_s7 + $0xf4] sm:$0xf0]  ;;  %v821_v9 = vld [vmem:[%s1082_s7 + $0x78] sm:$0xf0] }
  0x27   : > { %v884_v10 = vor.u32 %v929_v7, %v883_v5  ;;  %v824_v11 = vor.u32 %v912_v8, %v821_v9  ;;  %v928_v12 = vld [vmem:[%s1082_s7 + $0xf4] sm:$0xf]  ;;  %v885_v13 = vld [vmem:[%s1082_s7 + $0xf8] sm:$0xf0]  ;;  %v811_v14 = vld [vmem:[%s1082_s7 + $0x60] sm:$0xf] }
  0x28   : > { %527 = vmatpush.bf16.msra.mxu0 %v820_v6  ;;  %v888_v15 = vor.u32 %v928_v12, %v885_v13  ;;  %v911_v16 = vld [vmem:[%s1082_s7 + $0x64] sm:$0xf0]  ;;  %v875_v17 = vld [vmem:[%s1082_s7 + $0xe0] sm:$0xf]  ;;  %v910_v21 = vld [vmem:[%s1082_s7 + $0x64] sm:$0xf] }
  0x29   : > { %v927_v18 = vld [vmem:[%s1082_s7 + $0xe4] sm:$0xf0]  ;;  %541 = vmatpush.bf16.msra.mxu1 %v884_v10  ;;  %555 = vmatpush.bf16.msra.mxu2 %v824_v11  ;;  %v812_v19 = vor.u32 %v911_v16, %v811_v14  ;;  %v813_v22 = vld [vmem:[%s1082_s7 + $0x68] sm:$0xf0]  ;;  %v926_v23 = vld [vmem:[%s1082_s7 + $0xe4] sm:$0xf] }
  0x2a   : > { %v876_v20 = vor.u32 %v927_v18, %v875_v17  ;;  %569 = vmatpush.bf16.msra.mxu3 %v888_v15  ;;  %v816_v24 = vor.u32 %v910_v21, %v813_v22  ;;  %v877_v25 = vld [vmem:[%s1082_s7 + $0xe8] sm:$0xf0]  ;;  %v803_v26 = vld [vmem:[%s1082_s7 + $0x50] sm:$0xf]  ;;  %v909_v27 = vld [vmem:[%s1082_s7 + $0x54] sm:$0xf0] }
  0x2b   : > { %v880_v28 = vor.u32 %v926_v23, %v877_v25  ;;  %v867_v29 = vld [vmem:[%s1082_s7 + $0xd0] sm:$0xf]  ;;  %v925_v30 = vld [vmem:[%s1082_s7 + $0xd4] sm:$0xf0]  ;;  %v908_v31 = vld [vmem:[%s1082_s7 + $0x54] sm:$0xf]  ;;  %v804_v32 = vor.u32 %v909_v27, %v803_v26 }
  0x2c   : > { %528 = vmatpush.bf16.msra.mxu0 %v812_v19  ;;  %v805_v33 = vld [vmem:[%s1082_s7 + $0x58] sm:$0xf0]  ;;  %v924_v34 = vld [vmem:[%s1082_s7 + $0xd4] sm:$0xf]  ;;  %v868_v36 = vor.u32 %v925_v30, %v867_v29  ;;  %v795_v38 = vld [vmem:[%s1082_s7 + $0x40] sm:$0xf] }
  0x2d   : > { %v869_v35 = vld [vmem:[%s1082_s7 + $0xd8] sm:$0xf0]  ;;  %542 = vmatpush.bf16.msra.mxu1 %v876_v20  ;;  %556 = vmatpush.bf16.msra.mxu2 %v816_v24  ;;  %v808_v37 = vor.u32 %v908_v31, %v805_v33  ;;  %v907_v39 = vld [vmem:[%s1082_s7 + $0x44] sm:$0xf0]  ;;  %v859_v40 = vld [vmem:[%s1082_s7 + $0xc0] sm:$0xf] }
  0x2e   : > { %570 = vmatpush.bf16.msra.mxu3 %v880_v28  ;;  %v872_v41 = vor.u32 %v924_v34, %v869_v35  ;;  %v923_v42 = vld [vmem:[%s1082_s7 + $0xc4] sm:$0xf0]  ;;  %v906_v43 = vld [vmem:[%s1082_s7 + $0x44] sm:$0xf]  ;;  %v797_v44 = vld [vmem:[%s1082_s7 + $0x48] sm:$0xf0]  ;;  %v796_v47 = vor.u32 %v907_v39, %v795_v38 }
  0x2f   : > { %v922_v45 = vld [vmem:[%s1082_s7 + $0xc4] sm:$0xf]  ;;  %v861_v46 = vld [vmem:[%s1082_s7 + $0xc8] sm:$0xf0]  ;;  %v860_v48 = vor.u32 %v923_v42, %v859_v40  ;;  %v800_v49 = vor.u32 %v906_v43, %v797_v44  ;;  %v787_v50 = vld [vmem:[%s1082_s7 + $0x30] sm:$0xf] }
  0x30   : > { %529 = vmatpush.bf16.msra.mxu0 %v804_v32  ;;  %v905_v51 = vld [vmem:[%s1082_s7 + $0x34] sm:$0xf0]  ;;  %v851_v52 = vld [vmem:[%s1082_s7 + $0xb0] sm:$0xf]  ;;  %v864_v53 = vor.u32 %v922_v45, %v861_v46  ;;  %v904_v55 = vld [vmem:[%s1082_s7 + $0x34] sm:$0xf] }
  0x31   : > { %543 = vmatpush.bf16.msra.mxu1 %v868_v36  ;;  %557 = vmatpush.bf16.msra.mxu2 %v808_v37  ;;  %v921_v54 = vld [vmem:[%s1082_s7 + $0xb4] sm:$0xf0]  ;;  %v789_v56 = vld [vmem:[%s1082_s7 + $0x38] sm:$0xf0]  ;;  %v920_v57 = vld [vmem:[%s1082_s7 + $0xb4] sm:$0xf]  ;;  %v788_v59 = vor.u32 %v905_v51, %v787_v50 }
  0x32   : > { %571 = vmatpush.bf16.msra.mxu3 %v872_v41  ;;  %v853_v58 = vld [vmem:[%s1082_s7 + $0xb8] sm:$0xf0]  ;;  %v852_v60 = vor.u32 %v921_v54, %v851_v52  ;;  %v792_v61 = vor.u32 %v904_v55, %v789_v56  ;;  %v779_v62 = vld [vmem:[%s1082_s7 + $0x20] sm:$0xf]  ;;  %v903_v63 = vld [vmem:[%s1082_s7 + $0x24] sm:$0xf0] }
  0x33   : > { %v843_v0 = vld [vmem:[%s1082_s7 + $0xa0] sm:$0xf]  ;;  %v856_v1 = vor.u32 %v920_v57, %v853_v58  ;;  %v919_v2 = vld [vmem:[%s1082_s7 + $0xa4] sm:$0xf0]  ;;  %v902_v3 = vld [vmem:[%s1082_s7 + $0x24] sm:$0xf]  ;;  %v780_v7 = vor.u32 %v903_v63, %v779_v62 }
  0x34   : > { %530 = vmatpush.bf16.msra.mxu0 %v796_v47  ;;  %v781_v4 = vld [vmem:[%s1082_s7 + $0x28] sm:$0xf0]  ;;  %v918_v5 = vld [vmem:[%s1082_s7 + $0xa4] sm:$0xf]  ;;  %v844_v8 = vor.u32 %v919_v2, %v843_v0  ;;  %v771_v10 = vld [vmem:[%s1082_s7 + $0x10] sm:$0xf] }
  0x35   : > { %544 = vmatpush.bf16.msra.mxu1 %v860_v48  ;;  %558 = vmatpush.bf16.msra.mxu2 %v800_v49  ;;  %v845_v6 = vld [vmem:[%s1082_s7 + $0xa8] sm:$0xf0]  ;;  %v784_v9 = vor.u32 %v902_v3, %v781_v4  ;;  %v901_v11 = vld [vmem:[%s1082_s7 + $0x14] sm:$0xf0]  ;;  %v835_v12 = vld [vmem:[%s1082_s7 + $0x90] sm:$0xf] }
  0x36   : > { %572 = vmatpush.bf16.msra.mxu3 %v864_v53  ;;  %v848_v13 = vor.u32 %v918_v5, %v845_v6  ;;  %v917_v14 = vld [vmem:[%s1082_s7 + $0x94] sm:$0xf0]  ;;  %v900_v15 = vld [vmem:[%s1082_s7 + $0x14] sm:$0xf]  ;;  %v773_v16 = vld [vmem:[%s1082_s7 + $0x18] sm:$0xf0]  ;;  %v772_v19 = vor.u32 %v901_v11, %v771_v10 }
  0x37   : > { %v916_v17 = vld [vmem:[%s1082_s7 + $0x94] sm:$0xf]  ;;  %v837_v18 = vld [vmem:[%s1082_s7 + $0x98] sm:$0xf0]  ;;  %v836_v20 = vor.u32 %v917_v14, %v835_v12  ;;  %v776_v21 = vor.u32 %v900_v15, %v773_v16  ;;  %v763_v22 = vld [vmem:[%s1082_s7] sm:$0xf] }
  0x38   : > { %531 = vmatpush.bf16.msra.mxu0 %v788_v59  ;;  %v899_v23 = vld [vmem:[%s1082_s7 + $0x4] sm:$0xf0]  ;;  %v827_v24 = vld [vmem:[%s1082_s7 + $0x80] sm:$0xf]  ;;  %v840_v25 = vor.u32 %v916_v17, %v837_v18  ;;  %v898_v27 = vld [vmem:[%s1082_s7 + $0x4] sm:$0xf] }
  0x39   : > { %545 = vmatpush.bf16.msra.mxu1 %v852_v60  ;;  %559 = vmatpush.bf16.msra.mxu2 %v792_v61  ;;  %v915_v26 = vld [vmem:[%s1082_s7 + $0x84] sm:$0xf0]  ;;  %v765_v28 = vld [vmem:[%s1082_s7 + $0x8] sm:$0xf0]  ;;  %v914_v29 = vld [vmem:[%s1082_s7 + $0x84] sm:$0xf]  ;;  %v764_v31 = vor.u32 %v899_v23, %v763_v22 }
  0x3a   : > { %573 = vmatpush.bf16.msra.mxu3 %v856_v1  ;;  %v829_v30 = vld [vmem:[%s1082_s7 + $0x88] sm:$0xf0]  ;;  %v755_v32 = vld [vmem:[%s1084_s8] sm:$0xf]  ;;  %v897_v33 = vld [vmem:[%s1084_s8 + $0x4] sm:$0xf0]  ;;  %v828_v34 = vor.u32 %v915_v26, %v827_v24  ;;  %v768_v35 = vor.u32 %v898_v27, %v765_v28 }
  0x3b   : > { %v896_v36 = vld [vmem:[%s1084_s8 + $0x4] sm:$0xf]  ;;  %v757_v37 = vld [vmem:[%s1084_s8 + $0x8] sm:$0xf0]  ;;  %v832_v38 = vor.u32 %v914_v29, %v829_v30  ;;  %v756_v39 = vor.u32 %v897_v33, %v755_v32  ;;  %p889_p11 = scmp.ne.s32.totalorder %s1001_s14, 8 }
  0x3c   : > { %532 = vmatpush.bf16.msra.mxu0 %v780_v7  ;;  %v760_v40 = vor.u32 %v896_v36, %v757_v37  ;;  %v319_v42 = vld [vmem:[%s1237_s3] sm:$0xff]  ;;  %v320_v47 = vld [vmem:[%s1237_s3 + $0x8] sm:$0xff]  ;;  %v321_v51 = vld [vmem:[%s1237_s3 + $0x10] sm:$0xff] }
  0x3d   : > { %546 = vmatpush.bf16.msra.mxu1 %v844_v8  ;;  %560 = vmatpush.bf16.msra.mxu2 %v784_v9  ;;  %v322_v57 = vld [vmem:[%s1237_s3 + $0x18] sm:$0xff] }
  0x3e   : > { %574 = vmatpush.bf16.msra.mxu3 %v848_v13 }
  0x40   : > { %533 = vmatpush.bf16.msra.mxu0 %v772_v19 }
  0x41   : > { %547 = vmatpush.bf16.msra.mxu1 %v836_v20  ;;  %561 = vmatpush.bf16.msra.mxu2 %v776_v21 }
  0x42   : > { %575 = vmatpush.bf16.msra.mxu3 %v840_v25 }
  0x44   : > { %534 = vmatpush.bf16.msra.mxu0 %v764_v31 }
  0x45   : > { %548 = vmatpush.bf16.msra.mxu1 %v828_v34  ;;  %562 = vmatpush.bf16.msra.mxu2 %v768_v35 }
  0x46   : > { %576 = vmatpush.bf16.msra.mxu3 %v832_v38 }
  0x47   : > { %535 = vmatmul.bf16.vlgmr.msra.gmra.mxu0 %v756_v39 }
  0x48   : > { %549 = vmatmul.bf16.vlgmr.msra.gmra.mxu1 %v760_v40  ;;  %563 = vmatmul.bf16.vlgmr.msra.gmra.mxu2 %v756_v39 }
  0x49   : > { %577 = vmatmul.bf16.vlgmr.msra.gmra.mxu3 %v760_v40 }
  0xc4   : > { %v536_v41 = vpop.f32.mrf.mxu0 }
  0xc5   : > { %v550_v43 = vpop.f32.mrf.mxu1 }
  0xc6   : > { %v551_v44 = vadd.f32 %v550_v43, %v536_v41 }
  0xc8   : > { %v583_v45 = vadd.f32 %v551_v44, %v319_v42 }
  0xca   : > { %587 = vst [vmem:[%s1237_s3] sm:$0xff] %v583_v45 }
  0xcb   : > { %v564_v46 = vpop.f32.mrf.mxu2 }
  0xcc   : > { %v578_v48 = vpop.f32.mrf.mxu3  ;;  %v538_v49 = vpop.f32.mrf.mxu0 }
  0xcd   : > { %v579_v50 = vadd.f32 %v578_v48, %v564_v46  ;;  %v552_v52 = vpop.f32.mrf.mxu1 }
  0xce   : > { %v553_v53 = vadd.f32 %v552_v52, %v538_v49 }
  0xcf   : > { %v584_v54 = vadd.f32 %v579_v50, %v320_v47 }
  0xd0   : > { %v585_v55 = vadd.f32 %v553_v53, %v321_v51 }
  0xd1   : > { %588 = vst [vmem:[%s1237_s3 + $0x8] sm:$0xff] %v584_v54 }
  0xd2   : > { %589 = vst [vmem:[%s1237_s3 + $0x10] sm:$0xff] %v585_v55 }
  0xd3   : > { %v566_v56 = vpop.f32.mrf.mxu2 }
  0xd4   : > { %v580_v58 = vpop.f32.mrf.mxu3 }
  0xd5   : > { %v581_v59 = vadd.f32 %v580_v58, %v566_v56  ;;  %594 = sbr.rel (%p889_p11) target bundleno = 230 (0xe6), region = 78 }
  0xd7   : > { %v586_v60 = vadd.f32 %v581_v59, %v322_v57 }
  0xd9   : > { %590 = vst [vmem:[%s1237_s3 + $0x18] sm:$0xff] %v586_v60 }
  0xda   : > { %v595_v61 = vld [vmem:[%s1237_s3] sm:$0xff]  ;;  %v596_v63 = vld [vmem:[%s1237_s3 + $0x8] sm:$0xff]  ;;  %v597_v2 = vld [vmem:[%s1237_s3 + $0x10] sm:$0xff] }
  0xdb   : > { %v599_v62 = vld [vmem:[%s1236_s2] sm:$0x3] }
  0xdc   : > { %v601_v0 = vperm.slane %v599_v62, 0  ;;  %v602_v1 = vperm.slane %v599_v62, 1 }
  0xde   : > { %v605_v4 = vadd.f32 %v601_v0, %v595_v61  ;;  %v606_v5 = vadd.f32 %v602_v1, %v596_v63  ;;  %v607_v6 = vadd.f32 %v601_v0, %v597_v2 }
  0xe0   : > { %v598_v3 = vld [vmem:[%s1237_s3 + $0x18] sm:$0xff]  ;;  %v609_v8 = vmax.f32 %v605_v4, 0.0  ;;  %v610_v9 = vmax.f32 %v606_v5, 0.0  ;;  %v611_v10 = vmax.f32 %v607_v6, 0.0 }
  0xe1   : > { %v608_v7 = vadd.f32 %v602_v1, %v598_v3 }
  0xe2   : > { %613 = vst [vmem:[%s1237_s3] sm:$0xff] %v609_v8 }
  0xe3   : > { %v612_v11 = vmax.f32 %v608_v7, 0.0  ;;  %614 = vst [vmem:[%s1237_s3 + $0x8] sm:$0xff] %v610_v9 }
  0xe4   : > { %615 = vst [vmem:[%s1237_s3 + $0x10] sm:$0xff] %v611_v10 }
  0xe5   : > { %616 = vst [vmem:[%s1237_s3 + $0x18] sm:$0xff] %v612_v11 }
  0xe6 PF: > { %s13_s16 = sadd.s32 1, %s1009_s16   ;;  %s1238_s12 = smov %s997_s13 }
  0xe7   : > { %p10_p12 = scmp.ge.s32.totalorder %s13_s16, 11   ;;  %s1239_s13 = smov %s1067_s20 }
  0xe8   : > { %s1240_s14 = smov %s1005_s15  ;;  %s1241_s15 = smov %s1243_s17 }
  0xe9   :  { %12 = sbr.rel (!%p10_p12) target bundleno = 3 (0x3), region = 119 }

// kernel: resnet18_attention_forward.63
= control target key start
LH: loop header
LB: loop body
LE: loop exit
PB: predicated region body
PF: predicated region fallthrough
CT: control target
= control target key end

     0   :  { %s1285_s12 = smov 0   ;;  %s1287_s13 = smov 0   ;;  %s1623_s0 = inlined_call_operand.vmem [shape: bf16[16,2304], index: 0, kind: input, shape index: {}]   ;;  %s1624_s1 = inlined_call_operand.vmem [shape: bf16[2304,512], index: 1, kind: input, shape index: {}]   ;;  %s1625_s2 = inlined_call_operand.vmem [shape: f32[1,512], index: 2, kind: input, shape index: {}]   ;;  %s1626_s3 = inlined_call_operand.vmem [shape: f32[16,512], index: 3, kind: output, shape index: {}]  }
   0x1   :  { %s1289_s14 = smov 0   ;;  %s1291_s15 = smov 0  }
   0x2   :  { %s1293_s16 = smov 0   ;;  %s1295_s17 = smov 0  }
   0x3   :  { %s1297_s18 = smov 0   ;;  %s1299_s19 = smov 0  }
   0x4   :  { %s1301_s20 = smov 0   ;;  %s1303_s21 = smov 0  }
   0x5   :  { %s1305_s22 = smov 0  }
   0x6 LB: > { %s890_s23 = sadd.s32 4294967295, %s1262_s22   ;;  %s25_s24 = sadd.s32 1, %s1254_s20  ;;  %s1262_s22 = sphi %s1305_s22, %s13_s22   ;;  %s1258_s21 = sphi %s1303_s21, %s1647_s21   ;;  %s1254_s20 = sphi %s1301_s20, %s1646_s20   ;;  %s1250_s19 = sphi %s1299_s19, %s1645_s19   ;;  %s1246_s18 = sphi %s1297_s18, %s1644_s18   ;;  %s1242_s17 = sphi %s1295_s17, %s1643_s17   ;;  %s1238_s16 = sphi %s1293_s16, %s1642_s16   ;;  %s1234_s15 = sphi %s1291_s15, %s1641_s15   ;;  %s1230_s14 = sphi %s1289_s14, %s1640_s14   ;;  %s1226_s13 = sphi %s1287_s13, %s1639_s13   ;;  %s1222_s12 = sphi %s1285_s12, %s1638_s12  }
   0x7   : > { %p26_p0 = scmp.ge.s32.totalorder %s25_s24, 9  ;;  %s28_s25 = sadd.s32 1, %s1258_s21 }
   0x8   : > { %s41_s26 = sadd.s32 1, %s1242_s17  ;;  %p48_p1 = scmp.ne.s32.totalorder %s1242_s17, %s1238_s16 }
   0x9   : > { %s1649_s24 = smov (%p26_p0, %s25_s24), 0  ;;  %s1651_s25 = smov (!%p26_p0, %s28_s25), %s1258_s21 }
   0xa   : > { %1629 = sst [smem:[#allocation5_spill]] %s1649_s24  ;;  %s37_s27 = ssub.s32 %s1254_s20, %s1649_s24 }
   0xb   : > { %p49_p2 = scmp.eq.s32.totalorder %s1262_s22, 0  ;;  %p30_p3 = scmp.ge.s32.totalorder %s1651_s25, 2 }
   0xc   : > { %p39_p4 = scmp.eq.s32.totalorder %s37_s27, 0  ;;  %s69_s29 = sadd.s32 1, %s1234_s15 }
   0xd   : > { %p1352_p5 = por %p49_p2, %p48_p1  ;;  %s1653_s25 = smov (%p30_p3, %s1651_s25), 0 }
   0xe   : > { %1631 = sst [smem:[#allocation6_spill]] %s1653_s25  ;;  %s65_s4 = ssub.s32 %s1258_s21, %s1653_s25 }
   0xf   : > { %s1360_s30 = scalar_select %p39_p4, %s1242_s17, %s41_s26  }
  0x10   : > { %p76_p6 = scmp.ne.s32.totalorder %s1234_s15, %s1230_s14  ;;  %s66_s5 = sor.u32 %s65_s4, %s37_s27 }
  0x11   : > { %1632 = sst [smem:[#allocation7_spill]] %s1360_s30  ;;  %p121_p7 = scmp.eq.s32.totalorder %s65_s4, 0 }
  0x12   : > { %p67_p8 = scmp.eq.s32.totalorder %s66_s5, 0  ;;  %p1366_p9 = por %p76_p6, %p49_p2 }
  0x13   : > { %s123_s7 = sadd.s32 1, %s1226_s13  ;;  %p133_p10 = scmp.ne.s32.totalorder %s1226_s13, %s1222_s12 }
  0x14   : > { %s1374_s8 = scalar_select %p67_p8, %s1234_s15, %s69_s29  }
  0x15   : > { %s1377_s9 = scalar_select %p121_p7, %s1226_s13, %s123_s7  }
  0x16   : > { %p134_p11 = scmp.eq.s32.totalorder %s890_s23, 17  ;;  %p893_p13 = scmp.ge.s32.totalorder %s1262_s22, 18 }
  0x18   : > { %p1379_p12 = por %p134_p11, %p133_p10  ;;  %156 = sbr.rel (%p893_p13) target bundleno = 74 (0x4a), region = 16 }
  0x1d   : > { %159 = sbr.rel (!%p1352_p5) target bundleno = 35 (0x23), region = 20  ;;  %s161_s11 = sand.u32 (%p1352_p5), 1, %s1242_s17  }
  0x1e   : > { %s1050_s26 = sshll.u32 (%p1352_p5), %s1254_s20, 3  ;;  %s894_s27 = sshll.u32 (%p1352_p5), %s161_s11, 4 }
  0x1f   : > { %s169_s5 = scalar_lea.vmem (%p1352_p5), %s1623_s0, %s1050_s26  ;;  %s163_s23 = scalar_lea.vmem (%p1352_p5), [#allocation2], %s894_s27 }
  0x20   : > { %v200_v0 = vld [vmem:[%s169_s5] sm:$0xff] (%p1352_p5)  ;;  %v202_v1 = vld [vmem:[%s169_s5 + $0x48] sm:$0xff] (%p1352_p5) }
  0x21   : > { %201 = vst [vmem:[%s163_s23] sm:$0xff] (%p1352_p5), %v200_v0 }
  0x22   : > { %203 = vst [vmem:[%s163_s23 + $0x8] sm:$0xff] %v202_v1 }
  0x23 PF: > { %209 = sbr.rel (!%p1366_p9) target bundleno = 74 (0x4a), region = 58  ;;  %s211_s28 = sand.u32 (%p1366_p9), 1, %s1234_s15  }
  0x24   : > { %s899_s7 = sshll.u32 (%p1366_p9), %s1258_s21, 1  ;;  %s897_s25 = sshll.u32 (%p1366_p9), %s211_s28, 8 }
  0x25   : > { %s1051_s11 = sshll.u32 (%p1366_p9), %s1254_s20, 7  ;;  %s1404_s6 = scalar_lea.vmem (%p1366_p9), [#allocation3], %s897_s25 }
  0x26   : > { %s217_s24 = sadd.s32 (%p1366_p9), %s1051_s11, %s899_s7 }
  0x27   : > { %s901_s30 = sshll.u32 (%p1366_p9), %s217_s24, 2 }
  0x28   : > { %s1399_s4 = scalar_lea.vmem %s1624_s1, %s901_s30 }
  0x29   : > { %v310_v2 = vld [vmem:[%s1399_s4] sm:$0xff]  ;;  %v312_v3 = vld [vmem:[%s1399_s4 + $0x10] sm:$0xff] }
  0x2a   : > { %v314_v4 = vld [vmem:[%s1399_s4 + $0x20] sm:$0xff]  ;;  %311 = vst [vmem:[%s1404_s6] sm:$0xff] %v310_v2  ;;  %v316_v5 = vld [vmem:[%s1399_s4 + $0x30] sm:$0xff] }
  0x2b   : > { %313 = vst [vmem:[%s1404_s6 + $0x8] sm:$0xff] %v312_v3  ;;  %v318_v6 = vld [vmem:[%s1399_s4 + $0x40] sm:$0xff]  ;;  %v320_v7 = vld [vmem:[%s1399_s4 + $0x50] sm:$0xff] }
  0x2c   : > { %315 = vst [vmem:[%s1404_s6 + $0x10] sm:$0xff] %v314_v4  ;;  %v322_v8 = vld [vmem:[%s1399_s4 + $0x60] sm:$0xff]  ;;  %v324_v9 = vld [vmem:[%s1399_s4 + $0x70] sm:$0xff] }
  0x2d   : > { %317 = vst [vmem:[%s1404_s6 + $0x18] sm:$0xff] %v316_v5  ;;  %v326_v10 = vld [vmem:[%s1399_s4 + $0x80] sm:$0xff]  ;;  %v328_v11 = vld [vmem:[%s1399_s4 + $0x90] sm:$0xff] }
  0x2e   : > { %319 = vst [vmem:[%s1404_s6 + $0x20] sm:$0xff] %v318_v6  ;;  %v330_v12 = vld [vmem:[%s1399_s4 + $0xa0] sm:$0xff]  ;;  %v332_v13 = vld [vmem:[%s1399_s4 + $0xb0] sm:$0xff] }
  0x2f   : > { %321 = vst [vmem:[%s1404_s6 + $0x28] sm:$0xff] %v320_v7  ;;  %v334_v14 = vld [vmem:[%s1399_s4 + $0xc0] sm:$0xff]  ;;  %v336_v15 = vld [vmem:[%s1399_s4 + $0xd0] sm:$0xff] }
  0x30   : > { %323 = vst [vmem:[%s1404_s6 + $0x30] sm:$0xff] %v322_v8  ;;  %v338_v16 = vld [vmem:[%s1399_s4 + $0xe0] sm:$0xff]  ;;  %v340_v17 = vld [vmem:[%s1399_s4 + $0xf0] sm:$0xff] }
  0x31   : > { %325 = vst [vmem:[%s1404_s6 + $0x38] sm:$0xff] %v324_v9  ;;  %v342_v18 = vld [vmem:[%s1399_s4 + $0x100] sm:$0xff]  ;;  %v344_v19 = vld [vmem:[%s1399_s4 + $0x110] sm:$0xff] }
  0x32   : > { %327 = vst [vmem:[%s1404_s6 + $0x40] sm:$0xff] %v326_v10  ;;  %v346_v20 = vld [vmem:[%s1399_s4 + $0x120] sm:$0xff]  ;;  %v348_v21 = vld [vmem:[%s1399_s4 + $0x130] sm:$0xff] }
  0x33   : > { %329 = vst [vmem:[%s1404_s6 + $0x48] sm:$0xff] %v328_v11  ;;  %v350_v22 = vld [vmem:[%s1399_s4 + $0x140] sm:$0xff]  ;;  %v352_v23 = vld [vmem:[%s1399_s4 + $0x150] sm:$0xff] }
  0x34   : > { %331 = vst [vmem:[%s1404_s6 + $0x50] sm:$0xff] %v330_v12  ;;  %v354_v24 = vld [vmem:[%s1399_s4 + $0x160] sm:$0xff]  ;;  %v356_v25 = vld [vmem:[%s1399_s4 + $0x170] sm:$0xff] }
  0x35   : > { %333 = vst [vmem:[%s1404_s6 + $0x58] sm:$0xff] %v332_v13  ;;  %v358_v26 = vld [vmem:[%s1399_s4 + $0x180] sm:$0xff]  ;;  %v360_v27 = vld [vmem:[%s1399_s4 + $0x190] sm:$0xff] }
  0x36   : > { %335 = vst [vmem:[%s1404_s6 + $0x60] sm:$0xff] %v334_v14  ;;  %v362_v28 = vld [vmem:[%s1399_s4 + $0x1a0] sm:$0xff]  ;;  %v364_v29 = vld [vmem:[%s1399_s4 + $0x1b0] sm:$0xff] }
  0x37   : > { %337 = vst [vmem:[%s1404_s6 + $0x68] sm:$0xff] %v336_v15  ;;  %v366_v30 = vld [vmem:[%s1399_s4 + $0x1c0] sm:$0xff]  ;;  %v368_v31 = vld [vmem:[%s1399_s4 + $0x1d0] sm:$0xff] }
  0x38   : > { %339 = vst [vmem:[%s1404_s6 + $0x70] sm:$0xff] %v338_v16  ;;  %v370_v32 = vld [vmem:[%s1399_s4 + $0x1e0] sm:$0xff]  ;;  %v372_v33 = vld [vmem:[%s1399_s4 + $0x1f0] sm:$0xff] }
  0x39   : > { %341 = vst [vmem:[%s1404_s6 + $0x78] sm:$0xff] %v340_v17 }
  0x3a   : > { %343 = vst [vmem:[%s1404_s6 + $0x80] sm:$0xff] %v342_v18 }
  0x3b   : > { %345 = vst [vmem:[%s1404_s6 + $0x88] sm:$0xff] %v344_v19 }
  0x3c   : > { %347 = vst [vmem:[%s1404_s6 + $0x90] sm:$0xff] %v346_v20 }
  0x3d   : > { %349 = vst [vmem:[%s1404_s6 + $0x98] sm:$0xff] %v348_v21 }
  0x3e   : > { %351 = vst [vmem:[%s1404_s6 + $0xa0] sm:$0xff] %v350_v22 }
  0x3f   : > { %353 = vst [vmem:[%s1404_s6 + $0xa8] sm:$0xff] %v352_v23 }
  0x40   : > { %355 = vst [vmem:[%s1404_s6 + $0xb0] sm:$0xff] %v354_v24 }
  0x41   : > { %357 = vst [vmem:[%s1404_s6 + $0xb8] sm:$0xff] %v356_v25 }
  0x42   : > { %359 = vst [vmem:[%s1404_s6 + $0xc0] sm:$0xff] %v358_v26 }
  0x43   : > { %361 = vst [vmem:[%s1404_s6 + $0xc8] sm:$0xff] %v360_v27 }
  0x44   : > { %363 = vst [vmem:[%s1404_s6 + $0xd0] sm:$0xff] %v362_v28 }
  0x45   : > { %365 = vst [vmem:[%s1404_s6 + $0xd8] sm:$0xff] %v364_v29 }
  0x46   : > { %367 = vst [vmem:[%s1404_s6 + $0xe0] sm:$0xff] %v366_v30 }
  0x47   : > { %369 = vst [vmem:[%s1404_s6 + $0xe8] sm:$0xff] %v368_v31 }
  0x48   : > { %371 = vst [vmem:[%s1404_s6 + $0xf0] sm:$0xff] %v370_v32 }
  0x49   : > { %373 = vst [vmem:[%s1404_s6 + $0xf8] sm:$0xff] %v372_v33 }
  0x4a PF: > { %p902_p0 = scmp.ge.s32.totalorder %s1262_s22, 1  ;;  %p386_p1 = scmp.lt.s32.totalorder %s1262_s22, 19 }
  0x4c   : > { %p387_p2 = pnand %p902_p0, %p386_p1 }
  0x4d   : > { %s393_s24 = sand.u32 (!%p387_p2), 1, %s1238_s16   ;;  %s400_s25 = sand.u32 (!%p387_p2), 1, %s1230_s14  }
  0x4e   : > { %390 = sbr.rel (%p387_p2) target bundleno = 296 (0x128), region = 100  ;;  %s903_s30 = sshll.u32 (!%p387_p2), %s393_s24, 4 }
  0x4f   : > { %s904_s27 = sshll.u32 (!%p387_p2), %s400_s25, 8  ;;  %s427_s5 = sand.u32 (!%p387_p2), 1, %s1222_s12  }
  0x50   : > { %s906_s23 = sshll.u32 (!%p387_p2), %s1250_s19, 1  ;;  %s905_s28 = sshll.u32 (!%p387_p2), %s427_s5, 5 }
  0x51   : > { %p435_p3 = scmp.lt.s32.totalorder (!%p387_p2), %s906_s23, 3  ;;  %s1479_s26 = scalar_lea.vmem (!%p387_p2), [#allocation2], %s903_s30 }
  0x52   : > { %s1481_s4 = scalar_lea.vmem (!%p387_p2), [#allocation3], %s904_s27  ;;  %s1483_s6 = scalar_lea.vmem (!%p387_p2), [#allocation4], %s905_s28 }
  0x53   : > { %s1655_s23 = smov (!%p435_p3, %s906_s23), 3  ;;  %p907_p4 = scmp.ne.s32.totalorder %s1246_s18, 0 }
  0x54   : > { %s437_s29 = scalar_lea.vmem %s1625_s2, %s1655_s23 }
  0x55   : > { %444 = sbr.rel (%p907_p4) target bundleno = 95 (0x5f), region = 112 }
  0x5a   : > { %v1264_v34 = vmov 0.0  }
  0x5b   : > { %445 = vst [vmem:[%s1483_s6] sm:$0xff] %v1264_v34 }
  0x5c   : > { %446 = vst [vmem:[%s1483_s6 + $0x8] sm:$0xff] %v1264_v34 }
  0x5d   : > { %447 = vst [vmem:[%s1483_s6 + $0x10] sm:$0xff] %v1264_v34 }
  0x5e   : > { %448 = vst [vmem:[%s1483_s6 + $0x18] sm:$0xff] %v1264_v34 }
  0x5f PF: > { %v974_v35 = vld [vmem:[%s1481_s4 + $0x70] sm:$0xf]  ;;  %v1069_v36 = vld [vmem:[%s1481_s4 + $0x74] sm:$0xf0]  ;;  %v1068_v40 = vld [vmem:[%s1481_s4 + $0x74] sm:$0xf] }
  0x60   : > { %v1038_v37 = vld [vmem:[%s1481_s4 + $0xf0] sm:$0xf]  ;;  %v975_v38 = vor.u32 %v1069_v36, %v974_v35  ;;  %v1085_v39 = vld [vmem:[%s1481_s4 + $0xf4] sm:$0xf0]  ;;  %v976_v41 = vld [vmem:[%s1481_s4 + $0x78] sm:$0xf0] }
  0x61   : > { %v1039_v42 = vor.u32 %v1085_v39, %v1038_v37  ;;  %v979_v43 = vor.u32 %v1068_v40, %v976_v41  ;;  %v1084_v44 = vld [vmem:[%s1481_s4 + $0xf4] sm:$0xf]  ;;  %v1040_v45 = vld [vmem:[%s1481_s4 + $0xf8] sm:$0xf0]  ;;  %v966_v46 = vld [vmem:[%s1481_s4 + $0x60] sm:$0xf] }
  0x62   : > { %657 = vmatpush.bf16.msra.mxu0 %v975_v38  ;;  %v1043_v47 = vor.u32 %v1084_v44, %v1040_v45  ;;  %v1067_v48 = vld [vmem:[%s1481_s4 + $0x64] sm:$0xf0]  ;;  %v1030_v49 = vld [vmem:[%s1481_s4 + $0xe0] sm:$0xf]  ;;  %v1066_v53 = vld [vmem:[%s1481_s4 + $0x64] sm:$0xf] }
  0x63   : > { %v1083_v50 = vld [vmem:[%s1481_s4 + $0xe4] sm:$0xf0]  ;;  %671 = vmatpush.bf16.msra.mxu1 %v1039_v42  ;;  %685 = vmatpush.bf16.msra.mxu2 %v979_v43  ;;  %v967_v51 = vor.u32 %v1067_v48, %v966_v46  ;;  %v968_v54 = vld [vmem:[%s1481_s4 + $0x68] sm:$0xf0]  ;;  %v1082_v55 = vld [vmem:[%s1481_s4 + $0xe4] sm:$0xf] }
  0x64   : > { %v1031_v52 = vor.u32 %v1083_v50, %v1030_v49  ;;  %699 = vmatpush.bf16.msra.mxu3 %v1043_v47  ;;  %v971_v56 = vor.u32 %v1066_v53, %v968_v54  ;;  %v1032_v57 = vld [vmem:[%s1481_s4 + $0xe8] sm:$0xf0]  ;;  %v958_v58 = vld [vmem:[%s1481_s4 + $0x50] sm:$0xf]  ;;  %v1065_v59 = vld [vmem:[%s1481_s4 + $0x54] sm:$0xf0] }
  0x65   : > { %v1035_v60 = vor.u32 %v1082_v55, %v1032_v57  ;;  %v1022_v61 = vld [vmem:[%s1481_s4 + $0xd0] sm:$0xf]  ;;  %v1081_v62 = vld [vmem:[%s1481_s4 + $0xd4] sm:$0xf0]  ;;  %v1064_v63 = vld [vmem:[%s1481_s4 + $0x54] sm:$0xf]  ;;  %v959_v0 = vor.u32 %v1065_v59, %v958_v58 }
  0x66   : > { %658 = vmatpush.bf16.msra.mxu0 %v967_v51  ;;  %v960_v1 = vld [vmem:[%s1481_s4 + $0x58] sm:$0xf0]  ;;  %v1080_v2 = vld [vmem:[%s1481_s4 + $0xd4] sm:$0xf]  ;;  %v1023_v4 = vor.u32 %v1081_v62, %v1022_v61  ;;  %v950_v6 = vld [vmem:[%s1481_s4 + $0x40] sm:$0xf] }
  0x67   : > { %v1024_v3 = vld [vmem:[%s1481_s4 + $0xd8] sm:$0xf0]  ;;  %672 = vmatpush.bf16.msra.mxu1 %v1031_v52  ;;  %686 = vmatpush.bf16.msra.mxu2 %v971_v56  ;;  %v963_v5 = vor.u32 %v1064_v63, %v960_v1  ;;  %v1063_v7 = vld [vmem:[%s1481_s4 + $0x44] sm:$0xf0]  ;;  %v1014_v8 = vld [vmem:[%s1481_s4 + $0xc0] sm:$0xf] }
  0x68   : > { %700 = vmatpush.bf16.msra.mxu3 %v1035_v60  ;;  %v1027_v9 = vor.u32 %v1080_v2, %v1024_v3  ;;  %v1079_v10 = vld [vmem:[%s1481_s4 + $0xc4] sm:$0xf0]  ;;  %v1062_v11 = vld [vmem:[%s1481_s4 + $0x44] sm:$0xf]  ;;  %v952_v12 = vld [vmem:[%s1481_s4 + $0x48] sm:$0xf0]  ;;  %v951_v15 = vor.u32 %v1063_v7, %v950_v6 }
  0x69   : > { %v1078_v13 = vld [vmem:[%s1481_s4 + $0xc4] sm:$0xf]  ;;  %v1016_v14 = vld [vmem:[%s1481_s4 + $0xc8] sm:$0xf0]  ;;  %v1015_v16 = vor.u32 %v1079_v10, %v1014_v8  ;;  %v955_v17 = vor.u32 %v1062_v11, %v952_v12  ;;  %v942_v18 = vld [vmem:[%s1481_s4 + $0x30] sm:$0xf] }
  0x6a   : > { %659 = vmatpush.bf16.msra.mxu0 %v959_v0  ;;  %v1061_v19 = vld [vmem:[%s1481_s4 + $0x34] sm:$0xf0]  ;;  %v1006_v20 = vld [vmem:[%s1481_s4 + $0xb0] sm:$0xf]  ;;  %v1019_v21 = vor.u32 %v1078_v13, %v1016_v14  ;;  %v1060_v23 = vld [vmem:[%s1481_s4 + $0x34] sm:$0xf] }
  0x6b   : > { %673 = vmatpush.bf16.msra.mxu1 %v1023_v4  ;;  %687 = vmatpush.bf16.msra.mxu2 %v963_v5  ;;  %v1077_v22 = vld [vmem:[%s1481_s4 + $0xb4] sm:$0xf0]  ;;  %v944_v24 = vld [vmem:[%s1481_s4 + $0x38] sm:$0xf0]  ;;  %v1076_v25 = vld [vmem:[%s1481_s4 + $0xb4] sm:$0xf]  ;;  %v943_v27 = vor.u32 %v1061_v19, %v942_v18 }
  0x6c   : > { %701 = vmatpush.bf16.msra.mxu3 %v1027_v9  ;;  %v1008_v26 = vld [vmem:[%s1481_s4 + $0xb8] sm:$0xf0]  ;;  %v1007_v28 = vor.u32 %v1077_v22, %v1006_v20  ;;  %v947_v29 = vor.u32 %v1060_v23, %v944_v24  ;;  %v934_v30 = vld [vmem:[%s1481_s4 + $0x20] sm:$0xf]  ;;  %v1059_v31 = vld [vmem:[%s1481_s4 + $0x24] sm:$0xf0] }
  0x6d   : > { %v998_v32 = vld [vmem:[%s1481_s4 + $0xa0] sm:$0xf]  ;;  %v1011_v33 = vor.u32 %v1076_v25, %v1008_v26  ;;  %v1075_v34 = vld [vmem:[%s1481_s4 + $0xa4] sm:$0xf0]  ;;  %v1058_v35 = vld [vmem:[%s1481_s4 + $0x24] sm:$0xf]  ;;  %v935_v39 = vor.u32 %v1059_v31, %v934_v30 }
  0x6e   : > { %660 = vmatpush.bf16.msra.mxu0 %v951_v15  ;;  %v936_v36 = vld [vmem:[%s1481_s4 + $0x28] sm:$0xf0]  ;;  %v1074_v37 = vld [vmem:[%s1481_s4 + $0xa4] sm:$0xf]  ;;  %v999_v40 = vor.u32 %v1075_v34, %v998_v32  ;;  %v926_v42 = vld [vmem:[%s1481_s4 + $0x10] sm:$0xf] }
  0x6f   : > { %674 = vmatpush.bf16.msra.mxu1 %v1015_v16  ;;  %688 = vmatpush.bf16.msra.mxu2 %v955_v17  ;;  %v1000_v38 = vld [vmem:[%s1481_s4 + $0xa8] sm:$0xf0]  ;;  %v939_v41 = vor.u32 %v1058_v35, %v936_v36  ;;  %v1057_v43 = vld [vmem:[%s1481_s4 + $0x14] sm:$0xf0]  ;;  %v990_v44 = vld [vmem:[%s1481_s4 + $0x90] sm:$0xf] }
  0x70   : > { %702 = vmatpush.bf16.msra.mxu3 %v1019_v21  ;;  %v1003_v45 = vor.u32 %v1074_v37, %v1000_v38  ;;  %v1073_v46 = vld [vmem:[%s1481_s4 + $0x94] sm:$0xf0]  ;;  %v1056_v47 = vld [vmem:[%s1481_s4 + $0x14] sm:$0xf]  ;;  %v928_v48 = vld [vmem:[%s1481_s4 + $0x18] sm:$0xf0]  ;;  %v927_v51 = vor.u32 %v1057_v43, %v926_v42 }
  0x71   : > { %v1072_v49 = vld [vmem:[%s1481_s4 + $0x94] sm:$0xf]  ;;  %v992_v50 = vld [vmem:[%s1481_s4 + $0x98] sm:$0xf0]  ;;  %v991_v52 = vor.u32 %v1073_v46, %v990_v44  ;;  %v931_v53 = vor.u32 %v1056_v47, %v928_v48  ;;  %v918_v54 = vld [vmem:[%s1481_s4] sm:$0xf] }
  0x72   : > { %661 = vmatpush.bf16.msra.mxu0 %v943_v27  ;;  %v1055_v55 = vld [vmem:[%s1481_s4 + $0x4] sm:$0xf0]  ;;  %v982_v56 = vld [vmem:[%s1481_s4 + $0x80] sm:$0xf]  ;;  %v995_v57 = vor.u32 %v1072_v49, %v992_v50  ;;  %v1054_v59 = vld [vmem:[%s1481_s4 + $0x4] sm:$0xf] }
  0x73   : > { %675 = vmatpush.bf16.msra.mxu1 %v1007_v28  ;;  %689 = vmatpush.bf16.msra.mxu2 %v947_v29  ;;  %v1071_v58 = vld [vmem:[%s1481_s4 + $0x84] sm:$0xf0]  ;;  %v920_v60 = vld [vmem:[%s1481_s4 + $0x8] sm:$0xf0]  ;;  %v1070_v61 = vld [vmem:[%s1481_s4 + $0x84] sm:$0xf]  ;;  %v919_v63 = vor.u32 %v1055_v55, %v918_v54 }
  0x74   : > { %703 = vmatpush.bf16.msra.mxu3 %v1011_v33  ;;  %v984_v62 = vld [vmem:[%s1481_s4 + $0x88] sm:$0xf0]  ;;  %v910_v0 = vld [vmem:[%s1479_s26] sm:$0xf]  ;;  %v1053_v1 = vld [vmem:[%s1479_s26 + $0x4] sm:$0xf0]  ;;  %v983_v2 = vor.u32 %v1071_v58, %v982_v56  ;;  %v923_v3 = vor.u32 %v1054_v59, %v920_v60 }
  0x75   : > { %v1052_v4 = vld [vmem:[%s1479_s26 + $0x4] sm:$0xf]  ;;  %v912_v5 = vld [vmem:[%s1479_s26 + $0x8] sm:$0xf0]  ;;  %v987_v6 = vor.u32 %v1070_v61, %v984_v62  ;;  %v911_v7 = vor.u32 %v1053_v1, %v910_v0  ;;  %p1044_p5 = scmp.ne.s32.totalorder %s1246_s18, 8 }
  0x76   : > { %662 = vmatpush.bf16.msra.mxu0 %v935_v39  ;;  %v915_v8 = vor.u32 %v1052_v4, %v912_v5  ;;  %v449_v10 = vld [vmem:[%s1483_s6] sm:$0xff]  ;;  %v450_v15 = vld [vmem:[%s1483_s6 + $0x8] sm:$0xff]  ;;  %v451_v19 = vld [vmem:[%s1483_s6 + $0x10] sm:$0xff] }
  0x77   : > { %676 = vmatpush.bf16.msra.mxu1 %v999_v40  ;;  %690 = vmatpush.bf16.msra.mxu2 %v939_v41  ;;  %v452_v25 = vld [vmem:[%s1483_s6 + $0x18] sm:$0xff] }
  0x78   : > { %704 = vmatpush.bf16.msra.mxu3 %v1003_v45 }
  0x7a   : > { %663 = vmatpush.bf16.msra.mxu0 %v927_v51 }
  0x7b   : > { %677 = vmatpush.bf16.msra.mxu1 %v991_v52  ;;  %691 = vmatpush.bf16.msra.mxu2 %v931_v53 }
  0x7c   : > { %705 = vmatpush.bf16.msra.mxu3 %v995_v57 }
  0x7e   : > { %664 = vmatpush.bf16.msra.mxu0 %v919_v63 }
  0x7f   : > { %678 = vmatpush.bf16.msra.mxu1 %v983_v2  ;;  %692 = vmatpush.bf16.msra.mxu2 %v923_v3 }
  0x80   : > { %706 = vmatpush.bf16.msra.mxu3 %v987_v6 }
  0x81   : > { %665 = vmatmul.bf16.vlgmr.msra.gmra.mxu0 %v911_v7 }
  0x82   : > { %679 = vmatmul.bf16.vlgmr.msra.gmra.mxu1 %v915_v8  ;;  %693 = vmatmul.bf16.vlgmr.msra.gmra.mxu2 %v911_v7 }
  0x83   : > { %707 = vmatmul.bf16.vlgmr.msra.gmra.mxu3 %v915_v8 }
  0xfe   : > { %v666_v9 = vpop.f32.mrf.mxu0 }
  0xff   : > { %v680_v11 = vpop.f32.mrf.mxu1 }
 0x100   : > { %v681_v12 = vadd.f32 %v680_v11, %v666_v9 }
 0x102   : > { %v713_v13 = vadd.f32 %v681_v12, %v449_v10 }
 0x104   : > { %717 = vst [vmem:[%s1483_s6] sm:$0xff] %v713_v13 }
 0x105   : > { %v694_v14 = vpop.f32.mrf.mxu2 }
 0x106   : > { %v708_v16 = vpop.f32.mrf.mxu3  ;;  %v668_v17 = vpop.f32.mrf.mxu0 }
 0x107   : > { %v709_v18 = vadd.f32 %v708_v16, %v694_v14  ;;  %v682_v20 = vpop.f32.mrf.mxu1 }
 0x108   : > { %v683_v21 = vadd.f32 %v682_v20, %v668_v17 }
 0x109   : > { %v714_v22 = vadd.f32 %v709_v18, %v450_v15 }
 0x10a   : > { %v715_v23 = vadd.f32 %v683_v21, %v451_v19 }
 0x10b   : > { %718 = vst [vmem:[%s1483_s6 + $0x8] sm:$0xff] %v714_v22 }
 0x10c   : > { %719 = vst [vmem:[%s1483_s6 + $0x10] sm:$0xff] %v715_v23 }
 0x10d   : > { %v696_v24 = vpop.f32.mrf.mxu2 }
 0x10e   : > { %v710_v26 = vpop.f32.mrf.mxu3 }
 0x10f   : > { %v711_v27 = vadd.f32 %v710_v26, %v696_v24  ;;  %724 = sbr.rel (%p1044_p5) target bundleno = 288 (0x120), region = 116 }
 0x111   : > { %v716_v28 = vadd.f32 %v711_v27, %v452_v25 }
 0x113   : > { %720 = vst [vmem:[%s1483_s6 + $0x18] sm:$0xff] %v716_v28 }
 0x114   : > { %v725_v29 = vld [vmem:[%s1483_s6] sm:$0xff]  ;;  %v726_v31 = vld [vmem:[%s1483_s6 + $0x8] sm:$0xff]  ;;  %v727_v34 = vld [vmem:[%s1483_s6 + $0x10] sm:$0xff] }
 0x115   : > { %v729_v30 = vld [vmem:[%s437_s29] sm:$0x3] }
 0x116   : > { %v731_v32 = vperm.slane %v729_v30, 0  ;;  %v732_v33 = vperm.slane %v729_v30, 1 }
 0x118   : > { %v735_v36 = vadd.f32 %v731_v32, %v725_v29  ;;  %v736_v37 = vadd.f32 %v732_v33, %v726_v31  ;;  %v737_v38 = vadd.f32 %v731_v32, %v727_v34 }
 0x11a   : > { %v728_v35 = vld [vmem:[%s1483_s6 + $0x18] sm:$0xff]  ;;  %v739_v40 = vmax.f32 %v735_v36, 0.0  ;;  %v740_v41 = vmax.f32 %v736_v37, 0.0  ;;  %v741_v42 = vmax.f32 %v737_v38, 0.0 }
 0x11b   : > { %v738_v39 = vadd.f32 %v732_v33, %v728_v35 }
 0x11c   : > { %743 = vst [vmem:[%s1483_s6] sm:$0xff] %v739_v40 }
 0x11d   : > { %v742_v43 = vmax.f32 %v738_v39, 0.0  ;;  %744 = vst [vmem:[%s1483_s6 + $0x8] sm:$0xff] %v740_v41 }
 0x11e   : > { %745 = vst [vmem:[%s1483_s6 + $0x10] sm:$0xff] %v741_v42 }
 0x11f   : > { %746 = vst [vmem:[%s1483_s6 + $0x18] sm:$0xff] %v742_v43 }
 0x120 PF: > { %753 = sbr.rel (!%p1379_p12) target bundleno = 296 (0x128), region = 120  ;;  %s1086_s16 = sshll.u32 (%p1379_p12), %s1250_s19, 4 }
 0x121   : > { %s759_s25 = scalar_lea.vmem (%p1379_p12), %s1626_s3, %s1086_s16 }
 0x123   : > { %v772_v44 = vld [vmem:[%s1483_s6] sm:$0xff] (%p1379_p12) }
 0x124   : > { %v774_v45 = vld [vmem:[%s1483_s6 + $0x8] sm:$0xff] (%p1379_p12)  ;;  %773 = vst [vmem:[%s759_s25] sm:$0xff] (%p1379_p12), %v772_v44 }
 0x125   : > { %v776_v46 = vld [vmem:[%s1483_s6 + $0x10] sm:$0xff]  ;;  %775 = vst [vmem:[%s759_s25 + $0x8] sm:$0xff] %v774_v45 }
 0x126   : > { %v778_v47 = vld [vmem:[%s1483_s6 + $0x18] sm:$0xff]  ;;  %777 = vst [vmem:[%s759_s25 + $0x20] sm:$0xff] %v776_v46 }
 0x127   : > { %779 = vst [vmem:[%s759_s25 + $0x28] sm:$0xff] %v778_v47 }
 0x128 PF: > { %s13_s22 = sadd.s32 1, %s1262_s22   ;;  %s1635_s19 = sld [smem:[#allocation7_spill]] }
 0x129   : > { %p10_p6 = scmp.ge.s32.totalorder %s13_s22, 20   ;;  %s1636_s10 = sld [smem:[#allocation5_spill]] }
 0x12a   : > { %s1637_s30 = sld [smem:[#allocation6_spill]]  ;;  %s1638_s12 = smov %s1226_s13 }
 0x12b   : > { %s1639_s13 = smov %s1377_s9  ;;  %s1640_s14 = smov %s1234_s15 }
 0x12c   : > { %s1641_s15 = smov %s1374_s8  ;;  %s1642_s16 = smov %s1242_s17 }
 0x12d   : > { %s1644_s18 = smov %s1254_s20  ;;  %12 = sbr.rel (!%p10_p6) target bundleno = 6 (0x6), region = 185 }
 0x12e   : > { %s1643_s17 = smov %s1635_s19  ;;  %s1645_s19 = smov %s1258_s21 }
 0x12f   : > { %s1646_s20 = smov %s1636_s10 }
 0x130   : > { %s1647_s21 = smov %s1637_s30 }

// kernel: resnet18_attention_forward.64
= control target key start
LH: loop header
LB: loop body
LE: loop exit
PB: predicated region body
PF: predicated region fallthrough
CT: control target
= control target key end

     0   :  { %s1281_s12 = smov 0   ;;  %s1283_s13 = smov 0   ;;  %s1619_s0 = inlined_call_operand.vmem [shape: bf16[16,4608], index: 0, kind: input, shape index: {}]   ;;  %s1620_s1 = inlined_call_operand.vmem [shape: bf16[4608,512], index: 1, kind: input, shape index: {}]   ;;  %s1621_s2 = inlined_call_operand.vmem [shape: f32[1,512], index: 2, kind: input, shape index: {}]   ;;  %s1622_s3 = inlined_call_operand.vmem [shape: f32[16,512], index: 3, kind: output, shape index: {}]  }
   0x1   :  { %s1285_s14 = smov 0   ;;  %s1287_s15 = smov 0  }
   0x2   :  { %s1289_s16 = smov 0   ;;  %s1291_s17 = smov 0  }
   0x3   :  { %s1293_s18 = smov 0   ;;  %s1295_s19 = smov 0  }
   0x4   :  { %s1297_s20 = smov 0   ;;  %s1299_s21 = smov 0  }
   0x5   :  { %s1301_s22 = smov 0  }
   0x6 LB: > { %s886_s23 = sadd.s32 4294967295, %s1258_s22   ;;  %s25_s24 = sadd.s32 1, %s1250_s20  ;;  %s1258_s22 = sphi %s1301_s22, %s13_s22   ;;  %s1254_s21 = sphi %s1299_s21, %s1643_s21   ;;  %s1250_s20 = sphi %s1297_s20, %s1642_s20   ;;  %s1246_s19 = sphi %s1295_s19, %s1641_s19   ;;  %s1242_s18 = sphi %s1293_s18, %s1640_s18   ;;  %s1238_s17 = sphi %s1291_s17, %s1639_s17   ;;  %s1234_s16 = sphi %s1289_s16, %s1638_s16   ;;  %s1230_s15 = sphi %s1287_s15, %s1637_s15   ;;  %s1226_s14 = sphi %s1285_s14, %s1636_s14   ;;  %s1222_s13 = sphi %s1283_s13, %s1635_s13   ;;  %s1218_s12 = sphi %s1281_s12, %s1634_s12  }
   0x7   : > { %p26_p0 = scmp.ge.s32.totalorder %s25_s24, 18  ;;  %s28_s25 = sadd.s32 1, %s1254_s21 }
   0x8   : > { %s41_s26 = sadd.s32 1, %s1238_s17  ;;  %p48_p1 = scmp.ne.s32.totalorder %s1238_s17, %s1234_s16 }
   0x9   : > { %s1645_s24 = smov (%p26_p0, %s25_s24), 0  ;;  %s1647_s25 = smov (!%p26_p0, %s28_s25), %s1254_s21 }
   0xa   : > { %1625 = sst [smem:[#allocation5_spill]] %s1645_s24  ;;  %s37_s27 = ssub.s32 %s1250_s20, %s1645_s24 }
   0xb   : > { %p49_p2 = scmp.eq.s32.totalorder %s1258_s22, 0  ;;  %p30_p3 = scmp.ge.s32.totalorder %s1647_s25, 2 }
   0xc   : > { %p39_p4 = scmp.eq.s32.totalorder %s37_s27, 0  ;;  %s69_s29 = sadd.s32 1, %s1230_s15 }
   0xd   : > { %p1348_p5 = por %p49_p2, %p48_p1  ;;  %s1649_s25 = smov (%p30_p3, %s1647_s25), 0 }
   0xe   : > { %1627 = sst [smem:[#allocation6_spill]] %s1649_s25  ;;  %s65_s4 = ssub.s32 %s1254_s21, %s1649_s25 }
   0xf   : > { %s1356_s30 = scalar_select %p39_p4, %s1238_s17, %s41_s26  }
  0x10   : > { %p76_p6 = scmp.ne.s32.totalorder %s1230_s15, %s1226_s14  ;;  %s66_s5 = sor.u32 %s65_s4, %s37_s27 }
  0x11   : > { %1628 = sst [smem:[#allocation7_spill]] %s1356_s30  ;;  %p121_p7 = scmp.eq.s32.totalorder %s65_s4, 0 }
  0x12   : > { %p67_p8 = scmp.eq.s32.totalorder %s66_s5, 0  ;;  %p1362_p9 = por %p76_p6, %p49_p2 }
  0x13   : > { %s123_s7 = sadd.s32 1, %s1222_s13  ;;  %p133_p10 = scmp.ne.s32.totalorder %s1222_s13, %s1218_s12 }
  0x14   : > { %s1370_s8 = scalar_select %p67_p8, %s1230_s15, %s69_s29  }
  0x15   : > { %s1373_s9 = scalar_select %p121_p7, %s1222_s13, %s123_s7  }
  0x16   : > { %p134_p11 = scmp.eq.s32.totalorder %s886_s23, 35  ;;  %p889_p13 = scmp.ge.s32.totalorder %s1258_s22, 36 }
  0x18   : > { %p1375_p12 = por %p134_p11, %p133_p10  ;;  %156 = sbr.rel (%p889_p13) target bundleno = 74 (0x4a), region = 16 }
  0x1d   : > { %159 = sbr.rel (!%p1348_p5) target bundleno = 35 (0x23), region = 20  ;;  %s161_s11 = sand.u32 (%p1348_p5), 1, %s1238_s17  }
  0x1e   : > { %s1046_s26 = sshll.u32 (%p1348_p5), %s1250_s20, 3  ;;  %s890_s27 = sshll.u32 (%p1348_p5), %s161_s11, 4 }
  0x1f   : > { %s169_s5 = scalar_lea.vmem (%p1348_p5), %s1619_s0, %s1046_s26  ;;  %s163_s23 = scalar_lea.vmem (%p1348_p5), [#allocation2], %s890_s27 }
  0x20   : > { %v200_v0 = vld [vmem:[%s169_s5] sm:$0xff] (%p1348_p5)  ;;  %v202_v1 = vld [vmem:[%s169_s5 + $0x90] sm:$0xff] (%p1348_p5) }
  0x21   : > { %201 = vst [vmem:[%s163_s23] sm:$0xff] (%p1348_p5), %v200_v0 }
  0x22   : > { %203 = vst [vmem:[%s163_s23 + $0x8] sm:$0xff] %v202_v1 }
  0x23 PF: > { %209 = sbr.rel (!%p1362_p9) target bundleno = 74 (0x4a), region = 58  ;;  %s211_s28 = sand.u32 (%p1362_p9), 1, %s1230_s15  }
  0x24   : > { %s895_s7 = sshll.u32 (%p1362_p9), %s1254_s21, 1  ;;  %s893_s25 = sshll.u32 (%p1362_p9), %s211_s28, 8 }
  0x25   : > { %s1047_s11 = sshll.u32 (%p1362_p9), %s1250_s20, 7  ;;  %s1400_s6 = scalar_lea.vmem (%p1362_p9), [#allocation3], %s893_s25 }
  0x26   : > { %s217_s24 = sadd.s32 (%p1362_p9), %s1047_s11, %s895_s7 }
  0x27   : > { %s897_s30 = sshll.u32 (%p1362_p9), %s217_s24, 2 }
  0x28   : > { %s1395_s4 = scalar_lea.vmem %s1620_s1, %s897_s30 }
  0x29   : > { %v310_v2 = vld [vmem:[%s1395_s4] sm:$0xff]  ;;  %v312_v3 = vld [vmem:[%s1395_s4 + $0x10] sm:$0xff] }
  0x2a   : > { %v314_v4 = vld [vmem:[%s1395_s4 + $0x20] sm:$0xff]  ;;  %311 = vst [vmem:[%s1400_s6] sm:$0xff] %v310_v2  ;;  %v316_v5 = vld [vmem:[%s1395_s4 + $0x30] sm:$0xff] }
  0x2b   : > { %313 = vst [vmem:[%s1400_s6 + $0x8] sm:$0xff] %v312_v3  ;;  %v318_v6 = vld [vmem:[%s1395_s4 + $0x40] sm:$0xff]  ;;  %v320_v7 = vld [vmem:[%s1395_s4 + $0x50] sm:$0xff] }
  0x2c   : > { %315 = vst [vmem:[%s1400_s6 + $0x10] sm:$0xff] %v314_v4  ;;  %v322_v8 = vld [vmem:[%s1395_s4 + $0x60] sm:$0xff]  ;;  %v324_v9 = vld [vmem:[%s1395_s4 + $0x70] sm:$0xff] }
  0x2d   : > { %317 = vst [vmem:[%s1400_s6 + $0x18] sm:$0xff] %v316_v5  ;;  %v326_v10 = vld [vmem:[%s1395_s4 + $0x80] sm:$0xff]  ;;  %v328_v11 = vld [vmem:[%s1395_s4 + $0x90] sm:$0xff] }
  0x2e   : > { %319 = vst [vmem:[%s1400_s6 + $0x20] sm:$0xff] %v318_v6  ;;  %v330_v12 = vld [vmem:[%s1395_s4 + $0xa0] sm:$0xff]  ;;  %v332_v13 = vld [vmem:[%s1395_s4 + $0xb0] sm:$0xff] }
  0x2f   : > { %321 = vst [vmem:[%s1400_s6 + $0x28] sm:$0xff] %v320_v7  ;;  %v334_v14 = vld [vmem:[%s1395_s4 + $0xc0] sm:$0xff]  ;;  %v336_v15 = vld [vmem:[%s1395_s4 + $0xd0] sm:$0xff] }
  0x30   : > { %323 = vst [vmem:[%s1400_s6 + $0x30] sm:$0xff] %v322_v8  ;;  %v338_v16 = vld [vmem:[%s1395_s4 + $0xe0] sm:$0xff]  ;;  %v340_v17 = vld [vmem:[%s1395_s4 + $0xf0] sm:$0xff] }
  0x31   : > { %325 = vst [vmem:[%s1400_s6 + $0x38] sm:$0xff] %v324_v9  ;;  %v342_v18 = vld [vmem:[%s1395_s4 + $0x100] sm:$0xff]  ;;  %v344_v19 = vld [vmem:[%s1395_s4 + $0x110] sm:$0xff] }
  0x32   : > { %327 = vst [vmem:[%s1400_s6 + $0x40] sm:$0xff] %v326_v10  ;;  %v346_v20 = vld [vmem:[%s1395_s4 + $0x120] sm:$0xff]  ;;  %v348_v21 = vld [vmem:[%s1395_s4 + $0x130] sm:$0xff] }
  0x33   : > { %329 = vst [vmem:[%s1400_s6 + $0x48] sm:$0xff] %v328_v11  ;;  %v350_v22 = vld [vmem:[%s1395_s4 + $0x140] sm:$0xff]  ;;  %v352_v23 = vld [vmem:[%s1395_s4 + $0x150] sm:$0xff] }
  0x34   : > { %331 = vst [vmem:[%s1400_s6 + $0x50] sm:$0xff] %v330_v12  ;;  %v354_v24 = vld [vmem:[%s1395_s4 + $0x160] sm:$0xff]  ;;  %v356_v25 = vld [vmem:[%s1395_s4 + $0x170] sm:$0xff] }
  0x35   : > { %333 = vst [vmem:[%s1400_s6 + $0x58] sm:$0xff] %v332_v13  ;;  %v358_v26 = vld [vmem:[%s1395_s4 + $0x180] sm:$0xff]  ;;  %v360_v27 = vld [vmem:[%s1395_s4 + $0x190] sm:$0xff] }
  0x36   : > { %335 = vst [vmem:[%s1400_s6 + $0x60] sm:$0xff] %v334_v14  ;;  %v362_v28 = vld [vmem:[%s1395_s4 + $0x1a0] sm:$0xff]  ;;  %v364_v29 = vld [vmem:[%s1395_s4 + $0x1b0] sm:$0xff] }
  0x37   : > { %337 = vst [vmem:[%s1400_s6 + $0x68] sm:$0xff] %v336_v15  ;;  %v366_v30 = vld [vmem:[%s1395_s4 + $0x1c0] sm:$0xff]  ;;  %v368_v31 = vld [vmem:[%s1395_s4 + $0x1d0] sm:$0xff] }
  0x38   : > { %339 = vst [vmem:[%s1400_s6 + $0x70] sm:$0xff] %v338_v16  ;;  %v370_v32 = vld [vmem:[%s1395_s4 + $0x1e0] sm:$0xff]  ;;  %v372_v33 = vld [vmem:[%s1395_s4 + $0x1f0] sm:$0xff] }
  0x39   : > { %341 = vst [vmem:[%s1400_s6 + $0x78] sm:$0xff] %v340_v17 }
  0x3a   : > { %343 = vst [vmem:[%s1400_s6 + $0x80] sm:$0xff] %v342_v18 }
  0x3b   : > { %345 = vst [vmem:[%s1400_s6 + $0x88] sm:$0xff] %v344_v19 }
  0x3c   : > { %347 = vst [vmem:[%s1400_s6 + $0x90] sm:$0xff] %v346_v20 }
  0x3d   : > { %349 = vst [vmem:[%s1400_s6 + $0x98] sm:$0xff] %v348_v21 }
  0x3e   : > { %351 = vst [vmem:[%s1400_s6 + $0xa0] sm:$0xff] %v350_v22 }
  0x3f   : > { %353 = vst [vmem:[%s1400_s6 + $0xa8] sm:$0xff] %v352_v23 }
  0x40   : > { %355 = vst [vmem:[%s1400_s6 + $0xb0] sm:$0xff] %v354_v24 }
  0x41   : > { %357 = vst [vmem:[%s1400_s6 + $0xb8] sm:$0xff] %v356_v25 }
  0x42   : > { %359 = vst [vmem:[%s1400_s6 + $0xc0] sm:$0xff] %v358_v26 }
  0x43   : > { %361 = vst [vmem:[%s1400_s6 + $0xc8] sm:$0xff] %v360_v27 }
  0x44   : > { %363 = vst [vmem:[%s1400_s6 + $0xd0] sm:$0xff] %v362_v28 }
  0x45   : > { %365 = vst [vmem:[%s1400_s6 + $0xd8] sm:$0xff] %v364_v29 }
  0x46   : > { %367 = vst [vmem:[%s1400_s6 + $0xe0] sm:$0xff] %v366_v30 }
  0x47   : > { %369 = vst [vmem:[%s1400_s6 + $0xe8] sm:$0xff] %v368_v31 }
  0x48   : > { %371 = vst [vmem:[%s1400_s6 + $0xf0] sm:$0xff] %v370_v32 }
  0x49   : > { %373 = vst [vmem:[%s1400_s6 + $0xf8] sm:$0xff] %v372_v33 }
  0x4a PF: > { %p898_p0 = scmp.ge.s32.totalorder %s1258_s22, 1  ;;  %p386_p1 = scmp.lt.s32.totalorder %s1258_s22, 37 }
  0x4c   : > { %p387_p2 = pnand %p898_p0, %p386_p1 }
  0x4d   : > { %s393_s24 = sand.u32 (!%p387_p2), 1, %s1234_s16   ;;  %s400_s25 = sand.u32 (!%p387_p2), 1, %s1226_s14  }
  0x4e   : > { %390 = sbr.rel (%p387_p2) target bundleno = 294 (0x126), region = 100  ;;  %s899_s30 = sshll.u32 (!%p387_p2), %s393_s24, 4 }
  0x4f   : > { %s900_s27 = sshll.u32 (!%p387_p2), %s400_s25, 8  ;;  %s427_s5 = sand.u32 (!%p387_p2), 1, %s1218_s12  }
  0x50   : > { %s902_s23 = sshll.u32 (!%p387_p2), %s1246_s19, 1  ;;  %s901_s28 = sshll.u32 (!%p387_p2), %s427_s5, 5 }
  0x51   : > { %p435_p3 = scmp.lt.s32.totalorder (!%p387_p2), %s902_s23, 3  ;;  %s1475_s26 = scalar_lea.vmem (!%p387_p2), [#allocation2], %s899_s30 }
  0x52   : > { %s1477_s4 = scalar_lea.vmem (!%p387_p2), [#allocation3], %s900_s27  ;;  %s1479_s6 = scalar_lea.vmem (!%p387_p2), [#allocation4], %s901_s28 }
  0x53   : > { %s1651_s23 = smov (!%p435_p3, %s902_s23), 3  ;;  %p903_p4 = scmp.ne.s32.totalorder %s1242_s18, 0 }
  0x54   : > { %s437_s29 = scalar_lea.vmem %s1621_s2, %s1651_s23 }
  0x55   : > { %444 = sbr.rel (%p903_p4) target bundleno = 95 (0x5f), region = 112 }
  0x5a   : > { %v1260_v34 = vmov 0.0  }
  0x5b   : > { %445 = vst [vmem:[%s1479_s6] sm:$0xff] %v1260_v34 }
  0x5c   : > { %446 = vst [vmem:[%s1479_s6 + $0x8] sm:$0xff] %v1260_v34 }
  0x5d   : > { %447 = vst [vmem:[%s1479_s6 + $0x10] sm:$0xff] %v1260_v34 }
  0x5e   : > { %448 = vst [vmem:[%s1479_s6 + $0x18] sm:$0xff] %v1260_v34 }
  0x5f PF: > { %v970_v35 = vld [vmem:[%s1477_s4 + $0x70] sm:$0xf]  ;;  %v1065_v36 = vld [vmem:[%s1477_s4 + $0x74] sm:$0xf0]  ;;  %v1064_v40 = vld [vmem:[%s1477_s4 + $0x74] sm:$0xf] }
  0x60   : > { %v1034_v37 = vld [vmem:[%s1477_s4 + $0xf0] sm:$0xf]  ;;  %v971_v38 = vor.u32 %v1065_v36, %v970_v35  ;;  %v1081_v39 = vld [vmem:[%s1477_s4 + $0xf4] sm:$0xf0]  ;;  %v972_v41 = vld [vmem:[%s1477_s4 + $0x78] sm:$0xf0] }
  0x61   : > { %v1035_v42 = vor.u32 %v1081_v39, %v1034_v37  ;;  %v975_v43 = vor.u32 %v1064_v40, %v972_v41  ;;  %v1080_v44 = vld [vmem:[%s1477_s4 + $0xf4] sm:$0xf]  ;;  %v1036_v45 = vld [vmem:[%s1477_s4 + $0xf8] sm:$0xf0]  ;;  %v962_v46 = vld [vmem:[%s1477_s4 + $0x60] sm:$0xf] }
  0x62   : > { %657 = vmatpush.bf16.msra.mxu0 %v971_v38  ;;  %v1039_v47 = vor.u32 %v1080_v44, %v1036_v45  ;;  %v1063_v48 = vld [vmem:[%s1477_s4 + $0x64] sm:$0xf0]  ;;  %v1026_v49 = vld [vmem:[%s1477_s4 + $0xe0] sm:$0xf]  ;;  %v1062_v53 = vld [vmem:[%s1477_s4 + $0x64] sm:$0xf] }
  0x63   : > { %v1079_v50 = vld [vmem:[%s1477_s4 + $0xe4] sm:$0xf0]  ;;  %671 = vmatpush.bf16.msra.mxu1 %v1035_v42  ;;  %685 = vmatpush.bf16.msra.mxu2 %v975_v43  ;;  %v963_v51 = vor.u32 %v1063_v48, %v962_v46  ;;  %v964_v54 = vld [vmem:[%s1477_s4 + $0x68] sm:$0xf0]  ;;  %v1078_v55 = vld [vmem:[%s1477_s4 + $0xe4] sm:$0xf] }
  0x64   : > { %v1027_v52 = vor.u32 %v1079_v50, %v1026_v49  ;;  %699 = vmatpush.bf16.msra.mxu3 %v1039_v47  ;;  %v967_v56 = vor.u32 %v1062_v53, %v964_v54  ;;  %v1028_v57 = vld [vmem:[%s1477_s4 + $0xe8] sm:$0xf0]  ;;  %v954_v58 = vld [vmem:[%s1477_s4 + $0x50] sm:$0xf]  ;;  %v1061_v59 = vld [vmem:[%s1477_s4 + $0x54] sm:$0xf0] }
  0x65   : > { %v1031_v60 = vor.u32 %v1078_v55, %v1028_v57  ;;  %v1018_v61 = vld [vmem:[%s1477_s4 + $0xd0] sm:$0xf]  ;;  %v1077_v62 = vld [vmem:[%s1477_s4 + $0xd4] sm:$0xf0]  ;;  %v1060_v63 = vld [vmem:[%s1477_s4 + $0x54] sm:$0xf]  ;;  %v955_v0 = vor.u32 %v1061_v59, %v954_v58 }
  0x66   : > { %658 = vmatpush.bf16.msra.mxu0 %v963_v51  ;;  %v956_v1 = vld [vmem:[%s1477_s4 + $0x58] sm:$0xf0]  ;;  %v1076_v2 = vld [vmem:[%s1477_s4 + $0xd4] sm:$0xf]  ;;  %v1019_v4 = vor.u32 %v1077_v62, %v1018_v61  ;;  %v946_v6 = vld [vmem:[%s1477_s4 + $0x40] sm:$0xf] }
  0x67   : > { %v1020_v3 = vld [vmem:[%s1477_s4 + $0xd8] sm:$0xf0]  ;;  %672 = vmatpush.bf16.msra.mxu1 %v1027_v52  ;;  %686 = vmatpush.bf16.msra.mxu2 %v967_v56  ;;  %v959_v5 = vor.u32 %v1060_v63, %v956_v1  ;;  %v1059_v7 = vld [vmem:[%s1477_s4 + $0x44] sm:$0xf0]  ;;  %v1010_v8 = vld [vmem:[%s1477_s4 + $0xc0] sm:$0xf] }
  0x68   : > { %700 = vmatpush.bf16.msra.mxu3 %v1031_v60  ;;  %v1023_v9 = vor.u32 %v1076_v2, %v1020_v3  ;;  %v1075_v10 = vld [vmem:[%s1477_s4 + $0xc4] sm:$0xf0]  ;;  %v1058_v11 = vld [vmem:[%s1477_s4 + $0x44] sm:$0xf]  ;;  %v948_v12 = vld [vmem:[%s1477_s4 + $0x48] sm:$0xf0]  ;;  %v947_v15 = vor.u32 %v1059_v7, %v946_v6 }
  0x69   : > { %v1074_v13 = vld [vmem:[%s1477_s4 + $0xc4] sm:$0xf]  ;;  %v1012_v14 = vld [vmem:[%s1477_s4 + $0xc8] sm:$0xf0]  ;;  %v1011_v16 = vor.u32 %v1075_v10, %v1010_v8  ;;  %v951_v17 = vor.u32 %v1058_v11, %v948_v12  ;;  %v938_v18 = vld [vmem:[%s1477_s4 + $0x30] sm:$0xf] }
  0x6a   : > { %659 = vmatpush.bf16.msra.mxu0 %v955_v0  ;;  %v1057_v19 = vld [vmem:[%s1477_s4 + $0x34] sm:$0xf0]  ;;  %v1002_v20 = vld [vmem:[%s1477_s4 + $0xb0] sm:$0xf]  ;;  %v1015_v21 = vor.u32 %v1074_v13, %v1012_v14  ;;  %v1056_v23 = vld [vmem:[%s1477_s4 + $0x34] sm:$0xf] }
  0x6b   : > { %673 = vmatpush.bf16.msra.mxu1 %v1019_v4  ;;  %687 = vmatpush.bf16.msra.mxu2 %v959_v5  ;;  %v1073_v22 = vld [vmem:[%s1477_s4 + $0xb4] sm:$0xf0]  ;;  %v940_v24 = vld [vmem:[%s1477_s4 + $0x38] sm:$0xf0]  ;;  %v1072_v25 = vld [vmem:[%s1477_s4 + $0xb4] sm:$0xf]  ;;  %v939_v27 = vor.u32 %v1057_v19, %v938_v18 }
  0x6c   : > { %701 = vmatpush.bf16.msra.mxu3 %v1023_v9  ;;  %v1004_v26 = vld [vmem:[%s1477_s4 + $0xb8] sm:$0xf0]  ;;  %v1003_v28 = vor.u32 %v1073_v22, %v1002_v20  ;;  %v943_v29 = vor.u32 %v1056_v23, %v940_v24  ;;  %v930_v30 = vld [vmem:[%s1477_s4 + $0x20] sm:$0xf]  ;;  %v1055_v31 = vld [vmem:[%s1477_s4 + $0x24] sm:$0xf0] }
  0x6d   : > { %v994_v32 = vld [vmem:[%s1477_s4 + $0xa0] sm:$0xf]  ;;  %v1007_v33 = vor.u32 %v1072_v25, %v1004_v26  ;;  %v1071_v34 = vld [vmem:[%s1477_s4 + $0xa4] sm:$0xf0]  ;;  %v1054_v35 = vld [vmem:[%s1477_s4 + $0x24] sm:$0xf]  ;;  %v931_v39 = vor.u32 %v1055_v31, %v930_v30 }
  0x6e   : > { %660 = vmatpush.bf16.msra.mxu0 %v947_v15  ;;  %v932_v36 = vld [vmem:[%s1477_s4 + $0x28] sm:$0xf0]  ;;  %v1070_v37 = vld [vmem:[%s1477_s4 + $0xa4] sm:$0xf]  ;;  %v995_v40 = vor.u32 %v1071_v34, %v994_v32  ;;  %v922_v42 = vld [vmem:[%s1477_s4 + $0x10] sm:$0xf] }
  0x6f   : > { %674 = vmatpush.bf16.msra.mxu1 %v1011_v16  ;;  %688 = vmatpush.bf16.msra.mxu2 %v951_v17  ;;  %v996_v38 = vld [vmem:[%s1477_s4 + $0xa8] sm:$0xf0]  ;;  %v935_v41 = vor.u32 %v1054_v35, %v932_v36  ;;  %v1053_v43 = vld [vmem:[%s1477_s4 + $0x14] sm:$0xf0]  ;;  %v986_v44 = vld [vmem:[%s1477_s4 + $0x90] sm:$0xf] }
  0x70   : > { %702 = vmatpush.bf16.msra.mxu3 %v1015_v21  ;;  %v999_v45 = vor.u32 %v1070_v37, %v996_v38  ;;  %v1069_v46 = vld [vmem:[%s1477_s4 + $0x94] sm:$0xf0]  ;;  %v1052_v47 = vld [vmem:[%s1477_s4 + $0x14] sm:$0xf]  ;;  %v924_v48 = vld [vmem:[%s1477_s4 + $0x18] sm:$0xf0]  ;;  %v923_v51 = vor.u32 %v1053_v43, %v922_v42 }
  0x71   : > { %v1068_v49 = vld [vmem:[%s1477_s4 + $0x94] sm:$0xf]  ;;  %v988_v50 = vld [vmem:[%s1477_s4 + $0x98] sm:$0xf0]  ;;  %v987_v52 = vor.u32 %v1069_v46, %v986_v44  ;;  %v927_v53 = vor.u32 %v1052_v47, %v924_v48  ;;  %v914_v54 = vld [vmem:[%s1477_s4] sm:$0xf] }
  0x72   : > { %661 = vmatpush.bf16.msra.mxu0 %v939_v27  ;;  %v1051_v55 = vld [vmem:[%s1477_s4 + $0x4] sm:$0xf0]  ;;  %v978_v56 = vld [vmem:[%s1477_s4 + $0x80] sm:$0xf]  ;;  %v991_v57 = vor.u32 %v1068_v49, %v988_v50  ;;  %v1050_v59 = vld [vmem:[%s1477_s4 + $0x4] sm:$0xf] }
  0x73   : > { %675 = vmatpush.bf16.msra.mxu1 %v1003_v28  ;;  %689 = vmatpush.bf16.msra.mxu2 %v943_v29  ;;  %v1067_v58 = vld [vmem:[%s1477_s4 + $0x84] sm:$0xf0]  ;;  %v916_v60 = vld [vmem:[%s1477_s4 + $0x8] sm:$0xf0]  ;;  %v1066_v61 = vld [vmem:[%s1477_s4 + $0x84] sm:$0xf]  ;;  %v915_v63 = vor.u32 %v1051_v55, %v914_v54 }
  0x74   : > { %703 = vmatpush.bf16.msra.mxu3 %v1007_v33  ;;  %v980_v62 = vld [vmem:[%s1477_s4 + $0x88] sm:$0xf0]  ;;  %v906_v0 = vld [vmem:[%s1475_s26] sm:$0xf]  ;;  %v1049_v1 = vld [vmem:[%s1475_s26 + $0x4] sm:$0xf0]  ;;  %v979_v2 = vor.u32 %v1067_v58, %v978_v56  ;;  %v919_v3 = vor.u32 %v1050_v59, %v916_v60 }
  0x75   : > { %v1048_v4 = vld [vmem:[%s1475_s26 + $0x4] sm:$0xf]  ;;  %v908_v5 = vld [vmem:[%s1475_s26 + $0x8] sm:$0xf0]  ;;  %v983_v6 = vor.u32 %v1066_v61, %v980_v62  ;;  %v907_v7 = vor.u32 %v1049_v1, %v906_v0  ;;  %p1040_p5 = scmp.ne.s32.totalorder %s1242_s18, 17 }
  0x76   : > { %662 = vmatpush.bf16.msra.mxu0 %v931_v39  ;;  %v911_v8 = vor.u32 %v1048_v4, %v908_v5  ;;  %v449_v10 = vld [vmem:[%s1479_s6] sm:$0xff]  ;;  %v450_v15 = vld [vmem:[%s1479_s6 + $0x8] sm:$0xff]  ;;  %v451_v19 = vld [vmem:[%s1479_s6 + $0x10] sm:$0xff] }
  0x77   : > { %676 = vmatpush.bf16.msra.mxu1 %v995_v40  ;;  %690 = vmatpush.bf16.msra.mxu2 %v935_v41  ;;  %v452_v25 = vld [vmem:[%s1479_s6 + $0x18] sm:$0xff] }
  0x78   : > { %704 = vmatpush.bf16.msra.mxu3 %v999_v45 }
  0x7a   : > { %663 = vmatpush.bf16.msra.mxu0 %v923_v51 }
  0x7b   : > { %677 = vmatpush.bf16.msra.mxu1 %v987_v52  ;;  %691 = vmatpush.bf16.msra.mxu2 %v927_v53 }
  0x7c   : > { %705 = vmatpush.bf16.msra.mxu3 %v991_v57 }
  0x7e   : > { %664 = vmatpush.bf16.msra.mxu0 %v915_v63 }
  0x7f   : > { %678 = vmatpush.bf16.msra.mxu1 %v979_v2  ;;  %692 = vmatpush.bf16.msra.mxu2 %v919_v3 }
  0x80   : > { %706 = vmatpush.bf16.msra.mxu3 %v983_v6 }
  0x81   : > { %665 = vmatmul.bf16.vlgmr.msra.gmra.mxu0 %v907_v7 }
  0x82   : > { %679 = vmatmul.bf16.vlgmr.msra.gmra.mxu1 %v911_v8  ;;  %693 = vmatmul.bf16.vlgmr.msra.gmra.mxu2 %v907_v7 }
  0x83   : > { %707 = vmatmul.bf16.vlgmr.msra.gmra.mxu3 %v911_v8 }
  0xfe   : > { %v666_v9 = vpop.f32.mrf.mxu0 }
  0xff   : > { %v680_v11 = vpop.f32.mrf.mxu1 }
 0x100   : > { %v681_v12 = vadd.f32 %v680_v11, %v666_v9 }
 0x102   : > { %v713_v13 = vadd.f32 %v681_v12, %v449_v10 }
 0x104   : > { %717 = vst [vmem:[%s1479_s6] sm:$0xff] %v713_v13 }
 0x105   : > { %v694_v14 = vpop.f32.mrf.mxu2 }
 0x106   : > { %v708_v16 = vpop.f32.mrf.mxu3  ;;  %v668_v17 = vpop.f32.mrf.mxu0 }
 0x107   : > { %v709_v18 = vadd.f32 %v708_v16, %v694_v14  ;;  %v682_v20 = vpop.f32.mrf.mxu1 }
 0x108   : > { %v683_v21 = vadd.f32 %v682_v20, %v668_v17 }
 0x109   : > { %v714_v22 = vadd.f32 %v709_v18, %v450_v15 }
 0x10a   : > { %v715_v23 = vadd.f32 %v683_v21, %v451_v19 }
 0x10b   : > { %718 = vst [vmem:[%s1479_s6 + $0x8] sm:$0xff] %v714_v22 }
 0x10c   : > { %719 = vst [vmem:[%s1479_s6 + $0x10] sm:$0xff] %v715_v23 }
 0x10d   : > { %v696_v24 = vpop.f32.mrf.mxu2 }
 0x10e   : > { %v710_v26 = vpop.f32.mrf.mxu3 }
 0x10f   : > { %v711_v27 = vadd.f32 %v710_v26, %v696_v24  ;;  %724 = sbr.rel (%p1040_p5) target bundleno = 286 (0x11e), region = 116 }
 0x111   : > { %v716_v28 = vadd.f32 %v711_v27, %v452_v25 }
 0x113   : > { %720 = vst [vmem:[%s1479_s6 + $0x18] sm:$0xff] %v716_v28 }
 0x114   : > { %v725_v29 = vld [vmem:[%s1479_s6] sm:$0xff]  ;;  %v726_v31 = vld [vmem:[%s1479_s6 + $0x8] sm:$0xff]  ;;  %v727_v34 = vld [vmem:[%s1479_s6 + $0x10] sm:$0xff] }
 0x115   : > { %v729_v30 = vld [vmem:[%s437_s29] sm:$0x3] }
 0x116   : > { %v731_v32 = vperm.slane %v729_v30, 0  ;;  %v732_v33 = vperm.slane %v729_v30, 1 }
 0x118   : > { %v735_v36 = vadd.f32 %v731_v32, %v725_v29  ;;  %v736_v37 = vadd.f32 %v732_v33, %v726_v31  ;;  %v737_v38 = vadd.f32 %v731_v32, %v727_v34 }
 0x11a   : > { %v728_v35 = vld [vmem:[%s1479_s6 + $0x18] sm:$0xff]  ;;  %739 = vst [vmem:[%s1479_s6] sm:$0xff] %v735_v36 }
 0x11b   : > { %v738_v39 = vadd.f32 %v732_v33, %v728_v35  ;;  %740 = vst [vmem:[%s1479_s6 + $0x8] sm:$0xff] %v736_v37 }
 0x11c   : > { %741 = vst [vmem:[%s1479_s6 + $0x10] sm:$0xff] %v737_v38 }
 0x11d   : > { %742 = vst [vmem:[%s1479_s6 + $0x18] sm:$0xff] %v738_v39 }
 0x11e PF: > { %749 = sbr.rel (!%p1375_p12) target bundleno = 294 (0x126), region = 120  ;;  %s1082_s16 = sshll.u32 (%p1375_p12), %s1246_s19, 4 }
 0x11f   : > { %s755_s25 = scalar_lea.vmem (%p1375_p12), %s1622_s3, %s1082_s16 }
 0x121   : > { %v768_v40 = vld [vmem:[%s1479_s6] sm:$0xff] (%p1375_p12) }
 0x122   : > { %v770_v41 = vld [vmem:[%s1479_s6 + $0x8] sm:$0xff] (%p1375_p12)  ;;  %769 = vst [vmem:[%s755_s25] sm:$0xff] (%p1375_p12), %v768_v40 }
 0x123   : > { %v772_v42 = vld [vmem:[%s1479_s6 + $0x10] sm:$0xff]  ;;  %771 = vst [vmem:[%s755_s25 + $0x8] sm:$0xff] %v770_v41 }
 0x124   : > { %v774_v43 = vld [vmem:[%s1479_s6 + $0x18] sm:$0xff]  ;;  %773 = vst [vmem:[%s755_s25 + $0x20] sm:$0xff] %v772_v42 }
 0x125   : > { %775 = vst [vmem:[%s755_s25 + $0x28] sm:$0xff] %v774_v43 }
 0x126 PF: > { %s13_s22 = sadd.s32 1, %s1258_s22   ;;  %s1631_s19 = sld [smem:[#allocation7_spill]] }
 0x127   : > { %p10_p6 = scmp.ge.s32.totalorder %s13_s22, 38   ;;  %s1632_s10 = sld [smem:[#allocation5_spill]] }
 0x128   : > { %s1633_s30 = sld [smem:[#allocation6_spill]]  ;;  %s1634_s12 = smov %s1222_s13 }
 0x129   : > { %s1635_s13 = smov %s1373_s9  ;;  %s1636_s14 = smov %s1230_s15 }
 0x12a   : > { %s1637_s15 = smov %s1370_s8  ;;  %s1638_s16 = smov %s1238_s17 }
 0x12b   : > { %s1640_s18 = smov %s1250_s20  ;;  %12 = sbr.rel (!%p10_p6) target bundleno = 6 (0x6), region = 185 }
 0x12c   : > { %s1639_s17 = smov %s1631_s19  ;;  %s1641_s19 = smov %s1254_s21 }
 0x12d   : > { %s1642_s20 = smov %s1632_s10 }
 0x12e   : > { %s1643_s21 = smov %s1633_s30 }

// kernel: resnet18_attention_forward.65
= control target key start
LH: loop header
LB: loop body
LE: loop exit
PB: predicated region body
PF: predicated region fallthrough
CT: control target
= control target key end

     0   :  { %s404_s9 = smov 0   ;;  %s406_s10 = smov 0   ;;  %s445_s0 = inlined_call_operand.vmem [shape: f32[2,8,512], index: 0, kind: input, shape index: {}]   ;;  %s446_s1 = inlined_call_operand.vmem [shape: f32[2,1,512], index: 1, kind: input, shape index: {}]   ;;  %s447_s2 = inlined_call_operand.vmem [shape: f32[2,8,2], index: 2, kind: output, shape index: {}]  }
   0x1   :  { %s408_s11 = smov 0  }
   0x2 LB: > { %s24_s12 = sadd.s32 1, %s382_s10  ;;  %p329_p0 = scmp.ge.s32.totalorder %s386_s11, 1  ;;  %s386_s11 = sphi %s408_s11, %s12_s11   ;;  %s382_s10 = sphi %s406_s10, %s449_s10   ;;  %s378_s9 = sphi %s404_s9, %s448_s9  }
   0x3   : > { %p26_p1 = scmp.ge.s32.totalorder %s24_s12, 2  ;;  %p141_p2 = scmp.lt.s32.totalorder %s386_s11, 3 }
   0x5   : > { %s451_s12 = smov (%p26_p1, %s24_s12), 0  ;;  %p142_p3 = pnand %p329_p0, %p141_p2 }
   0x6   : > { %p173_p4 = scmp.lt.s32.totalorder (!%p142_p3), %s378_s9, 1 }
   0x7   : > { %145 = sbr.rel (%p142_p3) target bundleno = 153 (0x99), region = 28 }
   0xc   : > { %s453_s9 = smov (!%p173_p4, %s378_s9), 1  ;;  %v388_v19 = vmov 512.0   ;;  %vm229_vm1 = vcmask 7168   ;;  %vm231_vm2 = vcmask 15360  }
   0xd   : > { %s336_s13 = sshll.u32 %s453_s9, 5  ;;  %s332_s14 = sshll.u32 %s453_s9, 2  ;;  %362 = vrcp.f32 %v388_v19 }
   0xe   : > { %s181_s17 = scalar_lea.vmem %s445_s0, %s336_s13  ;;  %s185_s20 = scalar_lea.vmem %s446_s1, %s332_s14 }
   0xf   : > { %v193_v0 = vld [vmem:[%s181_s17] sm:$0xff]  ;;  %v194_v1 = vld [vmem:[%s181_s17 + $0x8] sm:$0xff]  ;;  %v195_v2 = vld [vmem:[%s181_s17 + $0x10] sm:$0xff]  ;;  %s333_s21 = sshll.u32 %s453_s9, 3 }
  0x10   : > { %v197_v3 = vld [vmem:[%s185_s20] sm:$0xf]  ;;  %v196_v8 = vld [vmem:[%s181_s17 + $0x18] sm:$0xff]  ;;  %s192_s24 = scalar_lea.vmem %s447_s2, %s333_s21 }
  0x11   : > { %v199_v4 = vperm.slane %v197_v3, 0  ;;  %v200_v5 = vperm.slane %v197_v3, 1  ;;  %v201_v6 = vperm.slane %v197_v3, 2  ;;  %v202_v7 = vperm.slane %v197_v3, 3 }
  0x13   : > { %v207_v9 = vmul.f32 %v199_v4, %v193_v0  ;;  %v208_v10 = vmul.f32 %v200_v5, %v194_v1  ;;  %v209_v11 = vmul.f32 %v201_v6, %v195_v2  ;;  %v210_v12 = vmul.f32 %v202_v7, %v196_v8  ;;  %v363_v20 = vpop.eup %362 }
  0x14   : > { %v217_v21 = vmul.f32 512.0, %v363_v20  ;;  %vm221_vm0 = vweird.f32 %v363_v20 }
  0x15   : > { %v211_v13 = vadd.f32 %v208_v10, %v207_v9  ;;  %v224_v16 = vmax.f32 %v207_v9, %v208_v10  ;;  %v225_v17 = vmax.f32 %v209_v11, %v210_v12 }
  0x16   : > { %v218_v22 = vsub.f32 1.0, %v217_v21 }
  0x17   : > { %v212_v14 = vadd.f32 %v211_v13, %v209_v11  ;;  %v226_v18 = vmax.f32 %v224_v16, %v225_v17 }
  0x18   : > { %v219_v23 = vmul.f32 %v363_v20, %v218_v22 }
  0x19   : > { %v213_v15 = vadd.f32 %v212_v14, %v210_v12 }
  0x1a   : > { %v220_v24 = vadd.f32 %v363_v20, %v219_v23 }
  0x1b   : > { %214 = vadd.xlane.f32.xlu0 %v213_v15 }
  0x1c   : > { %v222_v26 = vsel %vm221_vm0, %v363_v20, %v220_v24 }
  0x23   : > { %227 = vmax.xlane.f32.xlu0 %v226_v18 }
  0x8e   : > { %v215_v25 = vpop.xlane.xlu0 %214 }
  0x8f   : > { %v223_v27 = vmul.f32 %v222_v26, %v215_v25 }
  0x96   : > { %v228_v28 = vpop.xlane.xlu0 %227 }
  0x97   : > { %v230_v29 = vsel %vm229_vm1, %v223_v27, %v228_v28 }
  0x98   : > { %232 = vst.msk [vmem:[%s192_s24] sm:$0xff] %vm231_vm2, %v230_v29 }
  0x99 PF: > { %s12_s11 = sadd.s32 1, %s386_s11   ;;  %s448_s9 = smov %s382_s10 }
  0x9a   : > { %p9_p5 = scmp.ge.s32.totalorder %s12_s11, 4   ;;  %s449_s10 = smov %s451_s12 }
  0x9c   :  { %11 = sbr.rel (!%p9_p5) target bundleno = 2 (0x2), region = 61 }

// kernel: resnet18_attention_forward.66
= control target key start
LH: loop header
LB: loop body
LE: loop exit
PB: predicated region body
PF: predicated region fallthrough
CT: control target
= control target key end

     0   :  { %s1146_s12 = smov 0   ;;  %s1148_s13 = smov 0   ;;  %s1372_s0 = inlined_call_operand.vmem [shape: bf16[16,256], index: 0, kind: input, shape index: {}]   ;;  %s1373_s1 = inlined_call_operand.vmem [shape: bf16[256,512], index: 1, kind: input, shape index: {}]   ;;  %s1374_s2 = inlined_call_operand.vmem [shape: f32[1,512], index: 2, kind: input, shape index: {}]   ;;  %s1375_s3 = inlined_call_operand.vmem [shape: f32[16,512], index: 3, kind: output, shape index: {}]  }
   0x1   :  { %s1150_s14 = smov 0   ;;  %s1152_s15 = smov 0  }
   0x2   :  { %s1154_s16 = smov 0  }
   0x3 LB: > { %s28_s17 = sadd.s32 1, %s1120_s15  ;;  %s856_s18 = sadd.s32 4294967295, %s1124_s16   ;;  %s1124_s16 = sphi %s1154_s16, %s13_s16   ;;  %s1120_s15 = sphi %s1152_s15, %s1380_s15   ;;  %s1116_s14 = sphi %s1150_s14, %s1379_s14   ;;  %s1112_s13 = sphi %s1148_s13, %s1378_s13   ;;  %s1108_s12 = sphi %s1146_s12, %s1377_s12  }
   0x4   : > { %p30_p0 = scmp.ge.s32.totalorder %s28_s17, 2  ;;  %p76_p1 = scmp.ne.s32.totalorder %s1112_s13, %s1108_s12 }
   0x5   : > { %p77_p2 = scmp.eq.s32.totalorder %s1124_s16, 0  ;;  %p134_p4 = scmp.eq.s32.totalorder %s856_s18, 1 }
   0x6   : > { %s1382_s17 = smov (%p30_p0, %s28_s17), 0  ;;  %s69_s20 = sadd.s32 1, %s1112_s13 }
   0x7   : > { %p78_p3 = por %p77_p2, %p76_p1  ;;  %s65_s19 = ssub.s32 %s1120_s15, %s1382_s17 }
   0x8   : > { %p67_p5 = scmp.eq.s32.totalorder %s65_s19, 0  ;;  %p1181_p6 = por %p134_p4, %p76_p1 }
   0x9   : > { %p860_p7 = scmp.ge.s32.totalorder %s1124_s16, 2 }
   0xa   : > { %s1186_s22 = scalar_select %p67_p5, %s1112_s13, %s69_s20  }
   0xb   : > { %171 = sbr.rel (%p860_p7) target bundleno = 52 (0x34), region = 20 }
  0x10   : > { %174 = sbr.rel (!%p78_p3) target bundleno = 52 (0x34), region = 24  ;;  %s176_s23 = sand.u32 (%p78_p3), 1, %s1112_s13  }
  0x11   : > { %s1009_s24 = sshll.u32 (%p78_p3), %s1120_s15, 3  ;;  %s861_s25 = sshll.u32 (%p78_p3), %s176_s23, 8 }
  0x12   : > { %s1194_s28 = scalar_lea.vmem (%p78_p3), %s1373_s1, %s1009_s24  ;;  %s1199_s29 = scalar_lea.vmem (%p78_p3), [#allocation2], %s861_s25 }
  0x13   : > { %v275_v0 = vld [vmem:[%s1194_s28] sm:$0xff] (%p78_p3)  ;;  %v277_v1 = vld [vmem:[%s1194_s28 + $0x10] sm:$0xff] (%p78_p3) }
  0x14   : > { %v279_v2 = vld [vmem:[%s1194_s28 + $0x20] sm:$0xff] (%p78_p3)  ;;  %276 = vst [vmem:[%s1199_s29] sm:$0xff] (%p78_p3), %v275_v0  ;;  %v281_v3 = vld [vmem:[%s1194_s28 + $0x30] sm:$0xff] (%p78_p3) }
  0x15   : > { %278 = vst [vmem:[%s1199_s29 + $0x8] sm:$0xff] %v277_v1  ;;  %v283_v4 = vld [vmem:[%s1194_s28 + $0x40] sm:$0xff]  ;;  %v285_v5 = vld [vmem:[%s1194_s28 + $0x50] sm:$0xff] }
  0x16   : > { %280 = vst [vmem:[%s1199_s29 + $0x10] sm:$0xff] %v279_v2  ;;  %v287_v6 = vld [vmem:[%s1194_s28 + $0x60] sm:$0xff]  ;;  %v289_v7 = vld [vmem:[%s1194_s28 + $0x70] sm:$0xff] }
  0x17   : > { %282 = vst [vmem:[%s1199_s29 + $0x18] sm:$0xff] %v281_v3  ;;  %v291_v8 = vld [vmem:[%s1194_s28 + $0x80] sm:$0xff]  ;;  %v293_v9 = vld [vmem:[%s1194_s28 + $0x90] sm:$0xff] }
  0x18   : > { %284 = vst [vmem:[%s1199_s29 + $0x20] sm:$0xff] %v283_v4  ;;  %v295_v10 = vld [vmem:[%s1194_s28 + $0xa0] sm:$0xff]  ;;  %v297_v11 = vld [vmem:[%s1194_s28 + $0xb0] sm:$0xff] }
  0x19   : > { %286 = vst [vmem:[%s1199_s29 + $0x28] sm:$0xff] %v285_v5  ;;  %v299_v12 = vld [vmem:[%s1194_s28 + $0xc0] sm:$0xff]  ;;  %v301_v13 = vld [vmem:[%s1194_s28 + $0xd0] sm:$0xff] }
  0x1a   : > { %288 = vst [vmem:[%s1199_s29 + $0x30] sm:$0xff] %v287_v6  ;;  %v303_v14 = vld [vmem:[%s1194_s28 + $0xe0] sm:$0xff]  ;;  %v305_v15 = vld [vmem:[%s1194_s28 + $0xf0] sm:$0xff] }
  0x1b   : > { %290 = vst [vmem:[%s1199_s29 + $0x38] sm:$0xff] %v289_v7  ;;  %v307_v16 = vld [vmem:[%s1194_s28 + $0x100] sm:$0xff]  ;;  %v309_v17 = vld [vmem:[%s1194_s28 + $0x110] sm:$0xff] }
  0x1c   : > { %292 = vst [vmem:[%s1199_s29 + $0x40] sm:$0xff] %v291_v8  ;;  %v311_v18 = vld [vmem:[%s1194_s28 + $0x120] sm:$0xff]  ;;  %v313_v19 = vld [vmem:[%s1194_s28 + $0x130] sm:$0xff] }
  0x1d   : > { %294 = vst [vmem:[%s1199_s29 + $0x48] sm:$0xff] %v293_v9  ;;  %v315_v20 = vld [vmem:[%s1194_s28 + $0x140] sm:$0xff]  ;;  %v317_v21 = vld [vmem:[%s1194_s28 + $0x150] sm:$0xff] }
  0x1e   : > { %296 = vst [vmem:[%s1199_s29 + $0x50] sm:$0xff] %v295_v10  ;;  %v319_v22 = vld [vmem:[%s1194_s28 + $0x160] sm:$0xff]  ;;  %v321_v23 = vld [vmem:[%s1194_s28 + $0x170] sm:$0xff] }
  0x1f   : > { %298 = vst [vmem:[%s1199_s29 + $0x58] sm:$0xff] %v297_v11  ;;  %v323_v24 = vld [vmem:[%s1194_s28 + $0x180] sm:$0xff]  ;;  %v325_v25 = vld [vmem:[%s1194_s28 + $0x190] sm:$0xff] }
  0x20   : > { %300 = vst [vmem:[%s1199_s29 + $0x60] sm:$0xff] %v299_v12  ;;  %v327_v26 = vld [vmem:[%s1194_s28 + $0x1a0] sm:$0xff]  ;;  %v329_v27 = vld [vmem:[%s1194_s28 + $0x1b0] sm:$0xff] }
  0x21   : > { %302 = vst [vmem:[%s1199_s29 + $0x68] sm:$0xff] %v301_v13  ;;  %v331_v28 = vld [vmem:[%s1194_s28 + $0x1c0] sm:$0xff]  ;;  %v333_v29 = vld [vmem:[%s1194_s28 + $0x1d0] sm:$0xff] }
  0x22   : > { %304 = vst [vmem:[%s1199_s29 + $0x70] sm:$0xff] %v303_v14  ;;  %v335_v30 = vld [vmem:[%s1194_s28 + $0x1e0] sm:$0xff]  ;;  %v337_v31 = vld [vmem:[%s1194_s28 + $0x1f0] sm:$0xff] }
  0x23   : > { %306 = vst [vmem:[%s1199_s29 + $0x78] sm:$0xff] %v305_v15 }
  0x24   : > { %308 = vst [vmem:[%s1199_s29 + $0x80] sm:$0xff] %v307_v16 }
  0x25   : > { %310 = vst [vmem:[%s1199_s29 + $0x88] sm:$0xff] %v309_v17 }
  0x26   : > { %312 = vst [vmem:[%s1199_s29 + $0x90] sm:$0xff] %v311_v18 }
  0x27   : > { %314 = vst [vmem:[%s1199_s29 + $0x98] sm:$0xff] %v313_v19 }
  0x28   : > { %316 = vst [vmem:[%s1199_s29 + $0xa0] sm:$0xff] %v315_v20 }
  0x29   : > { %318 = vst [vmem:[%s1199_s29 + $0xa8] sm:$0xff] %v317_v21 }
  0x2a   : > { %320 = vst [vmem:[%s1199_s29 + $0xb0] sm:$0xff] %v319_v22 }
  0x2b   : > { %322 = vst [vmem:[%s1199_s29 + $0xb8] sm:$0xff] %v321_v23 }
  0x2c   : > { %324 = vst [vmem:[%s1199_s29 + $0xc0] sm:$0xff] %v323_v24 }
  0x2d   : > { %326 = vst [vmem:[%s1199_s29 + $0xc8] sm:$0xff] %v325_v25 }
  0x2e   : > { %328 = vst [vmem:[%s1199_s29 + $0xd0] sm:$0xff] %v327_v26 }
  0x2f   : > { %330 = vst [vmem:[%s1199_s29 + $0xd8] sm:$0xff] %v329_v27 }
  0x30   : > { %332 = vst [vmem:[%s1199_s29 + $0xe0] sm:$0xff] %v331_v28 }
  0x31   : > { %334 = vst [vmem:[%s1199_s29 + $0xe8] sm:$0xff] %v333_v29 }
  0x32   : > { %336 = vst [vmem:[%s1199_s29 + $0xf0] sm:$0xff] %v335_v30 }
  0x33   : > { %338 = vst [vmem:[%s1199_s29 + $0xf8] sm:$0xff] %v337_v31 }
  0x34 PF: > { %p864_p8 = scmp.ge.s32.totalorder %s1124_s16, 1  ;;  %p351_p9 = scmp.lt.s32.totalorder %s1124_s16, 3 }
  0x36   : > { %p352_p10 = pnand %p864_p8, %p351_p9 }
  0x37   : > { %s358_s30 = sand.u32 (!%p352_p10), 1, %s1108_s12   ;;  %s867_s20 = sshll.u32 (!%p352_p10), %s1116_s14, 1 }
  0x38   : > { %355 = sbr.rel (%p352_p10) target bundleno = 250 (0xfa), region = 66  ;;  %s865_s4 = sshll.u32 (!%p352_p10), %s358_s30, 8 }
  0x39   : > { %s1267_s5 = scalar_lea.vmem (!%p352_p10), [#allocation2], %s865_s4  ;;  %p409_p11 = scmp.lt.s32.totalorder (!%p352_p10), %s867_s20, 3 }
  0x3a   : > { %s866_s26 = sshll.u32 (!%p352_p10), %s358_s30, 5 }
  0x3b   : > { %s393_s27 = scalar_lea.vmem (!%p352_p10), [#allocation3], %s866_s26 }
  0x3d   : > { %v934_v32 = vld [vmem:[%s1267_s5 + $0x70] sm:$0xf]  ;;  %v1027_v33 = vld [vmem:[%s1267_s5 + $0x74] sm:$0xf0]  ;;  %v1026_v37 = vld [vmem:[%s1267_s5 + $0x74] sm:$0xf] }
  0x3e   : > { %v998_v34 = vld [vmem:[%s1267_s5 + $0xf0] sm:$0xf]  ;;  %v935_v35 = vor.u32 %v1027_v33, %v934_v32  ;;  %v1043_v36 = vld [vmem:[%s1267_s5 + $0xf4] sm:$0xf0]  ;;  %v936_v38 = vld [vmem:[%s1267_s5 + $0x78] sm:$0xf0] }
  0x3f   : > { %v999_v39 = vor.u32 %v1043_v36, %v998_v34  ;;  %v939_v40 = vor.u32 %v1026_v37, %v936_v38  ;;  %v1042_v41 = vld [vmem:[%s1267_s5 + $0xf4] sm:$0xf]  ;;  %v1000_v42 = vld [vmem:[%s1267_s5 + $0xf8] sm:$0xf0]  ;;  %v926_v43 = vld [vmem:[%s1267_s5 + $0x60] sm:$0xf] }
  0x40   : > { %631 = vmatpush.bf16.msra.mxu0 %v935_v35  ;;  %v1003_v44 = vor.u32 %v1042_v41, %v1000_v42  ;;  %v1025_v45 = vld [vmem:[%s1267_s5 + $0x64] sm:$0xf0]  ;;  %v990_v46 = vld [vmem:[%s1267_s5 + $0xe0] sm:$0xf]  ;;  %v1024_v50 = vld [vmem:[%s1267_s5 + $0x64] sm:$0xf] }
  0x41   : > { %v1041_v47 = vld [vmem:[%s1267_s5 + $0xe4] sm:$0xf0]  ;;  %645 = vmatpush.bf16.msra.mxu1 %v999_v39  ;;  %659 = vmatpush.bf16.msra.mxu2 %v939_v40  ;;  %v927_v48 = vor.u32 %v1025_v45, %v926_v43  ;;  %v928_v51 = vld [vmem:[%s1267_s5 + $0x68] sm:$0xf0]  ;;  %v1040_v52 = vld [vmem:[%s1267_s5 + $0xe4] sm:$0xf] }
  0x42   : > { %v991_v49 = vor.u32 %v1041_v47, %v990_v46  ;;  %673 = vmatpush.bf16.msra.mxu3 %v1003_v44  ;;  %v931_v53 = vor.u32 %v1024_v50, %v928_v51  ;;  %v992_v54 = vld [vmem:[%s1267_s5 + $0xe8] sm:$0xf0]  ;;  %v918_v55 = vld [vmem:[%s1267_s5 + $0x50] sm:$0xf]  ;;  %v1023_v56 = vld [vmem:[%s1267_s5 + $0x54] sm:$0xf0] }
  0x43   : > { %v995_v57 = vor.u32 %v1040_v52, %v992_v54  ;;  %v982_v58 = vld [vmem:[%s1267_s5 + $0xd0] sm:$0xf]  ;;  %v1039_v59 = vld [vmem:[%s1267_s5 + $0xd4] sm:$0xf0]  ;;  %v1022_v60 = vld [vmem:[%s1267_s5 + $0x54] sm:$0xf]  ;;  %v919_v61 = vor.u32 %v1023_v56, %v918_v55 }
  0x44   : > { %632 = vmatpush.bf16.msra.mxu0 %v927_v48  ;;  %v920_v62 = vld [vmem:[%s1267_s5 + $0x58] sm:$0xf0]  ;;  %v1038_v63 = vld [vmem:[%s1267_s5 + $0xd4] sm:$0xf]  ;;  %v983_v1 = vor.u32 %v1039_v59, %v982_v58  ;;  %v910_v3 = vld [vmem:[%s1267_s5 + $0x40] sm:$0xf] }
  0x45   : > { %v984_v0 = vld [vmem:[%s1267_s5 + $0xd8] sm:$0xf0]  ;;  %646 = vmatpush.bf16.msra.mxu1 %v991_v49  ;;  %660 = vmatpush.bf16.msra.mxu2 %v931_v53  ;;  %v923_v2 = vor.u32 %v1022_v60, %v920_v62  ;;  %v1021_v4 = vld [vmem:[%s1267_s5 + $0x44] sm:$0xf0]  ;;  %v974_v5 = vld [vmem:[%s1267_s5 + $0xc0] sm:$0xf] }
  0x46   : > { %674 = vmatpush.bf16.msra.mxu3 %v995_v57  ;;  %v987_v6 = vor.u32 %v1038_v63, %v984_v0  ;;  %v1037_v7 = vld [vmem:[%s1267_s5 + $0xc4] sm:$0xf0]  ;;  %v1020_v8 = vld [vmem:[%s1267_s5 + $0x44] sm:$0xf]  ;;  %v912_v9 = vld [vmem:[%s1267_s5 + $0x48] sm:$0xf0]  ;;  %v911_v12 = vor.u32 %v1021_v4, %v910_v3 }
  0x47   : > { %v1036_v10 = vld [vmem:[%s1267_s5 + $0xc4] sm:$0xf]  ;;  %v976_v11 = vld [vmem:[%s1267_s5 + $0xc8] sm:$0xf0]  ;;  %v975_v13 = vor.u32 %v1037_v7, %v974_v5  ;;  %v915_v14 = vor.u32 %v1020_v8, %v912_v9  ;;  %v902_v15 = vld [vmem:[%s1267_s5 + $0x30] sm:$0xf] }
  0x48   : > { %633 = vmatpush.bf16.msra.mxu0 %v919_v61  ;;  %v1019_v16 = vld [vmem:[%s1267_s5 + $0x34] sm:$0xf0]  ;;  %v966_v17 = vld [vmem:[%s1267_s5 + $0xb0] sm:$0xf]  ;;  %v979_v18 = vor.u32 %v1036_v10, %v976_v11  ;;  %v1018_v20 = vld [vmem:[%s1267_s5 + $0x34] sm:$0xf] }
  0x49   : > { %647 = vmatpush.bf16.msra.mxu1 %v983_v1  ;;  %661 = vmatpush.bf16.msra.mxu2 %v923_v2  ;;  %v1035_v19 = vld [vmem:[%s1267_s5 + $0xb4] sm:$0xf0]  ;;  %v904_v21 = vld [vmem:[%s1267_s5 + $0x38] sm:$0xf0]  ;;  %v1034_v22 = vld [vmem:[%s1267_s5 + $0xb4] sm:$0xf]  ;;  %v903_v24 = vor.u32 %v1019_v16, %v902_v15 }
  0x4a   : > { %675 = vmatpush.bf16.msra.mxu3 %v987_v6  ;;  %v968_v23 = vld [vmem:[%s1267_s5 + $0xb8] sm:$0xf0]  ;;  %v967_v25 = vor.u32 %v1035_v19, %v966_v17  ;;  %v907_v26 = vor.u32 %v1018_v20, %v904_v21  ;;  %v894_v27 = vld [vmem:[%s1267_s5 + $0x20] sm:$0xf]  ;;  %v1017_v28 = vld [vmem:[%s1267_s5 + $0x24] sm:$0xf0] }
  0x4b   : > { %v958_v29 = vld [vmem:[%s1267_s5 + $0xa0] sm:$0xf]  ;;  %v971_v30 = vor.u32 %v1034_v22, %v968_v23  ;;  %v1033_v31 = vld [vmem:[%s1267_s5 + $0xa4] sm:$0xf0]  ;;  %v1016_v32 = vld [vmem:[%s1267_s5 + $0x24] sm:$0xf]  ;;  %v895_v36 = vor.u32 %v1017_v28, %v894_v27 }
  0x4c   : > { %634 = vmatpush.bf16.msra.mxu0 %v911_v12  ;;  %v896_v33 = vld [vmem:[%s1267_s5 + $0x28] sm:$0xf0]  ;;  %v1032_v34 = vld [vmem:[%s1267_s5 + $0xa4] sm:$0xf]  ;;  %v959_v37 = vor.u32 %v1033_v31, %v958_v29  ;;  %v886_v39 = vld [vmem:[%s1267_s5 + $0x10] sm:$0xf] }
  0x4d   : > { %648 = vmatpush.bf16.msra.mxu1 %v975_v13  ;;  %662 = vmatpush.bf16.msra.mxu2 %v915_v14  ;;  %v960_v35 = vld [vmem:[%s1267_s5 + $0xa8] sm:$0xf0]  ;;  %v899_v38 = vor.u32 %v1016_v32, %v896_v33  ;;  %v1015_v40 = vld [vmem:[%s1267_s5 + $0x14] sm:$0xf0]  ;;  %v950_v41 = vld [vmem:[%s1267_s5 + $0x90] sm:$0xf] }
  0x4e   : > { %676 = vmatpush.bf16.msra.mxu3 %v979_v18  ;;  %v963_v42 = vor.u32 %v1032_v34, %v960_v35  ;;  %v1031_v43 = vld [vmem:[%s1267_s5 + $0x94] sm:$0xf0]  ;;  %v1014_v44 = vld [vmem:[%s1267_s5 + $0x14] sm:$0xf]  ;;  %v888_v45 = vld [vmem:[%s1267_s5 + $0x18] sm:$0xf0]  ;;  %v887_v48 = vor.u32 %v1015_v40, %v886_v39 }
  0x4f   : > { %v1030_v46 = vld [vmem:[%s1267_s5 + $0x94] sm:$0xf]  ;;  %v952_v47 = vld [vmem:[%s1267_s5 + $0x98] sm:$0xf0]  ;;  %v951_v49 = vor.u32 %v1031_v43, %v950_v41  ;;  %v891_v50 = vor.u32 %v1014_v44, %v888_v45  ;;  %v878_v51 = vld [vmem:[%s1267_s5] sm:$0xf] }
  0x50   : > { %635 = vmatpush.bf16.msra.mxu0 %v903_v24  ;;  %v1013_v52 = vld [vmem:[%s1267_s5 + $0x4] sm:$0xf0]  ;;  %v942_v53 = vld [vmem:[%s1267_s5 + $0x80] sm:$0xf]  ;;  %v955_v54 = vor.u32 %v1030_v46, %v952_v47  ;;  %v1012_v56 = vld [vmem:[%s1267_s5 + $0x4] sm:$0xf] }
  0x51   : > { %649 = vmatpush.bf16.msra.mxu1 %v967_v25  ;;  %663 = vmatpush.bf16.msra.mxu2 %v907_v26  ;;  %v1029_v55 = vld [vmem:[%s1267_s5 + $0x84] sm:$0xf0]  ;;  %v880_v57 = vld [vmem:[%s1267_s5 + $0x8] sm:$0xf0]  ;;  %v1028_v58 = vld [vmem:[%s1267_s5 + $0x84] sm:$0xf]  ;;  %v879_v60 = vor.u32 %v1013_v52, %v878_v51 }
  0x52   : > { %677 = vmatpush.bf16.msra.mxu3 %v971_v30  ;;  %v944_v59 = vld [vmem:[%s1267_s5 + $0x88] sm:$0xf0]  ;;  %v870_v61 = vld [vmem:[%s1372_s0] sm:$0xf]  ;;  %v1011_v62 = vld [vmem:[%s1372_s0 + $0x4] sm:$0xf0]  ;;  %v943_v63 = vor.u32 %v1029_v55, %v942_v53  ;;  %v883_v0 = vor.u32 %v1012_v56, %v880_v57 }
  0x53   : > { %v1010_v1 = vld [vmem:[%s1372_s0 + $0x4] sm:$0xf]  ;;  %v872_v2 = vld [vmem:[%s1372_s0 + $0x8] sm:$0xf0]  ;;  %v947_v3 = vor.u32 %v1028_v58, %v944_v59  ;;  %v871_v4 = vor.u32 %v1011_v62, %v870_v61  ;;  %s1384_s20 = smov (!%p409_p11, %s867_s20), 3  ;;  %s1044_s12 = sshll.u32 (%p1181_p6), %s1116_s14, 4 }
  0x54   : > { %636 = vmatpush.bf16.msra.mxu0 %v895_v36  ;;  %v875_v5 = vor.u32 %v1010_v1, %v872_v2  ;;  %s411_s25 = scalar_lea.vmem %s1374_s2, %s1384_s20  ;;  %s728_s30 = scalar_lea.vmem (%p1181_p6), %s1375_s3, %s1044_s12 }
  0x55   : > { %650 = vmatpush.bf16.msra.mxu1 %v959_v37  ;;  %664 = vmatpush.bf16.msra.mxu2 %v899_v38  ;;  %v702_v6 = vld [vmem:[%s411_s25] sm:$0x3] }
  0x56   : > { %678 = vmatpush.bf16.msra.mxu3 %v963_v42  ;;  %v704_v10 = vperm.slane %v702_v6, 0  ;;  %v705_v16 = vperm.slane %v702_v6, 1 }
  0x58   : > { %637 = vmatpush.bf16.msra.mxu0 %v887_v48 }
  0x59   : > { %651 = vmatpush.bf16.msra.mxu1 %v951_v49  ;;  %665 = vmatpush.bf16.msra.mxu2 %v891_v50 }
  0x5a   : > { %679 = vmatpush.bf16.msra.mxu3 %v955_v54 }
  0x5c   : > { %638 = vmatpush.bf16.msra.mxu0 %v879_v60 }
  0x5d   : > { %652 = vmatpush.bf16.msra.mxu1 %v943_v63  ;;  %666 = vmatpush.bf16.msra.mxu2 %v883_v0 }
  0x5e   : > { %680 = vmatpush.bf16.msra.mxu3 %v947_v3 }
  0x5f   : > { %639 = vmatmul.bf16.vlgmr.msra.gmra.mxu0 %v871_v4 }
  0x60   : > { %653 = vmatmul.bf16.vlgmr.msra.gmra.mxu1 %v875_v5  ;;  %667 = vmatmul.bf16.vlgmr.msra.gmra.mxu2 %v871_v4 }
  0x61   : > { %681 = vmatmul.bf16.vlgmr.msra.gmra.mxu3 %v875_v5 }
  0xdc   : > { %v640_v7 = vpop.f32.mrf.mxu0 }
  0xdd   : > { %v654_v8 = vpop.f32.mrf.mxu1 }
  0xde   : > { %v655_v9 = vadd.f32 %v654_v8, %v640_v7 }
  0xe0   : > { %v708_v11 = vadd.f32 %v704_v10, %v655_v9 }
  0xe2   : > { %712 = vst [vmem:[%s393_s27] sm:$0xff] %v708_v11 }
  0xe3   : > { %v668_v12 = vpop.f32.mrf.mxu2 }
  0xe4   : > { %v682_v13 = vpop.f32.mrf.mxu3  ;;  %v642_v14 = vpop.f32.mrf.mxu0 }
  0xe5   : > { %v683_v15 = vadd.f32 %v682_v13, %v668_v12  ;;  %v656_v17 = vpop.f32.mrf.mxu1 }
  0xe6   : > { %v657_v18 = vadd.f32 %v656_v17, %v642_v14 }
  0xe7   : > { %v709_v19 = vadd.f32 %v705_v16, %v683_v15 }
  0xe8   : > { %v710_v20 = vadd.f32 %v704_v10, %v657_v18 }
  0xe9   : > { %713 = vst [vmem:[%s393_s27 + $0x8] sm:$0xff] %v709_v19  ;;  %v741_v25 = vld [vmem:[%s393_s27] sm:$0xff] (%p1181_p6) }
  0xea   : > { %714 = vst [vmem:[%s393_s27 + $0x10] sm:$0xff] %v710_v20 }
  0xeb   : > { %v670_v21 = vpop.f32.mrf.mxu2  ;;  %742 = vst [vmem:[%s728_s30] sm:$0xff] (%p1181_p6), %v741_v25 }
  0xec   : > { %v684_v22 = vpop.f32.mrf.mxu3 }
  0xed   : > { %v685_v23 = vadd.f32 %v684_v22, %v670_v21  ;;  %722 = sbr.rel (!%p1181_p6) target bundleno = 250 (0xfa), region = 82 }
  0xef   : > { %v711_v24 = vadd.f32 %v705_v16, %v685_v23 }
  0xf0   : > { %v743_v26 = vld [vmem:[%s393_s27 + $0x8] sm:$0xff] (%p1181_p6) }
  0xf1   : > { %715 = vst [vmem:[%s393_s27 + $0x18] sm:$0xff] %v711_v24  ;;  %v745_v27 = vld [vmem:[%s393_s27 + $0x10] sm:$0xff] (%p1181_p6) }
  0xf2   : > { %744 = vst [vmem:[%s728_s30 + $0x8] sm:$0xff] %v743_v26 }
  0xf3   : > { %746 = vst [vmem:[%s728_s30 + $0x20] sm:$0xff] %v745_v27 }
  0xf8   : > { %v747_v28 = vld [vmem:[%s393_s27 + $0x18] sm:$0xff] }
  0xf9   : > { %748 = vst [vmem:[%s728_s30 + $0x28] sm:$0xff] %v747_v28 }
  0xfa PF: > { %s13_s16 = sadd.s32 1, %s1124_s16   ;;  %s1377_s12 = smov %s1112_s13 }
  0xfb   : > { %p10_p12 = scmp.ge.s32.totalorder %s13_s16, 4   ;;  %s1378_s13 = smov %s1186_s22 }
  0xfc   : > { %s1379_s14 = smov %s1120_s15  ;;  %s1380_s15 = smov %s1382_s17 }
  0xfd   :  { %12 = sbr.rel (!%p10_p12) target bundleno = 3 (0x3), region = 142 }

// kernel: resnet18_attention_forward.67
= control target key start
LH: loop header
LB: loop body
LE: loop exit
PB: predicated region body
PF: predicated region fallthrough
CT: control target
= control target key end

     0   :  { %s591_s15 = smov 0   ;;  %s593_s16 = smov 0   ;;  %s638_s0 = inlined_call_operand.vmem [shape: f32[2,8,512], index: 0, kind: input, shape index: {}]   ;;  %s639_s1 = inlined_call_operand.vmem [shape: f32[2,1,512], index: 1, kind: input, shape index: {}]   ;;  %s640_s2 = inlined_call_operand.vmem [shape: f32[2,8,1], index: 2, kind: input, shape index: {}]   ;;  %s641_s3 = inlined_call_operand.vmem [shape: f32[2,8,512], index: 3, kind: input, shape index: {}]   ;;  %s642_s4 = inlined_call_operand.vmem [shape: f32[2,8,512], index: 4, kind: output, shape index: {}]  }
   0x1   :  { %s595_s17 = smov 0  }
   0x2 LB: > { %s26_s18 = sadd.s32 1, %s559_s16  ;;  %p501_p0 = scmp.ge.s32.totalorder %s563_s17, 1  ;;  %s563_s17 = sphi %s595_s17, %s14_s17   ;;  %s559_s16 = sphi %s593_s16, %s644_s16   ;;  %s555_s15 = sphi %s591_s15, %s643_s15  }
   0x3   : > { %p28_p1 = scmp.ge.s32.totalorder %s26_s18, 2  ;;  %p221_p2 = scmp.lt.s32.totalorder %s563_s17, 3 }
   0x5   : > { %s646_s18 = smov (%p28_p1, %s26_s18), 0  ;;  %p222_p3 = pnand %p501_p0, %p221_p2 }
   0x6   : > { %p275_p4 = scmp.lt.s32.totalorder (!%p222_p3), %s555_s15, 1 }
   0x7   : > { %225 = sbr.rel (%p222_p3) target bundleno = 141 (0x8d), region = 36 }
   0xc   : > { %v565_v0 = vmov 0   ;;  %s648_s15 = smov (!%p275_p4, %s555_s15), 1 }
   0xd   : > { %540 = vset.pattern.permute.xlu0 %v565_v0  ;;  %s505_s19 = sshll.u32 %s648_s15, 3  ;;  %s504_s23 = sshll.u32 %s648_s15, 2 }
   0xe   : > { %s294_s22 = scalar_lea.vmem %s640_s2, %s505_s19  ;;  %s612_s24 = sshll.u32 %s648_s15, 5 }
   0xf   : > { %v331_v1 = vld [vmem:[%s294_s22] sm:$0xff]  ;;  %s287_s27 = scalar_lea.vmem %s639_s1, %s504_s23  ;;  %s283_s30 = scalar_lea.vmem %s638_s0, %s612_s24 }
  0x10   : > { %334 = vperm.xlu0 %540, %v331_v1   ;;  %v317_v2 = vld [vmem:[%s287_s27] sm:$0xf]  ;;  %v314_v8 = vld [vmem:[%s283_s30 + $0x8] sm:$0xff]  ;;  %v315_v9 = vld [vmem:[%s283_s30 + $0x10] sm:$0xff]  ;;  %s303_s7 = scalar_lea.vmem %s641_s3, %s612_s24  ;;  %s312_s10 = scalar_lea.vmem %s642_s4, %s612_s24 }
  0x11   : > { %v313_v3 = vld [vmem:[%s283_s30] sm:$0xff]  ;;  %v319_v4 = vperm.slane %v317_v2, 0  ;;  %v320_v5 = vperm.slane %v317_v2, 1  ;;  %v321_v6 = vperm.slane %v317_v2, 2  ;;  %v322_v7 = vperm.slane %v317_v2, 3  ;;  %v316_v10 = vld [vmem:[%s283_s30 + $0x18] sm:$0xff] }
  0x12   : > { %v341_v15 = vld [vmem:[%s303_s7] sm:$0xff]  ;;  %v342_v17 = vld [vmem:[%s303_s7 + $0x8] sm:$0xff]  ;;  %v343_v18 = vld [vmem:[%s303_s7 + $0x10] sm:$0xff] }
  0x13   : > { %v327_v11 = vmul.f32 %v319_v4, %v313_v3  ;;  %v328_v12 = vmul.f32 %v320_v5, %v314_v8  ;;  %v329_v13 = vmul.f32 %v321_v6, %v315_v9  ;;  %v330_v14 = vmul.f32 %v322_v7, %v316_v10  ;;  %v344_v19 = vld [vmem:[%s303_s7 + $0x18] sm:$0xff] }
  0x82   : > { %v335_v16 = vpop.permute.xlu0 %334 }
  0x83   : > { %v337_v20 = vmul.f32 %v335_v16, %v327_v11  ;;  %v338_v21 = vmul.f32 %v335_v16, %v328_v12  ;;  %v339_v22 = vmul.f32 %v335_v16, %v329_v13  ;;  %v340_v23 = vmul.f32 %v335_v16, %v330_v14 }
  0x85   : > { %v345_v24 = vadd.f32 %v341_v15, %v337_v20  ;;  %v346_v25 = vadd.f32 %v342_v17, %v338_v21  ;;  %v347_v26 = vadd.f32 %v343_v18, %v339_v22  ;;  %v348_v27 = vadd.f32 %v344_v19, %v340_v23 }
  0x87   : > { %v349_v28 = vmax.f32 %v345_v24, 0.0  ;;  %v350_v29 = vmax.f32 %v346_v25, 0.0  ;;  %v351_v30 = vmax.f32 %v347_v26, 0.0  ;;  %v352_v31 = vmax.f32 %v348_v27, 0.0 }
  0x89   : > { %353 = vst [vmem:[%s312_s10] sm:$0xff] %v349_v28 }
  0x8a   : > { %354 = vst [vmem:[%s312_s10 + $0x8] sm:$0xff] %v350_v29 }
  0x8b   : > { %355 = vst [vmem:[%s312_s10 + $0x10] sm:$0xff] %v351_v30 }
  0x8c   : > { %356 = vst [vmem:[%s312_s10 + $0x18] sm:$0xff] %v352_v31 }
  0x8d PF: > { %s14_s17 = sadd.s32 1, %s563_s17   ;;  %s643_s15 = smov %s559_s16 }
  0x8e   : > { %p11_p5 = scmp.ge.s32.totalorder %s14_s17, 4   ;;  %s644_s16 = smov %s646_s18 }
  0x90   :  { %13 = sbr.rel (!%p11_p5) target bundleno = 2 (0x2), region = 75 }

// kernel: resnet18_attention_forward.68
= control target key start
LH: loop header
LB: loop body
LE: loop exit
PB: predicated region body
PF: predicated region fallthrough
CT: control target
= control target key end

     0   :  { %s1285_s12 = smov 0   ;;  %s1287_s13 = smov 0   ;;  %s1623_s0 = inlined_call_operand.vmem [shape: bf16[16,4608], index: 0, kind: input, shape index: {}]   ;;  %s1624_s1 = inlined_call_operand.vmem [shape: bf16[4608,512], index: 1, kind: input, shape index: {}]   ;;  %s1625_s2 = inlined_call_operand.vmem [shape: f32[1,512], index: 2, kind: input, shape index: {}]   ;;  %s1626_s3 = inlined_call_operand.vmem [shape: f32[16,512], index: 3, kind: output, shape index: {}]  }
   0x1   :  { %s1289_s14 = smov 0   ;;  %s1291_s15 = smov 0  }
   0x2   :  { %s1293_s16 = smov 0   ;;  %s1295_s17 = smov 0  }
   0x3   :  { %s1297_s18 = smov 0   ;;  %s1299_s19 = smov 0  }
   0x4   :  { %s1301_s20 = smov 0   ;;  %s1303_s21 = smov 0  }
   0x5   :  { %s1305_s22 = smov 0  }
   0x6 LB: > { %s890_s23 = sadd.s32 4294967295, %s1262_s22   ;;  %s25_s24 = sadd.s32 1, %s1254_s20  ;;  %s1262_s22 = sphi %s1305_s22, %s13_s22   ;;  %s1258_s21 = sphi %s1303_s21, %s1647_s21   ;;  %s1254_s20 = sphi %s1301_s20, %s1646_s20   ;;  %s1250_s19 = sphi %s1299_s19, %s1645_s19   ;;  %s1246_s18 = sphi %s1297_s18, %s1644_s18   ;;  %s1242_s17 = sphi %s1295_s17, %s1643_s17   ;;  %s1238_s16 = sphi %s1293_s16, %s1642_s16   ;;  %s1234_s15 = sphi %s1291_s15, %s1641_s15   ;;  %s1230_s14 = sphi %s1289_s14, %s1640_s14   ;;  %s1226_s13 = sphi %s1287_s13, %s1639_s13   ;;  %s1222_s12 = sphi %s1285_s12, %s1638_s12  }
   0x7   : > { %p26_p0 = scmp.ge.s32.totalorder %s25_s24, 18  ;;  %s28_s25 = sadd.s32 1, %s1258_s21 }
   0x8   : > { %s41_s26 = sadd.s32 1, %s1242_s17  ;;  %p48_p1 = scmp.ne.s32.totalorder %s1242_s17, %s1238_s16 }
   0x9   : > { %s1649_s24 = smov (%p26_p0, %s25_s24), 0  ;;  %s1651_s25 = smov (!%p26_p0, %s28_s25), %s1258_s21 }
   0xa   : > { %1629 = sst [smem:[#allocation5_spill]] %s1649_s24  ;;  %s37_s27 = ssub.s32 %s1254_s20, %s1649_s24 }
   0xb   : > { %p49_p2 = scmp.eq.s32.totalorder %s1262_s22, 0  ;;  %p30_p3 = scmp.ge.s32.totalorder %s1651_s25, 2 }
   0xc   : > { %p39_p4 = scmp.eq.s32.totalorder %s37_s27, 0  ;;  %s69_s29 = sadd.s32 1, %s1234_s15 }
   0xd   : > { %p1352_p5 = por %p49_p2, %p48_p1  ;;  %s1653_s25 = smov (%p30_p3, %s1651_s25), 0 }
   0xe   : > { %1631 = sst [smem:[#allocation6_spill]] %s1653_s25  ;;  %s65_s4 = ssub.s32 %s1258_s21, %s1653_s25 }
   0xf   : > { %s1360_s30 = scalar_select %p39_p4, %s1242_s17, %s41_s26  }
  0x10   : > { %p76_p6 = scmp.ne.s32.totalorder %s1234_s15, %s1230_s14  ;;  %s66_s5 = sor.u32 %s65_s4, %s37_s27 }
  0x11   : > { %1632 = sst [smem:[#allocation7_spill]] %s1360_s30  ;;  %p121_p7 = scmp.eq.s32.totalorder %s65_s4, 0 }
  0x12   : > { %p67_p8 = scmp.eq.s32.totalorder %s66_s5, 0  ;;  %p1366_p9 = por %p76_p6, %p49_p2 }
  0x13   : > { %s123_s7 = sadd.s32 1, %s1226_s13  ;;  %p133_p10 = scmp.ne.s32.totalorder %s1226_s13, %s1222_s12 }
  0x14   : > { %s1374_s8 = scalar_select %p67_p8, %s1234_s15, %s69_s29  }
  0x15   : > { %s1377_s9 = scalar_select %p121_p7, %s1226_s13, %s123_s7  }
  0x16   : > { %p134_p11 = scmp.eq.s32.totalorder %s890_s23, 35  ;;  %p893_p13 = scmp.ge.s32.totalorder %s1262_s22, 36 }
  0x18   : > { %p1379_p12 = por %p134_p11, %p133_p10  ;;  %156 = sbr.rel (%p893_p13) target bundleno = 74 (0x4a), region = 16 }
  0x1d   : > { %159 = sbr.rel (!%p1352_p5) target bundleno = 35 (0x23), region = 20  ;;  %s161_s11 = sand.u32 (%p1352_p5), 1, %s1242_s17  }
  0x1e   : > { %s1050_s26 = sshll.u32 (%p1352_p5), %s1254_s20, 3  ;;  %s894_s27 = sshll.u32 (%p1352_p5), %s161_s11, 4 }
  0x1f   : > { %s169_s5 = scalar_lea.vmem (%p1352_p5), %s1623_s0, %s1050_s26  ;;  %s163_s23 = scalar_lea.vmem (%p1352_p5), [#allocation2], %s894_s27 }
  0x20   : > { %v200_v0 = vld [vmem:[%s169_s5] sm:$0xff] (%p1352_p5)  ;;  %v202_v1 = vld [vmem:[%s169_s5 + $0x90] sm:$0xff] (%p1352_p5) }
  0x21   : > { %201 = vst [vmem:[%s163_s23] sm:$0xff] (%p1352_p5), %v200_v0 }
  0x22   : > { %203 = vst [vmem:[%s163_s23 + $0x8] sm:$0xff] %v202_v1 }
  0x23 PF: > { %209 = sbr.rel (!%p1366_p9) target bundleno = 74 (0x4a), region = 58  ;;  %s211_s28 = sand.u32 (%p1366_p9), 1, %s1234_s15  }
  0x24   : > { %s899_s7 = sshll.u32 (%p1366_p9), %s1258_s21, 1  ;;  %s897_s25 = sshll.u32 (%p1366_p9), %s211_s28, 8 }
  0x25   : > { %s1051_s11 = sshll.u32 (%p1366_p9), %s1254_s20, 7  ;;  %s1404_s6 = scalar_lea.vmem (%p1366_p9), [#allocation3], %s897_s25 }
  0x26   : > { %s217_s24 = sadd.s32 (%p1366_p9), %s1051_s11, %s899_s7 }
  0x27   : > { %s901_s30 = sshll.u32 (%p1366_p9), %s217_s24, 2 }
  0x28   : > { %s1399_s4 = scalar_lea.vmem %s1624_s1, %s901_s30 }
  0x29   : > { %v310_v2 = vld [vmem:[%s1399_s4] sm:$0xff]  ;;  %v312_v3 = vld [vmem:[%s1399_s4 + $0x10] sm:$0xff] }
  0x2a   : > { %v314_v4 = vld [vmem:[%s1399_s4 + $0x20] sm:$0xff]  ;;  %311 = vst [vmem:[%s1404_s6] sm:$0xff] %v310_v2  ;;  %v316_v5 = vld [vmem:[%s1399_s4 + $0x30] sm:$0xff] }
  0x2b   : > { %313 = vst [vmem:[%s1404_s6 + $0x8] sm:$0xff] %v312_v3  ;;  %v318_v6 = vld [vmem:[%s1399_s4 + $0x40] sm:$0xff]  ;;  %v320_v7 = vld [vmem:[%s1399_s4 + $0x50] sm:$0xff] }
  0x2c   : > { %315 = vst [vmem:[%s1404_s6 + $0x10] sm:$0xff] %v314_v4  ;;  %v322_v8 = vld [vmem:[%s1399_s4 + $0x60] sm:$0xff]  ;;  %v324_v9 = vld [vmem:[%s1399_s4 + $0x70] sm:$0xff] }
  0x2d   : > { %317 = vst [vmem:[%s1404_s6 + $0x18] sm:$0xff] %v316_v5  ;;  %v326_v10 = vld [vmem:[%s1399_s4 + $0x80] sm:$0xff]  ;;  %v328_v11 = vld [vmem:[%s1399_s4 + $0x90] sm:$0xff] }
  0x2e   : > { %319 = vst [vmem:[%s1404_s6 + $0x20] sm:$0xff] %v318_v6  ;;  %v330_v12 = vld [vmem:[%s1399_s4 + $0xa0] sm:$0xff]  ;;  %v332_v13 = vld [vmem:[%s1399_s4 + $0xb0] sm:$0xff] }
  0x2f   : > { %321 = vst [vmem:[%s1404_s6 + $0x28] sm:$0xff] %v320_v7  ;;  %v334_v14 = vld [vmem:[%s1399_s4 + $0xc0] sm:$0xff]  ;;  %v336_v15 = vld [vmem:[%s1399_s4 + $0xd0] sm:$0xff] }
  0x30   : > { %323 = vst [vmem:[%s1404_s6 + $0x30] sm:$0xff] %v322_v8  ;;  %v338_v16 = vld [vmem:[%s1399_s4 + $0xe0] sm:$0xff]  ;;  %v340_v17 = vld [vmem:[%s1399_s4 + $0xf0] sm:$0xff] }
  0x31   : > { %325 = vst [vmem:[%s1404_s6 + $0x38] sm:$0xff] %v324_v9  ;;  %v342_v18 = vld [vmem:[%s1399_s4 + $0x100] sm:$0xff]  ;;  %v344_v19 = vld [vmem:[%s1399_s4 + $0x110] sm:$0xff] }
  0x32   : > { %327 = vst [vmem:[%s1404_s6 + $0x40] sm:$0xff] %v326_v10  ;;  %v346_v20 = vld [vmem:[%s1399_s4 + $0x120] sm:$0xff]  ;;  %v348_v21 = vld [vmem:[%s1399_s4 + $0x130] sm:$0xff] }
  0x33   : > { %329 = vst [vmem:[%s1404_s6 + $0x48] sm:$0xff] %v328_v11  ;;  %v350_v22 = vld [vmem:[%s1399_s4 + $0x140] sm:$0xff]  ;;  %v352_v23 = vld [vmem:[%s1399_s4 + $0x150] sm:$0xff] }
  0x34   : > { %331 = vst [vmem:[%s1404_s6 + $0x50] sm:$0xff] %v330_v12  ;;  %v354_v24 = vld [vmem:[%s1399_s4 + $0x160] sm:$0xff]  ;;  %v356_v25 = vld [vmem:[%s1399_s4 + $0x170] sm:$0xff] }
  0x35   : > { %333 = vst [vmem:[%s1404_s6 + $0x58] sm:$0xff] %v332_v13  ;;  %v358_v26 = vld [vmem:[%s1399_s4 + $0x180] sm:$0xff]  ;;  %v360_v27 = vld [vmem:[%s1399_s4 + $0x190] sm:$0xff] }
  0x36   : > { %335 = vst [vmem:[%s1404_s6 + $0x60] sm:$0xff] %v334_v14  ;;  %v362_v28 = vld [vmem:[%s1399_s4 + $0x1a0] sm:$0xff]  ;;  %v364_v29 = vld [vmem:[%s1399_s4 + $0x1b0] sm:$0xff] }
  0x37   : > { %337 = vst [vmem:[%s1404_s6 + $0x68] sm:$0xff] %v336_v15  ;;  %v366_v30 = vld [vmem:[%s1399_s4 + $0x1c0] sm:$0xff]  ;;  %v368_v31 = vld [vmem:[%s1399_s4 + $0x1d0] sm:$0xff] }
  0x38   : > { %339 = vst [vmem:[%s1404_s6 + $0x70] sm:$0xff] %v338_v16  ;;  %v370_v32 = vld [vmem:[%s1399_s4 + $0x1e0] sm:$0xff]  ;;  %v372_v33 = vld [vmem:[%s1399_s4 + $0x1f0] sm:$0xff] }
  0x39   : > { %341 = vst [vmem:[%s1404_s6 + $0x78] sm:$0xff] %v340_v17 }
  0x3a   : > { %343 = vst [vmem:[%s1404_s6 + $0x80] sm:$0xff] %v342_v18 }
  0x3b   : > { %345 = vst [vmem:[%s1404_s6 + $0x88] sm:$0xff] %v344_v19 }
  0x3c   : > { %347 = vst [vmem:[%s1404_s6 + $0x90] sm:$0xff] %v346_v20 }
  0x3d   : > { %349 = vst [vmem:[%s1404_s6 + $0x98] sm:$0xff] %v348_v21 }
  0x3e   : > { %351 = vst [vmem:[%s1404_s6 + $0xa0] sm:$0xff] %v350_v22 }
  0x3f   : > { %353 = vst [vmem:[%s1404_s6 + $0xa8] sm:$0xff] %v352_v23 }
  0x40   : > { %355 = vst [vmem:[%s1404_s6 + $0xb0] sm:$0xff] %v354_v24 }
  0x41   : > { %357 = vst [vmem:[%s1404_s6 + $0xb8] sm:$0xff] %v356_v25 }
  0x42   : > { %359 = vst [vmem:[%s1404_s6 + $0xc0] sm:$0xff] %v358_v26 }
  0x43   : > { %361 = vst [vmem:[%s1404_s6 + $0xc8] sm:$0xff] %v360_v27 }
  0x44   : > { %363 = vst [vmem:[%s1404_s6 + $0xd0] sm:$0xff] %v362_v28 }
  0x45   : > { %365 = vst [vmem:[%s1404_s6 + $0xd8] sm:$0xff] %v364_v29 }
  0x46   : > { %367 = vst [vmem:[%s1404_s6 + $0xe0] sm:$0xff] %v366_v30 }
  0x47   : > { %369 = vst [vmem:[%s1404_s6 + $0xe8] sm:$0xff] %v368_v31 }
  0x48   : > { %371 = vst [vmem:[%s1404_s6 + $0xf0] sm:$0xff] %v370_v32 }
  0x49   : > { %373 = vst [vmem:[%s1404_s6 + $0xf8] sm:$0xff] %v372_v33 }
  0x4a PF: > { %p902_p0 = scmp.ge.s32.totalorder %s1262_s22, 1  ;;  %p386_p1 = scmp.lt.s32.totalorder %s1262_s22, 37 }
  0x4c   : > { %p387_p2 = pnand %p902_p0, %p386_p1 }
  0x4d   : > { %s393_s24 = sand.u32 (!%p387_p2), 1, %s1238_s16   ;;  %s400_s25 = sand.u32 (!%p387_p2), 1, %s1230_s14  }
  0x4e   : > { %390 = sbr.rel (%p387_p2) target bundleno = 296 (0x128), region = 100  ;;  %s903_s30 = sshll.u32 (!%p387_p2), %s393_s24, 4 }
  0x4f   : > { %s904_s27 = sshll.u32 (!%p387_p2), %s400_s25, 8  ;;  %s427_s5 = sand.u32 (!%p387_p2), 1, %s1222_s12  }
  0x50   : > { %s906_s23 = sshll.u32 (!%p387_p2), %s1250_s19, 1  ;;  %s905_s28 = sshll.u32 (!%p387_p2), %s427_s5, 5 }
  0x51   : > { %p435_p3 = scmp.lt.s32.totalorder (!%p387_p2), %s906_s23, 3  ;;  %s1479_s26 = scalar_lea.vmem (!%p387_p2), [#allocation2], %s903_s30 }
  0x52   : > { %s1481_s4 = scalar_lea.vmem (!%p387_p2), [#allocation3], %s904_s27  ;;  %s1483_s6 = scalar_lea.vmem (!%p387_p2), [#allocation4], %s905_s28 }
  0x53   : > { %s1655_s23 = smov (!%p435_p3, %s906_s23), 3  ;;  %p907_p4 = scmp.ne.s32.totalorder %s1246_s18, 0 }
  0x54   : > { %s437_s29 = scalar_lea.vmem %s1625_s2, %s1655_s23 }
  0x55   : > { %444 = sbr.rel (%p907_p4) target bundleno = 95 (0x5f), region = 112 }
  0x5a   : > { %v1264_v34 = vmov 0.0  }
  0x5b   : > { %445 = vst [vmem:[%s1483_s6] sm:$0xff] %v1264_v34 }
  0x5c   : > { %446 = vst [vmem:[%s1483_s6 + $0x8] sm:$0xff] %v1264_v34 }
  0x5d   : > { %447 = vst [vmem:[%s1483_s6 + $0x10] sm:$0xff] %v1264_v34 }
  0x5e   : > { %448 = vst [vmem:[%s1483_s6 + $0x18] sm:$0xff] %v1264_v34 }
  0x5f PF: > { %v974_v35 = vld [vmem:[%s1481_s4 + $0x70] sm:$0xf]  ;;  %v1069_v36 = vld [vmem:[%s1481_s4 + $0x74] sm:$0xf0]  ;;  %v1068_v40 = vld [vmem:[%s1481_s4 + $0x74] sm:$0xf] }
  0x60   : > { %v1038_v37 = vld [vmem:[%s1481_s4 + $0xf0] sm:$0xf]  ;;  %v975_v38 = vor.u32 %v1069_v36, %v974_v35  ;;  %v1085_v39 = vld [vmem:[%s1481_s4 + $0xf4] sm:$0xf0]  ;;  %v976_v41 = vld [vmem:[%s1481_s4 + $0x78] sm:$0xf0] }
  0x61   : > { %v1039_v42 = vor.u32 %v1085_v39, %v1038_v37  ;;  %v979_v43 = vor.u32 %v1068_v40, %v976_v41  ;;  %v1084_v44 = vld [vmem:[%s1481_s4 + $0xf4] sm:$0xf]  ;;  %v1040_v45 = vld [vmem:[%s1481_s4 + $0xf8] sm:$0xf0]  ;;  %v966_v46 = vld [vmem:[%s1481_s4 + $0x60] sm:$0xf] }
  0x62   : > { %657 = vmatpush.bf16.msra.mxu0 %v975_v38  ;;  %v1043_v47 = vor.u32 %v1084_v44, %v1040_v45  ;;  %v1067_v48 = vld [vmem:[%s1481_s4 + $0x64] sm:$0xf0]  ;;  %v1030_v49 = vld [vmem:[%s1481_s4 + $0xe0] sm:$0xf]  ;;  %v1066_v53 = vld [vmem:[%s1481_s4 + $0x64] sm:$0xf] }
  0x63   : > { %v1083_v50 = vld [vmem:[%s1481_s4 + $0xe4] sm:$0xf0]  ;;  %671 = vmatpush.bf16.msra.mxu1 %v1039_v42  ;;  %685 = vmatpush.bf16.msra.mxu2 %v979_v43  ;;  %v967_v51 = vor.u32 %v1067_v48, %v966_v46  ;;  %v968_v54 = vld [vmem:[%s1481_s4 + $0x68] sm:$0xf0]  ;;  %v1082_v55 = vld [vmem:[%s1481_s4 + $0xe4] sm:$0xf] }
  0x64   : > { %v1031_v52 = vor.u32 %v1083_v50, %v1030_v49  ;;  %699 = vmatpush.bf16.msra.mxu3 %v1043_v47  ;;  %v971_v56 = vor.u32 %v1066_v53, %v968_v54  ;;  %v1032_v57 = vld [vmem:[%s1481_s4 + $0xe8] sm:$0xf0]  ;;  %v958_v58 = vld [vmem:[%s1481_s4 + $0x50] sm:$0xf]  ;;  %v1065_v59 = vld [vmem:[%s1481_s4 + $0x54] sm:$0xf0] }
  0x65   : > { %v1035_v60 = vor.u32 %v1082_v55, %v1032_v57  ;;  %v1022_v61 = vld [vmem:[%s1481_s4 + $0xd0] sm:$0xf]  ;;  %v1081_v62 = vld [vmem:[%s1481_s4 + $0xd4] sm:$0xf0]  ;;  %v1064_v63 = vld [vmem:[%s1481_s4 + $0x54] sm:$0xf]  ;;  %v959_v0 = vor.u32 %v1065_v59, %v958_v58 }
  0x66   : > { %658 = vmatpush.bf16.msra.mxu0 %v967_v51  ;;  %v960_v1 = vld [vmem:[%s1481_s4 + $0x58] sm:$0xf0]  ;;  %v1080_v2 = vld [vmem:[%s1481_s4 + $0xd4] sm:$0xf]  ;;  %v1023_v4 = vor.u32 %v1081_v62, %v1022_v61  ;;  %v950_v6 = vld [vmem:[%s1481_s4 + $0x40] sm:$0xf] }
  0x67   : > { %v1024_v3 = vld [vmem:[%s1481_s4 + $0xd8] sm:$0xf0]  ;;  %672 = vmatpush.bf16.msra.mxu1 %v1031_v52  ;;  %686 = vmatpush.bf16.msra.mxu2 %v971_v56  ;;  %v963_v5 = vor.u32 %v1064_v63, %v960_v1  ;;  %v1063_v7 = vld [vmem:[%s1481_s4 + $0x44] sm:$0xf0]  ;;  %v1014_v8 = vld [vmem:[%s1481_s4 + $0xc0] sm:$0xf] }
  0x68   : > { %700 = vmatpush.bf16.msra.mxu3 %v1035_v60  ;;  %v1027_v9 = vor.u32 %v1080_v2, %v1024_v3  ;;  %v1079_v10 = vld [vmem:[%s1481_s4 + $0xc4] sm:$0xf0]  ;;  %v1062_v11 = vld [vmem:[%s1481_s4 + $0x44] sm:$0xf]  ;;  %v952_v12 = vld [vmem:[%s1481_s4 + $0x48] sm:$0xf0]  ;;  %v951_v15 = vor.u32 %v1063_v7, %v950_v6 }
  0x69   : > { %v1078_v13 = vld [vmem:[%s1481_s4 + $0xc4] sm:$0xf]  ;;  %v1016_v14 = vld [vmem:[%s1481_s4 + $0xc8] sm:$0xf0]  ;;  %v1015_v16 = vor.u32 %v1079_v10, %v1014_v8  ;;  %v955_v17 = vor.u32 %v1062_v11, %v952_v12  ;;  %v942_v18 = vld [vmem:[%s1481_s4 + $0x30] sm:$0xf] }
  0x6a   : > { %659 = vmatpush.bf16.msra.mxu0 %v959_v0  ;;  %v1061_v19 = vld [vmem:[%s1481_s4 + $0x34] sm:$0xf0]  ;;  %v1006_v20 = vld [vmem:[%s1481_s4 + $0xb0] sm:$0xf]  ;;  %v1019_v21 = vor.u32 %v1078_v13, %v1016_v14  ;;  %v1060_v23 = vld [vmem:[%s1481_s4 + $0x34] sm:$0xf] }
  0x6b   : > { %673 = vmatpush.bf16.msra.mxu1 %v1023_v4  ;;  %687 = vmatpush.bf16.msra.mxu2 %v963_v5  ;;  %v1077_v22 = vld [vmem:[%s1481_s4 + $0xb4] sm:$0xf0]  ;;  %v944_v24 = vld [vmem:[%s1481_s4 + $0x38] sm:$0xf0]  ;;  %v1076_v25 = vld [vmem:[%s1481_s4 + $0xb4] sm:$0xf]  ;;  %v943_v27 = vor.u32 %v1061_v19, %v942_v18 }
  0x6c   : > { %701 = vmatpush.bf16.msra.mxu3 %v1027_v9  ;;  %v1008_v26 = vld [vmem:[%s1481_s4 + $0xb8] sm:$0xf0]  ;;  %v1007_v28 = vor.u32 %v1077_v22, %v1006_v20  ;;  %v947_v29 = vor.u32 %v1060_v23, %v944_v24  ;;  %v934_v30 = vld [vmem:[%s1481_s4 + $0x20] sm:$0xf]  ;;  %v1059_v31 = vld [vmem:[%s1481_s4 + $0x24] sm:$0xf0] }
  0x6d   : > { %v998_v32 = vld [vmem:[%s1481_s4 + $0xa0] sm:$0xf]  ;;  %v1011_v33 = vor.u32 %v1076_v25, %v1008_v26  ;;  %v1075_v34 = vld [vmem:[%s1481_s4 + $0xa4] sm:$0xf0]  ;;  %v1058_v35 = vld [vmem:[%s1481_s4 + $0x24] sm:$0xf]  ;;  %v935_v39 = vor.u32 %v1059_v31, %v934_v30 }
  0x6e   : > { %660 = vmatpush.bf16.msra.mxu0 %v951_v15  ;;  %v936_v36 = vld [vmem:[%s1481_s4 + $0x28] sm:$0xf0]  ;;  %v1074_v37 = vld [vmem:[%s1481_s4 + $0xa4] sm:$0xf]  ;;  %v999_v40 = vor.u32 %v1075_v34, %v998_v32  ;;  %v926_v42 = vld [vmem:[%s1481_s4 + $0x10] sm:$0xf] }
  0x6f   : > { %674 = vmatpush.bf16.msra.mxu1 %v1015_v16  ;;  %688 = vmatpush.bf16.msra.mxu2 %v955_v17  ;;  %v1000_v38 = vld [vmem:[%s1481_s4 + $0xa8] sm:$0xf0]  ;;  %v939_v41 = vor.u32 %v1058_v35, %v936_v36  ;;  %v1057_v43 = vld [vmem:[%s1481_s4 + $0x14] sm:$0xf0]  ;;  %v990_v44 = vld [vmem:[%s1481_s4 + $0x90] sm:$0xf] }
  0x70   : > { %702 = vmatpush.bf16.msra.mxu3 %v1019_v21  ;;  %v1003_v45 = vor.u32 %v1074_v37, %v1000_v38  ;;  %v1073_v46 = vld [vmem:[%s1481_s4 + $0x94] sm:$0xf0]  ;;  %v1056_v47 = vld [vmem:[%s1481_s4 + $0x14] sm:$0xf]  ;;  %v928_v48 = vld [vmem:[%s1481_s4 + $0x18] sm:$0xf0]  ;;  %v927_v51 = vor.u32 %v1057_v43, %v926_v42 }
  0x71   : > { %v1072_v49 = vld [vmem:[%s1481_s4 + $0x94] sm:$0xf]  ;;  %v992_v50 = vld [vmem:[%s1481_s4 + $0x98] sm:$0xf0]  ;;  %v991_v52 = vor.u32 %v1073_v46, %v990_v44  ;;  %v931_v53 = vor.u32 %v1056_v47, %v928_v48  ;;  %v918_v54 = vld [vmem:[%s1481_s4] sm:$0xf] }
  0x72   : > { %661 = vmatpush.bf16.msra.mxu0 %v943_v27  ;;  %v1055_v55 = vld [vmem:[%s1481_s4 + $0x4] sm:$0xf0]  ;;  %v982_v56 = vld [vmem:[%s1481_s4 + $0x80] sm:$0xf]  ;;  %v995_v57 = vor.u32 %v1072_v49, %v992_v50  ;;  %v1054_v59 = vld [vmem:[%s1481_s4 + $0x4] sm:$0xf] }
  0x73   : > { %675 = vmatpush.bf16.msra.mxu1 %v1007_v28  ;;  %689 = vmatpush.bf16.msra.mxu2 %v947_v29  ;;  %v1071_v58 = vld [vmem:[%s1481_s4 + $0x84] sm:$0xf0]  ;;  %v920_v60 = vld [vmem:[%s1481_s4 + $0x8] sm:$0xf0]  ;;  %v1070_v61 = vld [vmem:[%s1481_s4 + $0x84] sm:$0xf]  ;;  %v919_v63 = vor.u32 %v1055_v55, %v918_v54 }
  0x74   : > { %703 = vmatpush.bf16.msra.mxu3 %v1011_v33  ;;  %v984_v62 = vld [vmem:[%s1481_s4 + $0x88] sm:$0xf0]  ;;  %v910_v0 = vld [vmem:[%s1479_s26] sm:$0xf]  ;;  %v1053_v1 = vld [vmem:[%s1479_s26 + $0x4] sm:$0xf0]  ;;  %v983_v2 = vor.u32 %v1071_v58, %v982_v56  ;;  %v923_v3 = vor.u32 %v1054_v59, %v920_v60 }
  0x75   : > { %v1052_v4 = vld [vmem:[%s1479_s26 + $0x4] sm:$0xf]  ;;  %v912_v5 = vld [vmem:[%s1479_s26 + $0x8] sm:$0xf0]  ;;  %v987_v6 = vor.u32 %v1070_v61, %v984_v62  ;;  %v911_v7 = vor.u32 %v1053_v1, %v910_v0  ;;  %p1044_p5 = scmp.ne.s32.totalorder %s1246_s18, 17 }
  0x76   : > { %662 = vmatpush.bf16.msra.mxu0 %v935_v39  ;;  %v915_v8 = vor.u32 %v1052_v4, %v912_v5  ;;  %v449_v10 = vld [vmem:[%s1483_s6] sm:$0xff]  ;;  %v450_v15 = vld [vmem:[%s1483_s6 + $0x8] sm:$0xff]  ;;  %v451_v19 = vld [vmem:[%s1483_s6 + $0x10] sm:$0xff] }
  0x77   : > { %676 = vmatpush.bf16.msra.mxu1 %v999_v40  ;;  %690 = vmatpush.bf16.msra.mxu2 %v939_v41  ;;  %v452_v25 = vld [vmem:[%s1483_s6 + $0x18] sm:$0xff] }
  0x78   : > { %704 = vmatpush.bf16.msra.mxu3 %v1003_v45 }
  0x7a   : > { %663 = vmatpush.bf16.msra.mxu0 %v927_v51 }
  0x7b   : > { %677 = vmatpush.bf16.msra.mxu1 %v991_v52  ;;  %691 = vmatpush.bf16.msra.mxu2 %v931_v53 }
  0x7c   : > { %705 = vmatpush.bf16.msra.mxu3 %v995_v57 }
  0x7e   : > { %664 = vmatpush.bf16.msra.mxu0 %v919_v63 }
  0x7f   : > { %678 = vmatpush.bf16.msra.mxu1 %v983_v2  ;;  %692 = vmatpush.bf16.msra.mxu2 %v923_v3 }
  0x80   : > { %706 = vmatpush.bf16.msra.mxu3 %v987_v6 }
  0x81   : > { %665 = vmatmul.bf16.vlgmr.msra.gmra.mxu0 %v911_v7 }
  0x82   : > { %679 = vmatmul.bf16.vlgmr.msra.gmra.mxu1 %v915_v8  ;;  %693 = vmatmul.bf16.vlgmr.msra.gmra.mxu2 %v911_v7 }
  0x83   : > { %707 = vmatmul.bf16.vlgmr.msra.gmra.mxu3 %v915_v8 }
  0xfe   : > { %v666_v9 = vpop.f32.mrf.mxu0 }
  0xff   : > { %v680_v11 = vpop.f32.mrf.mxu1 }
 0x100   : > { %v681_v12 = vadd.f32 %v680_v11, %v666_v9 }
 0x102   : > { %v713_v13 = vadd.f32 %v681_v12, %v449_v10 }
 0x104   : > { %717 = vst [vmem:[%s1483_s6] sm:$0xff] %v713_v13 }
 0x105   : > { %v694_v14 = vpop.f32.mrf.mxu2 }
 0x106   : > { %v708_v16 = vpop.f32.mrf.mxu3  ;;  %v668_v17 = vpop.f32.mrf.mxu0 }
 0x107   : > { %v709_v18 = vadd.f32 %v708_v16, %v694_v14  ;;  %v682_v20 = vpop.f32.mrf.mxu1 }
 0x108   : > { %v683_v21 = vadd.f32 %v682_v20, %v668_v17 }
 0x109   : > { %v714_v22 = vadd.f32 %v709_v18, %v450_v15 }
 0x10a   : > { %v715_v23 = vadd.f32 %v683_v21, %v451_v19 }
 0x10b   : > { %718 = vst [vmem:[%s1483_s6 + $0x8] sm:$0xff] %v714_v22 }
 0x10c   : > { %719 = vst [vmem:[%s1483_s6 + $0x10] sm:$0xff] %v715_v23 }
 0x10d   : > { %v696_v24 = vpop.f32.mrf.mxu2 }
 0x10e   : > { %v710_v26 = vpop.f32.mrf.mxu3 }
 0x10f   : > { %v711_v27 = vadd.f32 %v710_v26, %v696_v24  ;;  %724 = sbr.rel (%p1044_p5) target bundleno = 288 (0x120), region = 116 }
 0x111   : > { %v716_v28 = vadd.f32 %v711_v27, %v452_v25 }
 0x113   : > { %720 = vst [vmem:[%s1483_s6 + $0x18] sm:$0xff] %v716_v28 }
 0x114   : > { %v725_v29 = vld [vmem:[%s1483_s6] sm:$0xff]  ;;  %v726_v31 = vld [vmem:[%s1483_s6 + $0x8] sm:$0xff]  ;;  %v727_v34 = vld [vmem:[%s1483_s6 + $0x10] sm:$0xff] }
 0x115   : > { %v729_v30 = vld [vmem:[%s437_s29] sm:$0x3] }
 0x116   : > { %v731_v32 = vperm.slane %v729_v30, 0  ;;  %v732_v33 = vperm.slane %v729_v30, 1 }
 0x118   : > { %v735_v36 = vadd.f32 %v731_v32, %v725_v29  ;;  %v736_v37 = vadd.f32 %v732_v33, %v726_v31  ;;  %v737_v38 = vadd.f32 %v731_v32, %v727_v34 }
 0x11a   : > { %v728_v35 = vld [vmem:[%s1483_s6 + $0x18] sm:$0xff]  ;;  %v739_v40 = vmax.f32 %v735_v36, 0.0  ;;  %v740_v41 = vmax.f32 %v736_v37, 0.0  ;;  %v741_v42 = vmax.f32 %v737_v38, 0.0 }
 0x11b   : > { %v738_v39 = vadd.f32 %v732_v33, %v728_v35 }
 0x11c   : > { %743 = vst [vmem:[%s1483_s6] sm:$0xff] %v739_v40 }
 0x11d   : > { %v742_v43 = vmax.f32 %v738_v39, 0.0  ;;  %744 = vst [vmem:[%s1483_s6 + $0x8] sm:$0xff] %v740_v41 }
 0x11e   : > { %745 = vst [vmem:[%s1483_s6 + $0x10] sm:$0xff] %v741_v42 }
 0x11f   : > { %746 = vst [vmem:[%s1483_s6 + $0x18] sm:$0xff] %v742_v43 }
 0x120 PF: > { %753 = sbr.rel (!%p1379_p12) target bundleno = 296 (0x128), region = 120  ;;  %s1086_s16 = sshll.u32 (%p1379_p12), %s1250_s19, 4 }
 0x121   : > { %s759_s25 = scalar_lea.vmem (%p1379_p12), %s1626_s3, %s1086_s16 }
 0x123   : > { %v772_v44 = vld [vmem:[%s1483_s6] sm:$0xff] (%p1379_p12) }
 0x124   : > { %v774_v45 = vld [vmem:[%s1483_s6 + $0x8] sm:$0xff] (%p1379_p12)  ;;  %773 = vst [vmem:[%s759_s25] sm:$0xff] (%p1379_p12), %v772_v44 }
 0x125   : > { %v776_v46 = vld [vmem:[%s1483_s6 + $0x10] sm:$0xff]  ;;  %775 = vst [vmem:[%s759_s25 + $0x8] sm:$0xff] %v774_v45 }
 0x126   : > { %v778_v47 = vld [vmem:[%s1483_s6 + $0x18] sm:$0xff]  ;;  %777 = vst [vmem:[%s759_s25 + $0x20] sm:$0xff] %v776_v46 }
 0x127   : > { %779 = vst [vmem:[%s759_s25 + $0x28] sm:$0xff] %v778_v47 }
 0x128 PF: > { %s13_s22 = sadd.s32 1, %s1262_s22   ;;  %s1635_s19 = sld [smem:[#allocation7_spill]] }
 0x129   : > { %p10_p6 = scmp.ge.s32.totalorder %s13_s22, 38   ;;  %s1636_s10 = sld [smem:[#allocation5_spill]] }
 0x12a   : > { %s1637_s30 = sld [smem:[#allocation6_spill]]  ;;  %s1638_s12 = smov %s1226_s13 }
 0x12b   : > { %s1639_s13 = smov %s1377_s9  ;;  %s1640_s14 = smov %s1234_s15 }
 0x12c   : > { %s1641_s15 = smov %s1374_s8  ;;  %s1642_s16 = smov %s1242_s17 }
 0x12d   : > { %s1644_s18 = smov %s1254_s20  ;;  %12 = sbr.rel (!%p10_p6) target bundleno = 6 (0x6), region = 185 }
 0x12e   : > { %s1643_s17 = smov %s1635_s19  ;;  %s1645_s19 = smov %s1258_s21 }
 0x12f   : > { %s1646_s20 = smov %s1636_s10 }
 0x130   : > { %s1647_s21 = smov %s1637_s30 }

</bundles_post_ra>
